<compile_context>
chip_gen: v5e
topology: v5e:2x2
jax: 0.10.0
libtpu: 0.0.40
codegen_flags: <defaults>
</compile_context>

<pallas_src>
import functools

import jax
import jax.numpy as jnp
from jax.experimental import pallas as pl
from jax.experimental.pallas import tpu as pltpu


def _repcpe_kernel(xpad_ref, w_ref, b_ref, o_ref, *, Bb, H, W, C, KH, KW):
    # xpad_ref: (Bb, Hp, Wp*C)  zero-padded input, (W, C) flattened onto lanes
    # w_ref:    (KH, KW*W*C)    f32 depthwise weights, lane-tiled over W
    #                           (center tap already carries the +1 residual)
    # b_ref:    (1, W*C)        f32 bias, lane-tiled over W
    # o_ref:    (Bb, H, W*C)    output
    WC = W * C
    # Hoisted once per grid step: bias -> fp32 accumulator init.
    acc0 = jnp.broadcast_to(b_ref[0, :], (H, WC))
    for b in range(Bb):
        acc = acc0
        for kh in range(KH):
            # One slab load per kh (H rows x Wp*C lanes).  All kw taps below are
            # in-vreg lane slices of this value (XLU work, no redundant vlds).
            slab = xpad_ref[b, kh:kh + H, :].astype(jnp.float32)
            wrow = w_ref[kh, :]                       # (KW*W*C,) f32, one row read per kh
            for kw in range(KW):
                tap = slab[:, kw * C:kw * C + WC]     # lane-shifted conv window
                wv = wrow[kw * WC:(kw + 1) * WC]      # W*C-aligned weight slice
                acc = acc + tap * wv                  # f32 multiply-add on the VPU
        o_ref[b] = acc.astype(o_ref.dtype)


@functools.partial(jax.jit, static_argnames=("spatial_shape",))
def repcpe_forward(x_nchw, weight, bias, spatial_shape=(7, 7)):
    """x_nchw: (B, C, H, W); weight: (KH, KW, C); bias: (C,). Returns (B, C, H, W)."""
    B, C, H, W = x_nchw.shape
    KH, KW = spatial_shape
    # NOTE: nn.Conv2d in the reference pads BOTH dims with KH//2; for KH != KW the
    # PyTorch module itself breaks on the residual add, so "same" padding
    # (KH//2, KW//2) is used here.  Identical to PyTorch for the square case.
    pad_h, pad_w = KH // 2, KW // 2
    Hp, Wp = H + 2 * pad_h, W + 2 * pad_w
    WC = W * C

    # Reparameterize: conv(x, w) + x == conv(x, w') with w'[center] += 1 (stride-1 "same").
    w_rep = weight.astype(jnp.float32).at[KH // 2, KW // 2, :].add(1.0)

    # Wrapper glue (fused by XLA under jit): NCHW -> NHWC, zero pad, lane-flatten.
    # TODO(synk): keep activations NHWC end-to-end in the surrounding model and fold the
    # zero-pad into the kernel (VMEM halo memset) to drop these HBM layout passes.
    x_nhwc = jnp.transpose(x_nchw, (0, 2, 3, 1))                       # (B, H, W, C)
    x_pad = jnp.pad(x_nhwc, ((0, 0), (pad_h, pad_h), (pad_w, pad_w), (0, 0)))
    x_pad_flat = x_pad.reshape(B, Hp, Wp * C)

    # Weights laid out (KH, KW*W*C): one row read per kh in the kernel, aligned per-kw
    # slices, f32 multiplies (no bf16 VALU needed on v5e, no per-tap convert on v6e/v7x).
    # TODO(synk): for large W*C pass weights untiled (KH*KW, C) and broadcast in-kernel to
    # avoid the W-fold inflation of resident/DMA'd parameter bytes.
    w_flat = jnp.tile(w_rep, (1, 1, W)).reshape(KH, KW * WC)
    b_flat = jnp.tile(bias.astype(jnp.float32), W).reshape(1, WC)

    # ---- generation-aware VMEM budget --------------------------------------
    try:
        phys_vmem = int(pltpu.get_tpu_info().vmem_capacity_bytes)
    except Exception:
        phys_vmem = 64 << 20                    # conservative default (v7x per-TC VMEM)
    # ~50 MiB on v7x (64 MiB physical), ~100 MiB on v5e/v6e (128 MiB physical).
    vmem_cap = min(int(0.78 * phys_vmem), phys_vmem - (8 << 20))

    itemsize = jnp.dtype(x_nchw.dtype).itemsize
    param_bytes = 2 * (KH * KW * WC + WC) * 4                  # double-buffered f32 params
    per_batch_io = 2 * (Hp * Wp * C + H * WC) * itemsize       # double-buffered in + out
    budget = max(per_batch_io, vmem_cap - param_bytes - (4 << 20))
    bb_max = max(1, budget // per_batch_io)

    # Batch-block size: amortize per-step overhead, but keep >= 2 grid steps when B >= 2
    # so both v7x TensorCores get work.  Bb must divide B (avoid partial blocks).
    n_steps_min = 2 if B >= 2 else 1
    bb_target = int(max(1, min(bb_max, B // n_steps_min)))
    Bb = max(d for d in range(1, bb_target + 1) if B % d == 0)
    grid = (B // Bb,)

    kernel = functools.partial(_repcpe_kernel, Bb=Bb, H=H, W=W, C=C, KH=KH, KW=KW)

    flops = 2 * B * H * W * C * KH * KW
    bytes_accessed = (B * Hp * Wp * C + B * H * WC) * itemsize + (KH * KW * WC + WC) * 4

    # TODO(synk): for very large frames add halo'd H-row tiling (overlapping blocks via
    # manual make_async_copy) plus a row-group fori_loop accumulator so `acc` never
    # exceeds the 64-vreg file when blocks are scaled up to fill VMEM.
    out_flat = pl.pallas_call(
        kernel,
        out_shape=jax.ShapeDtypeStruct((B, H, WC), x_nchw.dtype),
        grid_spec=pltpu.PrefetchScalarGridSpec(
            num_scalar_prefetch=0,
            grid=grid,
            in_specs=[
                pl.BlockSpec((Bb, Hp, Wp * C), lambda i: (i, 0, 0)),
                pl.BlockSpec((KH, KW * WC), lambda i: (0, 0)),   # grid-invariant -> DMA'd once
                pl.BlockSpec((1, WC), lambda i: (0, 0)),
            ],
            out_specs=pl.BlockSpec((Bb, H, WC), lambda i: (i, 0, 0)),
        ),
        compiler_params=pltpu.CompilerParams(
            dimension_semantics=("parallel",),
            vmem_limit_bytes=int(vmem_cap)),
        cost_estimate=pl.CostEstimate(
            flops=flops, transcendentals=0, bytes_accessed=bytes_accessed),
    )(x_pad_flat, w_flat, b_flat)

    out_nhwc = out_flat.reshape(B, H, W, C)
    return jnp.transpose(out_nhwc, (0, 3, 1, 2))                       # back to NCHW


def _reference(x_nchw, weight, bias, spatial_shape=(7, 7)):
    """Pure-JAX reference using lax depthwise conv (NCHW, matches nn.Conv2d)."""
    C = x_nchw.shape[1]
    KH, KW = spatial_shape
    # lax wants OIHW with feature_group_count=C: (C, 1, KH, KW)
    w_oihw = jnp.transpose(weight, (2, 0, 1))[:, None, :, :]
    y = jax.lax.conv_general_dilated(
        x_nchw.astype(jnp.float32), w_oihw.astype(jnp.float32),
        window_strides=(1, 1), padding=[(KH // 2, KH // 2), (KW // 2, KW // 2)],
        dimension_numbers=("NCHW", "OIHW", "NCHW"),
        feature_group_count=C)
    y = y + bias.astype(jnp.float32)[None, :, None, None]
    return (y + x_nchw.astype(jnp.float32)).astype(x_nchw.dtype)


if __name__ == "__main__":
    key = jax.random.PRNGKey(0)
    B, C, H, W = 2, 32, 16, 16           # in_channels == embed_dim == 32 (depthwise)
    KH, KW = 7, 7

    kx, kw_, kb = jax.random.split(key, 3)
    x = jax.random.normal(kx, (B, C, H, W), dtype=jnp.float32)
    # Deterministic synthetic parameters (shapes from nn.Conv2d(C, C, 7, groups=C)).
    weight = jax.random.normal(kw_, (KH, KW, C), dtype=jnp.float32) * 0.05
    bias = jax.random.normal(kb, (C,), dtype=jnp.float32) * 0.05

    out = repcpe_forward(x, weight, bias, spatial_shape=(KH, KW))
    out = jax.block_until_ready(out)

    ref = _reference(x, weight, bias, spatial_shape=(KH, KW))
    assert out.shape == (B, C, H, W)
    assert jnp.allclose(out, ref, atol=1e-4, rtol=1e-4), "mismatch vs reference"

    print("KERNEL_OK")
</pallas_src>

<mosaic_0001>
module attributes {stable_mosaic.version = 11 : i64} {
  func.func @_repcpe_kernel(%arg0: i32, %arg1: memref<1x22x704xf32, #tpu.memory_space<vmem>>, %arg2: memref<7x3584xf32, #tpu.memory_space<vmem>>, %arg3: memref<1x512xf32, #tpu.memory_space<vmem>>, %arg4: memref<1x16x512xf32, #tpu.memory_space<vmem>>) attributes {dimension_semantics = [#tpu.dimension_semantics<parallel>], iteration_bounds = array<i64: 2>, scalar_prefetch = 0 : i64, scratch_operands = 0 : i64, tpu.core_type = #tpu.core_type<tc>, window_params = [{transform_indices = @transform_0, window_bounds = array<i64: 1, 22, 704>}, {pipeline_mode = #tpu.pipeline_mode<synchronous>, transform_indices = @transform_1, window_bounds = array<i64: 7, 3584>}, {pipeline_mode = #tpu.pipeline_mode<synchronous>, transform_indices = @transform_2, window_bounds = array<i64: 1, 512>}, {transform_indices = @transform_3, window_bounds = array<i64: 1, 16, 512>}]} {
    %c0 = arith.constant 0 : index
    %c0_0 = arith.constant 0 : index
    %0 = vector.load %arg3[%c0, %c0_0] : memref<1x512xf32, #tpu.memory_space<vmem>>, vector<1x512xf32>
    %1 = vector.shape_cast %0 : vector<1x512xf32> to vector<512xf32>
    %2 = vector.shape_cast %1 : vector<512xf32> to vector<1x512xf32>
    %3 = vector.broadcast %2 : vector<1x512xf32> to vector<16x512xf32>
    %c0_1 = arith.constant 0 : index
    %c0_2 = arith.constant 0 : index
    %c0_3 = arith.constant 0 : index
    %4 = vector.load %arg1[%c0_1, %c0_2, %c0_3] : memref<1x22x704xf32, #tpu.memory_space<vmem>>, vector<1x16x704xf32>
    %5 = vector.shape_cast %4 : vector<1x16x704xf32> to vector<16x704xf32>
    %c0_4 = arith.constant 0 : index
    %c0_5 = arith.constant 0 : index
    %6 = vector.load %arg2[%c0_4, %c0_5] : memref<7x3584xf32, #tpu.memory_space<vmem>>, vector<1x3584xf32>
    %7 = vector.shape_cast %6 : vector<1x3584xf32> to vector<3584xf32>
    %8 = vector.extract_strided_slice %5 {offsets = [0, 0], sizes = [16, 512], strides = [1, 1]} : vector<16x704xf32> to vector<16x512xf32>
    %9 = vector.extract_strided_slice %7 {offsets = [0], sizes = [512], strides = [1]} : vector<3584xf32> to vector<512xf32>
    %10 = vector.shape_cast %9 : vector<512xf32> to vector<1x512xf32>
    %11 = vector.broadcast %10 : vector<1x512xf32> to vector<16x512xf32>
    %12 = arith.mulf %8, %11 : vector<16x512xf32>
    %13 = arith.addf %3, %12 : vector<16x512xf32>
    %14 = vector.extract_strided_slice %5 {offsets = [0, 32], sizes = [16, 512], strides = [1, 1]} : vector<16x704xf32> to vector<16x512xf32>
    %15 = vector.extract_strided_slice %7 {offsets = [512], sizes = [512], strides = [1]} : vector<3584xf32> to vector<512xf32>
    %16 = vector.shape_cast %15 : vector<512xf32> to vector<1x512xf32>
    %17 = vector.broadcast %16 : vector<1x512xf32> to vector<16x512xf32>
    %18 = arith.mulf %14, %17 : vector<16x512xf32>
    %19 = arith.addf %13, %18 : vector<16x512xf32>
    %20 = vector.extract_strided_slice %5 {offsets = [0, 64], sizes = [16, 512], strides = [1, 1]} : vector<16x704xf32> to vector<16x512xf32>
    %21 = vector.extract_strided_slice %7 {offsets = [1024], sizes = [512], strides = [1]} : vector<3584xf32> to vector<512xf32>
    %22 = vector.shape_cast %21 : vector<512xf32> to vector<1x512xf32>
    %23 = vector.broadcast %22 : vector<1x512xf32> to vector<16x512xf32>
    %24 = arith.mulf %20, %23 : vector<16x512xf32>
    %25 = arith.addf %19, %24 : vector<16x512xf32>
    %26 = vector.extract_strided_slice %5 {offsets = [0, 96], sizes = [16, 512], strides = [1, 1]} : vector<16x704xf32> to vector<16x512xf32>
    %27 = vector.extract_strided_slice %7 {offsets = [1536], sizes = [512], strides = [1]} : vector<3584xf32> to vector<512xf32>
    %28 = vector.shape_cast %27 : vector<512xf32> to vector<1x512xf32>
    %29 = vector.broadcast %28 : vector<1x512xf32> to vector<16x512xf32>
    %30 = arith.mulf %26, %29 : vector<16x512xf32>
    %31 = arith.addf %25, %30 : vector<16x512xf32>
    %32 = vector.extract_strided_slice %5 {offsets = [0, 128], sizes = [16, 512], strides = [1, 1]} : vector<16x704xf32> to vector<16x512xf32>
    %33 = vector.extract_strided_slice %7 {offsets = [2048], sizes = [512], strides = [1]} : vector<3584xf32> to vector<512xf32>
    %34 = vector.shape_cast %33 : vector<512xf32> to vector<1x512xf32>
    %35 = vector.broadcast %34 : vector<1x512xf32> to vector<16x512xf32>
    %36 = arith.mulf %32, %35 : vector<16x512xf32>
    %37 = arith.addf %31, %36 : vector<16x512xf32>
    %38 = vector.extract_strided_slice %5 {offsets = [0, 160], sizes = [16, 512], strides = [1, 1]} : vector<16x704xf32> to vector<16x512xf32>
    %39 = vector.extract_strided_slice %7 {offsets = [2560], sizes = [512], strides = [1]} : vector<3584xf32> to vector<512xf32>
    %40 = vector.shape_cast %39 : vector<512xf32> to vector<1x512xf32>
    %41 = vector.broadcast %40 : vector<1x512xf32> to vector<16x512xf32>
    %42 = arith.mulf %38, %41 : vector<16x512xf32>
    %43 = arith.addf %37, %42 : vector<16x512xf32>
    %44 = vector.extract_strided_slice %5 {offsets = [0, 192], sizes = [16, 512], strides = [1, 1]} : vector<16x704xf32> to vector<16x512xf32>
    %45 = vector.extract_strided_slice %7 {offsets = [3072], sizes = [512], strides = [1]} : vector<3584xf32> to vector<512xf32>
    %46 = vector.shape_cast %45 : vector<512xf32> to vector<1x512xf32>
    %47 = vector.broadcast %46 : vector<1x512xf32> to vector<16x512xf32>
    %48 = arith.mulf %44, %47 : vector<16x512xf32>
    %49 = arith.addf %43, %48 : vector<16x512xf32>
    %c0_6 = arith.constant 0 : index
    %c1 = arith.constant 1 : index
    %c0_7 = arith.constant 0 : index
    %50 = vector.load %arg1[%c0_6, %c1, %c0_7] : memref<1x22x704xf32, #tpu.memory_space<vmem>>, vector<1x16x704xf32>
    %51 = vector.shape_cast %50 : vector<1x16x704xf32> to vector<16x704xf32>
    %c1_8 = arith.constant 1 : index
    %c0_9 = arith.constant 0 : index
    %52 = vector.load %arg2[%c1_8, %c0_9] : memref<7x3584xf32, #tpu.memory_space<vmem>>, vector<1x3584xf32>
    %53 = vector.shape_cast %52 : vector<1x3584xf32> to vector<3584xf32>
    %54 = vector.extract_strided_slice %51 {offsets = [0, 0], sizes = [16, 512], strides = [1, 1]} : vector<16x704xf32> to vector<16x512xf32>
    %55 = vector.extract_strided_slice %53 {offsets = [0], sizes = [512], strides = [1]} : vector<3584xf32> to vector<512xf32>
    %56 = vector.shape_cast %55 : vector<512xf32> to vector<1x512xf32>
    %57 = vector.broadcast %56 : vector<1x512xf32> to vector<16x512xf32>
    %58 = arith.mulf %54, %57 : vector<16x512xf32>
    %59 = arith.addf %49, %58 : vector<16x512xf32>
    %60 = vector.extract_strided_slice %51 {offsets = [0, 32], sizes = [16, 512], strides = [1, 1]} : vector<16x704xf32> to vector<16x512xf32>
    %61 = vector.extract_strided_slice %53 {offsets = [512], sizes = [512], strides = [1]} : vector<3584xf32> to vector<512xf32>
    %62 = vector.shape_cast %61 : vector<512xf32> to vector<1x512xf32>
    %63 = vector.broadcast %62 : vector<1x512xf32> to vector<16x512xf32>
    %64 = arith.mulf %60, %63 : vector<16x512xf32>
    %65 = arith.addf %59, %64 : vector<16x512xf32>
    %66 = vector.extract_strided_slice %51 {offsets = [0, 64], sizes = [16, 512], strides = [1, 1]} : vector<16x704xf32> to vector<16x512xf32>
    %67 = vector.extract_strided_slice %53 {offsets = [1024], sizes = [512], strides = [1]} : vector<3584xf32> to vector<512xf32>
    %68 = vector.shape_cast %67 : vector<512xf32> to vector<1x512xf32>
    %69 = vector.broadcast %68 : vector<1x512xf32> to vector<16x512xf32>
    %70 = arith.mulf %66, %69 : vector<16x512xf32>
    %71 = arith.addf %65, %70 : vector<16x512xf32>
    %72 = vector.extract_strided_slice %51 {offsets = [0, 96], sizes = [16, 512], strides = [1, 1]} : vector<16x704xf32> to vector<16x512xf32>
    %73 = vector.extract_strided_slice %53 {offsets = [1536], sizes = [512], strides = [1]} : vector<3584xf32> to vector<512xf32>
    %74 = vector.shape_cast %73 : vector<512xf32> to vector<1x512xf32>
    %75 = vector.broadcast %74 : vector<1x512xf32> to vector<16x512xf32>
    %76 = arith.mulf %72, %75 : vector<16x512xf32>
    %77 = arith.addf %71, %76 : vector<16x512xf32>
    %78 = vector.extract_strided_slice %51 {offsets = [0, 128], sizes = [16, 512], strides = [1, 1]} : vector<16x704xf32> to vector<16x512xf32>
    %79 = vector.extract_strided_slice %53 {offsets = [2048], sizes = [512], strides = [1]} : vector<3584xf32> to vector<512xf32>
    %80 = vector.shape_cast %79 : vector<512xf32> to vector<1x512xf32>
    %81 = vector.broadcast %80 : vector<1x512xf32> to vector<16x512xf32>
    %82 = arith.mulf %78, %81 : vector<16x512xf32>
    %83 = arith.addf %77, %82 : vector<16x512xf32>
    %84 = vector.extract_strided_slice %51 {offsets = [0, 160], sizes = [16, 512], strides = [1, 1]} : vector<16x704xf32> to vector<16x512xf32>
    %85 = vector.extract_strided_slice %53 {offsets = [2560], sizes = [512], strides = [1]} : vector<3584xf32> to vector<512xf32>
    %86 = vector.shape_cast %85 : vector<512xf32> to vector<1x512xf32>
    %87 = vector.broadcast %86 : vector<1x512xf32> to vector<16x512xf32>
    %88 = arith.mulf %84, %87 : vector<16x512xf32>
    %89 = arith.addf %83, %88 : vector<16x512xf32>
    %90 = vector.extract_strided_slice %51 {offsets = [0, 192], sizes = [16, 512], strides = [1, 1]} : vector<16x704xf32> to vector<16x512xf32>
    %91 = vector.extract_strided_slice %53 {offsets = [3072], sizes = [512], strides = [1]} : vector<3584xf32> to vector<512xf32>
    %92 = vector.shape_cast %91 : vector<512xf32> to vector<1x512xf32>
    %93 = vector.broadcast %92 : vector<1x512xf32> to vector<16x512xf32>
    %94 = arith.mulf %90, %93 : vector<16x512xf32>
    %95 = arith.addf %89, %94 : vector<16x512xf32>
    %c0_10 = arith.constant 0 : index
    %c2 = arith.constant 2 : index
    %c0_11 = arith.constant 0 : index
    %96 = vector.load %arg1[%c0_10, %c2, %c0_11] : memref<1x22x704xf32, #tpu.memory_space<vmem>>, vector<1x16x704xf32>
    %97 = vector.shape_cast %96 : vector<1x16x704xf32> to vector<16x704xf32>
    %c2_12 = arith.constant 2 : index
    %c0_13 = arith.constant 0 : index
    %98 = vector.load %arg2[%c2_12, %c0_13] : memref<7x3584xf32, #tpu.memory_space<vmem>>, vector<1x3584xf32>
    %99 = vector.shape_cast %98 : vector<1x3584xf32> to vector<3584xf32>
    %100 = vector.extract_strided_slice %97 {offsets = [0, 0], sizes = [16, 512], strides = [1, 1]} : vector<16x704xf32> to vector<16x512xf32>
    %101 = vector.extract_strided_slice %99 {offsets = [0], sizes = [512], strides = [1]} : vector<3584xf32> to vector<512xf32>
    %102 = vector.shape_cast %101 : vector<512xf32> to vector<1x512xf32>
    %103 = vector.broadcast %102 : vector<1x512xf32> to vector<16x512xf32>
    %104 = arith.mulf %100, %103 : vector<16x512xf32>
    %105 = arith.addf %95, %104 : vector<16x512xf32>
    %106 = vector.extract_strided_slice %97 {offsets = [0, 32], sizes = [16, 512], strides = [1, 1]} : vector<16x704xf32> to vector<16x512xf32>
    %107 = vector.extract_strided_slice %99 {offsets = [512], sizes = [512], strides = [1]} : vector<3584xf32> to vector<512xf32>
    %108 = vector.shape_cast %107 : vector<512xf32> to vector<1x512xf32>
    %109 = vector.broadcast %108 : vector<1x512xf32> to vector<16x512xf32>
    %110 = arith.mulf %106, %109 : vector<16x512xf32>
    %111 = arith.addf %105, %110 : vector<16x512xf32>
    %112 = vector.extract_strided_slice %97 {offsets = [0, 64], sizes = [16, 512], strides = [1, 1]} : vector<16x704xf32> to vector<16x512xf32>
    %113 = vector.extract_strided_slice %99 {offsets = [1024], sizes = [512], strides = [1]} : vector<3584xf32> to vector<512xf32>
    %114 = vector.shape_cast %113 : vector<512xf32> to vector<1x512xf32>
    %115 = vector.broadcast %114 : vector<1x512xf32> to vector<16x512xf32>
    %116 = arith.mulf %112, %115 : vector<16x512xf32>
    %117 = arith.addf %111, %116 : vector<16x512xf32>
    %118 = vector.extract_strided_slice %97 {offsets = [0, 96], sizes = [16, 512], strides = [1, 1]} : vector<16x704xf32> to vector<16x512xf32>
    %119 = vector.extract_strided_slice %99 {offsets = [1536], sizes = [512], strides = [1]} : vector<3584xf32> to vector<512xf32>
    %120 = vector.shape_cast %119 : vector<512xf32> to vector<1x512xf32>
    %121 = vector.broadcast %120 : vector<1x512xf32> to vector<16x512xf32>
    %122 = arith.mulf %118, %121 : vector<16x512xf32>
    %123 = arith.addf %117, %122 : vector<16x512xf32>
    %124 = vector.extract_strided_slice %97 {offsets = [0, 128], sizes = [16, 512], strides = [1, 1]} : vector<16x704xf32> to vector<16x512xf32>
    %125 = vector.extract_strided_slice %99 {offsets = [2048], sizes = [512], strides = [1]} : vector<3584xf32> to vector<512xf32>
    %126 = vector.shape_cast %125 : vector<512xf32> to vector<1x512xf32>
    %127 = vector.broadcast %126 : vector<1x512xf32> to vector<16x512xf32>
    %128 = arith.mulf %124, %127 : vector<16x512xf32>
    %129 = arith.addf %123, %128 : vector<16x512xf32>
    %130 = vector.extract_strided_slice %97 {offsets = [0, 160], sizes = [16, 512], strides = [1, 1]} : vector<16x704xf32> to vector<16x512xf32>
    %131 = vector.extract_strided_slice %99 {offsets = [2560], sizes = [512], strides = [1]} : vector<3584xf32> to vector<512xf32>
    %132 = vector.shape_cast %131 : vector<512xf32> to vector<1x512xf32>
    %133 = vector.broadcast %132 : vector<1x512xf32> to vector<16x512xf32>
    %134 = arith.mulf %130, %133 : vector<16x512xf32>
    %135 = arith.addf %129, %134 : vector<16x512xf32>
    %136 = vector.extract_strided_slice %97 {offsets = [0, 192], sizes = [16, 512], strides = [1, 1]} : vector<16x704xf32> to vector<16x512xf32>
    %137 = vector.extract_strided_slice %99 {offsets = [3072], sizes = [512], strides = [1]} : vector<3584xf32> to vector<512xf32>
    %138 = vector.shape_cast %137 : vector<512xf32> to vector<1x512xf32>
    %139 = vector.broadcast %138 : vector<1x512xf32> to vector<16x512xf32>
    %140 = arith.mulf %136, %139 : vector<16x512xf32>
    %141 = arith.addf %135, %140 : vector<16x512xf32>
    %c0_14 = arith.constant 0 : index
    %c3 = arith.constant 3 : index
    %c0_15 = arith.constant 0 : index
    %142 = vector.load %arg1[%c0_14, %c3, %c0_15] : memref<1x22x704xf32, #tpu.memory_space<vmem>>, vector<1x16x704xf32>
    %143 = vector.shape_cast %142 : vector<1x16x704xf32> to vector<16x704xf32>
    %c3_16 = arith.constant 3 : index
    %c0_17 = arith.constant 0 : index
    %144 = vector.load %arg2[%c3_16, %c0_17] : memref<7x3584xf32, #tpu.memory_space<vmem>>, vector<1x3584xf32>
    %145 = vector.shape_cast %144 : vector<1x3584xf32> to vector<3584xf32>
    %146 = vector.extract_strided_slice %143 {offsets = [0, 0], sizes = [16, 512], strides = [1, 1]} : vector<16x704xf32> to vector<16x512xf32>
    %147 = vector.extract_strided_slice %145 {offsets = [0], sizes = [512], strides = [1]} : vector<3584xf32> to vector<512xf32>
    %148 = vector.shape_cast %147 : vector<512xf32> to vector<1x512xf32>
    %149 = vector.broadcast %148 : vector<1x512xf32> to vector<16x512xf32>
    %150 = arith.mulf %146, %149 : vector<16x512xf32>
    %151 = arith.addf %141, %150 : vector<16x512xf32>
    %152 = vector.extract_strided_slice %143 {offsets = [0, 32], sizes = [16, 512], strides = [1, 1]} : vector<16x704xf32> to vector<16x512xf32>
    %153 = vector.extract_strided_slice %145 {offsets = [512], sizes = [512], strides = [1]} : vector<3584xf32> to vector<512xf32>
    %154 = vector.shape_cast %153 : vector<512xf32> to vector<1x512xf32>
    %155 = vector.broadcast %154 : vector<1x512xf32> to vector<16x512xf32>
    %156 = arith.mulf %152, %155 : vector<16x512xf32>
    %157 = arith.addf %151, %156 : vector<16x512xf32>
    %158 = vector.extract_strided_slice %143 {offsets = [0, 64], sizes = [16, 512], strides = [1, 1]} : vector<16x704xf32> to vector<16x512xf32>
    %159 = vector.extract_strided_slice %145 {offsets = [1024], sizes = [512], strides = [1]} : vector<3584xf32> to vector<512xf32>
    %160 = vector.shape_cast %159 : vector<512xf32> to vector<1x512xf32>
    %161 = vector.broadcast %160 : vector<1x512xf32> to vector<16x512xf32>
    %162 = arith.mulf %158, %161 : vector<16x512xf32>
    %163 = arith.addf %157, %162 : vector<16x512xf32>
    %164 = vector.extract_strided_slice %143 {offsets = [0, 96], sizes = [16, 512], strides = [1, 1]} : vector<16x704xf32> to vector<16x512xf32>
    %165 = vector.extract_strided_slice %145 {offsets = [1536], sizes = [512], strides = [1]} : vector<3584xf32> to vector<512xf32>
    %166 = vector.shape_cast %165 : vector<512xf32> to vector<1x512xf32>
    %167 = vector.broadcast %166 : vector<1x512xf32> to vector<16x512xf32>
    %168 = arith.mulf %164, %167 : vector<16x512xf32>
    %169 = arith.addf %163, %168 : vector<16x512xf32>
    %170 = vector.extract_strided_slice %143 {offsets = [0, 128], sizes = [16, 512], strides = [1, 1]} : vector<16x704xf32> to vector<16x512xf32>
    %171 = vector.extract_strided_slice %145 {offsets = [2048], sizes = [512], strides = [1]} : vector<3584xf32> to vector<512xf32>
    %172 = vector.shape_cast %171 : vector<512xf32> to vector<1x512xf32>
    %173 = vector.broadcast %172 : vector<1x512xf32> to vector<16x512xf32>
    %174 = arith.mulf %170, %173 : vector<16x512xf32>
    %175 = arith.addf %169, %174 : vector<16x512xf32>
    %176 = vector.extract_strided_slice %143 {offsets = [0, 160], sizes = [16, 512], strides = [1, 1]} : vector<16x704xf32> to vector<16x512xf32>
    %177 = vector.extract_strided_slice %145 {offsets = [2560], sizes = [512], strides = [1]} : vector<3584xf32> to vector<512xf32>
    %178 = vector.shape_cast %177 : vector<512xf32> to vector<1x512xf32>
    %179 = vector.broadcast %178 : vector<1x512xf32> to vector<16x512xf32>
    %180 = arith.mulf %176, %179 : vector<16x512xf32>
    %181 = arith.addf %175, %180 : vector<16x512xf32>
    %182 = vector.extract_strided_slice %143 {offsets = [0, 192], sizes = [16, 512], strides = [1, 1]} : vector<16x704xf32> to vector<16x512xf32>
    %183 = vector.extract_strided_slice %145 {offsets = [3072], sizes = [512], strides = [1]} : vector<3584xf32> to vector<512xf32>
    %184 = vector.shape_cast %183 : vector<512xf32> to vector<1x512xf32>
    %185 = vector.broadcast %184 : vector<1x512xf32> to vector<16x512xf32>
    %186 = arith.mulf %182, %185 : vector<16x512xf32>
    %187 = arith.addf %181, %186 : vector<16x512xf32>
    %c0_18 = arith.constant 0 : index
    %c4 = arith.constant 4 : index
    %c0_19 = arith.constant 0 : index
    %188 = vector.load %arg1[%c0_18, %c4, %c0_19] : memref<1x22x704xf32, #tpu.memory_space<vmem>>, vector<1x16x704xf32>
    %189 = vector.shape_cast %188 : vector<1x16x704xf32> to vector<16x704xf32>
    %c4_20 = arith.constant 4 : index
    %c0_21 = arith.constant 0 : index
    %190 = vector.load %arg2[%c4_20, %c0_21] : memref<7x3584xf32, #tpu.memory_space<vmem>>, vector<1x3584xf32>
    %191 = vector.shape_cast %190 : vector<1x3584xf32> to vector<3584xf32>
    %192 = vector.extract_strided_slice %189 {offsets = [0, 0], sizes = [16, 512], strides = [1, 1]} : vector<16x704xf32> to vector<16x512xf32>
    %193 = vector.extract_strided_slice %191 {offsets = [0], sizes = [512], strides = [1]} : vector<3584xf32> to vector<512xf32>
    %194 = vector.shape_cast %193 : vector<512xf32> to vector<1x512xf32>
    %195 = vector.broadcast %194 : vector<1x512xf32> to vector<16x512xf32>
    %196 = arith.mulf %192, %195 : vector<16x512xf32>
    %197 = arith.addf %187, %196 : vector<16x512xf32>
    %198 = vector.extract_strided_slice %189 {offsets = [0, 32], sizes = [16, 512], strides = [1, 1]} : vector<16x704xf32> to vector<16x512xf32>
    %199 = vector.extract_strided_slice %191 {offsets = [512], sizes = [512], strides = [1]} : vector<3584xf32> to vector<512xf32>
    %200 = vector.shape_cast %199 : vector<512xf32> to vector<1x512xf32>
    %201 = vector.broadcast %200 : vector<1x512xf32> to vector<16x512xf32>
    %202 = arith.mulf %198, %201 : vector<16x512xf32>
    %203 = arith.addf %197, %202 : vector<16x512xf32>
    %204 = vector.extract_strided_slice %189 {offsets = [0, 64], sizes = [16, 512], strides = [1, 1]} : vector<16x704xf32> to vector<16x512xf32>
    %205 = vector.extract_strided_slice %191 {offsets = [1024], sizes = [512], strides = [1]} : vector<3584xf32> to vector<512xf32>
    %206 = vector.shape_cast %205 : vector<512xf32> to vector<1x512xf32>
    %207 = vector.broadcast %206 : vector<1x512xf32> to vector<16x512xf32>
    %208 = arith.mulf %204, %207 : vector<16x512xf32>
    %209 = arith.addf %203, %208 : vector<16x512xf32>
    %210 = vector.extract_strided_slice %189 {offsets = [0, 96], sizes = [16, 512], strides = [1, 1]} : vector<16x704xf32> to vector<16x512xf32>
    %211 = vector.extract_strided_slice %191 {offsets = [1536], sizes = [512], strides = [1]} : vector<3584xf32> to vector<512xf32>
    %212 = vector.shape_cast %211 : vector<512xf32> to vector<1x512xf32>
    %213 = vector.broadcast %212 : vector<1x512xf32> to vector<16x512xf32>
    %214 = arith.mulf %210, %213 : vector<16x512xf32>
    %215 = arith.addf %209, %214 : vector<16x512xf32>
    %216 = vector.extract_strided_slice %189 {offsets = [0, 128], sizes = [16, 512], strides = [1, 1]} : vector<16x704xf32> to vector<16x512xf32>
    %217 = vector.extract_strided_slice %191 {offsets = [2048], sizes = [512], strides = [1]} : vector<3584xf32> to vector<512xf32>
    %218 = vector.shape_cast %217 : vector<512xf32> to vector<1x512xf32>
    %219 = vector.broadcast %218 : vector<1x512xf32> to vector<16x512xf32>
    %220 = arith.mulf %216, %219 : vector<16x512xf32>
    %221 = arith.addf %215, %220 : vector<16x512xf32>
    %222 = vector.extract_strided_slice %189 {offsets = [0, 160], sizes = [16, 512], strides = [1, 1]} : vector<16x704xf32> to vector<16x512xf32>
    %223 = vector.extract_strided_slice %191 {offsets = [2560], sizes = [512], strides = [1]} : vector<3584xf32> to vector<512xf32>
    %224 = vector.shape_cast %223 : vector<512xf32> to vector<1x512xf32>
    %225 = vector.broadcast %224 : vector<1x512xf32> to vector<16x512xf32>
    %226 = arith.mulf %222, %225 : vector<16x512xf32>
    %227 = arith.addf %221, %226 : vector<16x512xf32>
    %228 = vector.extract_strided_slice %189 {offsets = [0, 192], sizes = [16, 512], strides = [1, 1]} : vector<16x704xf32> to vector<16x512xf32>
    %229 = vector.extract_strided_slice %191 {offsets = [3072], sizes = [512], strides = [1]} : vector<3584xf32> to vector<512xf32>
    %230 = vector.shape_cast %229 : vector<512xf32> to vector<1x512xf32>
    %231 = vector.broadcast %230 : vector<1x512xf32> to vector<16x512xf32>
    %232 = arith.mulf %228, %231 : vector<16x512xf32>
    %233 = arith.addf %227, %232 : vector<16x512xf32>
    %c0_22 = arith.constant 0 : index
    %c5 = arith.constant 5 : index
    %c0_23 = arith.constant 0 : index
    %234 = vector.load %arg1[%c0_22, %c5, %c0_23] : memref<1x22x704xf32, #tpu.memory_space<vmem>>, vector<1x16x704xf32>
    %235 = vector.shape_cast %234 : vector<1x16x704xf32> to vector<16x704xf32>
    %c5_24 = arith.constant 5 : index
    %c0_25 = arith.constant 0 : index
    %236 = vector.load %arg2[%c5_24, %c0_25] : memref<7x3584xf32, #tpu.memory_space<vmem>>, vector<1x3584xf32>
    %237 = vector.shape_cast %236 : vector<1x3584xf32> to vector<3584xf32>
    %238 = vector.extract_strided_slice %235 {offsets = [0, 0], sizes = [16, 512], strides = [1, 1]} : vector<16x704xf32> to vector<16x512xf32>
    %239 = vector.extract_strided_slice %237 {offsets = [0], sizes = [512], strides = [1]} : vector<3584xf32> to vector<512xf32>
    %240 = vector.shape_cast %239 : vector<512xf32> to vector<1x512xf32>
    %241 = vector.broadcast %240 : vector<1x512xf32> to vector<16x512xf32>
    %242 = arith.mulf %238, %241 : vector<16x512xf32>
    %243 = arith.addf %233, %242 : vector<16x512xf32>
    %244 = vector.extract_strided_slice %235 {offsets = [0, 32], sizes = [16, 512], strides = [1, 1]} : vector<16x704xf32> to vector<16x512xf32>
    %245 = vector.extract_strided_slice %237 {offsets = [512], sizes = [512], strides = [1]} : vector<3584xf32> to vector<512xf32>
    %246 = vector.shape_cast %245 : vector<512xf32> to vector<1x512xf32>
    %247 = vector.broadcast %246 : vector<1x512xf32> to vector<16x512xf32>
    %248 = arith.mulf %244, %247 : vector<16x512xf32>
    %249 = arith.addf %243, %248 : vector<16x512xf32>
    %250 = vector.extract_strided_slice %235 {offsets = [0, 64], sizes = [16, 512], strides = [1, 1]} : vector<16x704xf32> to vector<16x512xf32>
    %251 = vector.extract_strided_slice %237 {offsets = [1024], sizes = [512], strides = [1]} : vector<3584xf32> to vector<512xf32>
    %252 = vector.shape_cast %251 : vector<512xf32> to vector<1x512xf32>
    %253 = vector.broadcast %252 : vector<1x512xf32> to vector<16x512xf32>
    %254 = arith.mulf %250, %253 : vector<16x512xf32>
    %255 = arith.addf %249, %254 : vector<16x512xf32>
    %256 = vector.extract_strided_slice %235 {offsets = [0, 96], sizes = [16, 512], strides = [1, 1]} : vector<16x704xf32> to vector<16x512xf32>
    %257 = vector.extract_strided_slice %237 {offsets = [1536], sizes = [512], strides = [1]} : vector<3584xf32> to vector<512xf32>
    %258 = vector.shape_cast %257 : vector<512xf32> to vector<1x512xf32>
    %259 = vector.broadcast %258 : vector<1x512xf32> to vector<16x512xf32>
    %260 = arith.mulf %256, %259 : vector<16x512xf32>
    %261 = arith.addf %255, %260 : vector<16x512xf32>
    %262 = vector.extract_strided_slice %235 {offsets = [0, 128], sizes = [16, 512], strides = [1, 1]} : vector<16x704xf32> to vector<16x512xf32>
    %263 = vector.extract_strided_slice %237 {offsets = [2048], sizes = [512], strides = [1]} : vector<3584xf32> to vector<512xf32>
    %264 = vector.shape_cast %263 : vector<512xf32> to vector<1x512xf32>
    %265 = vector.broadcast %264 : vector<1x512xf32> to vector<16x512xf32>
    %266 = arith.mulf %262, %265 : vector<16x512xf32>
    %267 = arith.addf %261, %266 : vector<16x512xf32>
    %268 = vector.extract_strided_slice %235 {offsets = [0, 160], sizes = [16, 512], strides = [1, 1]} : vector<16x704xf32> to vector<16x512xf32>
    %269 = vector.extract_strided_slice %237 {offsets = [2560], sizes = [512], strides = [1]} : vector<3584xf32> to vector<512xf32>
    %270 = vector.shape_cast %269 : vector<512xf32> to vector<1x512xf32>
    %271 = vector.broadcast %270 : vector<1x512xf32> to vector<16x512xf32>
    %272 = arith.mulf %268, %271 : vector<16x512xf32>
    %273 = arith.addf %267, %272 : vector<16x512xf32>
    %274 = vector.extract_strided_slice %235 {offsets = [0, 192], sizes = [16, 512], strides = [1, 1]} : vector<16x704xf32> to vector<16x512xf32>
    %275 = vector.extract_strided_slice %237 {offsets = [3072], sizes = [512], strides = [1]} : vector<3584xf32> to vector<512xf32>
    %276 = vector.shape_cast %275 : vector<512xf32> to vector<1x512xf32>
    %277 = vector.broadcast %276 : vector<1x512xf32> to vector<16x512xf32>
    %278 = arith.mulf %274, %277 : vector<16x512xf32>
    %279 = arith.addf %273, %278 : vector<16x512xf32>
    %c0_26 = arith.constant 0 : index
    %c6 = arith.constant 6 : index
    %c0_27 = arith.constant 0 : index
    %280 = vector.load %arg1[%c0_26, %c6, %c0_27] : memref<1x22x704xf32, #tpu.memory_space<vmem>>, vector<1x16x704xf32>
    %281 = vector.shape_cast %280 : vector<1x16x704xf32> to vector<16x704xf32>
    %c6_28 = arith.constant 6 : index
    %c0_29 = arith.constant 0 : index
    %282 = vector.load %arg2[%c6_28, %c0_29] : memref<7x3584xf32, #tpu.memory_space<vmem>>, vector<1x3584xf32>
    %283 = vector.shape_cast %282 : vector<1x3584xf32> to vector<3584xf32>
    %284 = vector.extract_strided_slice %281 {offsets = [0, 0], sizes = [16, 512], strides = [1, 1]} : vector<16x704xf32> to vector<16x512xf32>
    %285 = vector.extract_strided_slice %283 {offsets = [0], sizes = [512], strides = [1]} : vector<3584xf32> to vector<512xf32>
    %286 = vector.shape_cast %285 : vector<512xf32> to vector<1x512xf32>
    %287 = vector.broadcast %286 : vector<1x512xf32> to vector<16x512xf32>
    %288 = arith.mulf %284, %287 : vector<16x512xf32>
    %289 = arith.addf %279, %288 : vector<16x512xf32>
    %290 = vector.extract_strided_slice %281 {offsets = [0, 32], sizes = [16, 512], strides = [1, 1]} : vector<16x704xf32> to vector<16x512xf32>
    %291 = vector.extract_strided_slice %283 {offsets = [512], sizes = [512], strides = [1]} : vector<3584xf32> to vector<512xf32>
    %292 = vector.shape_cast %291 : vector<512xf32> to vector<1x512xf32>
    %293 = vector.broadcast %292 : vector<1x512xf32> to vector<16x512xf32>
    %294 = arith.mulf %290, %293 : vector<16x512xf32>
    %295 = arith.addf %289, %294 : vector<16x512xf32>
    %296 = vector.extract_strided_slice %281 {offsets = [0, 64], sizes = [16, 512], strides = [1, 1]} : vector<16x704xf32> to vector<16x512xf32>
    %297 = vector.extract_strided_slice %283 {offsets = [1024], sizes = [512], strides = [1]} : vector<3584xf32> to vector<512xf32>
    %298 = vector.shape_cast %297 : vector<512xf32> to vector<1x512xf32>
    %299 = vector.broadcast %298 : vector<1x512xf32> to vector<16x512xf32>
    %300 = arith.mulf %296, %299 : vector<16x512xf32>
    %301 = arith.addf %295, %300 : vector<16x512xf32>
    %302 = vector.extract_strided_slice %281 {offsets = [0, 96], sizes = [16, 512], strides = [1, 1]} : vector<16x704xf32> to vector<16x512xf32>
    %303 = vector.extract_strided_slice %283 {offsets = [1536], sizes = [512], strides = [1]} : vector<3584xf32> to vector<512xf32>
    %304 = vector.shape_cast %303 : vector<512xf32> to vector<1x512xf32>
    %305 = vector.broadcast %304 : vector<1x512xf32> to vector<16x512xf32>
    %306 = arith.mulf %302, %305 : vector<16x512xf32>
    %307 = arith.addf %301, %306 : vector<16x512xf32>
    %308 = vector.extract_strided_slice %281 {offsets = [0, 128], sizes = [16, 512], strides = [1, 1]} : vector<16x704xf32> to vector<16x512xf32>
    %309 = vector.extract_strided_slice %283 {offsets = [2048], sizes = [512], strides = [1]} : vector<3584xf32> to vector<512xf32>
    %310 = vector.shape_cast %309 : vector<512xf32> to vector<1x512xf32>
    %311 = vector.broadcast %310 : vector<1x512xf32> to vector<16x512xf32>
    %312 = arith.mulf %308, %311 : vector<16x512xf32>
    %313 = arith.addf %307, %312 : vector<16x512xf32>
    %314 = vector.extract_strided_slice %281 {offsets = [0, 160], sizes = [16, 512], strides = [1, 1]} : vector<16x704xf32> to vector<16x512xf32>
    %315 = vector.extract_strided_slice %283 {offsets = [2560], sizes = [512], strides = [1]} : vector<3584xf32> to vector<512xf32>
    %316 = vector.shape_cast %315 : vector<512xf32> to vector<1x512xf32>
    %317 = vector.broadcast %316 : vector<1x512xf32> to vector<16x512xf32>
    %318 = arith.mulf %314, %317 : vector<16x512xf32>
    %319 = arith.addf %313, %318 : vector<16x512xf32>
    %320 = vector.extract_strided_slice %281 {offsets = [0, 192], sizes = [16, 512], strides = [1, 1]} : vector<16x704xf32> to vector<16x512xf32>
    %321 = vector.extract_strided_slice %283 {offsets = [3072], sizes = [512], strides = [1]} : vector<3584xf32> to vector<512xf32>
    %322 = vector.shape_cast %321 : vector<512xf32> to vector<1x512xf32>
    %323 = vector.broadcast %322 : vector<1x512xf32> to vector<16x512xf32>
    %324 = arith.mulf %320, %323 : vector<16x512xf32>
    %325 = arith.addf %319, %324 : vector<16x512xf32>
    %c0_30 = arith.constant 0 : index
    %c0_31 = arith.constant 0 : index
    %c0_32 = arith.constant 0 : index
    %326 = vector.load %arg4[%c0_30, %c0_31, %c0_32] : memref<1x16x512xf32, #tpu.memory_space<vmem>>, vector<1x16x512xf32>
    %327 = vector.shape_cast %326 : vector<1x16x512xf32> to vector<16x512xf32>
    %328 = vector.shape_cast %325 : vector<16x512xf32> to vector<1x16x512xf32>
    tpu.vector_store %arg4[%c0_30, %c0_31, %c0_32], %328 {strides = array<i32>} : memref<1x16x512xf32, #tpu.memory_space<vmem>>, vector<1x16x512xf32>,
    return
  }
  func.func @transform_0(%arg0: i32) -> (i32, i32, i32) {
    %c0_i32 = arith.constant 0 : i32
    %c0_i32_0 = arith.constant 0 : i32
    %c0_i32_1 = arith.constant 0 : i32
    return %arg0, %c0_i32, %c0_i32_0 : i32, i32, i32
  }
  func.func @transform_1(%arg0: i32) -> (i32, i32) {
    %c0_i32 = arith.constant 0 : i32
    %c0_i32_0 = arith.constant 0 : i32
    %c0_i32_1 = arith.constant 0 : i32
    return %c0_i32, %c0_i32_0 : i32, i32
  }
  func.func @transform_2(%arg0: i32) -> (i32, i32) {
    %c0_i32 = arith.constant 0 : i32
    %c0_i32_0 = arith.constant 0 : i32
    %c0_i32_1 = arith.constant 0 : i32
    return %c0_i32, %c0_i32_0 : i32, i32
  }
  func.func @transform_3(%arg0: i32) -> (i32, i32, i32) {
    %c0_i32 = arith.constant 0 : i32
    %c0_i32_0 = arith.constant 0 : i32
    %c0_i32_1 = arith.constant 0 : i32
    return %arg0, %c0_i32, %c0_i32_0 : i32, i32, i32
  }
}

</mosaic_0001>

<bundles_post_ra>
// kernel: tile.18
= control target key start
LH: loop header
LB: loop body
LE: loop exit
PB: predicated region body
PF: predicated region fallthrough
CT: control target
= control target key end

     0   :  { %s28_s0 = inlined_call_operand.vmem [shape: f32[32], index: 0, kind: input, shape index: {}]   ;;  %s29_s1 = inlined_call_operand.vmem [shape: f32[16,32], index: 1, kind: output, shape index: {}]  }
   0x1   :  { %v4_v0 = vld [vmem:[%s28_s0] ss:$0 sm:$0xff] }
   0x2   :  { %5 = vst [vmem:[%s29_s1] sm:$0xff] %v4_v0 }
   0x3   :  { %8 = vst [vmem:[%s29_s1 + $0x8] sm:$0xff] %v4_v0 }

// kernel: tile.19
= control target key start
LH: loop header
LB: loop body
LE: loop exit
PB: predicated region body
PF: predicated region fallthrough
CT: control target
= control target key end

     0   :  { %s56_s8 = smov 96   ;;  %s57_s11 = smov 32   ;;  %vm3_vm0 = vcmask 261120   ;;  %vm9_vm1 = vcmask 1048320   ;;  %vm15_vm2 = vcmask 785920   ;;  %vm21_vm3 = vcmask 523520   ;;  %s93_s0 = inlined_call_operand.vmem [shape: f32[16,32], index: 0, kind: input, shape index: {}]   ;;  %s94_s1 = inlined_call_operand.vmem [shape: f32[1,512], index: 1, kind: output, shape index: {}]  }
   0x1   :  { %v47_v0 = vld [vmem:[%s93_s0 + $0x3] ss:$4 sm:$0xf]   ;;  %v49_v1 = vld [vmem:[%s93_s0 + $0x1] ss:$4 sm:$0xf]  }
   0x2   :  { %7 = vrot.lane.b32.xlu0 %v47_v0, %s56_s8  ;;  %19 = vrot.lane.b32.xlu1 %v49_v1, %s57_s11  ;;  %v48_v2 = vld [vmem:[%s93_s0 + $0x2] ss:$4 sm:$0xf]   ;;  %s58_s14 = smov 64  }
   0x3   :  { %v2_v3 = vld [vmem:[%s93_s0] ss:$4 sm:$0xf]  }
   0x4   :  { %4 = vst.msk [vmem:[#allocation0] ss:$8 sm:$0xf] %vm3_vm0, %v2_v3  }
   0xa   :  { %13 = vrot.lane.b32.xlu0 %v48_v2, %s58_s14 }
  0x74   :  { %v8_v4 = vpop.permute.xlu0 %7   ;;  %v20_v5 = vpop.permute.xlu1 %19  }
  0x75   :  { %10 = vst.msk [vmem:[#allocation0] ss:$8 sm:$0xf] %vm9_vm1, %v8_v4  }
  0x7c   :  { %v14_v6 = vpop.permute.xlu0 %13  }
  0x7d   :  { %16 = vst.msk [vmem:[#allocation0] ss:$8 sm:$0xf] %vm15_vm2, %v14_v6  }
  0x7e   :  { %22 = vst.msk [vmem:[#allocation0] ss:$8 sm:$0xf] %vm21_vm3, %v20_v5  }
  0x85   :  { %v25_v7 = vld [vmem:[#allocation0] sm:$0x1]  ;;  %v30_v8 = vld [vmem:[#allocation0 + $0x8] sm:$0x1]  ;;  %v36_v9 = vld [vmem:[#allocation0 + $0x10] sm:$0x1] }
  0x86   :  { %28 = vst [vmem:[%s94_s1] sm:$0x1] %v25_v7  ;;  %v42_v10 = vld [vmem:[#allocation0 + $0x18] sm:$0x1] }
  0x87   :  { %50 = vst [vmem:[%s94_s1 + $0x1] sm:$0x1] %v30_v8 }
  0x88   :  { %51 = vst [vmem:[%s94_s1 + $0x2] sm:$0x1] %v36_v9 }
  0x89   :  { %52 = vst [vmem:[%s94_s1 + $0x3] sm:$0x1] %v42_v10 }

// kernel: tile.14
= control target key start
LH: loop header
LB: loop body
LE: loop exit
PB: predicated region body
PF: predicated region fallthrough
CT: control target
= control target key end

     0   :  { %vm178_vm0 = vcmask 1043458   ;;  %s222_s6 = smov 3  ;;  %vm183_vm1 = vcmask 1045508   ;;  %vm188_vm2 = vcmask 1047558   ;;  %s225_s9 = smov 12  ;;  %vm3_vm3 = vcmask 261120   ;;  %s4717_s0 = inlined_call_operand.vmem [shape: f32[7,7,16,32], index: 0, kind: input, shape index: {}]   ;;  %s4718_s1 = inlined_call_operand.vmem [shape: f32[7,3584], index: 1, kind: output, shape index: {}]  }
   0x1   :  { %v2090_v0 = vld [vmem:[%s4717_s0 + $0x23] ss:$112 sm:%s222_s6]   ;;  %s230_s10 = smov 48  ;;  %s235_s15 = smov 192  ;;  %vm192_vm4 = vcmask 1048320   ;;  %vm804_vm5 = vcmask 785920  }
   0x2   :  { %v2091_v1 = vld [vmem:[%s4717_s0 + $0x23] ss:$112 sm:%s225_s9]   ;;  %s173_s16 = smov 3  ;;  %s176_s21 = smov 12  ;;  %vm1416_vm6 = vcmask 523520  }
   0x3   :  { %v2092_v2 = vld [vmem:[%s4717_s0 + $0x23] ss:$112 sm:%s230_s10]   ;;  %v228_v3 = vsel %vm178_vm0, %v2091_v1, %v2090_v0  ;;  %s181_s22 = smov 48  ;;  %s186_s27 = smov 192 }
   0x4   :  { %v2093_v4 = vld [vmem:[%s4717_s0 + $0x126b] ss:$-668 sm:%s235_s15]   ;;  %v233_v6 = vsel %vm183_vm1, %v2092_v2, %v228_v3  ;;  %s247_s28 = smov 3  ;;  %s250_s4 = smov 12 }
   0x5   :  { %v2079_v5 = vld [vmem:[%s4717_s0 + $0x3] ss:$112 sm:%s173_s16]   ;;  %v238_v9 = vsel %vm188_vm2, %v2093_v4, %v233_v6  ;;  %s255_s5 = smov 48  ;;  %s2520_s6 = smov 96  }
   0x6   :  { %v2080_v7 = vld [vmem:[%s4717_s0 + $0x3] ss:$112 sm:%s176_s21]   ;;  %239 = vrot.lane.b32.xlu1 %v238_v9, %s2520_s6  ;;  %s260_s9 = smov 192  ;;  %s197_s10 = smov 3 }
   0x7   :  { %v2081_v8 = vld [vmem:[%s4717_s0 + $0x3] ss:$112 sm:%s181_s22]   ;;  %v179_v10 = vsel %vm178_vm0, %v2080_v7, %v2079_v5  ;;  %s200_s15 = smov 12  ;;  %s205_s16 = smov 48 }
   0x8   :  { %v2082_v11 = vld [vmem:[%s4717_s0 + $0x124b] ss:$-668 sm:%s186_s27]   ;;  %v184_v13 = vsel %vm183_vm1, %v2081_v8, %v179_v10  ;;  %s210_s19 = smov 192  ;;  %s347_s20 = smov 3 }
   0x9   :  { %v2096_v12 = vld [vmem:[%s4717_s0 + $0x33] ss:$112 sm:%s247_s28]   ;;  %v189_v15 = vsel %vm188_vm2, %v2082_v11, %v184_v13  ;;  %s350_s25 = smov 12  ;;  %s355_s26 = smov 48  ;;  %v2120_v25 = vld [vmem:[%s4717_s0 + $0x77] ss:$112 sm:%s347_s20]  }
   0xa   :  { %v2097_v14 = vld [vmem:[%s4717_s0 + $0x33] ss:$112 sm:%s250_s4]   ;;  %190 = vrot.lane.b32.xlu0 %v189_v15, %s2520_s6  ;;  %s360_s2 = smov 192  ;;  %s322_s3 = smov 3 }
   0xb   :  { %v253_v16 = vsel %vm178_vm0, %v2097_v14, %v2096_v12  ;;  %v2098_v17 = vld [vmem:[%s4717_s0 + $0x33] ss:$112 sm:%s255_s5]   ;;  %v2121_v28 = vld [vmem:[%s4717_s0 + $0x77] ss:$112 sm:%s350_s25]   ;;  %s325_s7 = smov 12  ;;  %s330_s8 = smov 48 }
   0xc   :  { %v2099_v18 = vld [vmem:[%s4717_s0 + $0x127b] ss:$-668 sm:%s260_s9]   ;;  %v258_v19 = vsel %vm183_vm1, %v2098_v17, %v253_v16  ;;  %s272_s11 = smov 3  ;;  %v353_v31 = vsel %vm178_vm0, %v2121_v28, %v2120_v25  ;;  %s280_s17 = smov 48 }
   0xd   :  { %v2084_v20 = vld [vmem:[%s4717_s0 + $0x13] ss:$112 sm:%s197_s10]   ;;  %v263_v26 = vsel %vm188_vm2, %v2099_v18, %v258_v19  ;;  %v2122_v32 = vld [vmem:[%s4717_s0 + $0x77] ss:$112 sm:%s355_s26]   ;;  %s335_s22 = smov 192  ;;  %s285_s23 = smov 192 }
   0xe   :  { %v2085_v21 = vld [vmem:[%s4717_s0 + $0x13] ss:$112 sm:%s200_s15]   ;;  %264 = vrot.lane.b32.xlu1 %v263_v26, %s2520_s6  ;;  %s422_s28 = smov 3  ;;  %s425_s29 = smov 12  ;;  %v358_v39 = vsel %vm183_vm1, %v2122_v32, %v353_v31 }
   0xf   :  { %v2086_v22 = vld [vmem:[%s4717_s0 + $0x13] ss:$112 sm:%s205_s16]   ;;  %v203_v23 = vsel %vm178_vm0, %v2085_v21, %v2084_v20  ;;  %s275_s16 = smov 12  ;;  %v2123_v34 = vld [vmem:[%s4717_s0 - $0x295] ss:$112 sm:%s360_s2]   ;;  %s400_s9 = smov 12 }
  0x10   :  { %v2087_v24 = vld [vmem:[%s4717_s0 + $0x125b] ss:$-668 sm:%s210_s19]   ;;  %v208_v27 = vsel %vm183_vm1, %v2086_v22, %v203_v23  ;;  %s430_s14 = smov 48  ;;  %s405_s15 = smov 48  ;;  %v363_v49 = vsel %vm188_vm2, %v2123_v34, %v358_v39 }
  0x11   :  { %v2114_v29 = vld [vmem:[%s4717_s0 + $0x63] ss:$112 sm:%s322_s3]   ;;  %v213_v30 = vsel %vm188_vm2, %v2087_v24, %v208_v27  ;;  %v2138_v47 = vld [vmem:[%s4717_s0 + $0xa7] ss:$112 sm:%s422_s28]   ;;  %s310_s28 = smov 192  ;;  %s410_s2 = smov 192 }
  0x12   :  { %v2115_v33 = vld [vmem:[%s4717_s0 + $0x63] ss:$112 sm:%s325_s7]   ;;  %214 = vrot.lane.b32.xlu0 %v213_v30, %s2520_s6  ;;  %s497_s10 = smov 3  ;;  %s475_s18 = smov 12 }
  0x13   :  { %v2116_v35 = vld [vmem:[%s4717_s0 + $0x63] ss:$112 sm:%s330_s8]   ;;  %v328_v36 = vsel %vm178_vm0, %v2115_v33, %v2114_v29  ;;  %s397_s8 = smov 3  ;;  %v2139_v48 = vld [vmem:[%s4717_s0 + $0xa7] ss:$112 sm:%s425_s29]   ;;  %s372_s24 = smov 3 }
  0x14   :  { %v2102_v37 = vld [vmem:[%s4717_s0 + $0x43] ss:$112 sm:%s272_s11]   ;;  %v333_v45 = vsel %vm183_vm1, %v2116_v35, %v328_v36  ;;  %v2132_v50 = vld [vmem:[%s4717_s0 + $0x97] ss:$112 sm:%s397_s8]   ;;  %v428_v53 = vsel %vm178_vm0, %v2139_v48, %v2138_v47  ;;  %s500_s11 = smov 12  ;;  %s375_s27 = smov 12 }
  0x15   :  { %v2103_v38 = vld [vmem:[%s4717_s0 + $0x43] ss:$112 sm:%s275_s16]   ;;  %s435_s16 = smov 192  ;;  %v2133_v51 = vld [vmem:[%s4717_s0 + $0x97] ss:$112 sm:%s400_s9]   ;;  %s380_s3 = smov 48 }
  0x16   :  { %v278_v40 = vsel %vm178_vm0, %v2103_v38, %v2102_v37  ;;  %v2104_v41 = vld [vmem:[%s4717_s0 + $0x43] ss:$112 sm:%s280_s17]   ;;  %s297_s17 = smov 3  ;;  %v2140_v54 = vld [vmem:[%s4717_s0 + $0xa7] ss:$112 sm:%s430_s14]   ;;  %v403_v58 = vsel %vm178_vm0, %v2133_v51, %v2132_v50  ;;  %s505_s14 = smov 48 }
  0x17   :  { %v2117_v42 = vld [vmem:[%s4717_s0 + $0x12ab] ss:$-668 sm:%s335_s22]   ;;  %v283_v43 = vsel %vm183_vm1, %v2104_v41, %v278_v40  ;;  %s300_s22 = smov 12  ;;  %364 = vrot.lane.b32.xlu1 %v363_v49, %s2520_s6  ;;  %v433_v61 = vsel %vm183_vm1, %v2140_v54, %v428_v53  ;;  %s385_s4 = smov 192 }
  0x18   :  { %v2105_v44 = vld [vmem:[%s4717_s0 + $0x128b] ss:$-668 sm:%s285_s23]   ;;  %s305_s23 = smov 48  ;;  %v338_v52 = vsel %vm188_vm2, %v2117_v42, %v333_v45  ;;  %s510_s5 = smov 192 }
  0x19   :  { %v288_v46 = vsel %vm188_vm2, %v2105_v44, %v283_v43  ;;  %v2134_v55 = vld [vmem:[%s4717_s0 + $0x97] ss:$112 sm:%s405_s15]   ;;  %v2141_v56 = vld [vmem:[%s4717_s0 - $0x265] ss:$112 sm:%s435_s16]   ;;  %s575_s19 = smov 12  ;;  %s547_s25 = smov 3 }
  0x1a   :  { %289 = vrot.lane.b32.xlu2 %v288_v46, %s2520_s6  ;;  %v2108_v57 = vld [vmem:[%s4717_s0 + $0x53] ss:$112 sm:%s297_s17]   ;;  %339 = vrot.lane.b32.xlu0 %v338_v52, %s2520_s6  ;;  %s472_s17 = smov 3  ;;  %v408_v2 = vsel %vm183_vm1, %v2134_v55, %v403_v58  ;;  %v438_v6 = vsel %vm188_vm2, %v2141_v56, %v433_v61  ;;  %s550_s26 = smov 12 }
  0x1b   :  { %v2109_v59 = vld [vmem:[%s4717_s0 + $0x53] ss:$112 sm:%s300_s22]   ;;  %v2135_v0 = vld [vmem:[%s4717_s0 - $0x275] ss:$112 sm:%s410_s2]   ;;  %s580_s22 = smov 48  ;;  %s447_s2 = smov 3 }
  0x1c   :  { %v2110_v60 = vld [vmem:[%s4717_s0 + $0x53] ss:$112 sm:%s305_s23]   ;;  %v303_v62 = vsel %vm178_vm0, %v2109_v59, %v2108_v57  ;;  %v2156_v4 = vld [vmem:[%s4717_s0 + $0xd7] ss:$112 sm:%s497_s10]   ;;  %s480_s23 = smov 48  ;;  %v413_v10 = vsel %vm188_vm2, %v2135_v0, %v408_v2  ;;  %s455_s7 = smov 48 }
  0x1d   :  { %v2111_v63 = vld [vmem:[%s4717_s0 + $0x129b] ss:$-668 sm:%s310_s28]   ;;  %v308_v1 = vsel %vm183_vm1, %v2110_v60, %v303_v62  ;;  %s555_s12 = smov 48  ;;  %s460_s13 = smov 192 }
  0x1e   :  { %v313_v3 = vsel %vm188_vm2, %v2111_v63, %v308_v1  ;;  %v2157_v5 = vld [vmem:[%s4717_s0 + $0xd7] ss:$112 sm:%s500_s11]   ;;  %s485_s11 = smov 192  ;;  %v2129_v18 = vld [vmem:[%s4717_s0 - $0x285] ss:$112 sm:%s385_s4]   ;;  %s655_s30 = smov 48 }
  0x1f   :  { %v2158_v7 = vld [vmem:[%s4717_s0 + $0xd7] ss:$112 sm:%s505_s14]   ;;  %v503_v11 = vsel %vm178_vm0, %v2157_v5, %v2156_v4  ;;  %439 = vrot.lane.b32.xlu1 %v438_v6, %s2520_s6  ;;  %s585_s14 = smov 192  ;;  %s630_s21 = smov 48 }
  0x20   :  { %v2150_v8 = vld [vmem:[%s4717_s0 + $0xc7] ss:$112 sm:%s472_s17]   ;;  %v508_v19 = vsel %vm183_vm1, %v2158_v7, %v503_v11  ;;  %v2159_v20 = vld [vmem:[%s4717_s0 - $0x235] ss:$112 sm:%s510_s5]   ;;  %s625_s5 = smov 12  ;;  %s635_s29 = smov 192 }
  0x21   :  { %v2151_v9 = vld [vmem:[%s4717_s0 + $0xc7] ss:$112 sm:%s475_s18]   ;;  %s572_s18 = smov 3  ;;  %v2153_v22 = vld [vmem:[%s4717_s0 - $0x245] ss:$112 sm:%s485_s11]   ;;  %v513_v27 = vsel %vm188_vm2, %v2159_v20, %v508_v19  ;;  %s697_s8 = smov 3 }
  0x22   :  { %314 = vrot.lane.b32.xlu2 %v313_v3, %s2520_s6  ;;  %v2152_v12 = vld [vmem:[%s4717_s0 + $0xc7] ss:$112 sm:%s480_s23]   ;;  %v478_v15 = vsel %vm178_vm0, %v2151_v9, %v2150_v8  ;;  %414 = vrot.lane.b32.xlu0 %v413_v10, %s2520_s6  ;;  %s730_s11 = smov 48  ;;  %s597_s17 = smov 3 }
  0x23   :  { %v2126_v13 = vld [vmem:[%s4717_s0 + $0x87] ss:$112 sm:%s372_s24]   ;;  %v483_v24 = vsel %vm183_vm1, %v2152_v12, %v478_v15  ;;  %v2174_v25 = vld [vmem:[%s4717_s0 + $0x10b] ss:$112 sm:%s572_s18]   ;;  %s535_s18 = smov 192  ;;  %s660_s24 = smov 192 }
  0x24   :  { %v2127_v14 = vld [vmem:[%s4717_s0 + $0x87] ss:$112 sm:%s375_s27]   ;;  %v2175_v26 = vld [vmem:[%s4717_s0 + $0x10b] ss:$112 sm:%s575_s19]   ;;  %v488_v31 = vsel %vm188_vm2, %v2153_v22, %v483_v24  ;;  %s560_s19 = smov 192  ;;  %s650_s27 = smov 12 }
  0x25   :  { %v378_v16 = vsel %vm178_vm0, %v2127_v14, %v2126_v13  ;;  %v2128_v17 = vld [vmem:[%s4717_s0 + $0x87] ss:$112 sm:%s380_s3]   ;;  %s450_s3 = smov 12  ;;  %v2168_v29 = vld [vmem:[%s4717_s0 + $0xfb] ss:$112 sm:%s547_s25]   ;;  %v578_v32 = vsel %vm178_vm0, %v2175_v26, %v2174_v25  ;;  %s605_s23 = smov 48 }
  0x26   :  { %v383_v21 = vsel %vm183_vm1, %v2128_v17, %v378_v16  ;;  %v2176_v28 = vld [vmem:[%s4717_s0 + $0xd3b] ss:$-668 sm:%s580_s22]   ;;  %s680_s22 = smov 48  ;;  %s862_s15 = smov 12 }
  0x27   :  { %v388_v23 = vsel %vm188_vm2, %v2129_v18, %v383_v21  ;;  %v2169_v30 = vld [vmem:[%s4717_s0 + $0xfb] ss:$112 sm:%s550_s26]   ;;  %v2144_v33 = vld [vmem:[%s4717_s0 + $0xb7] ss:$112 sm:%s447_s2]   ;;  %s647_s26 = smov 3  ;;  %v583_v41 = vsel %vm183_vm1, %v2176_v28, %v578_v32  ;;  %s622_s2 = smov 3 }
  0x28   :  { %v2145_v34 = vld [vmem:[%s4717_s0 + $0xb7] ss:$112 sm:%s450_s3]   ;;  %514 = vrot.lane.b32.xlu1 %v513_v27, %s2520_s6  ;;  %v553_v37 = vsel %vm178_vm0, %v2169_v30, %v2168_v29  ;;  %s722_s3 = smov 3  ;;  %s747_s16 = smov 3 }
  0x29   :  { %v453_v35 = vsel %vm178_vm0, %v2145_v34, %v2144_v33  ;;  %v2146_v36 = vld [vmem:[%s4717_s0 + $0xb7] ss:$112 sm:%s455_s7]   ;;  %v2147_v40 = vld [vmem:[%s4717_s0 - $0x255] ss:$112 sm:%s460_s13]   ;;  %s522_s7 = smov 3  ;;  %s530_s13 = smov 48 }
  0x2a   :  { %389 = vrot.lane.b32.xlu2 %v388_v23, %s2520_s6  ;;  %v2170_v38 = vld [vmem:[%s4717_s0 + $0xd2b] ss:$-668 sm:%s555_s12]   ;;  %v458_v39 = vsel %vm183_vm1, %v2146_v36, %v453_v35  ;;  %489 = vrot.lane.b32.xlu0 %v488_v31, %s2520_s6  ;;  %s525_s12 = smov 12  ;;  %s755_s20 = smov 48 }
  0x2b   :  { %v2177_v42 = vld [vmem:[%s4717_s0 - $0x201] ss:$112 sm:%s585_s14]   ;;  %v463_v43 = vsel %vm188_vm2, %v2147_v40, %v458_v39  ;;  %v558_v45 = vsel %vm183_vm1, %v2170_v38, %v553_v37  ;;  %v2192_v46 = vld [vmem:[%s4717_s0 + $0x13b] ss:$112 sm:%s647_s26]   ;;  %s859_s14 = smov 3  ;;  %s867_s4 = smov 48 }
  0x2c   :  { %v2171_v44 = vld [vmem:[%s4717_s0 - $0x211] ss:$112 sm:%s560_s19]   ;;  %v2193_v47 = vld [vmem:[%s4717_s0 + $0x13b] ss:$112 sm:%s650_s27]   ;;  %v588_v48 = vsel %vm188_vm2, %v2177_v42, %v583_v41  ;;  %s675_s19 = smov 12  ;;  %s793_s27 = smov 48 }
  0x2d   :  { %v2194_v49 = vld [vmem:[%s4717_s0 + $0xd6b] ss:$-668 sm:%s655_s30]   ;;  %v563_v53 = vsel %vm188_vm2, %v2171_v44, %v558_v45  ;;  %v653_v54 = vsel %vm178_vm0, %v2193_v47, %v2192_v46  ;;  %s705_s30 = smov 48  ;;  %v2227_v33 = vld [vmem:[%s4717_s0 + $0x2] ss:$112 sm:%s793_s27]   ;;  %s760_s10 = smov 192 }
  0x2e   :  { %v2186_v50 = vld [vmem:[%s4717_s0 + $0x12b] ss:$112 sm:%s622_s2]   ;;  %v2165_v58 = vld [vmem:[%s4717_s0 - $0x221] ss:$112 sm:%s535_s18]   ;;  %v658_v62 = vsel %vm183_vm1, %v2194_v49, %v653_v54  ;;  %s600_s18 = smov 12  ;;  %s812_s25 = smov 12 }
  0x2f   :  { %v2187_v51 = vld [vmem:[%s4717_s0 + $0x12b] ss:$112 sm:%s625_s5]   ;;  %v2195_v63 = vld [vmem:[%s4717_s0 - $0x1d1] ss:$112 sm:%s660_s24]   ;;  %s610_s24 = smov 192  ;;  %s817_s2 = smov 48 }
  0x30   :  { %v2162_v52 = vld [vmem:[%s4717_s0 + $0xeb] ss:$112 sm:%s522_s7]   ;;  %589 = vrot.lane.b32.xlu1 %v588_v48, %s2520_s6  ;;  %v628_v59 = vsel %vm178_vm0, %v2187_v51, %v2186_v50  ;;  %s725_s7 = smov 12  ;;  %v663_v6 = vsel %vm188_vm2, %v2195_v63, %v658_v62  ;;  %s912_s9 = smov 12 }
  0x31   :  { %v2163_v55 = vld [vmem:[%s4717_s0 + $0xeb] ss:$112 sm:%s525_s12]   ;;  %s700_s12 = smov 12  ;;  %v2189_v1 = vld [vmem:[%s4717_s0 - $0x1e1] ss:$112 sm:%s635_s29]   ;;  %s735_s29 = smov 192 }
  0x32   :  { %464 = vrot.lane.b32.xlu2 %v463_v43, %s2520_s6  ;;  %v2164_v56 = vld [vmem:[%s4717_s0 + $0xd1b] ss:$-668 sm:%s530_s13]   ;;  %v528_v57 = vsel %vm178_vm0, %v2163_v55, %v2162_v52  ;;  %564 = vrot.lane.b32.xlu0 %v563_v53, %s2520_s6  ;;  %s788_s13 = smov 12  ;;  %s922_s28 = smov 192 }
  0x33   :  { %v2188_v60 = vld [vmem:[%s4717_s0 + $0xd5b] ss:$-668 sm:%s630_s21]   ;;  %v533_v61 = vsel %vm183_vm1, %v2164_v56, %v528_v57  ;;  %v2226_v24 = vld [vmem:[%s4717_s0 + $0x2] ss:$112 sm:%s788_s13]   ;;  %s897_s27 = smov 192  ;;  %s959_s5 = smov 3 }
  0x34   :  { %v538_v0 = vsel %vm188_vm2, %v2165_v58, %v533_v61  ;;  %v2210_v2 = vld [vmem:[%s4717_s0 + $0x17f] ss:$112 sm:%s722_s3]   ;;  %v633_v3 = vsel %vm183_vm1, %v2188_v60, %v628_v59  ;;  %v2180_v9 = vld [vmem:[%s4717_s0 + $0x11b] ss:$112 sm:%s597_s17]   ;;  %s685_s3 = smov 192  ;;  %s1034_s17 = smov 3 }
  0x35   :  { %v2211_v4 = vld [vmem:[%s4717_s0 + $0x17f] ss:$112 sm:%s725_s7]   ;;  %v2181_v10 = vld [vmem:[%s4717_s0 + $0x11b] ss:$112 sm:%s600_s18]   ;;  %v638_v11 = vsel %vm188_vm2, %v2189_v1, %v633_v3  ;;  %s710_s7 = smov 192  ;;  %s672_s18 = smov 3 }
  0x36   :  { %v2204_v5 = vld [vmem:[%s4717_s0 + $0x15f] ss:$112 sm:%s697_s8]   ;;  %v728_v12 = vsel %vm178_vm0, %v2211_v4, %v2210_v2  ;;  %v603_v13 = vsel %vm178_vm0, %v2181_v10, %v2180_v9  ;;  %v2198_v26 = vld [vmem:[%s4717_s0 + $0x14b] ss:$112 sm:%s672_s18]   ;;  %s772_s8 = smov 3  ;;  %s984_s18 = smov 3 }
  0x37   :  { %v2212_v7 = vld [vmem:[%s4717_s0 - $0x31] ss:$112 sm:%s730_s11]   ;;  %v2199_v27 = vld [vmem:[%s4717_s0 + $0x14b] ss:$112 sm:%s675_s19]   ;;  %s775_s11 = smov 12  ;;  %s750_s19 = smov 12 }
  0x38   :  { %v2205_v8 = vld [vmem:[%s4717_s0 + $0x15f] ss:$112 sm:%s700_s12]   ;;  %664 = vrot.lane.b32.xlu1 %v663_v6, %s2520_s6  ;;  %s785_s12 = smov 3  ;;  %v733_v20 = vsel %vm183_vm1, %v2212_v7, %v728_v12  ;;  %v678_v29 = vsel %vm178_vm0, %v2199_v27, %v2198_v26  ;;  %s1072_s21 = smov 192 }
  0x39   :  { %v2182_v14 = vld [vmem:[%s4717_s0 + $0xd4b] ss:$-668 sm:%s605_s23]   ;;  %v703_v18 = vsel %vm178_vm0, %v2205_v8, %v2204_v5  ;;  %v2225_v23 = vld [vmem:[%s4717_s0 + $0x2] ss:$112 sm:%s785_s12]   ;;  %s2521_s23 = smov 64   ;;  %s1234_s12 = smov 3 }
  0x3a   :  { %539 = vrot.lane.b32.xlu2 %v538_v0, %s2520_s6  ;;  %v2183_v15 = vld [vmem:[%s4717_s0 - $0x1f1] ss:$112 sm:%s610_s24]   ;;  %v608_v16 = vsel %vm183_vm1, %v2182_v14, %v603_v13  ;;  %639 = vrot.lane.b32.xlu0 %v638_v11, %s2520_s6  ;;  %v791_v32 = vsel %vm178_vm0, %v2226_v24, %v2225_v23  ;;  %s809_s24 = smov 3  ;;  %s1112_s13 = smov 12 }
  0x3b   :  { %v2213_v17 = vld [vmem:[%s4717_s0 - $0x31] ss:$112 sm:%s735_s29]   ;;  %v613_v22 = vsel %vm188_vm2, %v2183_v15, %v608_v16  ;;  %v796_v37 = vsel %vm183_vm1, %v2227_v33, %v791_v32  ;;  %v2242_v41 = vld [vmem:[%s4717_s0 + $0x32] ss:$112 sm:%s859_s14]   ;;  %s834_s29 = smov 3  ;;  %s997_s14 = smov 192 }
  0x3c   :  { %v2206_v19 = vld [vmem:[%s4717_s0 - $0x51] ss:$112 sm:%s705_s30]   ;;  %v738_v28 = vsel %vm188_vm2, %v2213_v17, %v733_v20  ;;  %v2243_v42 = vld [vmem:[%s4717_s0 + $0x32] ss:$112 sm:%s862_s15]   ;;  %s837_s30 = smov 12  ;;  %s1084_s15 = smov 3 }
  0x3d   :  { %v2207_v21 = vld [vmem:[%s4717_s0 - $0x51] ss:$112 sm:%s710_s7]   ;;  %v708_v25 = vsel %vm183_vm1, %v2206_v19, %v703_v18  ;;  %s798_s7 = smov 192  ;;  %v2236_v48 = vld [vmem:[%s4717_s0 + $0x22] ss:$112 sm:%s834_s29]   ;;  %v865_v51 = vsel %vm178_vm0, %v2243_v42, %v2242_v41  ;;  %s1242_s26 = smov 48 }
  0x3e   :  { %v2200_v30 = vld [vmem:[%s4717_s0 + $0xd7b] ss:$-668 sm:%s680_s22]   ;;  %v713_v31 = vsel %vm188_vm2, %v2207_v21, %v708_v25  ;;  %v2228_v36 = vld [vmem:[%s4717_s0 + $0x124a] ss:$-668 sm:%s798_s7]   ;;  %s934_s22 = smov 3  ;;  %s1042_s7 = smov 48 }
  0x3f   :  { %v683_v34 = vsel %vm183_vm1, %v2200_v30, %v678_v29  ;;  %v2201_v35 = vld [vmem:[%s4717_s0 - $0x1c1] ss:$112 sm:%s685_s3]   ;;  %v801_v46 = vsel %vm188_vm2, %v2228_v36, %v796_v37  ;;  %v2237_v49 = vld [vmem:[%s4717_s0 + $0x22] ss:$112 sm:%s837_s30]   ;;  %s937_s30 = smov 12  ;;  %s1009_s3 = smov 3 }
  0x40   :  { %739 = vrot.lane.b32.xlu1 %v738_v28, %s2520_s6  ;;  %v2222_v38 = vld [vmem:[%s4717_s0 + $0x1bf] ss:$112 sm:%s772_s8]   ;;  %v688_v40 = vsel %vm188_vm2, %v2201_v35, %v683_v34  ;;  %v840_v56 = vsel %vm178_vm0, %v2237_v49, %v2236_v48  ;;  %s909_s8 = smov 3  ;;  %s1521_s29 = smov 3 }
  0x41   :  { %v2223_v39 = vld [vmem:[%s4717_s0 + $0x1bf] ss:$112 sm:%s775_s11]   ;;  %s872_s11 = smov 192  ;;  %v2244_v52 = vld [vmem:[%s4717_s0 + $0x32] ss:$112 sm:%s867_s4]   ;;  %s887_s4 = smov 12 }
  0x42   :  { %614 = vrot.lane.b32.xlu2 %v613_v22, %s2520_s6  ;;  %714 = vrot.lane.b32.xlu0 %v713_v31, %s2520_s6  ;;  %v2216_v43 = vld [vmem:[%s4717_s0 + $0x19f] ss:$112 sm:%s747_s16]   ;;  %s842_s16 = smov 48  ;;  %v778_v50 = vsel %vm178_vm0, %v2223_v39, %v2222_v38  ;;  %v870_v58 = vsel %vm183_vm1, %v2244_v52, %v865_v51 }
  0x43   :  { %v2217_v44 = vld [vmem:[%s4717_s0 + $0x19f] ss:$112 sm:%s750_s19]   ;;  %s847_s19 = smov 192  ;;  %v2245_v55 = vld [vmem:[%s4717_s0 + $0x127a] ss:$-668 sm:%s872_s11]   ;;  %s892_s11 = smov 48 }
  0x44   :  { %v2218_v45 = vld [vmem:[%s4717_s0 - $0x11] ss:$112 sm:%s755_s20]   ;;  %v753_v47 = vsel %vm178_vm0, %v2217_v44, %v2216_v43  ;;  %v2238_v57 = vld [vmem:[%s4717_s0 + $0x22] ss:$112 sm:%s842_s16]   ;;  %s942_s16 = smov 48  ;;  %v875_v4 = vsel %vm188_vm2, %v2245_v55, %v870_v58  ;;  %s967_s20 = smov 48 }
  0x45   :  { %v758_v53 = vsel %vm183_vm1, %v2218_v45, %v753_v47  ;;  %v2219_v54 = vld [vmem:[%s4717_s0 - $0x11] ss:$112 sm:%s760_s10]   ;;  %v2239_v59 = vld [vmem:[%s4717_s0 + $0x126a] ss:$-668 sm:%s847_s19]   ;;  %v845_v0 = vsel %vm183_vm1, %v2238_v57, %v840_v56  ;;  %s822_s19 = smov 192  ;;  %s1012_s10 = smov 12 }
  0x46   :  { %v763_v60 = vsel %vm188_vm2, %v2219_v54, %v758_v53  ;;  %v2260_v61 = vld [vmem:[%s4717_s0 + $0x62] ss:$112 sm:%s934_s22]   ;;  %v850_v7 = vsel %vm188_vm2, %v2239_v59, %v845_v0  ;;  %v2278_v19 = vld [vmem:[%s4717_s0 + $0x96] ss:$112 sm:%s1009_s3]   ;;  %s1247_s22 = smov 192  ;;  %s1671_s3 = smov 3 }
  0x47   :  { %v2230_v62 = vld [vmem:[%s4717_s0 + $0x12] ss:$112 sm:%s809_s24]   ;;  %v2279_v22 = vld [vmem:[%s4717_s0 + $0x96] ss:$112 sm:%s1012_s10]   ;;  %s1017_s24 = smov 48  ;;  %s1067_s10 = smov 48 }
  0x48   :  { %802 = vrot.lane.b32.xlu1 %v801_v46, %s2521_s23  ;;  %v2231_v63 = vld [vmem:[%s4717_s0 + $0x12] ss:$112 sm:%s812_s25]   ;;  %s917_s25 = smov 48  ;;  %v1015_v29 = vsel %vm178_vm0, %v2279_v22, %v2278_v19 }
  0x49   :  { %v2261_v1 = vld [vmem:[%s4717_s0 + $0x62] ss:$112 sm:%s937_s30]   ;;  %v815_v2 = vsel %vm178_vm0, %v2231_v63, %v2230_v62  ;;  %v2272_v26 = vld [vmem:[%s4717_s0 + $0x86] ss:$112 sm:%s984_s18]   ;;  %s1087_s18 = smov 12  ;;  %s1059_s30 = smov 3 }
  0x4a   :  { %689 = vrot.lane.b32.xlu2 %v688_v40, %s2520_s6  ;;  %779 = vrot.lane.b32.xlu0 %v778_v50, %s2520_s6  ;;  %v2232_v3 = vld [vmem:[%s4717_s0 + $0x12] ss:$112 sm:%s817_s2]   ;;  %v940_v8 = vsel %vm178_vm0, %v2261_v1, %v2260_v61  ;;  %s884_s2 = smov 3 }
  0x4b   :  { %v2254_v5 = vld [vmem:[%s4717_s0 + $0x52] ss:$112 sm:%s909_s8]   ;;  %v820_v10 = vsel %vm183_vm1, %v2232_v3, %v815_v2  ;;  %v2280_v30 = vld [vmem:[%s4717_s0 + $0x96] ss:$112 sm:%s1017_s24]   ;;  %s1047_s24 = smov 192  ;;  %s1212_s8 = smov 12 }
  0x4c   :  { %v2255_v6 = vld [vmem:[%s4717_s0 + $0x52] ss:$112 sm:%s912_s9]   ;;  %v2266_v36 = vld [vmem:[%s4717_s0 + $0x76] ss:$112 sm:%s959_s5]   ;;  %v1020_v37 = vsel %vm183_vm1, %v2280_v30, %v1015_v29  ;;  %s1092_s5 = smov 48  ;;  %s972_s9 = smov 192 }
  0x4d   :  { %v2262_v9 = vld [vmem:[%s4717_s0 + $0x62] ss:$112 sm:%s942_s16]   ;;  %v915_v13 = vsel %vm178_vm0, %v2255_v6, %v2254_v5  ;;  %v2011_v40 = vld [vmem:[%s4717_s0 + $0x40] ss:$4 sm:$0xff]   ;;  %s1237_s16 = smov 12 }
  0x4e   :  { %v2233_v11 = vld [vmem:[%s4717_s0 + $0x125a] ss:$-668 sm:%s822_s19]   ;;  %v945_v15 = vsel %vm183_vm1, %v2262_v9, %v940_v8  ;;  %s987_s19 = smov 12  ;;  %2012 = vst.msk [vmem:[%s4718_s1 + $0x80] ss:$8 sm:$0xf] %vm3_vm3, %v2011_v40  }
  0x4f   :  { %v2256_v14 = vld [vmem:[%s4717_s0 + $0x52] ss:$112 sm:%s917_s25]   ;;  %v825_v17 = vsel %vm188_vm2, %v2233_v11, %v820_v10  ;;  %v2273_v27 = vld [vmem:[%s4717_s0 + $0x86] ss:$112 sm:%s987_s19]   ;;  %s1117_s25 = smov 48  ;;  %s1434_s19 = smov 192 }
  0x50   :  { %876 = vrot.lane.b32.xlu1 %v875_v4, %s2521_s23  ;;  %v2257_v16 = vld [vmem:[%s4717_s0 + $0x129a] ss:$-668 sm:%s922_s28]   ;;  %v920_v21 = vsel %vm183_vm1, %v2256_v14, %v915_v13  ;;  %s1022_s28 = smov 192  ;;  %v990_v34 = vsel %vm178_vm0, %v2273_v27, %v2272_v26  ;;  %2013 = vst.msk [vmem:[%s4718_s1 + $0x80] ss:$8 sm:$0xf0] %vm3_vm3, %v2011_v40  }
  0x51   :  { %v2248_v18 = vld [vmem:[%s4717_s0 + $0x42] ss:$112 sm:%s884_s2]   ;;  %v925_v28 = vsel %vm188_vm2, %v2257_v16, %v920_v21  ;;  %v2281_v33 = vld [vmem:[%s4717_s0 - $0x276] ss:$112 sm:%s1022_s28]   ;;  %s1062_s2 = smov 12  ;;  %s1222_s28 = smov 192 }
  0x52   :  { %764 = vrot.lane.b32.xlu2 %v763_v60, %s2520_s6  ;;  %s947_s6 = smov 192  ;;  %851 = vrot.lane.b32.xlu0 %v850_v7, %s2521_s23  ;;  %v2249_v20 = vld [vmem:[%s4717_s0 + $0x42] ss:$112 sm:%s887_s4]   ;;  %s992_s4 = smov 48  ;;  %v1025_v47 = vsel %vm188_vm2, %v2281_v33, %v1020_v37 }
  0x53   :  { %v2263_v12 = vld [vmem:[%s4717_s0 + $0x12aa] ss:$-668 sm:%s947_s6]   ;;  %v890_v23 = vsel %vm178_vm0, %v2249_v20, %v2248_v18  ;;  %v2008_v62 = vld [vmem:[%s4717_s0 + $0x20] ss:$4 sm:$0xff]   ;;  %s1334_s6 = smov 3 }
  0x54   :  { %v2250_v24 = vld [vmem:[%s4717_s0 + $0x42] ss:$112 sm:%s892_s11]   ;;  %v950_v25 = vsel %vm188_vm2, %v2263_v12, %v945_v15  ;;  %s962_s11 = smov 12  ;;  %v2274_v35 = vld [vmem:[%s4717_s0 + $0x86] ss:$112 sm:%s992_s4]   ;;  %s1259_s4 = smov 3 }
  0x55   :  { %v895_v31 = vsel %vm183_vm1, %v2250_v24, %v890_v23  ;;  %v2251_v32 = vld [vmem:[%s4717_s0 + $0x128a] ss:$-668 sm:%s897_s27]   ;;  %v995_v43 = vsel %vm183_vm1, %v2274_v35, %v990_v34  ;;  %s1159_s27 = smov 3  ;;  %2009 = vst.msk [vmem:[%s4718_s1 + $0x40] ss:$8 sm:$0xf] %vm3_vm3, %v2008_v62  }
  0x56   :  { %v900_v38 = vsel %vm188_vm2, %v2251_v32, %v895_v31  ;;  %v2267_v39 = vld [vmem:[%s4717_s0 + $0x76] ss:$112 sm:%s962_s11]   ;;  %v2275_v41 = vld [vmem:[%s4717_s0 - $0x286] ss:$112 sm:%s997_s14]   ;;  %s1217_s11 = smov 48  ;;  %s1122_s14 = smov 192 }
  0x57   :  { %v2296_v42 = vld [vmem:[%s4717_s0 + $0xc6] ss:$112 sm:%s1084_s15]   ;;  %v965_v45 = vsel %vm178_vm0, %v2267_v39, %v2266_v36  ;;  %v1000_v50 = vsel %vm188_vm2, %v2275_v41, %v995_v43  ;;  %v2269_v54 = vld [vmem:[%s4717_s0 - $0x296] ss:$112 sm:%s972_s9]   ;;  %s1446_s9 = smov 3  ;;  %s1949_s15 = smov 12 }
  0x58   :  { %951 = vrot.lane.b32.xlu1 %v950_v25, %s2521_s23  ;;  %v2297_v44 = vld [vmem:[%s4717_s0 + $0xc6] ss:$112 sm:%s1087_s18]   ;;  %s1037_s18 = smov 12  ;;  %2010 = vst.msk [vmem:[%s4718_s1 + $0x40] ss:$8 sm:$0xf0] %vm3_vm3, %v2008_v62  }
  0x59   :  { %v2268_v46 = vld [vmem:[%s4717_s0 + $0x76] ss:$112 sm:%s967_s20]   ;;  %v1090_v51 = vsel %vm178_vm0, %v2297_v44, %v2296_v42  ;;  %s1097_s20 = smov 192  ;;  %v2293_v63 = vld [vmem:[%s4717_s0 - $0x256] ss:$112 sm:%s1072_s21]   ;;  %s1187_s21 = smov 12 }
  0x5a   :  { %826 = vrot.lane.b32.xlu2 %v825_v17, %s2521_s23  ;;  %926 = vrot.lane.b32.xlu0 %v925_v28, %s2521_s23  ;;  %v2290_v48 = vld [vmem:[%s4717_s0 + $0xb6] ss:$112 sm:%s1059_s30]   ;;  %v970_v53 = vsel %vm183_vm1, %v2268_v46, %v965_v45  ;;  %s1162_s30 = smov 12 }
  0x5b   :  { %v2291_v49 = vld [vmem:[%s4717_s0 + $0xb6] ss:$112 sm:%s1062_s2]   ;;  %v2299_v60 = vld [vmem:[%s4717_s0 - $0x246] ss:$112 sm:%s1097_s20]   ;;  %v975_v61 = vsel %vm188_vm2, %v2269_v54, %v970_v53  ;;  %s1142_s20 = smov 48  ;;  %s1309_s2 = smov 3 }
  0x5c   :  { %v2298_v52 = vld [vmem:[%s4717_s0 + $0xc6] ss:$112 sm:%s1092_s5]   ;;  %v1065_v56 = vsel %vm178_vm0, %v2291_v49, %v2290_v48  ;;  %v2314_v0 = vld [vmem:[%s4717_s0 + $0xfa] ss:$112 sm:%s1159_s27]   ;;  %s1172_s27 = smov 192  ;;  %s1147_s5 = smov 192 }
  0x5d   :  { %v2292_v55 = vld [vmem:[%s4717_s0 + $0xb6] ss:$112 sm:%s1067_s10]   ;;  %v1095_v59 = vsel %vm183_vm1, %v2298_v52, %v1090_v51  ;;  %s1167_s10 = smov 48  ;;  %v2315_v2 = vld [vmem:[%s4717_s0 + $0xfa] ss:$112 sm:%s1162_s30]   ;;  %s1359_s30 = smov 3 }
  0x5e   :  { %v2284_v57 = vld [vmem:[%s4717_s0 + $0xa6] ss:$112 sm:%s1034_s17]   ;;  %s1134_s17 = smov 3  ;;  %v1070_v1 = vsel %vm183_vm1, %v2292_v55, %v1065_v56  ;;  %v1100_v5 = vsel %vm188_vm2, %v2299_v60, %v1095_v59  ;;  %v1165_v10 = vsel %vm178_vm0, %v2315_v2, %v2314_v0  ;;  %v2287_v13 = vld [vmem:[%s4717_s0 - $0x266] ss:$112 sm:%s1047_s24]   ;;  %s1546_s24 = smov 3 }
  0x5f   :  { %v2285_v58 = vld [vmem:[%s4717_s0 + $0xa6] ss:$112 sm:%s1037_s18]   ;;  %s1137_s18 = smov 12  ;;  %v2308_v7 = vld [vmem:[%s4717_s0 + $0xea] ss:$112 sm:%s1134_s17]   ;;  %v1075_v9 = vsel %vm188_vm2, %v2293_v63, %v1070_v1  ;;  %s1387_s17 = smov 12 }
  0x60   :  { %1026 = vrot.lane.b32.xlu1 %v1025_v47, %s2521_s23  ;;  %v1040_v3 = vsel %vm178_vm0, %v2285_v58, %v2284_v57  ;;  %v2286_v4 = vld [vmem:[%s4717_s0 + $0xa6] ss:$112 sm:%s1042_s7]   ;;  %s1109_s7 = smov 3  ;;  %v2_v15 = vld [vmem:[%s4717_s0] ss:$4 sm:$0xff]  }
  0x61   :  { %v2316_v6 = vld [vmem:[%s4717_s0 + $0xd2a] ss:$-668 sm:%s1167_s10]   ;;  %v1045_v12 = vsel %vm183_vm1, %v2286_v4, %v1040_v3  ;;  %4 = vst.msk [vmem:[%s4718_s1] ss:$8 sm:$0xf] %vm3_vm3, %v2_v15   ;;  %s1262_s10 = smov 12 }
  0x62   :  { %901 = vrot.lane.b32.xlu2 %v900_v38, %s2521_s23  ;;  %1001 = vrot.lane.b32.xlu0 %v1000_v50, %s2521_s23  ;;  %v2309_v8 = vld [vmem:[%s4717_s0 + $0xea] ss:$112 sm:%s1137_s18]   ;;  %v1170_v18 = vsel %vm183_vm1, %v2316_v6, %v1165_v10  ;;  %v1050_v19 = vsel %vm188_vm2, %v2287_v13, %v1045_v12  ;;  %s1297_s18 = smov 192 }
  0x63   :  { %v2310_v11 = vld [vmem:[%s4717_s0 + $0xd1a] ss:$-668 sm:%s1142_s20]   ;;  %v1140_v16 = vsel %vm178_vm0, %v2309_v8, %v2308_v7  ;;  %5 = vst.msk [vmem:[%s4718_s1] ss:$8 sm:$0xf0] %vm3_vm3, %v2_v15   ;;  %s1184_s20 = smov 3 }
  0x64   :  { %v2317_v14 = vld [vmem:[%s4717_s0 - $0x212] ss:$112 sm:%s1172_s27]   ;;  %v2302_v17 = vld [vmem:[%s4717_s0 + $0xd6] ss:$112 sm:%s1109_s7]   ;;  %s1209_s7 = smov 3  ;;  %v1145_v23 = vsel %vm183_vm1, %v2310_v11, %v1140_v16  ;;  %s1267_s27 = smov 48 }
  0x65   :  { %v2303_v20 = vld [vmem:[%s4717_s0 + $0xd6] ss:$112 sm:%s1112_s13]   ;;  %v2311_v21 = vld [vmem:[%s4717_s0 - $0x222] ss:$112 sm:%s1147_s5]   ;;  %v1175_v27 = vsel %vm188_vm2, %v2317_v14, %v1170_v18  ;;  %s1312_s5 = smov 12  ;;  %s1484_s13 = smov 192 }
  0x66   :  { %v2332_v22 = vld [vmem:[%s4717_s0 + $0x12a] ss:$112 sm:%s1234_s12]   ;;  %v1115_v25 = vsel %vm178_vm0, %v2303_v20, %v2302_v17  ;;  %v2304_v26 = vld [vmem:[%s4717_s0 + $0xd6] ss:$112 sm:%s1117_s25]   ;;  %v1150_v31 = vsel %vm188_vm2, %v2311_v21, %v1145_v23  ;;  %s1292_s25 = smov 48  ;;  %s2522_s12 = smov 32  }
  0x67   :  { %v2333_v24 = vld [vmem:[%s4717_s0 + $0x12a] ss:$112 sm:%s1237_s16]   ;;  %v1120_v35 = vsel %vm183_vm1, %v2304_v26, %v1115_v25  ;;  %v2017_v37 = vld [vmem:[%s4717_s0 + $0x80] ss:$4 sm:$0xff]   ;;  %s1397_s16 = smov 3 }
  0x68   :  { %1101 = vrot.lane.b32.xlu1 %v1100_v5, %s2521_s23  ;;  %v2334_v28 = vld [vmem:[%s4717_s0 + $0xd5a] ss:$-668 sm:%s1242_s26]   ;;  %v1240_v32 = vsel %vm178_vm0, %v2333_v24, %v2332_v22  ;;  %2018 = vst.msk [vmem:[%s4718_s1 + $0x21] ss:$8 sm:$0xf] %vm3_vm3, %v2017_v37   ;;  %s1421_s26 = smov 3 }
  0x69   :  { %v2326_v29 = vld [vmem:[%s4717_s0 + $0x11a] ss:$112 sm:%s1209_s7]   ;;  %v1245_v41 = vsel %vm183_vm1, %v2334_v28, %v1240_v32  ;;  %v2335_v42 = vld [vmem:[%s4717_s0 - $0x1e2] ss:$112 sm:%s1247_s22]   ;;  %s1384_s7 = smov 3  ;;  %s1579_s22 = smov 48 }
  0x6a   :  { %976 = vrot.lane.b32.xlu2 %v975_v61, %s2521_s23  ;;  %1076 = vrot.lane.b32.xlu0 %v1075_v9, %s2521_s23  ;;  %v2327_v30 = vld [vmem:[%s4717_s0 + $0x11a] ss:$112 sm:%s1212_s8]   ;;  %v1250_v50 = vsel %vm188_vm2, %v2335_v42, %v1245_v41  ;;  %s1362_s8 = smov 12 }
  0x6b   :  { %v2328_v33 = vld [vmem:[%s4717_s0 + $0xd4a] ss:$-668 sm:%s1217_s11]   ;;  %v1215_v38 = vsel %vm178_vm0, %v2327_v30, %v2326_v29  ;;  %s1192_s11 = smov 48  ;;  %2019 = vst.msk [vmem:[%s4718_s1 + $0x21] ss:$8 sm:$0xf0] %vm3_vm3, %v2017_v37  }
  0x6c   :  { %v2305_v36 = vld [vmem:[%s4717_s0 - $0x236] ss:$112 sm:%s1122_s14]   ;;  %s1317_s14 = smov 48  ;;  %v2329_v44 = vld [vmem:[%s4717_s0 - $0x1f2] ss:$112 sm:%s1222_s28]   ;;  %v1220_v46 = vsel %vm183_vm1, %v2328_v33, %v1215_v38  ;;  %s1197_s28 = smov 192 }
  0x6d   :  { %v2320_v39 = vld [vmem:[%s4717_s0 + $0x10a] ss:$112 sm:%s1184_s20]   ;;  %v1125_v43 = vsel %vm188_vm2, %v2305_v36, %v1120_v35  ;;  %v2350_v45 = vld [vmem:[%s4717_s0 + $0x15e] ss:$112 sm:%s1309_s2]   ;;  %s1284_s20 = smov 3  ;;  %v1225_v54 = vsel %vm188_vm2, %v2329_v44, %v1220_v46  ;;  %s1754_s2 = smov 48 }
  0x6e   :  { %v2321_v40 = vld [vmem:[%s4717_s0 + $0x10a] ss:$112 sm:%s1187_s21]   ;;  %s1287_s21 = smov 12  ;;  %v2351_v47 = vld [vmem:[%s4717_s0 + $0x15e] ss:$112 sm:%s1312_s5]   ;;  %s1571_s5 = smov 3 }
  0x6f   :  { %v1190_v48 = vsel %vm178_vm0, %v2321_v40, %v2320_v39  ;;  %v2322_v49 = vld [vmem:[%s4717_s0 + $0xd3a] ss:$-668 sm:%s1192_s11]   ;;  %v1315_v55 = vsel %vm178_vm0, %v2351_v47, %v2350_v45  ;;  %s1322_s11 = smov 192  ;;  %v2014_v60 = vld [vmem:[%s4717_s0 + $0x60] ss:$4 sm:$0xff]  }
  0x70   :  { %1176 = vrot.lane.b32.xlu1 %v1175_v27, %s2521_s23  ;;  %v2352_v51 = vld [vmem:[%s4717_s0 - $0x52] ss:$112 sm:%s1317_s14]   ;;  %v1195_v58 = vsel %vm183_vm1, %v2322_v49, %v1190_v48  ;;  %2016 = vst.msk [vmem:[%s4718_s1 - $0x1f] ss:$8 sm:$0xf0] %vm3_vm3, %v2014_v60   ;;  %s1272_s14 = smov 192 }
  0x71   :  { %v2344_v52 = vld [vmem:[%s4717_s0 + $0x14a] ss:$112 sm:%s1284_s20]   ;;  %v2323_v59 = vld [vmem:[%s4717_s0 - $0x202] ss:$112 sm:%s1197_s28]   ;;  %v1320_v1 = vsel %vm183_vm1, %v2352_v51, %v1315_v55  ;;  %s1372_s28 = smov 192  ;;  %s1479_s20 = smov 48 }
  0x72   :  { %1051 = vrot.lane.b32.xlu2 %v1050_v19, %s2521_s23  ;;  %1151 = vrot.lane.b32.xlu0 %v1150_v31, %s2521_s23  ;;  %v2345_v53 = vld [vmem:[%s4717_s0 + $0x14a] ss:$112 sm:%s1287_s21]   ;;  %v1200_v3 = vsel %vm188_vm2, %v2323_v59, %v1195_v58  ;;  %s1400_s21 = smov 12 }
  0x73   :  { %v2346_v56 = vld [vmem:[%s4717_s0 + $0xd7a] ss:$-668 sm:%s1292_s25]   ;;  %v1290_v62 = vsel %vm178_vm0, %v2345_v53, %v2344_v52  ;;  %2015 = vst.msk [vmem:[%s4718_s1 + $0xc0] ss:$8 sm:$0xf] %vm3_vm3, %v2014_v60   ;;  %s1337_s25 = smov 12 }
  0x74   :  { %v3225_v34 = vpop.permute.xlu2 %289   ;;  %v2338_v61 = vld [vmem:[%s4717_s0 + $0x13a] ss:$112 sm:%s1259_s4]   ;;  %v2353_v2 = vld [vmem:[%s4717_s0 - $0x52] ss:$112 sm:%s1322_s11]   ;;  %v1295_v5 = vsel %vm183_vm1, %v2346_v56, %v1290_v62  ;;  %s1367_s11 = smov 48  ;;  %s1347_s4 = smov 192 }
  0x75   :  { %2107 = vst.msk [vmem:[%s4718_s1 + $0x81] sm:$0x80] %vm192_vm4, %v3225_v34   ;;  %v2339_v63 = vld [vmem:[%s4717_s0 + $0x13a] ss:$112 sm:%s1262_s10]   ;;  %v1325_v9 = vsel %vm188_vm2, %v2353_v2, %v1320_v1  ;;  %v2020_v12 = vld [vmem:[%s4717_s0 + $0xa0] ss:$4 sm:$0xff]  }
  0x76   :  { %v2347_v6 = vld [vmem:[%s4717_s0 - $0x1c2] ss:$112 sm:%s1297_s18]   ;;  %v1265_v7 = vsel %vm178_vm0, %v2339_v63, %v2338_v61  ;;  %s1449_s10 = smov 12  ;;  %2022 = vst.msk [vmem:[%s4718_s1 + $0x61] ss:$8 sm:$0xf0] %vm3_vm3, %v2020_v12  }
  0x77   :  { %v2340_v8 = vld [vmem:[%s4717_s0 + $0xd6a] ss:$-668 sm:%s1267_s27]   ;;  %v1300_v13 = vsel %vm188_vm2, %v2347_v6, %v1295_v5  ;;  %2021 = vst.msk [vmem:[%s4718_s1 + $0x61] ss:$8 sm:$0xf] %vm3_vm3, %v2020_v12   ;;  %s1424_s27 = smov 12 }
  0x78   :  { %1251 = vrot.lane.b32.xlu1 %v1250_v50, %s2521_s23  ;;  %v3318_v0 = vpop.permute.xlu1 %239   ;;  %v2362_v10 = vld [vmem:[%s4717_s0 + $0x19e] ss:$112 sm:%s1359_s30]   ;;  %v1270_v16 = vsel %vm183_vm1, %v2340_v8, %v1265_v7  ;;  %s1454_s30 = smov 48  ;;  %v2023_v33 = vld [vmem:[%s4717_s0 + $0xc0] ss:$4 sm:$0xff]   ;;  %s1496_s18 = smov 3 }
  0x79   :  { %2095 = vst.msk [vmem:[%s4718_s1 + $0x41] sm:$0x80] %vm192_vm4, %v3318_v0   ;;  %v2363_v11 = vld [vmem:[%s4717_s0 + $0x19e] ss:$112 sm:%s1362_s8]   ;;  %s1459_s8 = smov 192 }
  0x7a   :  { %1126 = vrot.lane.b32.xlu2 %v1125_v43, %s2521_s23  ;;  %1226 = vrot.lane.b32.xlu0 %v1225_v54, %s2521_s23  ;;  %v2364_v14 = vld [vmem:[%s4717_s0 - $0x12] ss:$112 sm:%s1367_s11]   ;;  %v1365_v21 = vsel %vm178_vm0, %v2363_v11, %v2362_v10  ;;  %s1474_s11 = smov 12 }
  0x7b   :  { %v2341_v17 = vld [vmem:[%s4717_s0 - $0x1d2] ss:$112 sm:%s1272_s14]   ;;  %v2382_v26 = vld [vmem:[%s4717_s0 + $0x21] ss:$112 sm:%s1446_s9]   ;;  %v1370_v28 = vsel %vm183_vm1, %v2364_v14, %v1365_v21  ;;  %s1429_s9 = smov 48  ;;  %s1724_s14 = smov 12 }
  0x7c   :  { %v3291_v57 = vpop.permute.xlu2 %314   ;;  %v3334_v4 = vpop.permute.xlu0 %190   ;;  %v2368_v18 = vld [vmem:[%s4717_s0 + $0x1be] ss:$112 sm:%s1384_s7]   ;;  %v1275_v25 = vsel %vm188_vm2, %v2341_v17, %v1270_v16  ;;  %v2383_v29 = vld [vmem:[%s4717_s0 + $0x21] ss:$112 sm:%s1449_s10]   ;;  %s1405_s7 = smov 48  ;;  %s1879_s10 = smov 48 }
  0x7d   :  { %2113 = vst.msk [vmem:[%s4718_s1 + $0xa1] sm:$0x80] %vm192_vm4, %v3291_v57   ;;  %v2369_v19 = vld [vmem:[%s4717_s0 + $0x1be] ss:$112 sm:%s1387_s17]   ;;  %s1342_s17 = smov 48  ;;  %v1452_v38 = vsel %vm178_vm0, %v2383_v29, %v2382_v26 }
  0x7e   :  { %2083 = vst.msk [vmem:[%s4718_s1 + $0x1] sm:$0x80] %vm192_vm4, %v3334_v4   ;;  %v2356_v20 = vld [vmem:[%s4717_s0 + $0x17e] ss:$112 sm:%s1334_s6]   ;;  %v1390_v32 = vsel %vm178_vm0, %v2369_v19, %v2368_v18  ;;  %v3540_v10 = vld [vmem:[%s4717_s0 + $0xe0] ss:$4 sm:$0xff]  }
  0x7f   :  { %v2357_v22 = vld [vmem:[%s4717_s0 + $0x17e] ss:$112 sm:%s1337_s25]   ;;  %v2376_v35 = vld [vmem:[%s4717_s0 + $0x11] ss:$112 sm:%s1421_s26]   ;;  %s1410_s25 = smov 192  ;;  %s1604_s26 = smov 48 }
  0x80   :  { %1326 = vrot.lane.b32.xlu1 %v1325_v9, %s2521_s23  ;;  %v3394_v23 = vpop.permute.xlu1 %264   ;;  %v2365_v24 = vld [vmem:[%s4717_s0 - $0x12] ss:$112 sm:%s1372_s28]   ;;  %v1340_v30 = vsel %vm178_vm0, %v2357_v22, %v2356_v20  ;;  %2025 = vst.msk [vmem:[%s4718_s1 + $0xa1] ss:$8 sm:$0xf0] %vm3_vm3, %v2023_v33   ;;  %s1504_s28 = smov 48 }
  0x81   :  { %2101 = vst.msk [vmem:[%s4718_s1 + $0x61] sm:$0x80] %vm192_vm4, %v3394_v23   ;;  %v2358_v31 = vld [vmem:[%s4717_s0 - $0x32] ss:$112 sm:%s1342_s17]   ;;  %v1375_v37 = vsel %vm188_vm2, %v2365_v24, %v1370_v28  ;;  %s1596_s17 = smov 3  ;;  %s1634_s6 = smov 192 }
  0x82   :  { %1201 = vrot.lane.b32.xlu2 %v1200_v3, %s2521_s23  ;;  %1301 = vrot.lane.b32.xlu0 %v1300_v13, %s2521_s23  ;;  %v2377_v36 = vld [vmem:[%s4717_s0 + $0x11] ss:$112 sm:%s1424_s27]   ;;  %v1345_v41 = vsel %vm183_vm1, %v2358_v31, %v1340_v30 }
  0x83   :  { %v2384_v39 = vld [vmem:[%s4717_s0 + $0x21] ss:$112 sm:%s1454_s30]   ;;  %v2359_v42 = vld [vmem:[%s4717_s0 - $0x32] ss:$112 sm:%s1347_s4]   ;;  %s1524_s30 = smov 12  ;;  %v1427_v45 = vsel %vm178_vm0, %v2377_v36, %v2376_v35  ;;  %s1471_s4 = smov 3 }
  0x84   :  { %v3364_v15 = vpop.permute.xlu2 %389   ;;  %v3412_v27 = vpop.permute.xlu0 %214   ;;  %v2385_v43 = vld [vmem:[%s4717_s0 + $0x1269] ss:$-668 sm:%s1459_s8]   ;;  %v1457_v48 = vsel %vm183_vm1, %v2384_v39, %v1452_v38  ;;  %v1350_v50 = vsel %vm188_vm2, %v2359_v42, %v1345_v41  ;;  %2024 = vst.msk [vmem:[%s4718_s1 + $0xa1] ss:$8 sm:$0xf] %vm3_vm3, %v2023_v33   ;;  %s1509_s8 = smov 192 }
  0x85   :  { %2131 = vst.msk [vmem:[%s4718_s1 + $0x2a] sm:$0xc0] %vm192_vm4, %v3364_v15   ;;  %v2378_v44 = vld [vmem:[%s4717_s0 + $0x11] ss:$112 sm:%s1429_s9]   ;;  %v1462_v59 = vsel %vm188_vm2, %v2385_v43, %v1457_v48  ;;  %v3603_v35 = vld [vmem:[%s4717_s0 + $0x160] ss:$4 sm:$0xff]  }
  0x86   :  { %2089 = vst.msk [vmem:[%s4718_s1 + $0x21] sm:$0x80] %vm192_vm4, %v3412_v27   ;;  %v2371_v46 = vld [vmem:[%s4717_s0 + $0x1] ss:$112 sm:%s1397_s16]   ;;  %v1432_v54 = vsel %vm183_vm1, %v2378_v44, %v1427_v45  ;;  %s1674_s9 = smov 12  ;;  %s1679_s16 = smov 48 }
  0x87   :  { %v2379_v49 = vld [vmem:[%s4717_s0 + $0x1259] ss:$-668 sm:%s1434_s19]   ;;  %s1499_s19 = smov 12  ;;  %2028 = vst.msk [vmem:[%s4718_s1 + $0x2] ss:$8 sm:$0xf0] %vm3_vm3, %v3540_v10  }
  0x88   :  { %1391 = vrot.lane.b32.xlu1 %v1390_v32, %s2521_s23  ;;  %v2372_v51 = vld [vmem:[%s4717_s0 + $0x1] ss:$112 sm:%s1400_s21]   ;;  %s1529_s21 = smov 48  ;;  %v1437_v62 = vsel %vm188_vm2, %v2379_v49, %v1432_v54  ;;  %2039 = vst.msk [vmem:[%s4718_s1 + $0x23] ss:$8 sm:$0xf] %vm3_vm3, %v3603_v35  }
  0x89   :  { %v3470_v47 = vpop.permute.xlu1 %364   ;;  %v2400_v52 = vld [vmem:[%s4717_s0 + $0x51] ss:$112 sm:%s1521_s29]   ;;  %v1403_v56 = vsel %vm178_vm0, %v2372_v51, %v2371_v46  ;;  %v2418_v17 = vld [vmem:[%s4717_s0 + $0x85] ss:$112 sm:%s1596_s17]   ;;  %s1759_s17 = smov 192  ;;  %s1824_s29 = smov 12 }
  0x8a   :  { %1276 = vrot.lane.b32.xlu2 %v1275_v25, %s2521_s23  ;;  %1376 = vrot.lane.b32.xlu0 %v1375_v37, %s2521_s23  ;;  %2125 = vst.msk [vmem:[%s4718_s1 + $0xa] sm:$0xc0] %vm192_vm4, %v3470_v47  }
  0x8b   :  { %v2401_v55 = vld [vmem:[%s4717_s0 + $0x51] ss:$112 sm:%s1524_s30]   ;;  %v2420_v25 = vld [vmem:[%s4717_s0 + $0x85] ss:$112 sm:%s1604_s26]   ;;  %s1749_s26 = smov 12  ;;  %s1799_s30 = smov 12 }
  0x8c   :  { %v3443_v40 = vpop.permute.xlu2 %464   ;;  %v3492_v53 = vpop.permute.xlu0 %339   ;;  %v2373_v58 = vld [vmem:[%s4717_s0 + $0x1] ss:$112 sm:%s1405_s7]   ;;  %v1527_v63 = vsel %vm178_vm0, %v2401_v55, %v2400_v52  ;;  %s1574_s7 = smov 12  ;;  %v2412_v26 = vld [vmem:[%s4717_s0 + $0x75] ss:$112 sm:%s1571_s5]   ;;  %s1654_s5 = smov 48 }
  0x8d   :  { %2149 = vst.msk [vmem:[%s4718_s1 + $0x8a] sm:$0xc0] %vm192_vm4, %v3443_v40   ;;  %v2394_v60 = vld [vmem:[%s4717_s0 + $0x41] ss:$112 sm:%s1496_s18]   ;;  %v1408_v3 = vsel %vm183_vm1, %v2373_v58, %v1403_v56  ;;  %s1599_s18 = smov 12 }
  0x8e   :  { %2119 = vst.msk [vmem:[%s4718_s1 + $0xc1] sm:$0x80] %vm192_vm4, %v3492_v53   ;;  %v2395_v61 = vld [vmem:[%s4717_s0 + $0x41] ss:$112 sm:%s1499_s19]   ;;  %s1704_s19 = smov 48 }
  0x8f   :  { %v2402_v1 = vld [vmem:[%s4717_s0 + $0x51] ss:$112 sm:%s1529_s21]   ;;  %v1502_v8 = vsel %vm178_vm0, %v2395_v61, %v2394_v60  ;;  %v2419_v20 = vld [vmem:[%s4717_s0 + $0x85] ss:$112 sm:%s1599_s18]   ;;  %s1609_s18 = smov 192  ;;  %s1804_s21 = smov 48 }
  0x90   :  { %v2374_v5 = vld [vmem:[%s4717_s0 + $0x1249] ss:$-668 sm:%s1410_s25]   ;;  %1463 = vrot.lane.b32.xlu1 %v1462_v59, %s2522_s12  ;;  %v1532_v12 = vsel %vm183_vm1, %v2402_v1, %v1527_v63  ;;  %v1602_v30 = vsel %vm178_vm0, %v2419_v20, %v2418_v17  ;;  %s1584_s25 = smov 192  ;;  %v3677_v1 = vld [vmem:[%s4717_s0 + $0x1c0] ss:$4 sm:$0xff]  }
  0x91   :  { %v2396_v7 = vld [vmem:[%s4717_s0 + $0x41] ss:$112 sm:%s1504_s28]   ;;  %v3543_v11 = vpop.permute.xlu1 %439   ;;  %v1413_v14 = vsel %vm188_vm2, %v2374_v5, %v1408_v3  ;;  %v2413_v28 = vld [vmem:[%s4717_s0 + $0x75] ss:$112 sm:%s1574_s7]   ;;  %v1607_v42 = vsel %vm183_vm1, %v2420_v25, %v1602_v30  ;;  %s1559_s28 = smov 192  ;;  %s1696_s7 = smov 3 }
  0x92   :  { %1351 = vrot.lane.b32.xlu2 %v1350_v50, %s2521_s23  ;;  %s1534_s23 = smov 192  ;;  %v2388_v9 = vld [vmem:[%s4717_s0 + $0x31] ss:$112 sm:%s1471_s4]   ;;  %1438 = vrot.lane.b32.xlu0 %v1437_v62, %s2522_s12  ;;  %v1507_v19 = vsel %vm183_vm1, %v2396_v7, %v1502_v8  ;;  %v1577_v37 = vsel %vm178_vm0, %v2413_v28, %v2412_v26  ;;  %s1684_s4 = smov 192 }
  0x93   :  { %v2403_v6 = vld [vmem:[%s4717_s0 + $0x1299] ss:$-668 sm:%s1534_s23]   ;;  %2143 = vst.msk [vmem:[%s4718_s1 + $0x6a] sm:$0xc0] %vm192_vm4, %v3543_v11   ;;  %s1549_s23 = smov 12 }
  0x94   :  { %v3520_v2 = vpop.permute.xlu2 %539   ;;  %v2397_v13 = vld [vmem:[%s4717_s0 + $0x1289] ss:$-668 sm:%s1509_s8]   ;;  %v3566_v18 = vpop.permute.xlu0 %414   ;;  %v1537_v24 = vsel %vm188_vm2, %v2403_v6, %v1532_v12  ;;  %2049 = vst.msk [vmem:[%s4718_s1 + $0x4] ss:$8 sm:$0xf0] %vm3_vm3, %v3677_v1   ;;  %s1859_s8 = smov 192 }
  0x95   :  { %v2389_v16 = vld [vmem:[%s4717_s0 + $0x31] ss:$112 sm:%s1474_s11]   ;;  %2137 = vst.msk [vmem:[%s4718_s1 + $0x4a] sm:$0xc0] %vm192_vm4, %v3566_v18   ;;  %v1512_v29 = vsel %vm188_vm2, %v2397_v13, %v1507_v19  ;;  %s1621_s11 = smov 3 }
  0x96   :  { %v1477_v21 = vsel %vm178_vm0, %v2389_v16, %v2388_v9  ;;  %v2390_v22 = vld [vmem:[%s4717_s0 + $0x31] ss:$112 sm:%s1479_s20]   ;;  %v2421_v36 = vld [vmem:[%s4717_s0 - $0x287] ss:$112 sm:%s1609_s18]   ;;  %s1871_s18 = smov 3 }
  0x97   :  { %v1482_v32 = vsel %vm183_vm1, %v2390_v22, %v1477_v21  ;;  %v2391_v33 = vld [vmem:[%s4717_s0 + $0x1279] ss:$-668 sm:%s1484_s13]   ;;  %s1554_s13 = smov 48  ;;  %v1612_v54 = vsel %vm188_vm2, %v2421_v36, %v1607_v42  ;;  %v3698_v8 = vld [vmem:[%s4717_s0 + $0x240] ss:$4 sm:$0xff]  }
  0x98   :  { %1538 = vrot.lane.b32.xlu1 %v1537_v24, %s2522_s12  ;;  %v2414_v38 = vld [vmem:[%s4717_s0 + $0x75] ss:$112 sm:%s1579_s22]   ;;  %v1487_v44 = vsel %vm188_vm2, %v2391_v33, %v1482_v32  ;;  %s1646_s22 = smov 3  ;;  %2060 = vst.msk [vmem:[%s4718_s1 + $0x25] ss:$8 sm:$0xf] %vm3_vm3, %v3698_v8  }
  0x99   :  { %v2406_v39 = vld [vmem:[%s4717_s0 + $0x61] ss:$112 sm:%s1546_s24]   ;;  %v2415_v43 = vld [vmem:[%s4717_s0 - $0x297] ss:$112 sm:%s1584_s25]   ;;  %s1649_s24 = smov 12  ;;  %v1582_v49 = vsel %vm183_vm1, %v2414_v38, %v1577_v37  ;;  %s1809_s25 = smov 192 }
  0x9a   :  { %1414 = vrot.lane.b32.xlu2 %v1413_v14, %s2522_s12  ;;  %1513 = vrot.lane.b32.xlu0 %v1512_v29, %s2522_s12  ;;  %v3622_v41 = vpop.permute.xlu1 %514   ;;  %v2407_v45 = vld [vmem:[%s4717_s0 + $0x61] ss:$112 sm:%s1549_s23]   ;;  %v1587_v59 = vsel %vm188_vm2, %v2415_v43, %v1582_v49  ;;  %s1979_s23 = smov 48 }
  0x9b   :  { %2161 = vst.msk [vmem:[%s4718_s1 + $0xca] sm:$0xc0] %vm192_vm4, %v3622_v41   ;;  %v2436_v46 = vld [vmem:[%s4717_s0 + $0xb5] ss:$112 sm:%s1671_s3]   ;;  %v1552_v51 = vsel %vm178_vm0, %v2407_v45, %v2406_v39  ;;  %s3748_s3 = smov 48 }
  0x9c   :  { %v3594_v31 = vpop.permute.xlu2 %614   ;;  %v3640_v48 = vpop.permute.xlu0 %489   ;;  %v2437_v50 = vld [vmem:[%s4717_s0 + $0xb5] ss:$112 sm:%s1674_s9]   ;;  %v2408_v52 = vld [vmem:[%s4717_s0 + $0x61] ss:$112 sm:%s1554_s13]   ;;  %s1659_s13 = smov 192  ;;  %s1946_s9 = smov 3 }
  0x9d   :  { %2155 = vst.msk [vmem:[%s4718_s1 + $0xaa] sm:$0xc0] %vm192_vm4, %v3640_v48   ;;  %v2438_v55 = vld [vmem:[%s4717_s0 + $0xb5] ss:$112 sm:%s1679_s16]   ;;  %v1677_v60 = vsel %vm178_vm0, %v2437_v50, %v2436_v46  ;;  %v1557_v62 = vsel %vm183_vm1, %v2408_v52, %v1552_v51  ;;  %s1624_s16 = smov 12 }
  0x9e   :  { %v2430_v56 = vld [vmem:[%s4717_s0 + $0xa5] ss:$112 sm:%s1646_s22]   ;;  %v2439_v3 = vld [vmem:[%s4717_s0 - $0x257] ss:$112 sm:%s1684_s4]   ;;  %s1746_s22 = smov 3  ;;  %v1682_v12 = vsel %vm183_vm1, %v2438_v55, %v1677_v60  ;;  %s1896_s4 = smov 3 }
  0x9f   :  { %v2431_v58 = vld [vmem:[%s4717_s0 + $0xa5] ss:$112 sm:%s1649_s24]   ;;  %v2433_v16 = vld [vmem:[%s4717_s0 - $0x267] ss:$112 sm:%s1659_s13]   ;;  %s1721_s13 = smov 3  ;;  %v1687_v25 = vsel %vm188_vm2, %v2439_v3, %v1682_v12  ;;  %s1734_s24 = smov 192 }
  0xa0   :  { %v2409_v63 = vld [vmem:[%s4717_s0 + $0x12a9] ss:$-668 sm:%s1559_s28]   ;;  %1613 = vrot.lane.b32.xlu1 %v1612_v54, %s2522_s12  ;;  %v1652_v6 = vsel %vm178_vm0, %v2431_v58, %v2430_v56  ;;  %s1629_s28 = smov 48  ;;  %v2068_v38 = vld [vmem:[%s4717_s0 + $0x2a0] ss:$4 sm:$0xff]  }
  0xa1   :  { %v2432_v5 = vld [vmem:[%s4717_s0 + $0xa5] ss:$112 sm:%s1654_s5]   ;;  %v1562_v13 = vsel %vm188_vm2, %v2409_v63, %v1557_v62  ;;  %v2454_v17 = vld [vmem:[%s4717_s0 + $0xe9] ss:$112 sm:%s1746_s22]   ;;  %s1729_s22 = smov 48  ;;  %s1899_s5 = smov 12 }
  0xa2   :  { %1488 = vrot.lane.b32.xlu2 %v1487_v44, %s2522_s12  ;;  %v2424_v7 = vld [vmem:[%s4717_s0 + $0x95] ss:$112 sm:%s1621_s11]   ;;  %1588 = vrot.lane.b32.xlu0 %v1587_v59, %s2522_s12  ;;  %v3701_v9 = vpop.permute.xlu1 %589   ;;  %v1657_v20 = vsel %vm183_vm1, %v2432_v5, %v1652_v6 }
  0xa3   :  { %v2425_v14 = vld [vmem:[%s4717_s0 + $0x95] ss:$112 sm:%s1624_s16]   ;;  %v2455_v21 = vld [vmem:[%s4717_s0 + $0xe9] ss:$112 sm:%s1749_s26]   ;;  %v1662_v30 = vsel %vm188_vm2, %v2433_v16, %v1657_v20  ;;  %s3765_s16 = smov 192  ;;  %s1796_s26 = smov 3 }
  0xa4   :  { %v3668_v61 = vpop.permute.xlu2 %689   ;;  %v3719_v19 = vpop.permute.xlu0 %564   ;;  %v1627_v22 = vsel %vm178_vm0, %v2425_v14, %v2424_v7  ;;  %v2426_v24 = vld [vmem:[%s4717_s0 + $0x95] ss:$112 sm:%s1629_s28]   ;;  %s1821_s28 = smov 3  ;;  %v1752_v32 = vsel %vm178_vm0, %v2455_v21, %v2454_v17  ;;  %v2427_v37 = vld [vmem:[%s4717_s0 - $0x277] ss:$112 sm:%s1634_s6]   ;;  %s1954_s6 = smov 48 }
  0xa5   :  { %v2456_v26 = vld [vmem:[%s4717_s0 + $0xd19] ss:$-668 sm:%s1754_s2]   ;;  %v1632_v36 = vsel %vm183_vm1, %v2426_v24, %v1627_v22  ;;  %2070 = vst.msk [vmem:[%s4718_s1 + $0x6] ss:$8 sm:$0xf0] %vm3_vm3, %v2068_v38   ;;  %s1774_s2 = smov 12 }
  0xa6   :  { %v2448_v28 = vld [vmem:[%s4717_s0 + $0xd5] ss:$112 sm:%s1721_s13]   ;;  %v2457_v39 = vld [vmem:[%s4717_s0 - $0x223] ss:$112 sm:%s1759_s17]   ;;  %s1699_s13 = smov 12  ;;  %v1757_v44 = vsel %vm183_vm1, %v2456_v26, %v1752_v32  ;;  %v1637_v46 = vsel %vm188_vm2, %v2427_v37, %v1632_v36 }
  0xa7   :  { %v2449_v29 = vld [vmem:[%s4717_s0 + $0xd5] ss:$112 sm:%s1724_s14]   ;;  %2088 = vst.msk [vmem:[%s4718_s1 + $0x20] sm:$0x7f] %vm192_vm4, %v3412_v27   ;;  %v1762_v56 = vsel %vm188_vm2, %v2457_v39, %v1757_v44  ;;  %v2056_v17 = vld [vmem:[%s4717_s0 + $0x220] ss:$4 sm:$0xff]  }
  0xa8   :  { %1688 = vrot.lane.b32.xlu1 %v1687_v25, %s2522_s12  ;;  %v1727_v42 = vsel %vm178_vm0, %v2449_v29, %v2448_v28  ;;  %v2450_v43 = vld [vmem:[%s4717_s0 + $0xd5] ss:$112 sm:%s1729_s22]   ;;  %2027 = vst.msk [vmem:[%s4718_s1 + $0x2] ss:$8 sm:$0xf] %vm3_vm3, %v3540_v10   ;;  %s1884_s22 = smov 192 }
  0xa9   :  { %v2451_v45 = vld [vmem:[%s4717_s0 - $0x237] ss:$112 sm:%s1734_s24]   ;;  %v2442_v10 = vld [vmem:[%s4717_s0 + $0xc5] ss:$112 sm:%s1696_s7]   ;;  %v1732_v52 = vsel %vm183_vm1, %v2450_v43, %v1727_v42  ;;  %s1779_s7 = smov 48 }
  0xaa   :  { %1563 = vrot.lane.b32.xlu2 %v1562_v13, %s2522_s12  ;;  %1663 = vrot.lane.b32.xlu0 %v1662_v30, %s2522_s12  ;;  %v3773_v27 = vpop.permute.xlu1 %664   ;;  %v2472_v49 = vld [vmem:[%s4717_s0 + $0x119] ss:$112 sm:%s1821_s28]   ;;  %v1737_v62 = vsel %vm188_vm2, %v2451_v45, %v1732_v52  ;;  %s1849_s28 = smov 12 }
  0xab   :  { %v2473_v50 = vld [vmem:[%s4717_s0 + $0x119] ss:$112 sm:%s1824_s29]   ;;  %2040 = vst.msk [vmem:[%s4718_s1 + $0x23] ss:$8 sm:$0xf0] %vm3_vm3, %v3603_v35   ;;  %s1904_s29 = smov 48 }
  0xac   :  { %v3742_v33 = vpop.permute.xlu2 %764   ;;  %v2443_v35 = vld [vmem:[%s4717_s0 + $0xc5] ss:$112 sm:%s1699_s13]   ;;  %v3802_v51 = vpop.permute.xlu0 %639   ;;  %2048 = vst.msk [vmem:[%s4718_s1 + $0x4] ss:$8 sm:$0xf] %vm3_vm3, %v3677_v1   ;;  %s1709_s13 = smov 192  ;;  %v1827_v63 = vsel %vm178_vm0, %v2473_v50, %v2472_v49 }
  0xad   :  { %v1702_v54 = vsel %vm178_vm0, %v2443_v35, %v2442_v10  ;;  %v2444_v55 = vld [vmem:[%s4717_s0 + $0xc5] ss:$112 sm:%s1704_s19]   ;;  %v2466_v59 = vld [vmem:[%s4717_s0 + $0x109] ss:$112 sm:%s1796_s26]   ;;  %s1874_s19 = smov 12  ;;  %s1846_s26 = smov 3 }
  0xae   :  { %v2474_v58 = vld [vmem:[%s4717_s0 + $0xd49] ss:$-668 sm:%s3748_s3]   ;;  %2061 = vst.msk [vmem:[%s4718_s1 + $0x25] ss:$8 sm:$0xf0] %vm3_vm3, %v3698_v8   ;;  %s1909_s3 = smov 192 }
  0xaf   :  { %v2467_v60 = vld [vmem:[%s4717_s0 + $0x109] ss:$112 sm:%s1799_s30]   ;;  %2069 = vst.msk [vmem:[%s4718_s1 + $0x6] ss:$8 sm:$0xf] %vm3_vm3, %v2068_v38   ;;  %v1832_v13 = vsel %vm183_vm1, %v2474_v58, %v1827_v63 }
  0xb0   :  { %2130 = vst.msk [vmem:[%s4718_s1 + $0x29] sm:$0x3f] %vm192_vm4, %v3364_v15   ;;  %v1707_v15 = vsel %vm183_vm1, %v2444_v55, %v1702_v54  ;;  %v2445_v3 = vld [vmem:[%s4717_s0 - $0x247] ss:$112 sm:%s1709_s13]   ;;  %1763 = vrot.lane.b32.xlu1 %v1762_v56, %s2522_s12  ;;  %v1802_v6 = vsel %vm178_vm0, %v2467_v60, %v2466_v59  ;;  %s1784_s13 = smov 192 }
  0xb1   :  { %v2475_v5 = vld [vmem:[%s4717_s0 - $0x1f3] ss:$112 sm:%s3765_s16]   ;;  %v2035_v8 = vld [vmem:[%s4717_s0 + $0x140] ss:$4 sm:$0xff]   ;;  %2172 = vst.msk [vmem:[%s4718_s1 + $0x32] sm:$0x1f] %vm192_vm4, %v3719_v19   ;;  %v1712_v16 = vsel %vm188_vm2, %v2445_v3, %v1707_v15 }
  0xb2   :  { %1638 = vrot.lane.b32.xlu2 %v1637_v46, %s2522_s12  ;;  %v2468_v7 = vld [vmem:[%s4717_s0 + $0xd39] ss:$-668 sm:%s1804_s21]   ;;  %1738 = vrot.lane.b32.xlu0 %v1737_v62, %s2522_s12  ;;  %v3867_v12 = vpop.permute.xlu1 %739   ;;  %v1837_v24 = vsel %vm188_vm2, %v2475_v5, %v1832_v13  ;;  %s1854_s16 = smov 48  ;;  %s1921_s21 = smov 3 }
  0xb3   :  { %v2469_v14 = vld [vmem:[%s4717_s0 - $0x203] ss:$112 sm:%s1809_s25]   ;;  %2173 = vst.msk [vmem:[%s4718_s1 + $0x33] sm:$0xe0] %vm192_vm4, %v3719_v19   ;;  %v1807_v21 = vsel %vm183_vm1, %v2468_v7, %v1802_v6  ;;  %v2041_v46 = vld [vmem:[%s4717_s0 + $0x180] ss:$4 sm:$0xff]  }
  0xb4   :  { %v827_v1 = vpop.permute.xlu2 %826   ;;  %v2490_v19 = vld [vmem:[%s4717_s0 + $0x149] ss:$112 sm:%s1896_s4]   ;;  %v715_v20 = vpop.permute.xlu0 %714   ;;  %2037 = vst.msk [vmem:[%s4718_s1 - $0x1d] ss:$8 sm:$0xf0] %vm3_vm3, %v2035_v8   ;;  %v1812_v28 = vsel %vm188_vm2, %v2469_v14, %v1807_v21  ;;  %s1959_s25 = smov 192 }
  0xb5   :  { %2234 = vst.msk [vmem:[%s4718_s1 + $0x20] sm:$0x7f] %vm804_vm5, %v827_v1   ;;  %v2491_v22 = vld [vmem:[%s4717_s0 + $0x149] ss:$112 sm:%s1899_s5]   ;;  %v2053_v49 = vld [vmem:[%s4717_s0 + $0x200] ss:$4 sm:$0xff]  }
  0xb6   :  { %2235 = vst.msk [vmem:[%s4718_s1 + $0x21] sm:$0x80] %vm804_vm5, %v827_v1   ;;  %v2484_v25 = vld [vmem:[%s4717_s0 + $0x139] ss:$112 sm:%s1871_s18]   ;;  %v2062_v50 = vld [vmem:[%s4717_s0 + $0x260] ss:$4 sm:$0xff]  }
  0xb7   :  { %2209 = vst.msk [vmem:[%s4718_s1 + $0x37] sm:$0xf0] %vm192_vm4, %v715_v20   ;;  %v2485_v26 = vld [vmem:[%s4717_s0 + $0x139] ss:$112 sm:%s1874_s19]   ;;  %v2074_v10 = vld [vmem:[%s4717_s0 + $0x2e0] ss:$4 sm:$0xff]  }
  0xb8   :  { %2058 = vst.msk [vmem:[%s4718_s1 - $0x1b] ss:$8 sm:$0xf0] %vm3_vm3, %v2056_v17   ;;  %v2492_v29 = vld [vmem:[%s4717_s0 + $0xd79] ss:$-668 sm:%s1904_s29]   ;;  %1838 = vrot.lane.b32.xlu1 %v1837_v24, %s2522_s12  ;;  %v1877_v32 = vsel %vm178_vm0, %v2485_v26, %v2484_v25  ;;  %s1771_s29 = smov 3 }
  0xb9   :  { %193 = vst.msk [vmem:[%s4718_s1] sm:$0x7f] %vm192_vm4, %v3334_v4   ;;  %v1902_v4 = vsel %vm178_vm0, %v2491_v22, %v2490_v19  ;;  %v2486_v36 = vld [vmem:[%s4717_s0 + $0xd69] ss:$-668 sm:%s1879_s10]   ;;  %s1971_s18 = smov 3 }
  0xba   :  { %1713 = vrot.lane.b32.xlu2 %v1712_v16, %s2522_s12  ;;  %2036 = vst.msk [vmem:[%s4718_s1 + $0xc2] ss:$8 sm:$0xf] %vm3_vm3, %v2035_v8   ;;  %1813 = vrot.lane.b32.xlu0 %v1812_v28, %s2522_s12  ;;  %v803_v37 = vpop.permute.xlu1 %802   ;;  %v1882_v42 = vsel %vm183_vm1, %v2486_v36, %v1877_v32  ;;  %v2029_v16 = vld [vmem:[%s4717_s0 + $0x100] ss:$4 sm:$0xff]  }
  0xbb   :  { %2057 = vst.msk [vmem:[%s4718_s1 + $0xc4] ss:$8 sm:$0xf] %vm3_vm3, %v2056_v17   ;;  %v2493_v38 = vld [vmem:[%s4717_s0 - $0x1c3] ss:$112 sm:%s1909_s3]  }
  0xbc   :  { %v902_v30 = vpop.permute.xlu2 %901   ;;  %2124 = vst.msk [vmem:[%s4718_s1 + $0x9] sm:$0x3f] %vm192_vm4, %v3470_v47   ;;  %v1907_v47 = vsel %vm183_vm1, %v2492_v29, %v1902_v4  ;;  %v3955_v39 = vpop.permute.xlu0 %779   ;;  %v2487_v43 = vld [vmem:[%s4717_s0 - $0x1d3] ss:$112 sm:%s1884_s22]   ;;  %s1974_s22 = smov 12 }
  0xbd   :  { %805 = vst.msk [vmem:[%s4718_s1] sm:$0x7f] %vm804_vm5, %v803_v37   ;;  %v1912_v44 = vsel %vm188_vm2, %v2493_v38, %v1907_v47  ;;  %v1887_v45 = vsel %vm188_vm2, %v2487_v43, %v1882_v42  ;;  %v2461_v55 = vld [vmem:[%s4717_s0 + $0xf9] ss:$112 sm:%s1774_s2]   ;;  %s1984_s2 = smov 192 }
  0xbe   :  { %2229 = vst.msk [vmem:[%s4718_s1 + $0x1] sm:$0x80] %vm804_vm5, %v803_v37   ;;  %v2462_v58 = vld [vmem:[%s4717_s0 + $0xd29] ss:$-668 sm:%s1779_s7]   ;;  %v2071_v22 = vld [vmem:[%s4717_s0 + $0x2c0] ss:$4 sm:$0xff]  }
  0xbf   :  { %2166 = vst.msk [vmem:[%s4718_s1 + $0x12] sm:$0x1f] %vm192_vm4, %v3520_v2   ;;  %v2463_v60 = vld [vmem:[%s4717_s0 - $0x213] ss:$112 sm:%s1784_s13]  }
  0xc0   :  { %2167 = vst.msk [vmem:[%s4718_s1 + $0x13] sm:$0xe0] %vm192_vm4, %v3520_v2   ;;  %v2032_v2 = vld [vmem:[%s4717_s0 + $0x120] ss:$4 sm:$0xff]   ;;  %1913 = vrot.lane.b32.xlu1 %v1912_v44, %s2522_s12 }
  0xc1   :  { %2208 = vst.msk [vmem:[%s4718_s1 + $0x1b] sm:$0xf] %vm192_vm4, %v715_v20   ;;  %v2508_v63 = vld [vmem:[%s4717_s0 + $0x19d] ss:$112 sm:%s1971_s18]   ;;  %v2050_v20 = vld [vmem:[%s4717_s0 + $0x1e0] ss:$4 sm:$0xff]  }
  0xc2   :  { %2203 = vst.msk [vmem:[%s4718_s1 + $0xd3] sm:$0xe0] %vm192_vm4, %v3668_v61   ;;  %1888 = vrot.lane.b32.xlu0 %v1887_v45, %s2522_s12  ;;  %v4007_v35 = vpop.permute.xlu1 %876   ;;  %v2509_v15 = vld [vmem:[%s4717_s0 + $0x19d] ss:$112 sm:%s1974_s22]  }
  0xc3   :  { %2033 = vst.msk [vmem:[%s4718_s1 + $0x82] ss:$8 sm:$0xf] %vm3_vm3, %v2032_v2   ;;  %v1977_v3 = vsel %vm178_vm0, %v2509_v15, %v2508_v63  ;;  %v2510_v5 = vld [vmem:[%s4717_s0 - $0x13] ss:$112 sm:%s1979_s23]   ;;  %s1929_s23 = smov 48 }
  0xc4   :  { %2043 = vst.msk [vmem:[%s4718_s1 + $0x63] ss:$8 sm:$0xf0] %vm3_vm3, %v2041_v46   ;;  %v4017_v52 = vpop.permute.xlu0 %851   ;;  %v4031_v54 = vpop.permute.xlu2 %976   ;;  %v1982_v6 = vsel %vm183_vm1, %v2510_v5, %v1977_v3  ;;  %v2511_v7 = vld [vmem:[%s4717_s0 - $0x13] ss:$112 sm:%s1984_s2]   ;;  %s1934_s2 = smov 192 }
  0xc5   :  { %2054 = vst.msk [vmem:[%s4718_s1 + $0x84] ss:$8 sm:$0xf] %vm3_vm3, %v2053_v49   ;;  %v2502_v8 = vld [vmem:[%s4717_s0 + $0x17d] ss:$112 sm:%s1946_s9]  }
  0xc6   :  { %2064 = vst.msk [vmem:[%s4718_s1 + $0x65] ss:$8 sm:$0xf0] %vm3_vm3, %v2062_v50   ;;  %v2503_v13 = vld [vmem:[%s4717_s0 + $0x17d] ss:$112 sm:%s1949_s15]  }
  0xc7   :  { %2075 = vst.msk [vmem:[%s4718_s1 + $0x86] ss:$8 sm:$0xf] %vm3_vm3, %v2074_v10   ;;  %v2504_v14 = vld [vmem:[%s4717_s0 - $0x33] ss:$112 sm:%s1954_s6]  }
  0xc8   :  { %2106 = vst.msk [vmem:[%s4718_s1 + $0x80] sm:$0x7f] %vm192_vm4, %v3225_v34   ;;  %v2460_v34 = vld [vmem:[%s4717_s0 + $0xf9] ss:$112 sm:%s1771_s29]   ;;  %v2044_v45 = vld [vmem:[%s4717_s0 + $0x1a0] ss:$4 sm:$0xff]  }
  0xc9   :  { %2252 = vst.msk [vmem:[%s4718_s1 + $0x80] sm:$0x7f] %vm804_vm5, %v902_v30   ;;  %v1777_v56 = vsel %vm178_vm0, %v2461_v55, %v2460_v34  ;;  %v2505_v19 = vld [vmem:[%s4717_s0 - $0x33] ss:$112 sm:%s1959_s25]   ;;  %s1924_s25 = smov 12 }
  0xca   :  { %2253 = vst.msk [vmem:[%s4718_s1 + $0x81] sm:$0x80] %vm804_vm5, %v902_v30   ;;  %v1782_v59 = vsel %vm183_vm1, %v2462_v58, %v1777_v56  ;;  %v4064_v1 = vpop.permute.xlu1 %951   ;;  %v2479_v26 = vld [vmem:[%s4717_s0 + $0x129] ss:$112 sm:%s1849_s28]  }
  0xcb   :  { %2034 = vst.msk [vmem:[%s4718_s1 + $0x82] ss:$8 sm:$0xf0] %vm3_vm3, %v2032_v2   ;;  %v1787_v62 = vsel %vm188_vm2, %v2463_v60, %v1782_v59  ;;  %v2480_v28 = vld [vmem:[%s4717_s0 + $0xd59] ss:$-668 sm:%s1854_s16]  }
  0xcc   :  { %2042 = vst.msk [vmem:[%s4718_s1 + $0x63] ss:$8 sm:$0xf] %vm3_vm3, %v2041_v46   ;;  %1788 = vrot.lane.b32.xlu2 %v1787_v62, %s2522_s12  ;;  %v4145_v24 = vpop.permute.xlu0 %926   ;;  %v4177_v25 = vpop.permute.xlu2 %1051   ;;  %v2481_v30 = vld [vmem:[%s4717_s0 - $0x1e3] ss:$112 sm:%s1859_s8]  }
  0xcd   :  { %2055 = vst.msk [vmem:[%s4718_s1 + $0x84] ss:$8 sm:$0xf0] %vm3_vm3, %v2053_v49   ;;  %v2496_v36 = vld [vmem:[%s4717_s0 + $0x15d] ss:$112 sm:%s1921_s21]   ;;  %s1996_s21 = smov 3 }
  0xce   :  { %2063 = vst.msk [vmem:[%s4718_s1 + $0x65] ss:$8 sm:$0xf] %vm3_vm3, %v2062_v50   ;;  %v2498_v47 = vld [vmem:[%s4717_s0 - $0x53] ss:$112 sm:%s1929_s23]  }
  0xcf   :  { %2076 = vst.msk [vmem:[%s4718_s1 + $0x86] ss:$8 sm:$0xf0] %vm3_vm3, %v2074_v10   ;;  %v2499_v43 = vld [vmem:[%s4717_s0 - $0x53] ss:$112 sm:%s1934_s2]  }
  0xd0   :  { %2148 = vst.msk [vmem:[%s4718_s1 + $0x89] sm:$0x3f] %vm192_vm4, %v3443_v40   ;;  %v1987_v40 = vsel %vm188_vm2, %v2511_v7, %v1982_v6  ;;  %v2514_v2 = vld [vmem:[%s4717_s0 + $0x1bd] ss:$112 sm:%s1996_s21]   ;;  %v2065_v49 = vld [vmem:[%s4717_s0 + $0x280] ss:$4 sm:$0xff]  }
  0xd1   :  { %2190 = vst.msk [vmem:[%s4718_s1 + $0x92] sm:$0x1f] %vm192_vm4, %v3802_v51   ;;  %1988 = vrot.lane.b32.xlu1 %v1987_v40, %s2522_s12 }
  0xd2   :  { %2191 = vst.msk [vmem:[%s4718_s1 + $0x93] sm:$0xe0] %vm192_vm4, %v3802_v51   ;;  %v1952_v51 = vsel %vm178_vm0, %v2503_v13, %v2502_v8  ;;  %v4195_v4 = vpop.permute.xlu1 %1026  }
  0xd3   :  { %2220 = vst.msk [vmem:[%s4718_s1 + $0x9b] sm:$0xf] %vm192_vm4, %v3742_v33   ;;  %v1957_v17 = vsel %vm183_vm1, %v2504_v14, %v1952_v51 }
  0xd4   :  { %2031 = vst.msk [vmem:[%s4718_s1 + $0x42] ss:$8 sm:$0xf0] %vm3_vm3, %v2029_v16   ;;  %v1962_v21 = vsel %vm188_vm2, %v2505_v19, %v1957_v17  ;;  %v4212_v32 = vpop.permute.xlu0 %1001   ;;  %v1127_v38 = vpop.permute.xlu2 %1126  }
  0xd5   :  { %2052 = vst.msk [vmem:[%s4718_s1 + $0x44] ss:$8 sm:$0xf0] %vm3_vm3, %v2050_v20   ;;  %1963 = vrot.lane.b32.xlu0 %v1962_v21, %s2522_s12 }
  0xd6   :  { %2073 = vst.msk [vmem:[%s4718_s1 + $0x46] ss:$8 sm:$0xf0] %vm3_vm3, %v2071_v22  }
  0xd7   :  { %2100 = vst.msk [vmem:[%s4718_s1 + $0x60] sm:$0x7f] %vm192_vm4, %v3394_v23   ;;  %v2478_v23 = vld [vmem:[%s4717_s0 + $0x129] ss:$112 sm:%s1846_s26]  }
  0xd8   :  { %2246 = vst.msk [vmem:[%s4718_s1 + $0x60] sm:$0x7f] %vm804_vm5, %v4007_v35  }
  0xd9   :  { %2247 = vst.msk [vmem:[%s4718_s1 + $0x61] sm:$0x80] %vm804_vm5, %v4007_v35  }
  0xda   :  { %2030 = vst.msk [vmem:[%s4718_s1 + $0x42] ss:$8 sm:$0xf] %vm3_vm3, %v2029_v16   ;;  %v1102_v44 = vpop.permute.xlu1 %1101  }
  0xdb   :  { %2051 = vst.msk [vmem:[%s4718_s1 + $0x44] ss:$8 sm:$0xf] %vm3_vm3, %v2050_v20  }
  0xdc   :  { %2072 = vst.msk [vmem:[%s4718_s1 + $0x46] ss:$8 sm:$0xf] %vm3_vm3, %v2071_v22   ;;  %v1202_v50 = vpop.permute.xlu2 %1201  }
  0xdd   :  { %2142 = vst.msk [vmem:[%s4718_s1 + $0x69] sm:$0x3f] %vm192_vm4, %v3543_v11   ;;  %v1852_v11 = vsel %vm178_vm0, %v2479_v26, %v2478_v23 }
  0xde   :  { %2184 = vst.msk [vmem:[%s4718_s1 + $0x72] sm:$0x1f] %vm192_vm4, %v3594_v31   ;;  %v1857_v29 = vsel %vm183_vm1, %v2480_v28, %v1852_v11 }
  0xdf   :  { %2185 = vst.msk [vmem:[%s4718_s1 + $0x73] sm:$0xe0] %vm192_vm4, %v3594_v31   ;;  %v1862_v31 = vsel %vm188_vm2, %v2481_v30, %v1857_v29 }
  0xe0   :  { %2197 = vst.msk [vmem:[%s4718_s1 + $0xb3] sm:$0xe0] %vm192_vm4, %v3773_v27   ;;  %1863 = vrot.lane.b32.xlu2 %v1862_v31, %s2522_s12 }
  0xe1   :  { %2215 = vst.msk [vmem:[%s4718_s1 + $0x77] sm:$0xf0] %vm192_vm4, %v3867_v12  }
  0xe2   :  { %2094 = vst.msk [vmem:[%s4718_s1 + $0x40] sm:$0x7f] %vm192_vm4, %v3318_v0   ;;  %v2497_v0 = vld [vmem:[%s4717_s0 + $0x15d] ss:$112 sm:%s1924_s25]   ;;  %s1999_s25 = smov 12  ;;  %v1177_v35 = vpop.permute.xlu1 %1176  }
  0xe3   :  { %2240 = vst.msk [vmem:[%s4718_s1 + $0x40] sm:$0x7f] %vm804_vm5, %v4017_v52   ;;  %v1927_v37 = vsel %vm178_vm0, %v2497_v0, %v2496_v36  ;;  %v2515_v46 = vld [vmem:[%s4717_s0 + $0x1bd] ss:$112 sm:%s1999_s25]  }
  0xe4   :  { %2241 = vst.msk [vmem:[%s4718_s1 + $0x41] sm:$0x80] %vm804_vm5, %v4017_v52   ;;  %v1932_v42 = vsel %vm183_vm1, %v2498_v47, %v1927_v37  ;;  %v2002_v10 = vsel %vm178_vm0, %v2515_v46, %v2514_v2 }
  0xe5   :  { %2136 = vst.msk [vmem:[%s4718_s1 + $0x49] sm:$0x3f] %vm192_vm4, %v3566_v18   ;;  %v1937_v18 = vsel %vm188_vm2, %v2499_v43, %v1932_v42 }
  0xe6   :  { %2178 = vst.msk [vmem:[%s4718_s1 + $0x52] sm:$0x1f] %vm192_vm4, %v3701_v9  }
  0xe7   :  { %2179 = vst.msk [vmem:[%s4718_s1 + $0x53] sm:$0xe0] %vm192_vm4, %v3701_v9   ;;  %v1077_v9 = vpop.permute.xlu0 %1076  }
  0xe8   :  { %2214 = vst.msk [vmem:[%s4718_s1 + $0x5b] sm:$0xf] %vm192_vm4, %v3867_v12   ;;  %v2077_v12 = vld [vmem:[%s4717_s0 + $0x300] ss:$4 sm:$0xf]   ;;  %1938 = vrot.lane.b32.xlu2 %v1937_v18, %s2522_s12 }
  0xe9   :  { %2270 = vst.msk [vmem:[%s4718_s1 + $0x9] sm:$0x3f] %vm804_vm5, %v4031_v54  }
  0xea   :  { %2271 = vst.msk [vmem:[%s4718_s1 + $0xa] sm:$0xc0] %vm804_vm5, %v4031_v54  }
  0xeb   :  { %2046 = vst.msk [vmem:[%s4718_s1 + $0xa3] ss:$8 sm:$0xf0] %vm3_vm3, %v2044_v45  }
  0xec   :  { %2067 = vst.msk [vmem:[%s4718_s1 + $0xa5] ss:$8 sm:$0xf0] %vm3_vm3, %v2065_v49  }
  0xed   :  { %2078 = vst.msk [vmem:[%s4718_s1 + $0xc6] ss:$8 sm:$0xf] %vm3_vm3, %v2077_v12  }
  0xee   :  { %2118 = vst.msk [vmem:[%s4718_s1 + $0xc0] sm:$0x7f] %vm192_vm4, %v3492_v53  }
  0xef   :  { %2264 = vst.msk [vmem:[%s4718_s1 + $0xc0] sm:$0x7f] %vm804_vm5, %v4064_v1   ;;  %v1152_v53 = vpop.permute.xlu0 %1151  }
  0xf0   :  { %2265 = vst.msk [vmem:[%s4718_s1 + $0xc1] sm:$0x80] %vm804_vm5, %v4064_v1   ;;  %2003 = vrot.lane.b32.xlu2 %v2002_v10, %s2522_s12 }
  0xf1   :  { %2045 = vst.msk [vmem:[%s4718_s1 + $0xa3] ss:$8 sm:$0xf] %vm3_vm3, %v2044_v45  }
  0xf2   :  { %2066 = vst.msk [vmem:[%s4718_s1 + $0xa5] ss:$8 sm:$0xf] %vm3_vm3, %v2065_v49  }
  0xf3   :  { %2160 = vst.msk [vmem:[%s4718_s1 + $0xc9] sm:$0x3f] %vm192_vm4, %v3622_v41   ;;  %v1277_v41 = vpop.permute.xlu2 %1276  }
  0xf4   :  { %2202 = vst.msk [vmem:[%s4718_s1 + $0xd2] sm:$0x1f] %vm192_vm4, %v3668_v61   ;;  %v1252_v61 = vpop.permute.xlu1 %1251  }
  0xf5   :  { %2224 = vst.msk [vmem:[%s4718_s1 + $0xdb] sm:$0xf] %vm192_vm4, %v3955_v39  }
  0xf6   :  { %2112 = vst.msk [vmem:[%s4718_s1 + $0xa0] sm:$0x7f] %vm192_vm4, %v3291_v57  }
  0xf7   :  { %2258 = vst.msk [vmem:[%s4718_s1 + $0xa0] sm:$0x7f] %vm804_vm5, %v4145_v24   ;;  %v1227_v57 = vpop.permute.xlu0 %1226  }
  0xf8   :  { %2259 = vst.msk [vmem:[%s4718_s1 + $0xa1] sm:$0x80] %vm804_vm5, %v4145_v24  }
  0xf9   :  { %2154 = vst.msk [vmem:[%s4718_s1 + $0xa9] sm:$0x3f] %vm192_vm4, %v3640_v48  }
  0xfa   :  { %2196 = vst.msk [vmem:[%s4718_s1 + $0xb2] sm:$0x1f] %vm192_vm4, %v3773_v27  }
  0xfb   :  { %2221 = vst.msk [vmem:[%s4718_s1 + $0xb7] sm:$0xf0] %vm192_vm4, %v3742_v33   ;;  %v1352_v48 = vpop.permute.xlu2 %1351  }
  0xfc   :  { %2288 = vst.msk [vmem:[%s4718_s1 + $0x69] sm:$0x3f] %vm804_vm5, %v4177_v25   ;;  %v1327_v33 = vpop.permute.xlu1 %1326  }
  0xfd   :  { %2289 = vst.msk [vmem:[%s4718_s1 + $0x6a] sm:$0xc0] %vm804_vm5, %v4177_v25  }
  0xfe   :  { %2282 = vst.msk [vmem:[%s4718_s1 + $0x49] sm:$0x3f] %vm804_vm5, %v4195_v4  }
  0xff   :  { %2283 = vst.msk [vmem:[%s4718_s1 + $0x4a] sm:$0xc0] %vm804_vm5, %v4195_v4   ;;  %v1302_v27 = vpop.permute.xlu0 %1301  }
 0x100   :  { %2276 = vst.msk [vmem:[%s4718_s1 + $0x29] sm:$0x3f] %vm804_vm5, %v4212_v32  }
 0x101   :  { %2277 = vst.msk [vmem:[%s4718_s1 + $0x2a] sm:$0xc0] %vm804_vm5, %v4212_v32  }
 0x102   :  { %2306 = vst.msk [vmem:[%s4718_s1 + $0xc9] sm:$0x3f] %vm804_vm5, %v1127_v38  }
 0x103   :  { %2307 = vst.msk [vmem:[%s4718_s1 + $0xca] sm:$0xc0] %vm804_vm5, %v1127_v38   ;;  %v1415_v39 = vpop.permute.xlu2 %1414  }
 0x104   :  { %2300 = vst.msk [vmem:[%s4718_s1 + $0xa9] sm:$0x3f] %vm804_vm5, %v1102_v44   ;;  %v1392_v52 = vpop.permute.xlu1 %1391  }
 0x105   :  { %2301 = vst.msk [vmem:[%s4718_s1 + $0xaa] sm:$0xc0] %vm804_vm5, %v1102_v44  }
 0x106   :  { %2294 = vst.msk [vmem:[%s4718_s1 + $0x89] sm:$0x3f] %vm804_vm5, %v1077_v9  }
 0x107   :  { %2295 = vst.msk [vmem:[%s4718_s1 + $0x8a] sm:$0xc0] %vm804_vm5, %v1077_v9   ;;  %v1377_v34 = vpop.permute.xlu0 %1376  }
 0x108   :  { %2324 = vst.msk [vmem:[%s4718_s1 + $0x52] sm:$0x1f] %vm804_vm5, %v1202_v50  }
 0x109   :  { %2325 = vst.msk [vmem:[%s4718_s1 + $0x53] sm:$0xe0] %vm804_vm5, %v1202_v50  }
 0x10a   :  { %2318 = vst.msk [vmem:[%s4718_s1 + $0x32] sm:$0x1f] %vm804_vm5, %v1177_v35  }
 0x10b   :  { %2319 = vst.msk [vmem:[%s4718_s1 + $0x33] sm:$0xe0] %vm804_vm5, %v1177_v35   ;;  %v1489_v54 = vpop.permute.xlu2 %1488  }
 0x10c   :  { %2312 = vst.msk [vmem:[%s4718_s1 + $0x12] sm:$0x1f] %vm804_vm5, %v1152_v53   ;;  %v1464_v55 = vpop.permute.xlu1 %1463  }
 0x10d   :  { %2313 = vst.msk [vmem:[%s4718_s1 + $0x13] sm:$0xe0] %vm804_vm5, %v1152_v53  }
 0x10e   :  { %2342 = vst.msk [vmem:[%s4718_s1 + $0xb2] sm:$0x1f] %vm804_vm5, %v1277_v41  }
 0x10f   :  { %2343 = vst.msk [vmem:[%s4718_s1 + $0xb3] sm:$0xe0] %vm804_vm5, %v1277_v41   ;;  %v1439_v56 = vpop.permute.xlu0 %1438  }
 0x110   :  { %2336 = vst.msk [vmem:[%s4718_s1 + $0x92] sm:$0x1f] %vm804_vm5, %v1252_v61  }
 0x111   :  { %2337 = vst.msk [vmem:[%s4718_s1 + $0x93] sm:$0xe0] %vm804_vm5, %v1252_v61  }
 0x112   :  { %2330 = vst.msk [vmem:[%s4718_s1 + $0x72] sm:$0x1f] %vm804_vm5, %v1227_v57  }
 0x113   :  { %2331 = vst.msk [vmem:[%s4718_s1 + $0x73] sm:$0xe0] %vm804_vm5, %v1227_v57   ;;  %v1564_v58 = vpop.permute.xlu2 %1563  }
 0x114   :  { %2360 = vst.msk [vmem:[%s4718_s1 + $0x5b] sm:$0xf] %vm804_vm5, %v1352_v48   ;;  %v1539_v59 = vpop.permute.xlu1 %1538  }
 0x115   :  { %2361 = vst.msk [vmem:[%s4718_s1 + $0x77] sm:$0xf0] %vm804_vm5, %v1352_v48  }
 0x116   :  { %2354 = vst.msk [vmem:[%s4718_s1 + $0x1b] sm:$0xf] %vm804_vm5, %v1327_v33  }
 0x117   :  { %2355 = vst.msk [vmem:[%s4718_s1 + $0x37] sm:$0xf0] %vm804_vm5, %v1327_v33   ;;  %v1514_v60 = vpop.permute.xlu0 %1513  }
 0x118   :  { %2348 = vst.msk [vmem:[%s4718_s1 + $0xd2] sm:$0x1f] %vm804_vm5, %v1302_v27  }
 0x119   :  { %2349 = vst.msk [vmem:[%s4718_s1 + $0xd3] sm:$0xe0] %vm804_vm5, %v1302_v27  }
 0x11a   :  { %1417 = vst.msk [vmem:[%s4718_s1] sm:$0x7f] %vm1416_vm6, %v1415_v39  }
 0x11b   :  { %2375 = vst.msk [vmem:[%s4718_s1 + $0x1] sm:$0x80] %vm1416_vm6, %v1415_v39   ;;  %v1639_v62 = vpop.permute.xlu2 %1638  }
 0x11c   :  { %2370 = vst.msk [vmem:[%s4718_s1 + $0xdb] sm:$0xf] %vm804_vm5, %v1392_v52   ;;  %v1614_v63 = vpop.permute.xlu1 %1613  }
 0x11d   :  { %2366 = vst.msk [vmem:[%s4718_s1 + $0x9b] sm:$0xf] %vm804_vm5, %v1377_v34  }
 0x11e   :  { %2367 = vst.msk [vmem:[%s4718_s1 + $0xb7] sm:$0xf0] %vm804_vm5, %v1377_v34  }
 0x11f   :  { %2392 = vst.msk [vmem:[%s4718_s1 + $0x60] sm:$0x7f] %vm1416_vm6, %v1489_v54   ;;  %v1589_v1 = vpop.permute.xlu0 %1588  }
 0x120   :  { %2393 = vst.msk [vmem:[%s4718_s1 + $0x61] sm:$0x80] %vm1416_vm6, %v1489_v54  }
 0x121   :  { %2386 = vst.msk [vmem:[%s4718_s1 + $0x40] sm:$0x7f] %vm1416_vm6, %v1464_v55  }
 0x122   :  { %2387 = vst.msk [vmem:[%s4718_s1 + $0x41] sm:$0x80] %vm1416_vm6, %v1464_v55  }
 0x123   :  { %2380 = vst.msk [vmem:[%s4718_s1 + $0x20] sm:$0x7f] %vm1416_vm6, %v1439_v56   ;;  %v1714_v15 = vpop.permute.xlu2 %1713  }
 0x124   :  { %2381 = vst.msk [vmem:[%s4718_s1 + $0x21] sm:$0x80] %vm1416_vm6, %v1439_v56   ;;  %v1689_v3 = vpop.permute.xlu1 %1688  }
 0x125   :  { %2410 = vst.msk [vmem:[%s4718_s1 + $0xc0] sm:$0x7f] %vm1416_vm6, %v1564_v58  }
 0x126   :  { %2411 = vst.msk [vmem:[%s4718_s1 + $0xc1] sm:$0x80] %vm1416_vm6, %v1564_v58  }
 0x127   :  { %2404 = vst.msk [vmem:[%s4718_s1 + $0xa0] sm:$0x7f] %vm1416_vm6, %v1539_v59   ;;  %v1664_v5 = vpop.permute.xlu0 %1663  }
 0x128   :  { %2405 = vst.msk [vmem:[%s4718_s1 + $0xa1] sm:$0x80] %vm1416_vm6, %v1539_v59  }
 0x129   :  { %2398 = vst.msk [vmem:[%s4718_s1 + $0x80] sm:$0x7f] %vm1416_vm6, %v1514_v60  }
 0x12a   :  { %2399 = vst.msk [vmem:[%s4718_s1 + $0x81] sm:$0x80] %vm1416_vm6, %v1514_v60  }
 0x12b   :  { %2428 = vst.msk [vmem:[%s4718_s1 + $0x49] sm:$0x3f] %vm1416_vm6, %v1639_v62   ;;  %v1789_v6 = vpop.permute.xlu2 %1788  }
 0x12c   :  { %2429 = vst.msk [vmem:[%s4718_s1 + $0x4a] sm:$0xc0] %vm1416_vm6, %v1639_v62   ;;  %v1764_v7 = vpop.permute.xlu1 %1763  }
 0x12d   :  { %2422 = vst.msk [vmem:[%s4718_s1 + $0x29] sm:$0x3f] %vm1416_vm6, %v1614_v63  }
 0x12e   :  { %2423 = vst.msk [vmem:[%s4718_s1 + $0x2a] sm:$0xc0] %vm1416_vm6, %v1614_v63  }
 0x12f   :  { %2416 = vst.msk [vmem:[%s4718_s1 + $0x9] sm:$0x3f] %vm1416_vm6, %v1589_v1   ;;  %v1739_v40 = vpop.permute.xlu0 %1738  }
 0x130   :  { %2417 = vst.msk [vmem:[%s4718_s1 + $0xa] sm:$0xc0] %vm1416_vm6, %v1589_v1  }
 0x131   :  { %2446 = vst.msk [vmem:[%s4718_s1 + $0xa9] sm:$0x3f] %vm1416_vm6, %v1714_v15  }
 0x132   :  { %2447 = vst.msk [vmem:[%s4718_s1 + $0xaa] sm:$0xc0] %vm1416_vm6, %v1714_v15  }
 0x133   :  { %2440 = vst.msk [vmem:[%s4718_s1 + $0x89] sm:$0x3f] %vm1416_vm6, %v1689_v3  }
 0x134   :  { %2441 = vst.msk [vmem:[%s4718_s1 + $0x8a] sm:$0xc0] %vm1416_vm6, %v1689_v3   ;;  %v1839_v8 = vpop.permute.xlu1 %1838  }
 0x135   :  { %2434 = vst.msk [vmem:[%s4718_s1 + $0x69] sm:$0x3f] %vm1416_vm6, %v1664_v5  }
 0x136   :  { %2435 = vst.msk [vmem:[%s4718_s1 + $0x6a] sm:$0xc0] %vm1416_vm6, %v1664_v5  }
 0x137   :  { %2464 = vst.msk [vmem:[%s4718_s1 + $0x32] sm:$0x1f] %vm1416_vm6, %v1789_v6   ;;  %v1814_v13 = vpop.permute.xlu0 %1813  }
 0x138   :  { %2465 = vst.msk [vmem:[%s4718_s1 + $0x33] sm:$0xe0] %vm1416_vm6, %v1789_v6  }
 0x139   :  { %2458 = vst.msk [vmem:[%s4718_s1 + $0x12] sm:$0x1f] %vm1416_vm6, %v1764_v7  }
 0x13a   :  { %2459 = vst.msk [vmem:[%s4718_s1 + $0x13] sm:$0xe0] %vm1416_vm6, %v1764_v7   ;;  %v1864_v51 = vpop.permute.xlu2 %1863  }
 0x13b   :  { %2452 = vst.msk [vmem:[%s4718_s1 + $0xc9] sm:$0x3f] %vm1416_vm6, %v1739_v40  }
 0x13c   :  { %2453 = vst.msk [vmem:[%s4718_s1 + $0xca] sm:$0xc0] %vm1416_vm6, %v1739_v40   ;;  %v1914_v14 = vpop.permute.xlu1 %1913  }
 0x13d   :  { %2482 = vst.msk [vmem:[%s4718_s1 + $0x92] sm:$0x1f] %vm1416_vm6, %v1864_v51  }
 0x13e   :  { %2483 = vst.msk [vmem:[%s4718_s1 + $0x93] sm:$0xe0] %vm1416_vm6, %v1864_v51  }
 0x13f   :  { %2476 = vst.msk [vmem:[%s4718_s1 + $0x72] sm:$0x1f] %vm1416_vm6, %v1839_v8   ;;  %v1889_v16 = vpop.permute.xlu0 %1888  }
 0x140   :  { %2477 = vst.msk [vmem:[%s4718_s1 + $0x73] sm:$0xe0] %vm1416_vm6, %v1839_v8  }
 0x141   :  { %2470 = vst.msk [vmem:[%s4718_s1 + $0x52] sm:$0x1f] %vm1416_vm6, %v1814_v13  }
 0x142   :  { %2471 = vst.msk [vmem:[%s4718_s1 + $0x53] sm:$0xe0] %vm1416_vm6, %v1814_v13   ;;  %v1939_v17 = vpop.permute.xlu2 %1938  }
 0x143   :  { %2500 = vst.msk [vmem:[%s4718_s1 + $0x1b] sm:$0xf] %vm1416_vm6, %v1939_v17  }
 0x144   :  { %2501 = vst.msk [vmem:[%s4718_s1 + $0x37] sm:$0xf0] %vm1416_vm6, %v1939_v17   ;;  %v1989_v19 = vpop.permute.xlu1 %1988  }
 0x145   :  { %2494 = vst.msk [vmem:[%s4718_s1 + $0xd2] sm:$0x1f] %vm1416_vm6, %v1914_v14  }
 0x146   :  { %2495 = vst.msk [vmem:[%s4718_s1 + $0xd3] sm:$0xe0] %vm1416_vm6, %v1914_v14  }
 0x147   :  { %2488 = vst.msk [vmem:[%s4718_s1 + $0xb2] sm:$0x1f] %vm1416_vm6, %v1889_v16   ;;  %v1964_v20 = vpop.permute.xlu0 %1963  }
 0x148   :  { %2489 = vst.msk [vmem:[%s4718_s1 + $0xb3] sm:$0xe0] %vm1416_vm6, %v1889_v16  }
 0x149   :  { %2512 = vst.msk [vmem:[%s4718_s1 + $0x9b] sm:$0xf] %vm1416_vm6, %v1989_v19  }
 0x14a   :  { %v2004_v21 = vpop.permute.xlu2 %2003   ;;  %2513 = vst.msk [vmem:[%s4718_s1 + $0xb7] sm:$0xf0] %vm1416_vm6, %v1989_v19  }
 0x14b   :  { %2516 = vst.msk [vmem:[%s4718_s1 + $0xdb] sm:$0xf] %vm1416_vm6, %v2004_v21  }
 0x14c   :  { %2506 = vst.msk [vmem:[%s4718_s1 + $0x5b] sm:$0xf] %vm1416_vm6, %v1964_v20  }
 0x14d   :  { %2507 = vst.msk [vmem:[%s4718_s1 + $0x77] sm:$0xf0] %vm1416_vm6, %v1964_v20  }

// kernel: repcpe_forward.1
= control target key start
LH: loop header
LB: loop body
LE: loop exit
PB: predicated region body
PF: predicated region fallthrough
CT: control target
= control target key end

     0   :  { %s5530_s12 = smov 0   ;;  %s9680_s0 = inlined_call_operand.vmem [shape: f32[2,22,704], index: 0, kind: input, shape index: {}]   ;;  %s9681_s1 = inlined_call_operand.vmem [shape: f32[7,3584], index: 1, kind: input, shape index: {}]   ;;  %s9682_s2 = inlined_call_operand.vmem [shape: f32[1,512], index: 2, kind: input, shape index: {}]   ;;  %s9683_s3 = inlined_call_operand.vmem [shape: f32[2,16,512], index: 3, kind: output, shape index: {}]  }
   0x1 LB: > { %s5337_s13 = sadd.s32 4294967295, %s5505_s12   ;;  %p5341_p0 = scmp.ge.s32.totalorder %s5505_s12, 1  ;;  %s5505_s12 = sphi %s5530_s12, %s13_s12  }
   0x2   : > { %p137_p1 = scmp.lt.s32.totalorder %s5505_s12, 3 }
   0x4   : > { %p138_p2 = pnand %p5341_p0, %p137_p1 }
   0x6   : > { %141 = sbr.rel (%p138_p2) target bundleno = 4780 (0x12ac), region = 32 }
   0xb   : > { %v193_v0 = vld [vmem:[%s9681_s1] ss:$8 sm:$0xf]  ;;  %s5507_s22 = smov 32   ;;  %s5508_s23 = smov 64   ;;  %vm331_vm0 = vcmask 523264  }
   0xc   : > { %v194_v1 = vld [vmem:[%s9681_s1] ss:$8 sm:$0xf0]  ;;  %s5509_s28 = smov 96   ;;  %p161_p3 = scmp.lt.s32.totalorder %s5337_s13, 1  ;;  %vm244_vm1 = vcmask 261120  }
   0xd   : > { %v5544_v2 = vor.u32 %v194_v1, %v193_v0  ;;  %v5345_v3 = vld [vmem:[%s9681_s1 + $0x40] ss:$8 sm:$0xf]  ;;  %vm293_vm2 = vcmask 785408   ;;  %vm743_vm3 = vcmask 1046528   ;;  %vm1508_vm4 = vcmask 1045504  }
   0xe   : > { %v5346_v4 = vld [vmem:[%s9681_s1 + $0x40] ss:$8 sm:$0xf0]  ;;  %s10448_s13 = smov (!%p161_p3, %s5337_s13), 1  ;;  %vm2273_vm5 = vcmask 1044480   ;;  %vm3038_vm6 = vcmask 1043456  }
   0xf   : > { %9877 = vst [vmem:[#allocation2_spill] sm:$0xff] %v5544_v2  ;;  %v231_v5 = vrot.slane %v5544_v2, 4  ;;  %v199_v6 = vor.u32 %v5346_v4, %v5345_v3  ;;  %v5347_v16 = vld [vmem:[%s9681_s1 + $0x80] ss:$8 sm:$0xf]  ;;  %s5395_s29 = smul.u32 144, %s10448_s13 }
  0x10   : > { %v5348_v17 = vld [vmem:[%s9681_s1 + $0x80] ss:$8 sm:$0xf0]  ;;  %vm3803_vm7 = vcmask 1042432   ;;  %vm4568_vm8 = vcmask 1041408  }
  0x11   : > { %v234_v7 = vperm.slane %v231_v5, 2  ;;  %v232_v8 = vperm.slane %v231_v5, 0  ;;  %v319_v9 = vperm.slane %v199_v6, 0  ;;  %v235_v10 = vperm.slane %v231_v5, 3  ;;  %s5588_s5 = scalar_lea.vmem %s9680_s0, %s5395_s29 }
  0x12   : > { %v233_v11 = vperm.slane %v231_v5, 1  ;;  %v322_v12 = vperm.slane %v199_v6, 3  ;;  %v321_v13 = vperm.slane %v199_v6, 2  ;;  %v320_v14 = vperm.slane %v199_v6, 1  ;;  %v181_v28 = vld [vmem:[%s5588_s5] sm:$0xff]  ;;  %v5592_v29 = vld [vmem:[%s5588_s5 + $0x30] sm:$0xff] }
  0x13   : > { %240 = vrot.lane.b32.xlu1 %v234_v7, %s5507_s22  ;;  %236 = vrot.lane.b32.xlu0 %v232_v8, %s5507_s22  ;;  %v404_v15 = vrot.slane %v199_v6, 4  ;;  %v5565_v19 = vor.u32 %v5348_v17, %v5347_v16  ;;  %v5598_v33 = vld [vmem:[%s5588_s5 + $0x50] sm:$0xff]  ;;  %v5601_v34 = vld [vmem:[%s5588_s5 + $0x20] sm:$0xff] }
  0x14   : > { %323 = vrot.lane.b32.xlu2 %v319_v9, %s5508_s23  ;;  %v5611_v47 = vld [vmem:[%s5588_s5 + $0x10] sm:$0xff]  ;;  %v5614_v48 = vld [vmem:[%s5588_s5 + $0x8] sm:$0xff]  ;;  %v5617_v49 = vld [vmem:[%s5588_s5 + $0x18] sm:$0xff] }
  0x15   : > { %v406_v18 = vperm.slane %v404_v15, 1  ;;  %9878 = vst [vmem:[#allocation3_spill] sm:$0xff] %v5565_v19  ;;  %v514_v20 = vrot.slane %v5565_v19, 4  ;;  %v405_v21 = vperm.slane %v404_v15, 0  ;;  %v407_v22 = vperm.slane %v404_v15, 2  ;;  %v5626_v53 = vld [vmem:[%s5588_s5 + $0x48] sm:$0xff] }
  0x16   : > { %v408_v24 = vperm.slane %v404_v15, 3  ;;  %v5629_v54 = vld [vmem:[%s5588_s5 + $0x40] sm:$0xff]  ;;  %v5634_v57 = vld [vmem:[%s5588_s5 + $0x38] sm:$0xff] }
  0x17   : > { %v517_v23 = vperm.slane %v514_v20, 2  ;;  %v515_v25 = vperm.slane %v514_v20, 0  ;;  %v516_v26 = vperm.slane %v514_v20, 1  ;;  %v518_v27 = vperm.slane %v514_v20, 3 }
  0x1b   : > { %242 = vrot.lane.b32.xlu1 %v235_v10, %s5507_s22  ;;  %238 = vrot.lane.b32.xlu0 %v233_v11, %s5507_s22 }
  0x1c   : > { %329 = vrot.lane.b32.xlu2 %v322_v12, %s5508_s23 }
  0x23   : > { %327 = vrot.lane.b32.xlu1 %v321_v13, %s5508_s23  ;;  %325 = vrot.lane.b32.xlu0 %v320_v14, %s5508_s23 }
  0x24   : > { %411 = vrot.lane.b32.xlu2 %v406_v18, %s5509_s28 }
  0x2b   : > { %409 = vrot.lane.b32.xlu1 %v405_v21, %s5509_s28  ;;  %413 = vrot.lane.b32.xlu0 %v407_v22, %s5509_s28 }
  0x2c   : > { %523 = vrot.lane.b32.xlu2 %v517_v23, %s5507_s22 }
  0x33   : > { %415 = vrot.lane.b32.xlu1 %v408_v24, %s5509_s28  ;;  %519 = vrot.lane.b32.xlu0 %v515_v25, %s5507_s22 }
  0x3b   : > { %521 = vrot.lane.b32.xlu1 %v516_v26, %s5507_s22  ;;  %525 = vrot.lane.b32.xlu0 %v518_v27, %s5507_s22 }
  0x6e   : > { %v324_v30 = vpop.permute.xlu2 %323 }
  0x6f   : > { %v340_v31 = vmul.f32 %v324_v30, %v181_v28  ;;  %v345_v32 = vmul.f32 %v324_v30, %v5592_v29 }
  0x71   : > { %360 = vrot.lane.b32.xlu0 %v340_v31, %s5508_s23  ;;  %370 = vrot.lane.b32.xlu2 %v345_v32, %s5508_s23 }
  0x76   : > { %v330_v35 = vpop.permute.xlu2 %329 }
  0x77   : > { %v349_v36 = vmul.f32 %v330_v35, %v5598_v33  ;;  %v344_v37 = vmul.f32 %v330_v35, %v5601_v34 }
  0x79   : > { %378 = vrot.lane.b32.xlu0 %v349_v36, %s5508_s23  ;;  %368 = vrot.lane.b32.xlu1 %v344_v37, %s5508_s23 }
  0x7e   : > { %v412_v14 = vpop.permute.xlu2 %411 }
  0x85   : > { %v241_v38 = vpop.permute.xlu1 %240  ;;  %v237_v39 = vpop.permute.xlu0 %236 }
  0x86   : > { %v253_v61 = vmul.f32 %v237_v39, %v181_v28  ;;  %v258_v62 = vmul.f32 %v237_v39, %v5592_v29  ;;  %v524_v25 = vpop.permute.xlu2 %523 }
  0x8d   : > { %v243_v40 = vpop.permute.xlu1 %242  ;;  %v239_v41 = vpop.permute.xlu0 %238 }
  0x8e   : > { %v262_v60 = vmul.f32 %v243_v40, %v5598_v33  ;;  %v257_v4 = vmul.f32 %v243_v40, %v5601_v34  ;;  %v246_v6 = vsel %vm244_vm1, %v239_v41, %v241_v38  ;;  %v247_v10 = vsel %vm244_vm1, %v241_v38, %v243_v40 }
  0x8f   : > { %v255_v9 = vmul.f32 %v246_v6, %v5611_v47  ;;  %v256_v11 = vmul.f32 %v247_v10, %v5617_v49  ;;  %v261_v13 = vmul.f32 %v247_v10, %v5626_v53  ;;  %v245_v15 = vsel %vm244_vm1, %v237_v39, %v239_v41 }
  0x90   : > { %v259_v17 = vmul.f32 %v245_v15, %v5634_v57  ;;  %v254_v18 = vmul.f32 %v245_v15, %v5614_v48  ;;  %v260_v23 = vmul.f32 %v246_v6, %v5629_v54 }
  0x95   : > { %v328_v42 = vpop.permute.xlu1 %327  ;;  %v326_v43 = vpop.permute.xlu0 %325 }
  0x96   : > { %v334_v44 = vsel %vm331_vm0, %v328_v42, %v330_v35  ;;  %v332_v45 = vsel %vm331_vm0, %v324_v30, %v326_v43  ;;  %v333_v46 = vsel %vm331_vm0, %v326_v43, %v328_v42 }
  0x97   : > { %v342_v50 = vmul.f32 %v333_v46, %v5611_v47  ;;  %v341_v51 = vmul.f32 %v332_v45, %v5614_v48  ;;  %v343_v52 = vmul.f32 %v334_v44, %v5617_v49  ;;  %v348_v55 = vmul.f32 %v334_v44, %v5626_v53 }
  0x98   : > { %v347_v56 = vmul.f32 %v333_v46, %v5629_v54  ;;  %v346_v58 = vmul.f32 %v332_v45, %v5634_v57  ;;  %v5349_v45 = vld [vmem:[%s9681_s1 + $0xc0] ss:$8 sm:$0xf] }
  0x99   : > { %364 = vrot.lane.b32.xlu2 %v342_v50, %s5508_s23  ;;  %362 = vrot.lane.b32.xlu1 %v341_v51, %s5508_s23  ;;  %v5707_v46 = vld [vmem:[%s5588_s5 + $0x58] sm:$0xff]  ;;  %v5710_v50 = vld [vmem:[%s5588_s5 + $0x28] sm:$0xff]  ;;  %v601_v51 = vperm.slane %v5349_v45, 1 }
  0x9a   : > { %366 = vrot.lane.b32.xlu0 %v343_v52, %s5508_s23 }
  0x9d   : > { %v410_v59 = vpop.permute.xlu1 %409  ;;  %v414_v63 = vpop.permute.xlu0 %413 }
  0x9e   : > { %v430_v1 = vmul.f32 %v410_v59, %v5592_v29  ;;  %v425_v8 = vmul.f32 %v410_v59, %v181_v28  ;;  %v417_v16 = vsel %vm293_vm2, %v410_v59, %v412_v14  ;;  %v418_v21 = vsel %vm293_vm2, %v412_v14, %v414_v63 }
  0x9f   : > { %v426_v20 = vmul.f32 %v417_v16, %v5614_v48  ;;  %v427_v22 = vmul.f32 %v418_v21, %v5611_v47  ;;  %v432_v24 = vmul.f32 %v418_v21, %v5629_v54  ;;  %v431_v38 = vmul.f32 %v417_v16, %v5634_v57 }
  0xa1   : > { %376 = vrot.lane.b32.xlu2 %v348_v55, %s5508_s23  ;;  %374 = vrot.lane.b32.xlu1 %v347_v56, %s5508_s23 }
  0xa2   : > { %372 = vrot.lane.b32.xlu0 %v346_v58, %s5508_s23  ;;  %v602_v58 = vperm.slane %v5349_v45, 2 }
  0xa5   : > { %v416_v0 = vpop.permute.xlu1 %415  ;;  %v520_v5 = vpop.permute.xlu0 %519 }
  0xa6   : > { %v429_v3 = vmul.f32 %v416_v0, %v5601_v34  ;;  %v535_v7 = vmul.f32 %v520_v5, %v5614_v48  ;;  %v434_v12 = vmul.f32 %v416_v0, %v5598_v33  ;;  %v419_v28 = vsel %vm293_vm2, %v414_v63, %v416_v0 }
  0xa7   : > { %v433_v31 = vmul.f32 %v419_v28, %v5626_v53  ;;  %v428_v32 = vmul.f32 %v419_v28, %v5617_v49  ;;  %v540_v39 = vmul.f32 %v520_v5, %v5634_v57 }
  0xa9   : > { %291 = vrot.lane.b32.xlu1 %v262_v60, %s5509_s28  ;;  %273 = vrot.lane.b32.xlu2 %v253_v61, %s5509_s28 }
  0xaa   : > { %283 = vrot.lane.b32.xlu0 %v258_v62, %s5509_s28  ;;  %v600_v62 = vperm.slane %v5349_v45, 0 }
  0xad   : > { %v522_v26 = vpop.permute.xlu1 %521  ;;  %v526_v35 = vpop.permute.xlu0 %525 }
  0xae   : > { %v528_v27 = vsel %vm244_vm1, %v522_v26, %v524_v25  ;;  %v529_v36 = vsel %vm244_vm1, %v524_v25, %v526_v35  ;;  %v527_v40 = vsel %vm244_vm1, %v520_v5, %v522_v26  ;;  %v544_v52 = vmul.f32 %v526_v35, %v5707_v46 }
  0xaf   : > { %v537_v30 = vmul.f32 %v528_v27, %v5617_v49  ;;  %v538_v37 = vmul.f32 %v529_v36, %v5601_v34  ;;  %v541_v41 = vmul.f32 %v527_v40, %v5629_v54  ;;  %v536_v42 = vmul.f32 %v527_v40, %v5611_v47 }
  0xb0   : > { %v543_v43 = vmul.f32 %v529_v36, %v5598_v33  ;;  %v539_v55 = vmul.f32 %v526_v35, %v5710_v50  ;;  %v542_v59 = vmul.f32 %v528_v27, %v5626_v53 }
  0xb1   : > { %455 = vrot.lane.b32.xlu1 %v430_v1, %s5507_s22  ;;  %281 = vrot.lane.b32.xlu2 %v257_v4, %s5509_s28 }
  0xb2   : > { %453 = vrot.lane.b32.xlu0 %v429_v3, %s5507_s22  ;;  %v603_v3 = vperm.slane %v5349_v45, 3 }
  0xb9   : > { %555 = vrot.lane.b32.xlu1 %v535_v7, %s5509_s28  ;;  %445 = vrot.lane.b32.xlu2 %v425_v8, %s5507_s22 }
  0xba   : > { %277 = vrot.lane.b32.xlu0 %v255_v9, %s5509_s28 }
  0xc1   : > { %279 = vrot.lane.b32.xlu1 %v256_v11, %s5509_s28  ;;  %463 = vrot.lane.b32.xlu2 %v434_v12, %s5507_s22 }
  0xc2   : > { %289 = vrot.lane.b32.xlu0 %v261_v13, %s5509_s28 }
  0xc9   : > { %285 = vrot.lane.b32.xlu1 %v259_v17, %s5509_s28  ;;  %275 = vrot.lane.b32.xlu2 %v254_v18, %s5509_s28 }
  0xca   : > { %447 = vrot.lane.b32.xlu0 %v426_v20, %s5507_s22 }
  0xcb   : > { %v5701_v44 = vpop.permute.xlu2 %370 }
  0xd1   : > { %449 = vrot.lane.b32.xlu1 %v427_v22, %s5507_s22  ;;  %287 = vrot.lane.b32.xlu2 %v260_v23, %s5509_s28 }
  0xd2   : > { %459 = vrot.lane.b32.xlu0 %v432_v24, %s5507_s22 }
  0xd9   : > { %461 = vrot.lane.b32.xlu1 %v433_v31, %s5507_s22  ;;  %451 = vrot.lane.b32.xlu2 %v428_v32, %s5507_s22 }
  0xda   : > { %559 = vrot.lane.b32.xlu0 %v537_v30, %s5509_s28 }
  0xe1   : > { %561 = vrot.lane.b32.xlu1 %v538_v37, %s5509_s28  ;;  %457 = vrot.lane.b32.xlu2 %v431_v38, %s5507_s22 }
  0xe2   : > { %565 = vrot.lane.b32.xlu0 %v540_v39, %s5509_s28 }
  0xe3   : > { %v5722_v60 = vpop.permute.xlu0 %360 }
  0xe4   : > { %9880 = vst [vmem:[#allocation5_spill] sm:$0xff] %v5722_v60 }
  0xe9   : > { %567 = vrot.lane.b32.xlu1 %v541_v41, %s5509_s28  ;;  %557 = vrot.lane.b32.xlu2 %v536_v42, %s5509_s28 }
  0xea   : > { %571 = vrot.lane.b32.xlu0 %v543_v43, %s5509_s28 }
  0xeb   : > { %v5726_v63 = vpop.permute.xlu1 %368  ;;  %v5731_v1 = vpop.permute.xlu0 %378 }
  0xf1   : > { %573 = vrot.lane.b32.xlu1 %v544_v52, %s5509_s28  ;;  %563 = vrot.lane.b32.xlu2 %v539_v55, %s5509_s28 }
  0xf2   : > { %606 = vrot.lane.b32.xlu0 %v601_v51, %s5508_s23 }
  0xf3   : > { %v5717_v56 = vpop.permute.xlu2 %364 }
  0xf4   : > { %9879 = vst [vmem:[#allocation4_spill] sm:$0xff] %v5717_v56 }
  0xf9   : > { %608 = vrot.lane.b32.xlu1 %v602_v58, %s5508_s23  ;;  %569 = vrot.lane.b32.xlu2 %v542_v59, %s5509_s28 }
  0xfb   : > { %v5724_v61 = vpop.permute.xlu2 %376 }
 0x101   : > { %604 = vrot.lane.b32.xlu2 %v600_v62, %s5508_s23 }
 0x103   : > { %v5729_v0 = vpop.permute.xlu2 %273 }
 0x104   : > { %9881 = vst [vmem:[#allocation6_spill] sm:$0xff] %v5729_v0 }
 0x109   : > { %610 = vrot.lane.b32.xlu2 %v603_v3, %s5508_s23 }
 0x10b   : > { %v5734_v4 = vpop.permute.xlu1 %362  ;;  %v5736_v5 = vpop.permute.xlu2 %281 }
 0x10c   : > { %9882 = vst [vmem:[#allocation7_spill] sm:$0xff] %v5734_v4  ;;  %v5738_v6 = vpop.permute.xlu0 %366 }
 0x113   : > { %v5740_v7 = vpop.permute.xlu1 %374  ;;  %v5742_v8 = vpop.permute.xlu2 %445 }
 0x114   : > { %9883 = vst [vmem:[#allocation8_spill] sm:$0xff] %v5742_v8  ;;  %v5744_v9 = vpop.permute.xlu0 %372 }
 0x11b   : > { %v5746_v10 = vpop.permute.xlu1 %291  ;;  %v5748_v11 = vpop.permute.xlu2 %463 }
 0x11c   : > { %9884 = vst [vmem:[#allocation9_spill] sm:$0xff] %v5748_v11  ;;  %v5750_v12 = vpop.permute.xlu0 %283 }
 0x123   : > { %v5752_v13 = vpop.permute.xlu1 %455  ;;  %v5754_v14 = vpop.permute.xlu2 %275 }
 0x124   : > { %9885 = vst [vmem:[#allocation10_spill] sm:$0xff] %v5752_v13  ;;  %v5756_v15 = vpop.permute.xlu0 %453 }
 0x125   : > { %9886 = vst [vmem:[#allocation11_spill] sm:$0xff] %v5754_v14 }
 0x12b   : > { %v5758_v16 = vpop.permute.xlu1 %555  ;;  %v5760_v17 = vpop.permute.xlu2 %287 }
 0x12c   : > { %9887 = vst [vmem:[#allocation12_spill] sm:$0xff] %v5758_v16  ;;  %v5762_v18 = vpop.permute.xlu0 %277 }
 0x12d   : > { %9888 = vst [vmem:[#allocation13_spill] sm:$0xff] %v5762_v18 }
 0x133   : > { %v5764_v20 = vpop.permute.xlu1 %279  ;;  %v5766_v21 = vpop.permute.xlu2 %451 }
 0x134   : > { %v5768_v22 = vpop.permute.xlu0 %289 }
 0x13b   : > { %v5770_v23 = vpop.permute.xlu1 %285  ;;  %v5772_v24 = vpop.permute.xlu2 %457 }
 0x13c   : > { %v5774_v25 = vpop.permute.xlu0 %447 }
 0x13d   : > { %9889 = vst [vmem:[#allocation14_spill] sm:$0xff] %v5774_v25 }
 0x143   : > { %v5776_v26 = vpop.permute.xlu1 %449  ;;  %v5778_v27 = vpop.permute.xlu2 %557 }
 0x144   : > { %9890 = vst [vmem:[#allocation15_spill] sm:$0xff] %v5776_v26  ;;  %v5780_v28 = vpop.permute.xlu0 %459 }
 0x145   : > { %9891 = vst [vmem:[#allocation16_spill] sm:$0xff] %v5778_v27 }
 0x14b   : > { %v5782_v30 = vpop.permute.xlu1 %461  ;;  %v5784_v31 = vpop.permute.xlu2 %563 }
 0x14c   : > { %9892 = vst [vmem:[#allocation17_spill] sm:$0xff] %v5782_v30  ;;  %v5786_v32 = vpop.permute.xlu0 %559 }
 0x14d   : > { %9893 = vst [vmem:[#allocation18_spill] sm:$0xff] %v5784_v31 }
 0x14e   : > { %9894 = vst [vmem:[#allocation19_spill] sm:$0xff] %v5786_v32 }
 0x153   : > { %v5788_v35 = vpop.permute.xlu1 %561  ;;  %v5790_v36 = vpop.permute.xlu2 %569 }
 0x154   : > { %9895 = vst [vmem:[#allocation20_spill] sm:$0xff] %v5788_v35  ;;  %v5792_v37 = vpop.permute.xlu0 %565 }
 0x155   : > { %9896 = vst [vmem:[#allocation21_spill] sm:$0xff] %v5790_v36 }
 0x156   : > { %9897 = vst [vmem:[#allocation22_spill] sm:$0xff] %v5792_v37 }
 0x15b   : > { %v5794_v38 = vpop.permute.xlu1 %567  ;;  %v605_v39 = vpop.permute.xlu2 %604 }
 0x15c   : > { %9898 = vst [vmem:[#allocation23_spill] sm:$0xff] %v5794_v38  ;;  %v5796_v40 = vpop.permute.xlu0 %571  ;;  %v620_v41 = vmul.f32 %v605_v39, %v5614_v48 }
 0x15d   : > { %9899 = vst [vmem:[#allocation24_spill] sm:$0xff] %v5796_v40  ;;  %v5889_v40 = vld [vmem:[%s5588_s5 + $0x60] sm:$0x1] }
 0x15e   : > { %640 = vrot.lane.b32.xlu0 %v620_v41, %s5508_s23 }
 0x163   : > { %v5800_v42 = vpop.permute.xlu1 %573  ;;  %v611_v52 = vpop.permute.xlu2 %610 }
 0x164   : > { %9900 = vst [vmem:[#allocation25_spill] sm:$0xff] %v5800_v42  ;;  %v607_v43 = vpop.permute.xlu0 %606  ;;  %v624_v59 = vmul.f32 %v611_v52, %v5710_v50  ;;  %v5351_v50 = vld [vmem:[%s9681_s1 + $0x1] ss:$8 sm:$0xf0] }
 0x165   : > { %v612_v45 = vsel %vm331_vm0, %v605_v39, %v607_v43 }
 0x166   : > { %v621_v51 = vmul.f32 %v612_v45, %v5611_v47  ;;  %v5350_v47 = vld [vmem:[%s9681_s1 + $0x1] ss:$8 sm:$0xf] }
 0x167   : > { %v5819_v41 = vor.u32 %v5351_v50, %v5350_v47 }
 0x168   : > { %642 = vrot.lane.b32.xlu1 %v621_v51, %s5508_s23 }
 0x169   : > { %9901 = vst [vmem:[#allocation26_spill] sm:$0xff] %v5819_v41  ;;  %v780_v51 = vrot.slane %v5819_v41, 4 }
 0x16b   : > { %v609_v55 = vpop.permute.xlu1 %608 }
 0x16c   : > { %v613_v58 = vsel %vm331_vm0, %v607_v43, %v609_v55  ;;  %v614_v62 = vsel %vm331_vm0, %v609_v55, %v611_v52  ;;  %v781_v55 = vperm.slane %v780_v51, 0 }
 0x16d   : > { %v622_v48 = vmul.f32 %v613_v58, %v5617_v49  ;;  %v623_v3 = vmul.f32 %v614_v62, %v5601_v34  ;;  %v625_v49 = vmul.f32 %v605_v39, %v5634_v57  ;;  %v626_v34 = vmul.f32 %v612_v45, %v5629_v54 }
 0x16e   : > { %v627_v43 = vmul.f32 %v613_v58, %v5626_v53  ;;  %v783_v39 = vperm.slane %v780_v51, 2  ;;  %v782_v45 = vperm.slane %v780_v51, 1  ;;  %v784_v58 = vperm.slane %v780_v51, 3 }
 0x16f   : > { %644 = vrot.lane.b32.xlu2 %v622_v48, %s5508_s23  ;;  %646 = vrot.lane.b32.xlu0 %v623_v3, %s5508_s23  ;;  %v629_v48 = vmul.f32 %v611_v52, %v5707_v46 }
 0x170   : > { %648 = vrot.lane.b32.xlu1 %v624_v59, %s5508_s23  ;;  %v628_v59 = vmul.f32 %v614_v62, %v5598_v33 }
 0x177   : > { %650 = vrot.lane.b32.xlu2 %v625_v49, %s5508_s23  ;;  %652 = vrot.lane.b32.xlu0 %v626_v34, %s5508_s23 }
 0x178   : > { %654 = vrot.lane.b32.xlu1 %v627_v43, %s5508_s23 }
 0x17f   : > { %656 = vrot.lane.b32.xlu2 %v628_v59, %s5508_s23  ;;  %658 = vrot.lane.b32.xlu0 %v629_v48, %s5508_s23 }
 0x180   : > { %785 = vrot.lane.b32.xlu1 %v781_v55, %s5507_s22 }
 0x187   : > { %789 = vrot.lane.b32.xlu0 %v783_v39, %s5507_s22  ;;  %787 = vrot.lane.b32.xlu2 %v782_v45, %s5507_s22  ;;  %v5857_v39 = vld [vmem:[%s5588_s5] sm:$0xfe]  ;;  %v5860_v45 = vld [vmem:[%s5588_s5 + $0x8] sm:$0xfe] }
 0x188   : > { %791 = vrot.lane.b32.xlu1 %v784_v58, %s5507_s22 }
 0x1c9   : > { %v5836_v62 = vpop.permute.xlu2 %644 }
 0x1ca   : > { %9902 = vst [vmem:[#allocation27_spill] sm:$0xff] %v5836_v62 }
 0x1d0   : > { %v5838_v52 = vpop.permute.xlu0 %640 }
 0x1d1   : > { %9903 = vst [vmem:[#allocation28_spill] sm:$0xff] %v5838_v52  ;;  %v5842_v47 = vpop.permute.xlu2 %650 }
 0x1d2   : > { %9905 = vst [vmem:[#allocation30_spill] sm:$0xff] %v5842_v47  ;;  %v5872_v47 = vld [vmem:[%s5588_s5 + $0x20] sm:$0xfe] }
 0x1d9   : > { %v5848_v34 = vpop.permute.xlu2 %656 }
 0x1da   : > { %v5840_v3 = vpop.permute.xlu1 %642  ;;  %9908 = vst [vmem:[#allocation33_spill] sm:$0xff] %v5848_v34 }
 0x1db   : > { %9904 = vst [vmem:[#allocation29_spill] sm:$0xff] %v5840_v3 }
 0x1e1   : > { %v5844_v50 = vpop.permute.xlu0 %646  ;;  %v788_v55 = vpop.permute.xlu2 %787 }
 0x1e2   : > { %9906 = vst [vmem:[#allocation31_spill] sm:$0xff] %v5844_v50  ;;  %v5846_v49 = vpop.permute.xlu1 %648 }
 0x1e3   : > { %9907 = vst [vmem:[#allocation32_spill] sm:$0xff] %v5846_v49 }
 0x1e9   : > { %v5850_v43 = vpop.permute.xlu0 %652 }
 0x1ea   : > { %9909 = vst [vmem:[#allocation34_spill] sm:$0xff] %v5850_v43  ;;  %v5852_v51 = vpop.permute.xlu1 %654 }
 0x1eb   : > { %9910 = vst [vmem:[#allocation35_spill] sm:$0xff] %v5852_v51  ;;  %v5875_v51 = vld [vmem:[%s5588_s5 + $0x10] sm:$0xfe] }
 0x1f1   : > { %v5854_v59 = vpop.permute.xlu0 %658 }
 0x1f2   : > { %9911 = vst [vmem:[#allocation36_spill] sm:$0xff] %v5854_v59  ;;  %v786_v48 = vpop.permute.xlu1 %785 }
 0x1f3   : > { %v793_v58 = vsel %vm244_vm1, %v786_v48, %v788_v55  ;;  %v801_v52 = vmul.f32 %v786_v48, %v5857_v39  ;;  %v806_v3 = vmul.f32 %v786_v48, %v5592_v29  ;;  %v811_v38 = vmul.f32 %v786_v48, %v5889_v40  ;;  %v5907_v48 = vld [vmem:[%s5588_s5 + $0x80] sm:$0x1] }
 0x1f4   : > { %v802_v16 = vmul.f32 %v793_v58, %v5860_v45  ;;  %v807_v27 = vmul.f32 %v793_v58, %v5634_v57 }
 0x1f5   : > { %v831_v8 = vrot.slane %v801_v52, 1  ;;  %v832_v25 = vrot.slane %v806_v3, 1 }
 0x1f6   : > { %v834_v60 = vrot.slane %v802_v16, 1  ;;  %v835_v4 = vrot.slane %v807_v27, 1  ;;  %v5879_v16 = vld [vmem:[%s5588_s5 + $0x18] sm:$0xfe] }
 0x1f7   : > { %v833_v0 = vsel %vm743_vm3, %v831_v8, %v832_v25 }
 0x1f8   : > { %856 = vrot.lane.b32.xlu2 %v833_v0, %s5509_s28  ;;  %v836_v14 = vsel %vm743_vm3, %v834_v60, %v835_v4 }
 0x1f9   : > { %858 = vrot.lane.b32.xlu0 %v836_v14, %s5509_s28  ;;  %v790_v59 = vpop.permute.xlu0 %789 }
 0x1fa   : > { %v792_v43 = vpop.permute.xlu1 %791  ;;  %v794_v52 = vsel %vm244_vm1, %v788_v55, %v790_v59 }
 0x1fb   : > { %v795_v8 = vsel %vm244_vm1, %v790_v59, %v792_v43  ;;  %v803_v0 = vmul.f32 %v794_v52, %v5875_v51  ;;  %v808_v60 = vmul.f32 %v794_v52, %v5629_v54  ;;  %v805_v3 = vmul.f32 %v792_v43, %v5872_v47  ;;  %v5892_v59 = vld [vmem:[%s5588_s5 + $0x68] sm:$0x1] }
 0x1fc   : > { %v804_v14 = vmul.f32 %v795_v8, %v5879_v16  ;;  %v809_v27 = vmul.f32 %v795_v8, %v5626_v53  ;;  %v810_v62 = vmul.f32 %v792_v43, %v5598_v33  ;;  %v812_v41 = vmul.f32 %v793_v58, %v5892_v59  ;;  %v5910_v58 = vld [vmem:[%s5588_s5 + $0x78] sm:$0x1] }
 0x1fd   : > { %v837_v34 = vrot.slane %v803_v0, 1  ;;  %v838_v49 = vrot.slane %v808_v60, 1  ;;  %v843_v42 = vrot.slane %v805_v3, 1  ;;  %v5898_v0 = vld [vmem:[%s5588_s5 + $0x70] sm:$0x1]  ;;  %v814_v31 = vmul.f32 %v795_v8, %v5910_v58 }
 0x1fe   : > { %v840_v55 = vrot.slane %v804_v14, 1  ;;  %v841_v50 = vrot.slane %v809_v27, 1  ;;  %v844_v37 = vrot.slane %v810_v62, 1  ;;  %v813_v14 = vmul.f32 %v794_v52, %v5898_v0 }
 0x1ff   : > { %v839_v36 = vsel %vm743_vm3, %v837_v34, %v838_v49  ;;  %v846_v34 = vrot.slane %v811_v38, 1  ;;  %v848_v62 = vrot.slane %v812_v41, 1  ;;  %v815_v41 = vmul.f32 %v792_v43, %v5907_v48 }
 0x200   : > { %v842_v60 = vsel %vm743_vm3, %v840_v55, %v841_v50  ;;  %860 = vrot.lane.b32.xlu1 %v839_v36, %s5509_s28  ;;  %v845_v27 = vsel %vm743_vm3, %v843_v42, %v844_v37  ;;  %v850_v3 = vrot.slane %v813_v14, 1  ;;  %v5352_v36 = vld [vmem:[%s9681_s1 + $0x41] ss:$8 sm:$0xf]  ;;  %v852_v8 = vrot.slane %v814_v31, 1 }
 0x201   : > { %862 = vrot.lane.b32.xlu2 %v842_v60, %s5509_s28  ;;  %864 = vrot.lane.b32.xlu0 %v845_v27, %s5509_s28  ;;  %v847_v55 = vsel %vm743_vm3, %v832_v25, %v846_v34  ;;  %v5353_v42 = vld [vmem:[%s9681_s1 + $0x41] ss:$8 sm:$0xf0]  ;;  %v849_v38 = vsel %vm743_vm3, %v835_v4, %v848_v62  ;;  %v854_v60 = vrot.slane %v815_v41, 1 }
 0x202   : > { %v851_v52 = vsel %vm743_vm3, %v838_v49, %v850_v3  ;;  %v5926_v25 = vor.u32 %v5353_v42, %v5352_v36  ;;  %v853_v27 = vsel %vm743_vm3, %v841_v50, %v852_v8 }
 0x203   : > { %v855_v4 = vsel %vm743_vm3, %v844_v37, %v854_v60 }
 0x204   : > { %v901_v14 = vperm.slane %v5926_v25, 0  ;;  %v902_v49 = vperm.slane %v5926_v25, 1  ;;  %v903_v43 = vperm.slane %v5926_v25, 2  ;;  %v904_v34 = vperm.slane %v5926_v25, 3 }
 0x208   : > { %866 = vrot.lane.b32.xlu1 %v847_v55, %s5509_s28 }
 0x209   : > { %868 = vrot.lane.b32.xlu2 %v849_v38, %s5509_s28  ;;  %870 = vrot.lane.b32.xlu0 %v851_v52, %s5509_s28 }
 0x210   : > { %872 = vrot.lane.b32.xlu1 %v853_v27, %s5509_s28 }
 0x211   : > { %874 = vrot.lane.b32.xlu2 %v855_v4, %s5509_s28  ;;  %905 = vrot.lane.b32.xlu0 %v901_v14, %s5508_s23 }
 0x218   : > { %907 = vrot.lane.b32.xlu1 %v902_v49, %s5508_s23 }
 0x219   : > { %909 = vrot.lane.b32.xlu2 %v903_v43, %s5508_s23  ;;  %911 = vrot.lane.b32.xlu0 %v904_v34, %s5508_s23 }
 0x252   : > { %v5940_v31 = vpop.permute.xlu2 %856 }
 0x253   : > { %9912 = vst [vmem:[#allocation37_spill] sm:$0xff] %v5940_v31 }
 0x25b   : > { %v5944_v37 = vpop.permute.xlu2 %862 }
 0x25c   : > { %9914 = vst [vmem:[#allocation39_spill] sm:$0xff] %v5944_v37 }
 0x263   : > { %v5950_v55 = vpop.permute.xlu2 %868 }
 0x264   : > { %9917 = vst [vmem:[#allocation42_spill] sm:$0xff] %v5950_v55 }
 0x26b   : > { %v5942_v50 = vpop.permute.xlu0 %858  ;;  %v5956_v38 = vpop.permute.xlu2 %874 }
 0x26c   : > { %9913 = vst [vmem:[#allocation38_spill] sm:$0xff] %v5942_v50 }
 0x26d   : > { %9920 = vst [vmem:[#allocation45_spill] sm:$0xff] %v5956_v38 }
 0x272   : > { %v5946_v62 = vpop.permute.xlu1 %860 }
 0x273   : > { %9915 = vst [vmem:[#allocation40_spill] sm:$0xff] %v5946_v62  ;;  %v5948_v3 = vpop.permute.xlu0 %864  ;;  %v910_v4 = vpop.permute.xlu2 %909 }
 0x274   : > { %9916 = vst [vmem:[#allocation41_spill] sm:$0xff] %v5948_v3 }
 0x27a   : > { %v5952_v36 = vpop.permute.xlu1 %866 }
 0x27b   : > { %9918 = vst [vmem:[#allocation43_spill] sm:$0xff] %v5952_v36  ;;  %v5954_v42 = vpop.permute.xlu0 %870 }
 0x27c   : > { %9919 = vst [vmem:[#allocation44_spill] sm:$0xff] %v5954_v42 }
 0x282   : > { %v5958_v41 = vpop.permute.xlu1 %872 }
 0x283   : > { %9921 = vst [vmem:[#allocation46_spill] sm:$0xff] %v5958_v41  ;;  %v906_v52 = vpop.permute.xlu0 %905 }
 0x284   : > { %v921_v8 = vmul.f32 %v906_v52, %v5857_v39  ;;  %v926_v60 = vmul.f32 %v906_v52, %v5592_v29  ;;  %v931_v11 = vmul.f32 %v906_v52, %v5889_v40 }
 0x286   : > { %v951_v14 = vrot.slane %v921_v8, 1  ;;  %v952_v27 = vrot.slane %v926_v60, 1 }
 0x288   : > { %v953_v49 = vsel %vm743_vm3, %v951_v14, %v952_v27 }
 0x289   : > { %976 = vrot.lane.b32.xlu1 %v953_v49, %s5508_s23 }
 0x28a   : > { %v908_v43 = vpop.permute.xlu1 %907 }
 0x28b   : > { %v913_v34 = vsel %vm331_vm0, %v906_v52, %v908_v43  ;;  %v914_v31 = vsel %vm331_vm0, %v908_v43, %v910_v4  ;;  %v912_v41 = vpop.permute.xlu0 %911 }
 0x28c   : > { %v922_v50 = vmul.f32 %v913_v34, %v5860_v45  ;;  %v927_v38 = vmul.f32 %v913_v34, %v5634_v57  ;;  %v923_v42 = vmul.f32 %v914_v31, %v5875_v51  ;;  %v915_v8 = vsel %vm331_vm0, %v910_v4, %v912_v41 }
 0x28d   : > { %v928_v60 = vmul.f32 %v914_v31, %v5629_v54  ;;  %v924_v14 = vmul.f32 %v915_v8, %v5879_v16  ;;  %v929_v49 = vmul.f32 %v915_v8, %v5626_v53  ;;  %v925_v55 = vmul.f32 %v912_v41, %v5872_v47 }
 0x28e   : > { %v954_v36 = vrot.slane %v922_v50, 1  ;;  %v955_v3 = vrot.slane %v927_v38, 1  ;;  %v957_v43 = vrot.slane %v923_v42, 1  ;;  %v930_v37 = vmul.f32 %v912_v41, %v5598_v33 }
 0x28f   : > { %v958_v62 = vrot.slane %v928_v60, 1  ;;  %v960_v32 = vrot.slane %v924_v14, 1  ;;  %v961_v35 = vrot.slane %v929_v49, 1  ;;  %v932_v30 = vmul.f32 %v913_v34, %v5892_v59 }
 0x290   : > { %v956_v13 = vsel %vm743_vm3, %v954_v36, %v955_v3  ;;  %v963_v42 = vrot.slane %v925_v55, 1  ;;  %v964_v38 = vrot.slane %v930_v37, 1  ;;  %v966_v60 = vrot.slane %v931_v11, 1 }
 0x291   : > { %v959_v4 = vsel %vm743_vm3, %v957_v43, %v958_v62  ;;  %978 = vrot.lane.b32.xlu2 %v956_v13, %s5508_s23  ;;  %v962_v50 = vsel %vm743_vm3, %v960_v32, %v961_v35  ;;  %v968_v14 = vrot.slane %v932_v30, 1  ;;  %v933_v49 = vmul.f32 %v914_v31, %v5898_v0 }
 0x292   : > { %980 = vrot.lane.b32.xlu0 %v959_v4, %s5508_s23  ;;  %982 = vrot.lane.b32.xlu1 %v962_v50, %s5508_s23  ;;  %v965_v36 = vsel %vm743_vm3, %v963_v42, %v964_v38  ;;  %v934_v52 = vmul.f32 %v915_v8, %v5910_v58  ;;  %v967_v34 = vsel %vm743_vm3, %v952_v27, %v966_v60 }
 0x293   : > { %v969_v13 = vsel %vm743_vm3, %v955_v3, %v968_v14  ;;  %v935_v32 = vmul.f32 %v912_v41, %v5907_v48  ;;  %v970_v11 = vrot.slane %v933_v49, 1  ;;  %v1020_v3 = vrot.slane %v5926_v25, 4 }
 0x294   : > { %v972_v30 = vrot.slane %v934_v52, 1 }
 0x295   : > { %v974_v37 = vrot.slane %v935_v32, 1  ;;  %v971_v55 = vsel %vm743_vm3, %v958_v62, %v970_v11  ;;  %v1022_v41 = vperm.slane %v1020_v3, 1  ;;  %v1021_v27 = vperm.slane %v1020_v3, 0 }
 0x296   : > { %v973_v31 = vsel %vm743_vm3, %v961_v35, %v972_v30  ;;  %v1023_v43 = vperm.slane %v1020_v3, 2  ;;  %v1024_v35 = vperm.slane %v1020_v3, 3 }
 0x297   : > { %v975_v8 = vsel %vm743_vm3, %v964_v38, %v974_v37 }
 0x299   : > { %984 = vrot.lane.b32.xlu2 %v965_v36, %s5508_s23 }
 0x29a   : > { %986 = vrot.lane.b32.xlu0 %v967_v34, %s5508_s23  ;;  %988 = vrot.lane.b32.xlu1 %v969_v13, %s5508_s23 }
 0x2a1   : > { %990 = vrot.lane.b32.xlu2 %v971_v55, %s5508_s23 }
 0x2a2   : > { %992 = vrot.lane.b32.xlu0 %v973_v31, %s5508_s23  ;;  %994 = vrot.lane.b32.xlu1 %v975_v8, %s5508_s23 }
 0x2a9   : > { %1025 = vrot.lane.b32.xlu2 %v1021_v27, %s5509_s28 }
 0x2aa   : > { %1027 = vrot.lane.b32.xlu0 %v1022_v41, %s5509_s28  ;;  %1029 = vrot.lane.b32.xlu1 %v1023_v43, %s5509_s28 }
 0x2b1   : > { %1031 = vrot.lane.b32.xlu2 %v1024_v35, %s5509_s28 }
 0x2eb   : > { %v6003_v62 = vpop.permute.xlu2 %978 }
 0x2ec   : > { %9922 = vst [vmem:[#allocation47_spill] sm:$0xff] %v6003_v62 }
 0x2f3   : > { %v6005_v4 = vpop.permute.xlu2 %984 }
 0x2f4   : > { %9923 = vst [vmem:[#allocation48_spill] sm:$0xff] %v6005_v4 }
 0x2fb   : > { %v6007_v50 = vpop.permute.xlu1 %976  ;;  %v6009_v25 = vpop.permute.xlu2 %990 }
 0x2fc   : > { %9924 = vst [vmem:[#allocation49_spill] sm:$0xff] %v6007_v50 }
 0x2fd   : > { %9925 = vst [vmem:[#allocation50_spill] sm:$0xff] %v6009_v25 }
 0x303   : > { %v1026_v38 = vpop.permute.xlu2 %1025 }
 0x304   : > { %v6011_v42 = vpop.permute.xlu0 %980  ;;  %v6013_v60 = vpop.permute.xlu1 %982  ;;  %v1041_v14 = vmul.f32 %v1026_v38, %v5857_v39  ;;  %v1046_v36 = vmul.f32 %v1026_v38, %v5592_v29 }
 0x305   : > { %9926 = vst [vmem:[#allocation51_spill] sm:$0xff] %v6011_v42 }
 0x306   : > { %9927 = vst [vmem:[#allocation52_spill] sm:$0xff] %v6013_v60  ;;  %v1071_v49 = vrot.slane %v1041_v14, 1  ;;  %v1072_v52 = vrot.slane %v1046_v36, 1 }
 0x308   : > { %v1073_v34 = vsel %vm743_vm3, %v1071_v49, %v1072_v52 }
 0x309   : > { %1096 = vrot.lane.b32.xlu0 %v1073_v34, %s5507_s22 }
 0x30b   : > { %v1032_v55 = vpop.permute.xlu2 %1031 }
 0x30c   : > { %v6019_v13 = vpop.permute.xlu0 %986  ;;  %v6021_v32 = vpop.permute.xlu1 %988  ;;  %v1045_v41 = vmul.f32 %v1032_v55, %v5872_v47  ;;  %v1050_v14 = vmul.f32 %v1032_v55, %v5598_v33 }
 0x30d   : > { %9928 = vst [vmem:[#allocation53_spill] sm:$0xff] %v6019_v13 }
 0x30e   : > { %9929 = vst [vmem:[#allocation54_spill] sm:$0xff] %v6021_v32  ;;  %v1084_v42 = vrot.slane %v1050_v14, 1 }
 0x314   : > { %v6023_v11 = vpop.permute.xlu0 %992  ;;  %v6025_v30 = vpop.permute.xlu1 %994 }
 0x315   : > { %9930 = vst [vmem:[#allocation55_spill] sm:$0xff] %v6023_v11 }
 0x316   : > { %9931 = vst [vmem:[#allocation56_spill] sm:$0xff] %v6025_v30 }
 0x31c   : > { %v1028_v37 = vpop.permute.xlu0 %1027  ;;  %v1030_v31 = vpop.permute.xlu1 %1029 }
 0x31d   : > { %v1033_v39 = vsel %vm293_vm2, %v1026_v38, %v1028_v37  ;;  %v1034_v29 = vsel %vm293_vm2, %v1028_v37, %v1030_v31  ;;  %v1035_v35 = vsel %vm293_vm2, %v1030_v31, %v1032_v55  ;;  %v1051_v31 = vmul.f32 %v1026_v38, %v5889_v40 }
 0x31e   : > { %v1042_v8 = vmul.f32 %v1033_v39, %v5860_v45  ;;  %v1047_v3 = vmul.f32 %v1033_v39, %v5634_v57  ;;  %v1043_v27 = vmul.f32 %v1034_v29, %v5875_v51  ;;  %v1048_v43 = vmul.f32 %v1034_v29, %v5629_v54 }
 0x31f   : > { %v1044_v34 = vmul.f32 %v1035_v35, %v5879_v16  ;;  %v1049_v37 = vmul.f32 %v1035_v35, %v5626_v53  ;;  %v1052_v25 = vmul.f32 %v1033_v39, %v5892_v59  ;;  %v1054_v40 = vmul.f32 %v1035_v35, %v5910_v58 }
 0x320   : > { %v1074_v36 = vrot.slane %v1042_v8, 1  ;;  %v1075_v49 = vrot.slane %v1047_v3, 1  ;;  %v1077_v50 = vrot.slane %v1043_v27, 1  ;;  %v1078_v62 = vrot.slane %v1048_v43, 1 }
 0x321   : > { %v1080_v11 = vrot.slane %v1044_v34, 1  ;;  %v1081_v13 = vrot.slane %v1049_v37, 1  ;;  %v1083_v3 = vrot.slane %v1045_v41, 1  ;;  %v1086_v27 = vrot.slane %v1051_v31, 1 }
 0x322   : > { %v1076_v30 = vsel %vm743_vm3, %v1074_v36, %v1075_v49  ;;  %v1079_v32 = vsel %vm743_vm3, %v1077_v50, %v1078_v62  ;;  %v1088_v36 = vrot.slane %v1052_v25, 1  ;;  %v1053_v50 = vmul.f32 %v1034_v29, %v5898_v0  ;;  %v5355_v25 = vld [vmem:[%s9681_s1 + $0x81] ss:$8 sm:$0xf0] }
 0x323   : > { %1098 = vrot.lane.b32.xlu1 %v1076_v30, %s5507_s22  ;;  %1100 = vrot.lane.b32.xlu2 %v1079_v32, %s5507_s22  ;;  %v1082_v8 = vsel %vm743_vm3, %v1080_v11, %v1081_v13  ;;  %v1085_v43 = vsel %vm743_vm3, %v1083_v3, %v1084_v42  ;;  %v1087_v30 = vsel %vm743_vm3, %v1072_v52, %v1086_v27  ;;  %v5354_v11 = vld [vmem:[%s9681_s1 + $0x81] ss:$8 sm:$0xf]  ;;  %v1092_v39 = vrot.slane %v1054_v40, 1 }
 0x324   : > { %1102 = vrot.lane.b32.xlu0 %v1082_v8, %s5507_s22  ;;  %v1089_v38 = vsel %vm743_vm3, %v1075_v49, %v1088_v36  ;;  %v1055_v32 = vmul.f32 %v1032_v55, %v5907_v48  ;;  %v1090_v52 = vrot.slane %v1053_v50, 1  ;;  %v6061_v29 = vor.u32 %v5355_v25, %v5354_v11 }
 0x325   : > { %v1093_v55 = vsel %vm743_vm3, %v1081_v13, %v1092_v39 }
 0x326   : > { %9932 = vst [vmem:[#allocation57_spill] sm:$0xff] %v6061_v29  ;;  %v1094_v41 = vrot.slane %v1055_v32, 1  ;;  %v1091_v35 = vsel %vm743_vm3, %v1078_v62, %v1090_v52  ;;  %v1209_v14 = vrot.slane %v6061_v29, 4 }
 0x328   : > { %v1095_v49 = vsel %vm743_vm3, %v1084_v42, %v1094_v41  ;;  %v1210_v34 = vperm.slane %v1209_v14, 0  ;;  %v1211_v37 = vperm.slane %v1209_v14, 1  ;;  %v1212_v31 = vperm.slane %v1209_v14, 2 }
 0x329   : > { %v1213_v62 = vperm.slane %v1209_v14, 3 }
 0x32b   : > { %1104 = vrot.lane.b32.xlu1 %v1085_v43, %s5507_s22  ;;  %1106 = vrot.lane.b32.xlu2 %v1087_v30, %s5507_s22 }
 0x32c   : > { %1108 = vrot.lane.b32.xlu0 %v1089_v38, %s5507_s22 }
 0x333   : > { %1110 = vrot.lane.b32.xlu1 %v1091_v35, %s5507_s22  ;;  %1112 = vrot.lane.b32.xlu2 %v1093_v55, %s5507_s22 }
 0x334   : > { %1114 = vrot.lane.b32.xlu0 %v1095_v49, %s5507_s22 }
 0x33b   : > { %1214 = vrot.lane.b32.xlu1 %v1210_v34, %s5507_s22  ;;  %1216 = vrot.lane.b32.xlu2 %v1211_v37, %s5507_s22 }
 0x33c   : > { %1218 = vrot.lane.b32.xlu0 %v1212_v31, %s5507_s22 }
 0x343   : > { %1220 = vrot.lane.b32.xlu1 %v1213_v62, %s5507_s22 }
 0x37b   : > { %v6074_v13 = vpop.permute.xlu0 %1096 }
 0x37c   : > { %9933 = vst [vmem:[#allocation58_spill] sm:$0xff] %v6074_v13 }
 0x37d   : > { %v6076_v8 = vpop.permute.xlu2 %1100 }
 0x37e   : > { %9934 = vst [vmem:[#allocation59_spill] sm:$0xff] %v6076_v8 }
 0x385   : > { %v6082_v27 = vpop.permute.xlu2 %1106 }
 0x386   : > { %9937 = vst [vmem:[#allocation62_spill] sm:$0xff] %v6082_v27 }
 0x38d   : > { %v6088_v50 = vpop.permute.xlu2 %1112 }
 0x38e   : > { %9940 = vst [vmem:[#allocation65_spill] sm:$0xff] %v6088_v50  ;;  %v6105_v50 = vld [vmem:[%s5588_s5 + $0x28] sm:$0xfe] }
 0x395   : > { %v6078_v3 = vpop.permute.xlu1 %1098  ;;  %v1217_v38 = vpop.permute.xlu2 %1216 }
 0x396   : > { %9935 = vst [vmem:[#allocation60_spill] sm:$0xff] %v6078_v3  ;;  %v6080_v42 = vpop.permute.xlu0 %1102 }
 0x397   : > { %9936 = vst [vmem:[#allocation61_spill] sm:$0xff] %v6080_v42 }
 0x39d   : > { %v6084_v43 = vpop.permute.xlu1 %1104 }
 0x39e   : > { %9938 = vst [vmem:[#allocation63_spill] sm:$0xff] %v6084_v43  ;;  %v6086_v36 = vpop.permute.xlu0 %1108 }
 0x39f   : > { %9939 = vst [vmem:[#allocation64_spill] sm:$0xff] %v6086_v36 }
 0x3a5   : > { %v6090_v30 = vpop.permute.xlu1 %1110 }
 0x3a6   : > { %9941 = vst [vmem:[#allocation66_spill] sm:$0xff] %v6090_v30  ;;  %v6092_v40 = vpop.permute.xlu0 %1114 }
 0x3a7   : > { %9942 = vst [vmem:[#allocation67_spill] sm:$0xff] %v6092_v40 }
 0x3ad   : > { %v1215_v32 = vpop.permute.xlu1 %1214 }
 0x3ae   : > { %v1222_v11 = vsel %vm244_vm1, %v1215_v32, %v1217_v38  ;;  %v1230_v25 = vmul.f32 %v1215_v32, %v5860_v45  ;;  %v1235_v52 = vmul.f32 %v1215_v32, %v5634_v57  ;;  %v1219_v39 = vpop.permute.xlu0 %1218 }
 0x3af   : > { %v1231_v41 = vmul.f32 %v1222_v11, %v5875_v51  ;;  %v1236_v35 = vmul.f32 %v1222_v11, %v5629_v54  ;;  %v1223_v55 = vsel %vm244_vm1, %v1217_v38, %v1219_v39 }
 0x3b0   : > { %v1260_v14 = vrot.slane %v1230_v25, 1  ;;  %v1261_v49 = vrot.slane %v1235_v52, 1  ;;  %v1232_v34 = vmul.f32 %v1223_v55, %v5879_v16  ;;  %v1237_v37 = vmul.f32 %v1223_v55, %v5626_v53 }
 0x3b1   : > { %v1263_v31 = vrot.slane %v1231_v41, 1  ;;  %v1264_v13 = vrot.slane %v1236_v35, 1  ;;  %v1240_v52 = vmul.f32 %v1215_v32, %v5892_v59  ;;  %v1242_v30 = vmul.f32 %v1223_v55, %v5910_v58 }
 0x3b2   : > { %v1262_v62 = vsel %vm743_vm3, %v1260_v14, %v1261_v49  ;;  %v1266_v3 = vrot.slane %v1232_v34, 1  ;;  %v1267_v40 = vrot.slane %v1237_v37, 1 }
 0x3b3   : > { %1285 = vrot.lane.b32.xlu2 %v1262_v62, %s5509_s28  ;;  %v1265_v54 = vsel %vm743_vm3, %v1263_v31, %v1264_v13 }
 0x3b4   : > { %v1268_v38 = vsel %vm743_vm3, %v1266_v3, %v1267_v40  ;;  %1287 = vrot.lane.b32.xlu0 %v1265_v54, %s5509_s28  ;;  %v1275_v54 = vrot.slane %v1240_v52, 1  ;;  %v1279_v52 = vrot.slane %v1242_v30, 1 }
 0x3b5   : > { %v1221_v25 = vpop.permute.xlu1 %1220  ;;  %1289 = vrot.lane.b32.xlu1 %v1268_v38, %s5509_s28  ;;  %v1241_v38 = vmul.f32 %v1222_v11, %v5898_v0 }
 0x3b6   : > { %v1224_v53 = vsel %vm244_vm1, %v1219_v39, %v1221_v25  ;;  %v1234_v41 = vmul.f32 %v1221_v25, %v6105_v50  ;;  %v1239_v35 = vmul.f32 %v1221_v25, %v5707_v46  ;;  %v1276_v27 = vsel %vm743_vm3, %v1261_v49, %v1275_v54 }
 0x3b7   : > { %v1233_v14 = vmul.f32 %v1224_v53, %v5872_v47  ;;  %v1238_v34 = vmul.f32 %v1224_v53, %v5598_v33  ;;  %v1243_v33 = vmul.f32 %v1224_v53, %v5907_v48  ;;  %v1280_v55 = vsel %vm743_vm3, %v1267_v40, %v1279_v52 }
 0x3b8   : > { %v1272_v37 = vrot.slane %v1234_v41, 1  ;;  %v1273_v3 = vrot.slane %v1239_v35, 1  ;;  %v1277_v41 = vrot.slane %v1241_v38, 1  ;;  %v6127_v35 = vld [vmem:[%s5588_s5 + $0x88] sm:$0x1] }
 0x3b9   : > { %v1269_v31 = vrot.slane %v1233_v14, 1  ;;  %v1270_v62 = vrot.slane %v1238_v34, 1  ;;  %v1281_v14 = vrot.slane %v1243_v33, 1  ;;  %v1244_v34 = vmul.f32 %v1221_v25, %v6127_v35 }
 0x3ba   : > { %v1274_v32 = vsel %vm743_vm3, %v1272_v37, %v1273_v3  ;;  %v1278_v11 = vsel %vm743_vm3, %v1264_v13, %v1277_v41 }
 0x3bb   : > { %v1271_v39 = vsel %vm743_vm3, %v1269_v31, %v1270_v62  ;;  %v1282_v49 = vsel %vm743_vm3, %v1270_v62, %v1281_v14  ;;  %v1283_v30 = vrot.slane %v1244_v34, 1 }
 0x3bc   : > { %1291 = vrot.lane.b32.xlu2 %v1271_v39, %s5509_s28  ;;  %1293 = vrot.lane.b32.xlu0 %v1274_v32, %s5509_s28 }
 0x3bd   : > { %1295 = vrot.lane.b32.xlu1 %v1276_v27, %s5509_s28  ;;  %v5356_v27 = vld [vmem:[%s9681_s1 + $0xc1] ss:$8 sm:$0xf]  ;;  %v1284_v13 = vsel %vm743_vm3, %v1273_v3, %v1283_v30 }
 0x3be   : > { %v1330_v53 = vperm.slane %v5356_v27, 0  ;;  %v1331_v37 = vperm.slane %v5356_v27, 1  ;;  %v1332_v40 = vperm.slane %v5356_v27, 2  ;;  %v1333_v25 = vperm.slane %v5356_v27, 3 }
 0x3c4   : > { %1297 = vrot.lane.b32.xlu2 %v1278_v11, %s5509_s28  ;;  %1299 = vrot.lane.b32.xlu0 %v1280_v55, %s5509_s28 }
 0x3c5   : > { %1301 = vrot.lane.b32.xlu1 %v1282_v49, %s5509_s28 }
 0x3cc   : > { %1303 = vrot.lane.b32.xlu2 %v1284_v13, %s5509_s28  ;;  %1334 = vrot.lane.b32.xlu0 %v1330_v53, %s5508_s23 }
 0x3cd   : > { %1336 = vrot.lane.b32.xlu1 %v1331_v37, %s5508_s23  ;;  %v6171_v37 = vld [vmem:[%s5588_s5 + $0x48] sm:$0xff] }
 0x3d4   : > { %1338 = vrot.lane.b32.xlu2 %v1332_v40, %s5508_s23  ;;  %1340 = vrot.lane.b32.xlu0 %v1333_v25, %s5508_s23 }
 0x40d   : > { %v6145_v31 = vpop.permute.xlu2 %1285 }
 0x40e   : > { %9943 = vst [vmem:[#allocation68_spill] sm:$0xff] %v6145_v31 }
 0x416   : > { %v6147_v62 = vpop.permute.xlu2 %1291 }
 0x417   : > { %9944 = vst [vmem:[#allocation69_spill] sm:$0xff] %v6147_v62 }
 0x41e   : > { %v6153_v32 = vpop.permute.xlu2 %1297 }
 0x41f   : > { %9947 = vst [vmem:[#allocation72_spill] sm:$0xff] %v6153_v32 }
 0x426   : > { %v6149_v54 = vpop.permute.xlu0 %1287  ;;  %v6159_v33 = vpop.permute.xlu2 %1303 }
 0x427   : > { %9945 = vst [vmem:[#allocation70_spill] sm:$0xff] %v6149_v54  ;;  %v6151_v3 = vpop.permute.xlu1 %1289  ;;  %v6176_v54 = vld [vmem:[%s5588_s5 + $0x40] sm:$0xff] }
 0x428   : > { %9946 = vst [vmem:[#allocation71_spill] sm:$0xff] %v6151_v3  ;;  %v6293_v3 = vld [vmem:[%s5588_s5 + $0x68] sm:$0x3] }
 0x429   : > { %9950 = vst [vmem:[#allocation75_spill] sm:$0xff] %v6159_v33 }
 0x42e   : > { %v6155_v38 = vpop.permute.xlu0 %1293  ;;  %v1339_v14 = vpop.permute.xlu2 %1338 }
 0x42f   : > { %9948 = vst [vmem:[#allocation73_spill] sm:$0xff] %v6155_v38  ;;  %v6157_v39 = vpop.permute.xlu1 %1295 }
 0x430   : > { %9949 = vst [vmem:[#allocation74_spill] sm:$0xff] %v6157_v39 }
 0x436   : > { %v6161_v41 = vpop.permute.xlu0 %1299 }
 0x437   : > { %9951 = vst [vmem:[#allocation76_spill] sm:$0xff] %v6161_v41  ;;  %v6163_v52 = vpop.permute.xlu1 %1301 }
 0x438   : > { %9952 = vst [vmem:[#allocation77_spill] sm:$0xff] %v6163_v52 }
 0x43e   : > { %v1335_v11 = vpop.permute.xlu0 %1334 }
 0x43f   : > { %v1337_v34 = vpop.permute.xlu1 %1336  ;;  %v1350_v55 = vmul.f32 %v1335_v11, %v5860_v45  ;;  %v1355_v49 = vmul.f32 %v1335_v11, %v5634_v57 }
 0x440   : > { %v1342_v27 = vsel %vm331_vm0, %v1335_v11, %v1337_v34  ;;  %v1343_v30 = vsel %vm331_vm0, %v1337_v34, %v1339_v14 }
 0x441   : > { %v1352_v53 = vmul.f32 %v1343_v30, %v5879_v16  ;;  %v1357_v13 = vmul.f32 %v6171_v37, %v1343_v30  ;;  %v1380_v40 = vrot.slane %v1350_v55, 1  ;;  %v1381_v25 = vrot.slane %v1355_v49, 1 }
 0x442   : > { %v1351_v31 = vmul.f32 %v1342_v27, %v5875_v51  ;;  %v1356_v45 = vmul.f32 %v6176_v54, %v1342_v27  ;;  %v1360_v55 = vmul.f32 %v1335_v11, %v5892_v59 }
 0x443   : > { %v1386_v52 = vrot.slane %v1352_v53, 1  ;;  %v1387_v57 = vrot.slane %v1357_v13, 1  ;;  %v1382_v33 = vsel %vm743_vm3, %v1380_v40, %v1381_v25 }
 0x444   : > { %v1383_v34 = vrot.slane %v1351_v31, 1  ;;  %v1384_v41 = vrot.slane %v1356_v45, 1  ;;  %1405 = vrot.lane.b32.xlu1 %v1382_v33, %s5508_s23  ;;  %v6191_v33 = vld [vmem:[%s5588_s5 + $0x50] sm:$0xff]  ;;  %v1395_v45 = vrot.slane %v1360_v55, 1 }
 0x445   : > { %v1388_v16 = vsel %vm743_vm3, %v1386_v52, %v1387_v57  ;;  %v5357_v55 = vld [vmem:[%s9681_s1 + $0x2] ss:$8 sm:$0xf] }
 0x446   : > { %v1385_v49 = vsel %vm743_vm3, %v1383_v34, %v1384_v41  ;;  %1409 = vrot.lane.b32.xlu0 %v1388_v16, %s5508_s23  ;;  %v1341_v51 = vpop.permute.xlu0 %1340 }
 0x447   : > { %1407 = vrot.lane.b32.xlu2 %v1385_v49, %s5508_s23  ;;  %v1344_v53 = vsel %vm331_vm0, %v1339_v14, %v1341_v51  ;;  %v1354_v13 = vmul.f32 %v1341_v51, %v6105_v50  ;;  %v1359_v31 = vmul.f32 %v1341_v51, %v5707_v46  ;;  %v1361_v14 = vmul.f32 %v1342_v27, %v5898_v0  ;;  %v5358_v0 = vld [vmem:[%s9681_s1 + $0x2] ss:$8 sm:$0xf0] }
 0x448   : > { %v1353_v40 = vmul.f32 %v1344_v53, %v5872_v47  ;;  %v1358_v52 = vmul.f32 %v6191_v33, %v1344_v53  ;;  %v1396_v46 = vsel %vm743_vm3, %v1381_v25, %v1395_v45  ;;  %v1363_v47 = vmul.f32 %v1344_v53, %v5907_v48 }
 0x449   : > { %v1392_v59 = vrot.slane %v1354_v13, 1  ;;  %v1393_v11 = vrot.slane %v1359_v31, 1  ;;  %v1362_v50 = vmul.f32 %v1343_v30, %v5910_v58  ;;  %v1397_v27 = vrot.slane %v1361_v14, 1 }
 0x44a   : > { %v1389_v34 = vrot.slane %v1353_v40, 1  ;;  %v1390_v16 = vrot.slane %v1358_v52, 1  ;;  %v1401_v13 = vrot.slane %v1363_v47, 1  ;;  %v6209_v25 = vor.u32 %v5358_v0, %v5357_v55  ;;  %v6240_v47 = vld [vmem:[%s5588_s5 + $0x30] sm:$0xff] }
 0x44b   : > { %v1394_v39 = vsel %vm743_vm3, %v1392_v59, %v1393_v11  ;;  %v1399_v31 = vrot.slane %v1362_v50, 1  ;;  %v1398_v48 = vsel %vm743_vm3, %v1384_v41, %v1397_v27  ;;  %v1364_v58 = vmul.f32 %v1341_v51, %v6127_v35 }
 0x44c   : > { %v1391_v49 = vsel %vm743_vm3, %v1389_v34, %v1390_v16  ;;  %9953 = vst [vmem:[#allocation78_spill] sm:$0xff] %v6209_v25  ;;  %v1545_v53 = vrot.slane %v6209_v25, 4 }
 0x44d   : > { %1411 = vrot.lane.b32.xlu1 %v1391_v49, %s5508_s23  ;;  %v1400_v30 = vsel %vm743_vm3, %v1387_v57, %v1399_v31  ;;  %v1403_v40 = vrot.slane %v1364_v58, 1  ;;  %v6236_v49 = vld [vmem:[%s5588_s5] sm:$0xfc] }
 0x44e   : > { %1415 = vrot.lane.b32.xlu0 %v1396_v46, %s5508_s23  ;;  %v1547_v52 = vperm.slane %v1545_v53, 1  ;;  %v1546_v59 = vperm.slane %v1545_v53, 0  ;;  %v1548_v35 = vperm.slane %v1545_v53, 2  ;;  %v1549_v57 = vperm.slane %v1545_v53, 3 }
 0x44f   : > { %1413 = vrot.lane.b32.xlu2 %v1394_v39, %s5508_s23  ;;  %v1402_v39 = vsel %vm743_vm3, %v1390_v16, %v1401_v13  ;;  %v1404_v41 = vsel %vm743_vm3, %v1393_v11, %v1403_v40  ;;  %v6257_v40 = vld [vmem:[%s5588_s5 + $0x8] sm:$0xfc] }
 0x455   : > { %1417 = vrot.lane.b32.xlu1 %v1398_v48, %s5508_s23 }
 0x456   : > { %1421 = vrot.lane.b32.xlu0 %v1402_v39, %s5508_s23 }
 0x457   : > { %1419 = vrot.lane.b32.xlu2 %v1400_v30, %s5508_s23 }
 0x45d   : > { %1423 = vrot.lane.b32.xlu1 %v1404_v41, %s5508_s23 }
 0x45e   : > { %1552 = vrot.lane.b32.xlu0 %v1547_v52, %s5507_s22 }
 0x45f   : > { %1550 = vrot.lane.b32.xlu2 %v1546_v59, %s5507_s22  ;;  %v6260_v59 = vld [vmem:[%s5588_s5 + $0x20] sm:$0xfc] }
 0x465   : > { %1554 = vrot.lane.b32.xlu1 %v1548_v35, %s5507_s22  ;;  %v6264_v35 = vld [vmem:[%s5588_s5 + $0x38] sm:$0xff] }
 0x467   : > { %1556 = vrot.lane.b32.xlu2 %v1549_v57, %s5507_s22 }
 0x4a1   : > { %v6225_v51 = vpop.permute.xlu2 %1407 }
 0x4a2   : > { %9954 = vst [vmem:[#allocation79_spill] sm:$0xff] %v6225_v51 }
 0x4a9   : > { %v6227_v45 = vpop.permute.xlu2 %1413 }
 0x4aa   : > { %9955 = vst [vmem:[#allocation80_spill] sm:$0xff] %v6227_v45 }
 0x4b1   : > { %v6229_v34 = vpop.permute.xlu2 %1419 }
 0x4b2   : > { %9956 = vst [vmem:[#allocation81_spill] sm:$0xff] %v6229_v34 }
 0x4b6   : > { %v6231_v11 = vpop.permute.xlu1 %1405 }
 0x4b7   : > { %9957 = vst [vmem:[#allocation82_spill] sm:$0xff] %v6231_v11 }
 0x4b8   : > { %v6233_v16 = vpop.permute.xlu0 %1409 }
 0x4b9   : > { %9958 = vst [vmem:[#allocation83_spill] sm:$0xff] %v6233_v16  ;;  %v1551_v14 = vpop.permute.xlu2 %1550 }
 0x4ba   : > { %v1566_v46 = vmul.f32 %v1551_v14, %v6236_v49  ;;  %v1571_v50 = vmul.f32 %v6240_v47, %v1551_v14 }
 0x4bc   : > { %v1596_v55 = vrot.slane %v1566_v46, 2  ;;  %v1597_v0 = vrot.slane %v1571_v50, 2 }
 0x4be   : > { %v1598_v27 = vsel %vm1508_vm4, %v1596_v55, %v1597_v0 }
 0x4bf   : > { %v6244_v13 = vpop.permute.xlu1 %1411  ;;  %1621 = vrot.lane.b32.xlu0 %v1598_v27, %s5509_s28 }
 0x4c0   : > { %9959 = vst [vmem:[#allocation84_spill] sm:$0xff] %v6244_v13  ;;  %v6247_v31 = vpop.permute.xlu0 %1415 }
 0x4c1   : > { %9960 = vst [vmem:[#allocation85_spill] sm:$0xff] %v6247_v31  ;;  %v1557_v52 = vpop.permute.xlu2 %1556 }
 0x4c2   : > { %v1570_v55 = vmul.f32 %v1557_v52, %v6260_v59  ;;  %v1575_v27 = vmul.f32 %v6191_v33, %v1557_v52 }
 0x4c4   : > { %v1608_v31 = vrot.slane %v1570_v55, 2  ;;  %v6285_v55 = vld [vmem:[%s5588_s5 + $0x60] sm:$0x3] }
 0x4c5   : > { %v1576_v38 = vmul.f32 %v1551_v14, %v6285_v55 }
 0x4c7   : > { %v6249_v48 = vpop.permute.xlu1 %1417 }
 0x4c8   : > { %9961 = vst [vmem:[#allocation86_spill] sm:$0xff] %v6249_v48  ;;  %v6251_v58 = vpop.permute.xlu0 %1421 }
 0x4c9   : > { %9962 = vst [vmem:[#allocation87_spill] sm:$0xff] %v6251_v58 }
 0x4cf   : > { %v6253_v39 = vpop.permute.xlu1 %1423 }
 0x4d0   : > { %9963 = vst [vmem:[#allocation88_spill] sm:$0xff] %v6253_v39  ;;  %v1553_v30 = vpop.permute.xlu0 %1552  ;;  %v6272_v39 = vld [vmem:[%s5588_s5 + $0x10] sm:$0xfc] }
 0x4d1   : > { %v1558_v53 = vsel %vm244_vm1, %v1551_v14, %v1553_v30  ;;  %v6305_v14 = vld [vmem:[%s5588_s5 + $0x80] sm:$0x3] }
 0x4d2   : > { %v1567_v41 = vmul.f32 %v1558_v53, %v6257_v40  ;;  %v1572_v57 = vmul.f32 %v6264_v35, %v1558_v53 }
 0x4d4   : > { %v1599_v46 = vrot.slane %v1567_v41, 2  ;;  %v1600_v50 = vrot.slane %v1572_v57, 2  ;;  %v1609_v41 = vrot.slane %v1575_v27, 2  ;;  %v6277_v57 = vld [vmem:[%s5588_s5 + $0x18] sm:$0xfc] }
 0x4d5   : > { %v6288_v27 = vld [vmem:[%s5588_s5 + $0x70] sm:$0x3] }
 0x4d6   : > { %v1601_v11 = vsel %vm1508_vm4, %v1599_v46, %v1600_v50 }
 0x4d7   : > { %1623 = vrot.lane.b32.xlu1 %v1601_v11, %s5509_s28  ;;  %v1555_v51 = vpop.permute.xlu1 %1554 }
 0x4d8   : > { %v1559_v58 = vsel %vm244_vm1, %v1553_v30, %v1555_v51  ;;  %v1560_v34 = vsel %vm244_vm1, %v1555_v51, %v1557_v52  ;;  %v1610_v30 = vsel %vm1508_vm4, %v1608_v31, %v1609_v41  ;;  %v1577_v31 = vmul.f32 %v1558_v53, %v6293_v3 }
 0x4d9   : > { %v1568_v48 = vmul.f32 %v1559_v58, %v6272_v39  ;;  %v1573_v46 = vmul.f32 %v6176_v54, %v1559_v58  ;;  %v1569_v11 = vmul.f32 %v1560_v34, %v6277_v57  ;;  %v1574_v45 = vmul.f32 %v6171_v37, %v1560_v34 }
 0x4da   : > { %v1578_v62 = vmul.f32 %v1559_v58, %v6288_v27  ;;  %v5359_v58 = vld [vmem:[%s9681_s1 + $0x42] ss:$8 sm:$0xf] }
 0x4db   : > { %v1602_v16 = vrot.slane %v1568_v48, 2  ;;  %v1603_v13 = vrot.slane %v1573_v46, 2  ;;  %v1605_v32 = vrot.slane %v1569_v11, 2  ;;  %v1606_v51 = vrot.slane %v1574_v45, 2 }
 0x4dc   : > { %v1611_v45 = vrot.slane %v1576_v38, 2  ;;  %v1615_v46 = vrot.slane %v1578_v62, 2  ;;  %v1613_v11 = vrot.slane %v1577_v31, 2 }
 0x4dd   : > { %v1604_v25 = vsel %vm1508_vm4, %v1602_v16, %v1603_v13  ;;  %v1607_v48 = vsel %vm1508_vm4, %v1605_v32, %v1606_v51  ;;  %v6302_v16 = vld [vmem:[%s5588_s5 + $0x78] sm:$0x3]  ;;  %v5360_v32 = vld [vmem:[%s9681_s1 + $0x42] ss:$8 sm:$0xf0] }
 0x4de   : > { %1625 = vrot.lane.b32.xlu2 %v1604_v25, %s5509_s28  ;;  %1627 = vrot.lane.b32.xlu0 %v1607_v48, %s5509_s28  ;;  %v1612_v25 = vsel %vm1508_vm4, %v1597_v0, %v1611_v45  ;;  %v1579_v53 = vmul.f32 %v1560_v34, %v6302_v16  ;;  %v1616_v62 = vsel %vm1508_vm4, %v1603_v13, %v1615_v46 }
 0x4df   : > { %1629 = vrot.lane.b32.xlu1 %v1610_v30, %s5509_s28  ;;  %v1614_v38 = vsel %vm1508_vm4, %v1600_v50, %v1613_v11  ;;  %v1580_v30 = vmul.f32 %v1557_v52, %v6305_v14  ;;  %v6321_v48 = vor.u32 %v5360_v32, %v5359_v58 }
 0x4e0   : > { %v1617_v31 = vrot.slane %v1579_v53, 2 }
 0x4e1   : > { %v1619_v36 = vrot.slane %v1580_v30, 2  ;;  %v1666_v0 = vperm.slane %v6321_v48, 0  ;;  %v1667_v52 = vperm.slane %v6321_v48, 1  ;;  %v1669_v50 = vperm.slane %v6321_v48, 3 }
 0x4e2   : > { %v1618_v34 = vsel %vm1508_vm4, %v1606_v51, %v1617_v31  ;;  %v1668_v45 = vperm.slane %v6321_v48, 2 }
 0x4e3   : > { %v1620_v13 = vsel %vm1508_vm4, %v1609_v41, %v1619_v36 }
 0x4e6   : > { %1631 = vrot.lane.b32.xlu2 %v1612_v25, %s5509_s28  ;;  %1633 = vrot.lane.b32.xlu0 %v1614_v38, %s5509_s28 }
 0x4e7   : > { %1635 = vrot.lane.b32.xlu1 %v1616_v62, %s5509_s28 }
 0x4ee   : > { %1637 = vrot.lane.b32.xlu2 %v1618_v34, %s5509_s28  ;;  %1639 = vrot.lane.b32.xlu0 %v1620_v13, %s5509_s28 }
 0x4ef   : > { %1670 = vrot.lane.b32.xlu1 %v1666_v0, %s5508_s23 }
 0x4f6   : > { %1672 = vrot.lane.b32.xlu2 %v1667_v52, %s5508_s23  ;;  %1674 = vrot.lane.b32.xlu0 %v1668_v45, %s5508_s23 }
 0x4f7   : > { %1676 = vrot.lane.b32.xlu1 %v1669_v50, %s5508_s23 }
 0x531   : > { %v6337_v46 = vpop.permute.xlu0 %1621 }
 0x532   : > { %9965 = vst [vmem:[#allocation90_spill] sm:$0xff] %v6337_v46 }
 0x538   : > { %v6335_v51 = vpop.permute.xlu2 %1625 }
 0x539   : > { %9964 = vst [vmem:[#allocation89_spill] sm:$0xff] %v6335_v51 }
 0x540   : > { %v6341_v41 = vpop.permute.xlu2 %1631 }
 0x541   : > { %9967 = vst [vmem:[#allocation92_spill] sm:$0xff] %v6341_v41 }
 0x548   : > { %v6347_v32 = vpop.permute.xlu2 %1637 }
 0x549   : > { %v6339_v36 = vpop.permute.xlu1 %1623  ;;  %9970 = vst [vmem:[#allocation95_spill] sm:$0xff] %v6347_v32 }
 0x54a   : > { %9966 = vst [vmem:[#allocation91_spill] sm:$0xff] %v6339_v36 }
 0x550   : > { %v6345_v58 = vpop.permute.xlu0 %1627  ;;  %v1673_v62 = vpop.permute.xlu2 %1672 }
 0x551   : > { %v6343_v11 = vpop.permute.xlu1 %1629  ;;  %9969 = vst [vmem:[#allocation94_spill] sm:$0xff] %v6345_v58 }
 0x552   : > { %9968 = vst [vmem:[#allocation93_spill] sm:$0xff] %v6343_v11 }
 0x558   : > { %v6351_v53 = vpop.permute.xlu0 %1633 }
 0x559   : > { %v6349_v25 = vpop.permute.xlu1 %1635  ;;  %9972 = vst [vmem:[#allocation97_spill] sm:$0xff] %v6351_v53 }
 0x55a   : > { %9971 = vst [vmem:[#allocation96_spill] sm:$0xff] %v6349_v25 }
 0x560   : > { %v6353_v30 = vpop.permute.xlu0 %1639 }
 0x561   : > { %v1671_v38 = vpop.permute.xlu1 %1670  ;;  %9973 = vst [vmem:[#allocation98_spill] sm:$0xff] %v6353_v30 }
 0x562   : > { %v1678_v31 = vsel %vm331_vm0, %v1671_v38, %v1673_v62  ;;  %v1686_v0 = vmul.f32 %v1671_v38, %v6236_v49  ;;  %v1691_v34 = vmul.f32 %v6240_v47, %v1671_v38  ;;  %v1696_v4 = vmul.f32 %v1671_v38, %v6285_v55 }
 0x563   : > { %v1687_v13 = vmul.f32 %v1678_v31, %v6257_v40  ;;  %v1692_v52 = vmul.f32 %v6264_v35, %v1678_v31  ;;  %v1697_v8 = vmul.f32 %v1678_v31, %v6293_v3 }
 0x564   : > { %v1716_v50 = vrot.slane %v1686_v0, 2  ;;  %v1717_v45 = vrot.slane %v1691_v34, 2 }
 0x565   : > { %v1719_v46 = vrot.slane %v1687_v13, 2  ;;  %v1720_v36 = vrot.slane %v1692_v52, 2 }
 0x566   : > { %v1718_v41 = vsel %vm1508_vm4, %v1716_v50, %v1717_v45 }
 0x567   : > { %1741 = vrot.lane.b32.xlu2 %v1718_v41, %s5508_s23  ;;  %v1721_v30 = vsel %vm1508_vm4, %v1719_v46, %v1720_v36 }
 0x568   : > { %1743 = vrot.lane.b32.xlu0 %v1721_v30, %s5508_s23  ;;  %v1675_v25 = vpop.permute.xlu0 %1674 }
 0x569   : > { %v1677_v53 = vpop.permute.xlu1 %1676  ;;  %v1679_v32 = vsel %vm331_vm0, %v1673_v62, %v1675_v25 }
 0x56a   : > { %v1680_v11 = vsel %vm331_vm0, %v1675_v25, %v1677_v53  ;;  %v1690_v51 = vmul.f32 %v1677_v53, %v6260_v59  ;;  %v1695_v0 = vmul.f32 %v6191_v33, %v1677_v53  ;;  %v1688_v34 = vmul.f32 %v1679_v32, %v6272_v39 }
 0x56b   : > { %v1689_v13 = vmul.f32 %v1680_v11, %v6277_v57  ;;  %v1693_v41 = vmul.f32 %v6176_v54, %v1679_v32  ;;  %v1694_v46 = vmul.f32 %v6171_v37, %v1680_v11  ;;  %v1698_v29 = vmul.f32 %v1679_v32, %v6288_v27 }
 0x56c   : > { %v1728_v52 = vrot.slane %v1690_v51, 2  ;;  %v1729_v30 = vrot.slane %v1695_v0, 2  ;;  %v1722_v50 = vrot.slane %v1688_v34, 2  ;;  %v1733_v51 = vrot.slane %v1697_v8, 2 }
 0x56d   : > { %v1723_v58 = vrot.slane %v1693_v41, 2  ;;  %v1725_v43 = vrot.slane %v1689_v13, 2  ;;  %v1726_v62 = vrot.slane %v1694_v46, 2  ;;  %v1731_v0 = vrot.slane %v1696_v4, 2 }
 0x56e   : > { %v1730_v25 = vsel %vm1508_vm4, %v1728_v52, %v1729_v30  ;;  %v1735_v34 = vrot.slane %v1698_v29, 2  ;;  %v1699_v13 = vmul.f32 %v1680_v11, %v6302_v16  ;;  %v1700_v41 = vmul.f32 %v1677_v53, %v6305_v14 }
 0x56f   : > { %v1727_v42 = vsel %vm1508_vm4, %v1725_v43, %v1726_v62  ;;  %v1724_v60 = vsel %vm1508_vm4, %v1722_v50, %v1723_v58  ;;  %v1732_v31 = vsel %vm1508_vm4, %v1717_v45, %v1731_v0  ;;  %v1734_v43 = vsel %vm1508_vm4, %v1720_v36, %v1733_v51 }
 0x570   : > { %1747 = vrot.lane.b32.xlu2 %v1727_v42, %s5508_s23  ;;  %1745 = vrot.lane.b32.xlu1 %v1724_v60, %s5508_s23  ;;  %v1736_v42 = vsel %vm1508_vm4, %v1723_v58, %v1735_v34  ;;  %v1785_v60 = vrot.slane %v6321_v48, 4  ;;  %v1737_v4 = vrot.slane %v1699_v13, 2  ;;  %v1739_v29 = vrot.slane %v1700_v41, 2 }
 0x571   : > { %1749 = vrot.lane.b32.xlu0 %v1730_v25, %s5508_s23 }
 0x572   : > { %v1786_v8 = vperm.slane %v1785_v60, 0  ;;  %v1738_v11 = vsel %vm1508_vm4, %v1726_v62, %v1737_v4  ;;  %v1740_v32 = vsel %vm1508_vm4, %v1729_v30, %v1739_v29  ;;  %v1787_v36 = vperm.slane %v1785_v60, 1 }
 0x573   : > { %v1788_v53 = vperm.slane %v1785_v60, 2  ;;  %v1789_v58 = vperm.slane %v1785_v60, 3 }
 0x578   : > { %1751 = vrot.lane.b32.xlu1 %v1732_v31, %s5508_s23  ;;  %1753 = vrot.lane.b32.xlu2 %v1734_v43, %s5508_s23 }
 0x579   : > { %1755 = vrot.lane.b32.xlu0 %v1736_v42, %s5508_s23 }
 0x580   : > { %1757 = vrot.lane.b32.xlu1 %v1738_v11, %s5508_s23  ;;  %1759 = vrot.lane.b32.xlu2 %v1740_v32, %s5508_s23 }
 0x581   : > { %1790 = vrot.lane.b32.xlu0 %v1786_v8, %s5509_s28 }
 0x588   : > { %1792 = vrot.lane.b32.xlu1 %v1787_v36, %s5509_s28  ;;  %1794 = vrot.lane.b32.xlu2 %v1788_v53, %s5509_s28 }
 0x589   : > { %1796 = vrot.lane.b32.xlu0 %v1789_v58, %s5509_s28 }
 0x5c1   : > { %v6398_v48 = vpop.permute.xlu2 %1741 }
 0x5c2   : > { %9974 = vst [vmem:[#allocation99_spill] sm:$0xff] %v6398_v48 }
 0x5ca   : > { %v6402_v45 = vpop.permute.xlu2 %1747 }
 0x5cb   : > { %9976 = vst [vmem:[#allocation101_spill] sm:$0xff] %v6402_v45 }
 0x5d2   : > { %v6408_v30 = vpop.permute.xlu2 %1753 }
 0x5d3   : > { %9979 = vst [vmem:[#allocation104_spill] sm:$0xff] %v6408_v30 }
 0x5da   : > { %v6400_v38 = vpop.permute.xlu0 %1743  ;;  %v6414_v25 = vpop.permute.xlu2 %1759 }
 0x5db   : > { %9975 = vst [vmem:[#allocation100_spill] sm:$0xff] %v6400_v38 }
 0x5dc   : > { %9982 = vst [vmem:[#allocation107_spill] sm:$0xff] %v6414_v25 }
 0x5e2   : > { %v6404_v46 = vpop.permute.xlu1 %1745  ;;  %v1795_v42 = vpop.permute.xlu2 %1794 }
 0x5e3   : > { %9977 = vst [vmem:[#allocation102_spill] sm:$0xff] %v6404_v46  ;;  %v6406_v52 = vpop.permute.xlu0 %1749 }
 0x5e4   : > { %9978 = vst [vmem:[#allocation103_spill] sm:$0xff] %v6406_v52 }
 0x5ea   : > { %v6410_v50 = vpop.permute.xlu1 %1751 }
 0x5eb   : > { %9980 = vst [vmem:[#allocation105_spill] sm:$0xff] %v6410_v50  ;;  %v6412_v62 = vpop.permute.xlu0 %1755 }
 0x5ec   : > { %9981 = vst [vmem:[#allocation106_spill] sm:$0xff] %v6412_v62 }
 0x5f2   : > { %v6416_v51 = vpop.permute.xlu1 %1757 }
 0x5f3   : > { %9983 = vst [vmem:[#allocation108_spill] sm:$0xff] %v6416_v51  ;;  %v1791_v0 = vpop.permute.xlu0 %1790 }
 0x5f4   : > { %v1806_v34 = vmul.f32 %v1791_v0, %v6236_v49  ;;  %v1811_v13 = vmul.f32 %v6240_v47, %v1791_v0  ;;  %v1816_v50 = vmul.f32 %v1791_v0, %v6285_v55 }
 0x5f6   : > { %v1836_v31 = vrot.slane %v1806_v34, 2  ;;  %v1837_v43 = vrot.slane %v1811_v13, 2 }
 0x5f8   : > { %v1838_v41 = vsel %vm1508_vm4, %v1836_v31, %v1837_v43 }
 0x5f9   : > { %1861 = vrot.lane.b32.xlu1 %v1838_v41, %s5507_s22 }
 0x5fa   : > { %v1793_v60 = vpop.permute.xlu1 %1792 }
 0x5fb   : > { %v1798_v4 = vsel %vm293_vm2, %v1791_v0, %v1793_v60  ;;  %v1797_v29 = vpop.permute.xlu0 %1796  ;;  %v1799_v8 = vsel %vm293_vm2, %v1793_v60, %v1795_v42 }
 0x5fc   : > { %v1807_v11 = vmul.f32 %v1798_v4, %v6257_v40  ;;  %v1812_v32 = vmul.f32 %v6264_v35, %v1798_v4  ;;  %v1800_v49 = vsel %vm293_vm2, %v1795_v42, %v1797_v29  ;;  %v1808_v36 = vmul.f32 %v1799_v8, %v6272_v39 }
 0x5fd   : > { %v1809_v53 = vmul.f32 %v1800_v49, %v6277_v57  ;;  %v1813_v58 = vmul.f32 %v6176_v54, %v1799_v8  ;;  %v1814_v34 = vmul.f32 %v6171_v37, %v1800_v49  ;;  %v1810_v51 = vmul.f32 %v1797_v29, %v6260_v59 }
 0x5fe   : > { %v1839_v13 = vrot.slane %v1807_v11, 2  ;;  %v1840_v31 = vrot.slane %v1812_v32, 2  ;;  %v1842_v41 = vrot.slane %v1808_v36, 2  ;;  %v1815_v62 = vmul.f32 %v6191_v33, %v1797_v29 }
 0x5ff   : > { %v1843_v48 = vrot.slane %v1813_v58, 2  ;;  %v1845_v38 = vrot.slane %v1809_v53, 2  ;;  %v1846_v60 = vrot.slane %v1814_v34, 2  ;;  %v1817_v30 = vmul.f32 %v1798_v4, %v6293_v3 }
 0x600   : > { %v1841_v25 = vsel %vm1508_vm4, %v1839_v13, %v1840_v31  ;;  %v1848_v32 = vrot.slane %v1810_v51, 2  ;;  %v1849_v36 = vrot.slane %v1815_v62, 2  ;;  %v1851_v53 = vrot.slane %v1816_v50, 2  ;;  %v5362_v50 = vld [vmem:[%s9681_s1 + $0x82] ss:$8 sm:$0xf0] }
 0x601   : > { %1863 = vrot.lane.b32.xlu2 %v1841_v25, %s5507_s22  ;;  %v1844_v42 = vsel %vm1508_vm4, %v1842_v41, %v1843_v48  ;;  %v1847_v11 = vsel %vm1508_vm4, %v1845_v38, %v1846_v60  ;;  %v1853_v58 = vrot.slane %v1817_v30, 2  ;;  %v1818_v34 = vmul.f32 %v1799_v8, %v6288_v27  ;;  %v5361_v30 = vld [vmem:[%s9681_s1 + $0x82] ss:$8 sm:$0xf] }
 0x602   : > { %1865 = vrot.lane.b32.xlu0 %v1844_v42, %s5507_s22  ;;  %1867 = vrot.lane.b32.xlu1 %v1847_v11, %s5507_s22  ;;  %v1850_v25 = vsel %vm1508_vm4, %v1848_v32, %v1849_v36  ;;  %v1819_v13 = vmul.f32 %v1800_v49, %v6302_v16  ;;  %v1852_v55 = vsel %vm1508_vm4, %v1837_v43, %v1851_v53 }
 0x603   : > { %v1854_v38 = vsel %vm1508_vm4, %v1840_v31, %v1853_v58  ;;  %v1820_v51 = vmul.f32 %v1797_v29, %v6305_v14  ;;  %v1855_v62 = vrot.slane %v1818_v34, 2  ;;  %v6456_v43 = vor.u32 %v5362_v50, %v5361_v30 }
 0x604   : > { %v1857_v0 = vrot.slane %v1819_v13, 2 }
 0x605   : > { %v1859_v4 = vrot.slane %v1820_v51, 2  ;;  %v1856_v8 = vsel %vm1508_vm4, %v1843_v48, %v1855_v62  ;;  %v1974_v31 = vrot.slane %v6456_v43, 4 }
 0x606   : > { %v1858_v29 = vsel %vm1508_vm4, %v1846_v60, %v1857_v0 }
 0x607   : > { %v1860_v49 = vsel %vm1508_vm4, %v1849_v36, %v1859_v4  ;;  %v1975_v41 = vperm.slane %v1974_v31, 0  ;;  %v1976_v42 = vperm.slane %v1974_v31, 1  ;;  %v1977_v11 = vperm.slane %v1974_v31, 2 }
 0x608   : > { %v1978_v48 = vperm.slane %v1974_v31, 3 }
 0x609   : > { %1869 = vrot.lane.b32.xlu2 %v1850_v25, %s5507_s22 }
 0x60a   : > { %1871 = vrot.lane.b32.xlu0 %v1852_v55, %s5507_s22  ;;  %1873 = vrot.lane.b32.xlu1 %v1854_v38, %s5507_s22 }
 0x611   : > { %1875 = vrot.lane.b32.xlu2 %v1856_v8, %s5507_s22 }
 0x612   : > { %1877 = vrot.lane.b32.xlu0 %v1858_v29, %s5507_s22  ;;  %1879 = vrot.lane.b32.xlu1 %v1860_v49, %s5507_s22  ;;  %v6494_v49 = vld [vmem:[%s5588_s5 + $0x28] sm:$0xfc] }
 0x619   : > { %1979 = vrot.lane.b32.xlu2 %v1975_v41, %s5507_s22 }
 0x61a   : > { %1981 = vrot.lane.b32.xlu0 %v1976_v42, %s5507_s22  ;;  %1983 = vrot.lane.b32.xlu1 %v1977_v11, %s5507_s22 }
 0x621   : > { %1985 = vrot.lane.b32.xlu2 %v1978_v48, %s5507_s22 }
 0x65b   : > { %v6469_v60 = vpop.permute.xlu2 %1863 }
 0x65c   : > { %9984 = vst [vmem:[#allocation109_spill] sm:$0xff] %v6469_v60 }
 0x663   : > { %v6471_v32 = vpop.permute.xlu2 %1869 }
 0x664   : > { %9985 = vst [vmem:[#allocation110_spill] sm:$0xff] %v6471_v32 }
 0x66b   : > { %v6473_v36 = vpop.permute.xlu1 %1861  ;;  %v6475_v53 = vpop.permute.xlu2 %1875 }
 0x66c   : > { %9986 = vst [vmem:[#allocation111_spill] sm:$0xff] %v6473_v36 }
 0x66d   : > { %9987 = vst [vmem:[#allocation112_spill] sm:$0xff] %v6475_v53 }
 0x673   : > { %v1980_v58 = vpop.permute.xlu2 %1979 }
 0x674   : > { %v6477_v25 = vpop.permute.xlu0 %1865  ;;  %v1995_v34 = vmul.f32 %v1980_v58, %v6257_v40  ;;  %v2000_v13 = vmul.f32 %v6264_v35, %v1980_v58  ;;  %v6481_v55 = vpop.permute.xlu1 %1867 }
 0x675   : > { %9988 = vst [vmem:[#allocation113_spill] sm:$0xff] %v6477_v25 }
 0x676   : > { %9989 = vst [vmem:[#allocation114_spill] sm:$0xff] %v6481_v55  ;;  %v2025_v38 = vrot.slane %v1995_v34, 2  ;;  %v2026_v51 = vrot.slane %v2000_v13, 2 }
 0x678   : > { %v2027_v30 = vsel %vm1508_vm4, %v2025_v38, %v2026_v51 }
 0x679   : > { %2050 = vrot.lane.b32.xlu0 %v2027_v30, %s5509_s28 }
 0x67b   : > { %v1986_v29 = vpop.permute.xlu2 %1985 }
 0x67c   : > { %v6485_v50 = vpop.permute.xlu0 %1871  ;;  %v6487_v62 = vpop.permute.xlu1 %1873  ;;  %v1999_v30 = vmul.f32 %v1986_v29, %v6494_v49 }
 0x67d   : > { %9990 = vst [vmem:[#allocation115_spill] sm:$0xff] %v6485_v50 }
 0x67e   : > { %9991 = vst [vmem:[#allocation116_spill] sm:$0xff] %v6487_v62  ;;  %v2037_v32 = vrot.slane %v1999_v30, 2 }
 0x684   : > { %v6489_v0 = vpop.permute.xlu0 %1877  ;;  %v6491_v4 = vpop.permute.xlu1 %1879 }
 0x685   : > { %9992 = vst [vmem:[#allocation117_spill] sm:$0xff] %v6489_v0  ;;  %v6506_v0 = vld [vmem:[%s5588_s5 + $0x58] sm:$0xff] }
 0x686   : > { %9993 = vst [vmem:[#allocation118_spill] sm:$0xff] %v6491_v4 }
 0x68c   : > { %v1982_v8 = vpop.permute.xlu0 %1981  ;;  %v1984_v31 = vpop.permute.xlu1 %1983 }
 0x68d   : > { %v1987_v41 = vsel %vm244_vm1, %v1980_v58, %v1982_v8  ;;  %v1988_v42 = vsel %vm244_vm1, %v1982_v8, %v1984_v31  ;;  %v1989_v38 = vsel %vm244_vm1, %v1984_v31, %v1986_v29  ;;  %v2004_v8 = vmul.f32 %v6506_v0, %v1986_v29 }
 0x68e   : > { %v1996_v11 = vmul.f32 %v1987_v41, %v6272_v39  ;;  %v2001_v48 = vmul.f32 %v6176_v54, %v1987_v41  ;;  %v1997_v34 = vmul.f32 %v1988_v42, %v6277_v57  ;;  %v2002_v13 = vmul.f32 %v6171_v37, %v1988_v42 }
 0x68f   : > { %v1998_v4 = vmul.f32 %v1989_v38, %v6260_v59  ;;  %v2003_v53 = vmul.f32 %v6191_v33, %v1989_v38  ;;  %v2038_v52 = vrot.slane %v2004_v8, 2 }
 0x690   : > { %v2028_v36 = vrot.slane %v1996_v11, 2  ;;  %v2029_v60 = vrot.slane %v2001_v48, 2  ;;  %v2031_v50 = vrot.slane %v1997_v34, 2  ;;  %v2032_v62 = vrot.slane %v2002_v13, 2 }
 0x691   : > { %v2034_v55 = vrot.slane %v1998_v4, 2  ;;  %v2035_v11 = vrot.slane %v2003_v53, 2  ;;  %v2005_v48 = vmul.f32 %v1980_v58, %v6293_v3  ;;  %v2006_v34 = vmul.f32 %v1987_v41, %v6288_v27 }
 0x692   : > { %v2030_v25 = vsel %vm1508_vm4, %v2028_v36, %v2029_v60  ;;  %v2033_v31 = vsel %vm1508_vm4, %v2031_v50, %v2032_v62  ;;  %v2039_v4 = vsel %vm1508_vm4, %v2037_v32, %v2038_v52  ;;  %v2007_v50 = vmul.f32 %v1988_v42, %v6302_v16 }
 0x693   : > { %2052 = vrot.lane.b32.xlu1 %v2030_v25, %s5509_s28  ;;  %2054 = vrot.lane.b32.xlu2 %v2033_v31, %s5509_s28  ;;  %v2036_v13 = vsel %vm1508_vm4, %v2034_v55, %v2035_v11  ;;  %v2040_v36 = vrot.slane %v2005_v48, 2  ;;  %v2042_v46 = vrot.slane %v2006_v34, 2  ;;  %v6521_v25 = vld [vmem:[%s5588_s5 + $0x88] sm:$0x3]  ;;  %v2008_v58 = vmul.f32 %v1989_v38, %v6305_v14 }
 0x694   : > { %2056 = vrot.lane.b32.xlu0 %v2036_v13, %s5509_s28  ;;  %v2009_v41 = vmul.f32 %v1986_v29, %v6521_v25  ;;  %v2044_v30 = vrot.slane %v2007_v50, 2  ;;  %v5363_v38 = vld [vmem:[%s9681_s1 + $0xc2] ss:$8 sm:$0xf] }
 0x695   : > { %v2041_v53 = vsel %vm1508_vm4, %v2026_v51, %v2040_v36  ;;  %v2043_v55 = vsel %vm1508_vm4, %v2029_v60, %v2042_v46  ;;  %v2046_v32 = vrot.slane %v2008_v58, 2  ;;  %v2095_v60 = vperm.slane %v5363_v38, 0 }
 0x696   : > { %v2048_v8 = vrot.slane %v2009_v41, 2  ;;  %v2045_v42 = vsel %vm1508_vm4, %v2032_v62, %v2044_v30  ;;  %v2096_v29 = vperm.slane %v5363_v38, 1  ;;  %v2097_v31 = vperm.slane %v5363_v38, 2 }
 0x697   : > { %v2047_v51 = vsel %vm1508_vm4, %v2035_v11, %v2046_v32  ;;  %v2098_v62 = vperm.slane %v5363_v38, 3 }
 0x698   : > { %v2049_v46 = vsel %vm1508_vm4, %v2038_v52, %v2048_v8 }
 0x69b   : > { %2058 = vrot.lane.b32.xlu1 %v2039_v4, %s5509_s28  ;;  %2060 = vrot.lane.b32.xlu2 %v2041_v53, %s5509_s28 }
 0x69c   : > { %2062 = vrot.lane.b32.xlu0 %v2043_v55, %s5509_s28 }
 0x6a3   : > { %2064 = vrot.lane.b32.xlu1 %v2045_v42, %s5509_s28  ;;  %2066 = vrot.lane.b32.xlu2 %v2047_v51, %s5509_s28 }
 0x6a4   : > { %2068 = vrot.lane.b32.xlu0 %v2049_v46, %s5509_s28 }
 0x6ab   : > { %2099 = vrot.lane.b32.xlu1 %v2095_v60, %s5508_s23  ;;  %2101 = vrot.lane.b32.xlu2 %v2096_v29, %s5508_s23 }
 0x6ac   : > { %2103 = vrot.lane.b32.xlu0 %v2097_v31, %s5508_s23 }
 0x6b3   : > { %2105 = vrot.lane.b32.xlu1 %v2098_v62, %s5508_s23 }
 0x6eb   : > { %v6543_v11 = vpop.permute.xlu0 %2050 }
 0x6ec   : > { %9994 = vst [vmem:[#allocation119_spill] sm:$0xff] %v6543_v11 }
 0x6ed   : > { %v6545_v48 = vpop.permute.xlu2 %2054 }
 0x6ee   : > { %9995 = vst [vmem:[#allocation120_spill] sm:$0xff] %v6545_v48 }
 0x6f5   : > { %v6551_v13 = vpop.permute.xlu2 %2060 }
 0x6f6   : > { %9998 = vst [vmem:[#allocation123_spill] sm:$0xff] %v6551_v13 }
 0x6fd   : > { %v6557_v50 = vpop.permute.xlu2 %2066 }
 0x6fe   : > { %10001 = vst [vmem:[#allocation126_spill] sm:$0xff] %v6557_v50 }
 0x705   : > { %v6547_v34 = vpop.permute.xlu1 %2052  ;;  %v2102_v55 = vpop.permute.xlu2 %2101 }
 0x706   : > { %9996 = vst [vmem:[#allocation121_spill] sm:$0xff] %v6547_v34  ;;  %v6549_v52 = vpop.permute.xlu0 %2056 }
 0x707   : > { %9997 = vst [vmem:[#allocation122_spill] sm:$0xff] %v6549_v52 }
 0x70d   : > { %v6553_v36 = vpop.permute.xlu1 %2058 }
 0x70e   : > { %9999 = vst [vmem:[#allocation124_spill] sm:$0xff] %v6553_v36  ;;  %v6555_v4 = vpop.permute.xlu0 %2062 }
 0x70f   : > { %10000 = vst [vmem:[#allocation125_spill] sm:$0xff] %v6555_v4 }
 0x715   : > { %v6559_v53 = vpop.permute.xlu1 %2064 }
 0x716   : > { %10002 = vst [vmem:[#allocation127_spill] sm:$0xff] %v6559_v53  ;;  %v6561_v58 = vpop.permute.xlu0 %2068 }
 0x717   : > { %10003 = vst [vmem:[#allocation128_spill] sm:$0xff] %v6561_v58 }
 0x71d   : > { %v2100_v41 = vpop.permute.xlu1 %2099 }
 0x71e   : > { %v2107_v30 = vsel %vm331_vm0, %v2100_v41, %v2102_v55  ;;  %v2115_v32 = vmul.f32 %v2100_v41, %v6257_v40  ;;  %v2120_v8 = vmul.f32 %v6264_v35, %v2100_v41  ;;  %v2104_v38 = vpop.permute.xlu0 %2103 }
 0x71f   : > { %v2116_v42 = vmul.f32 %v2107_v30, %v6272_v39  ;;  %v2121_v51 = vmul.f32 %v6176_v54, %v2107_v30  ;;  %v2108_v29 = vsel %vm331_vm0, %v2102_v55, %v2104_v38 }
 0x720   : > { %v2145_v46 = vrot.slane %v2115_v32, 2  ;;  %v2146_v60 = vrot.slane %v2120_v8, 2  ;;  %v2117_v11 = vmul.f32 %v2108_v29, %v6277_v57  ;;  %v2122_v34 = vmul.f32 %v6171_v37, %v2108_v29 }
 0x721   : > { %v2148_v31 = vrot.slane %v2116_v42, 2  ;;  %v2149_v62 = vrot.slane %v2121_v51, 2  ;;  %v2125_v8 = vmul.f32 %v2100_v41, %v6293_v3  ;;  %v2126_v41 = vmul.f32 %v2107_v30, %v6288_v27 }
 0x722   : > { %v2147_v58 = vsel %vm1508_vm4, %v2145_v46, %v2146_v60  ;;  %v2151_v39 = vrot.slane %v2117_v11, 2  ;;  %v2152_v50 = vrot.slane %v2122_v34, 2 }
 0x723   : > { %2170 = vrot.lane.b32.xlu2 %v2147_v58, %s5508_s23  ;;  %v2150_v40 = vsel %vm1508_vm4, %v2148_v31, %v2149_v62  ;;  %v2160_v53 = vrot.slane %v2125_v8, 2  ;;  %v2162_v30 = vrot.slane %v2126_v41, 2 }
 0x724   : > { %2172 = vrot.lane.b32.xlu0 %v2150_v40, %s5508_s23  ;;  %v2153_v55 = vsel %vm1508_vm4, %v2151_v39, %v2152_v50  ;;  %v5365_v39 = vld [vmem:[%s9681_s1 + $0x3] ss:$8 sm:$0xf0] }
 0x725   : > { %v2106_v32 = vpop.permute.xlu1 %2105  ;;  %2174 = vrot.lane.b32.xlu1 %v2153_v55, %s5508_s23  ;;  %v2161_v8 = vsel %vm1508_vm4, %v2146_v60, %v2160_v53 }
 0x726   : > { %v2109_v42 = vsel %vm331_vm0, %v2104_v38, %v2106_v32  ;;  %v2119_v57 = vmul.f32 %v2106_v32, %v6494_v49  ;;  %v2124_v51 = vmul.f32 %v6506_v0, %v2106_v32  ;;  %v2127_v38 = vmul.f32 %v2108_v29, %v6302_v16 }
 0x727   : > { %v2118_v58 = vmul.f32 %v2109_v42, %v6260_v59  ;;  %v2123_v11 = vmul.f32 %v6191_v33, %v2109_v42  ;;  %v5364_v59 = vld [vmem:[%s9681_s1 + $0x3] ss:$8 sm:$0xf]  ;;  %v2128_v27 = vmul.f32 %v2109_v42, %v6305_v14 }
 0x728   : > { %v2157_v34 = vrot.slane %v2119_v57, 2  ;;  %v2158_v46 = vrot.slane %v2124_v51, 2  ;;  %v2164_v16 = vrot.slane %v2127_v38, 2  ;;  %v6598_v29 = vor.u32 %v5365_v39, %v5364_v59 }
 0x729   : > { %v2154_v31 = vrot.slane %v2118_v58, 2  ;;  %v2155_v40 = vrot.slane %v2123_v11, 2  ;;  %v2166_v55 = vrot.slane %v2128_v27, 2  ;;  %v2163_v57 = vsel %vm1508_vm4, %v2149_v62, %v2162_v30 }
 0x72a   : > { %v2159_v3 = vsel %vm1508_vm4, %v2157_v34, %v2158_v46  ;;  %10004 = vst [vmem:[#allocation129_spill] sm:$0xff] %v6598_v29  ;;  %v2165_v51 = vsel %vm1508_vm4, %v2152_v50, %v2164_v16  ;;  %v2129_v58 = vmul.f32 %v2106_v32, %v6521_v25  ;;  %v2310_v53 = vrot.slane %v6598_v29, 4 }
 0x72b   : > { %v2156_v49 = vsel %vm1508_vm4, %v2154_v31, %v2155_v40  ;;  %v2167_v14 = vsel %vm1508_vm4, %v2155_v40, %v2166_v55 }
 0x72c   : > { %2176 = vrot.lane.b32.xlu2 %v2156_v49, %s5508_s23  ;;  %2178 = vrot.lane.b32.xlu0 %v2159_v3, %s5508_s23  ;;  %v2168_v60 = vrot.slane %v2129_v58, 2  ;;  %v2311_v42 = vperm.slane %v2310_v53, 0  ;;  %v2312_v11 = vperm.slane %v2310_v53, 1  ;;  %v2314_v25 = vperm.slane %v2310_v53, 3 }
 0x72d   : > { %2180 = vrot.lane.b32.xlu1 %v2161_v8, %s5508_s23  ;;  %v2313_v50 = vperm.slane %v2310_v53, 2  ;;  %v6635_v8 = vld [vmem:[%s5588_s5] sm:$0xf8]  ;;  %v6641_v53 = vld [vmem:[%s5588_s5 + $0x10] sm:$0xf8] }
 0x72e   : > { %v2169_v34 = vsel %vm1508_vm4, %v2158_v46, %v2168_v60 }
 0x734   : > { %2182 = vrot.lane.b32.xlu2 %v2163_v57, %s5508_s23  ;;  %2184 = vrot.lane.b32.xlu0 %v2165_v51, %s5508_s23 }
 0x735   : > { %2186 = vrot.lane.b32.xlu1 %v2167_v14, %s5508_s23 }
 0x73c   : > { %2188 = vrot.lane.b32.xlu2 %v2169_v34, %s5508_s23  ;;  %2315 = vrot.lane.b32.xlu0 %v2311_v42, %s5507_s22  ;;  %v6648_v34 = vld [vmem:[%s5588_s5 + $0x8] sm:$0xf8] }
 0x73d   : > { %2317 = vrot.lane.b32.xlu1 %v2312_v11, %s5507_s22 }
 0x744   : > { %2321 = vrot.lane.b32.xlu0 %v2314_v25, %s5507_s22  ;;  %2319 = vrot.lane.b32.xlu2 %v2313_v50, %s5507_s22 }
 0x77d   : > { %v6614_v62 = vpop.permute.xlu2 %2170 }
 0x77e   : > { %10005 = vst [vmem:[#allocation130_spill] sm:$0xff] %v6614_v62 }
 0x786   : > { %v6616_v32 = vpop.permute.xlu2 %2176 }
 0x787   : > { %10006 = vst [vmem:[#allocation131_spill] sm:$0xff] %v6616_v32  ;;  %v6680_v32 = vld [vmem:[%s5588_s5 + $0x78] sm:$0x7] }
 0x78e   : > { %v6622_v40 = vpop.permute.xlu2 %2182 }
 0x78f   : > { %10009 = vst [vmem:[#allocation134_spill] sm:$0xff] %v6622_v40 }
 0x796   : > { %v6618_v31 = vpop.permute.xlu0 %2172  ;;  %v6630_v49 = vpop.permute.xlu2 %2188 }
 0x797   : > { %10007 = vst [vmem:[#allocation132_spill] sm:$0xff] %v6618_v31  ;;  %v6620_v46 = vpop.permute.xlu1 %2174 }
 0x798   : > { %10008 = vst [vmem:[#allocation133_spill] sm:$0xff] %v6620_v46  ;;  %v6673_v46 = vld [vmem:[%s5588_s5 + $0x68] sm:$0x7] }
 0x799   : > { %10013 = vst [vmem:[#allocation138_spill] sm:$0xff] %v6630_v49 }
 0x79e   : > { %v6624_v3 = vpop.permute.xlu0 %2178  ;;  %v2320_v27 = vpop.permute.xlu2 %2319 }
 0x79f   : > { %10010 = vst [vmem:[#allocation135_spill] sm:$0xff] %v6624_v3  ;;  %v6626_v41 = vpop.permute.xlu1 %2180 }
 0x7a0   : > { %10011 = vst [vmem:[#allocation136_spill] sm:$0xff] %v6626_v41 }
 0x7a6   : > { %v6628_v38 = vpop.permute.xlu0 %2184 }
 0x7a7   : > { %10012 = vst [vmem:[#allocation137_spill] sm:$0xff] %v6628_v38  ;;  %v6632_v59 = vpop.permute.xlu1 %2186 }
 0x7a8   : > { %10014 = vst [vmem:[#allocation139_spill] sm:$0xff] %v6632_v59 }
 0x7ae   : > { %v2316_v39 = vpop.permute.xlu0 %2315 }
 0x7af   : > { %v2331_v30 = vmul.f32 %v2316_v39, %v6635_v8  ;;  %v2336_v16 = vmul.f32 %v6240_v47, %v2316_v39  ;;  %v2318_v55 = vpop.permute.xlu1 %2317 }
 0x7b0   : > { %v2323_v58 = vsel %vm244_vm1, %v2316_v39, %v2318_v55  ;;  %v2324_v14 = vsel %vm244_vm1, %v2318_v55, %v2320_v27 }
 0x7b1   : > { %v2361_v57 = vrot.slane %v2331_v30, 3  ;;  %v2362_v51 = vrot.slane %v2336_v16, 3  ;;  %v2333_v60 = vmul.f32 %v2324_v14, %v6641_v53  ;;  %v2338_v42 = vmul.f32 %v6176_v54, %v2324_v14  ;;  %v6654_v30 = vld [vmem:[%s5588_s5 + $0x20] sm:$0xf8]  ;;  %v6657_v16 = vld [vmem:[%s5588_s5 + $0x60] sm:$0x7] }
 0x7b2   : > { %v2332_v25 = vmul.f32 %v2323_v58, %v6648_v34  ;;  %v2337_v50 = vmul.f32 %v6264_v35, %v2323_v58  ;;  %v2341_v54 = vmul.f32 %v2316_v39, %v6657_v16 }
 0x7b3   : > { %v2363_v11 = vsel %vm2273_vm5, %v2361_v57, %v2362_v51  ;;  %v2367_v55 = vrot.slane %v2333_v60, 3  ;;  %v2368_v62 = vrot.slane %v2338_v42, 3  ;;  %v6661_v57 = vld [vmem:[%s5588_s5 + $0x18] sm:$0xf8] }
 0x7b4   : > { %2386 = vrot.lane.b32.xlu1 %v2363_v11, %s5509_s28  ;;  %v2364_v31 = vrot.slane %v2332_v25, 3  ;;  %v2365_v49 = vrot.slane %v2337_v50, 3  ;;  %v2376_v3 = vrot.slane %v2341_v54, 3 }
 0x7b5   : > { %v2369_v11 = vsel %vm2273_vm5, %v2367_v55, %v2368_v62 }
 0x7b6   : > { %v2322_v59 = vpop.permute.xlu0 %2321  ;;  %v2366_v60 = vsel %vm2273_vm5, %v2364_v31, %v2365_v49  ;;  %2390 = vrot.lane.b32.xlu0 %v2369_v11, %s5509_s28  ;;  %v2342_v31 = vmul.f32 %v2323_v58, %v6673_v46  ;;  %v6691_v58 = vld [vmem:[%s5588_s5 + $0x80] sm:$0x7] }
 0x7b7   : > { %v2325_v38 = vsel %vm244_vm1, %v2320_v27, %v2322_v59  ;;  %v2335_v41 = vmul.f32 %v2322_v59, %v6654_v30  ;;  %v2340_v40 = vmul.f32 %v6191_v33, %v2322_v59  ;;  %2388 = vrot.lane.b32.xlu2 %v2366_v60, %s5509_s28 }
 0x7b8   : > { %v2334_v42 = vmul.f32 %v2325_v38, %v6661_v57  ;;  %v2339_v39 = vmul.f32 %v6171_v37, %v2325_v38  ;;  %v6683_v37 = vld [vmem:[%s5588_s5 + $0x70] sm:$0x7]  ;;  %v2378_v60 = vrot.slane %v2342_v31, 3 }
 0x7b9   : > { %v2373_v25 = vrot.slane %v2335_v41, 3  ;;  %v2374_v50 = vrot.slane %v2340_v40, 3  ;;  %v2377_v40 = vsel %vm2273_vm5, %v2362_v51, %v2376_v3  ;;  %v2344_v41 = vmul.f32 %v2325_v38, %v6680_v32  ;;  %v5366_v3 = vld [vmem:[%s9681_s1 + $0x43] ss:$8 sm:$0xf] }
 0x7ba   : > { %v2370_v55 = vrot.slane %v2334_v42, 3  ;;  %v2371_v27 = vrot.slane %v2339_v39, 3  ;;  %v2343_v54 = vmul.f32 %v2324_v14, %v6683_v37  ;;  %v5367_v38 = vld [vmem:[%s9681_s1 + $0x43] ss:$8 sm:$0xf0] }
 0x7bb   : > { %v2375_v11 = vsel %vm2273_vm5, %v2373_v25, %v2374_v50  ;;  %v2382_v42 = vrot.slane %v2344_v41, 3  ;;  %v2379_v25 = vsel %vm2273_vm5, %v2365_v49, %v2378_v60  ;;  %v6705_v49 = vor.u32 %v5367_v38, %v5366_v3 }
 0x7bc   : > { %v2372_v33 = vsel %vm2273_vm5, %v2370_v55, %v2371_v27  ;;  %v2380_v39 = vrot.slane %v2343_v54, 3  ;;  %v2345_v55 = vmul.f32 %v2322_v59, %v6691_v58 }
 0x7bd   : > { %2392 = vrot.lane.b32.xlu1 %v2372_v33, %s5509_s28  ;;  %v2383_v51 = vsel %vm2273_vm5, %v2371_v27, %v2382_v42  ;;  %v2432_v31 = vperm.slane %v6705_v49, 1  ;;  %v2433_v27 = vperm.slane %v6705_v49, 2 }
 0x7be   : > { %2396 = vrot.lane.b32.xlu0 %v2377_v40, %s5509_s28  ;;  %v2381_v14 = vsel %vm2273_vm5, %v2368_v62, %v2380_v39  ;;  %v2384_v33 = vrot.slane %v2345_v55, 3  ;;  %v2434_v62 = vperm.slane %v6705_v49, 3 }
 0x7bf   : > { %2394 = vrot.lane.b32.xlu2 %v2375_v11, %s5509_s28  ;;  %v2431_v11 = vperm.slane %v6705_v49, 0 }
 0x7c0   : > { %v2385_v59 = vsel %vm2273_vm5, %v2374_v50, %v2384_v33 }
 0x7c5   : > { %2398 = vrot.lane.b32.xlu1 %v2379_v25, %s5509_s28 }
 0x7c6   : > { %2402 = vrot.lane.b32.xlu0 %v2383_v51, %s5509_s28 }
 0x7c7   : > { %2400 = vrot.lane.b32.xlu2 %v2381_v14, %s5509_s28 }
 0x7cd   : > { %2404 = vrot.lane.b32.xlu1 %v2385_v59, %s5509_s28 }
 0x7ce   : > { %2437 = vrot.lane.b32.xlu0 %v2432_v31, %s5508_s23 }
 0x7cf   : > { %2435 = vrot.lane.b32.xlu2 %v2431_v11, %s5508_s23 }
 0x7d5   : > { %2439 = vrot.lane.b32.xlu1 %v2433_v27, %s5508_s23 }
 0x7d7   : > { %2441 = vrot.lane.b32.xlu2 %v2434_v62, %s5508_s23 }
 0x811   : > { %v6718_v40 = vpop.permute.xlu2 %2388 }
 0x812   : > { %10015 = vst [vmem:[#allocation140_spill] sm:$0xff] %v6718_v40 }
 0x819   : > { %v6720_v50 = vpop.permute.xlu2 %2394 }
 0x81a   : > { %10016 = vst [vmem:[#allocation141_spill] sm:$0xff] %v6720_v50 }
 0x821   : > { %v6722_v41 = vpop.permute.xlu2 %2400 }
 0x822   : > { %10017 = vst [vmem:[#allocation142_spill] sm:$0xff] %v6722_v41 }
 0x826   : > { %v6724_v54 = vpop.permute.xlu1 %2386 }
 0x827   : > { %10018 = vst [vmem:[#allocation143_spill] sm:$0xff] %v6724_v54  ;;  %v6747_v54 = vld [vmem:[%s5588_s5 + $0x50] sm:$0xff] }
 0x828   : > { %v6726_v60 = vpop.permute.xlu0 %2390 }
 0x829   : > { %10019 = vst [vmem:[#allocation144_spill] sm:$0xff] %v6726_v60  ;;  %v2436_v42 = vpop.permute.xlu2 %2435 }
 0x82a   : > { %v2451_v39 = vmul.f32 %v2436_v42, %v6635_v8  ;;  %v2456_v25 = vmul.f32 %v6240_v47, %v2436_v42  ;;  %v2461_v36 = vmul.f32 %v2436_v42, %v6657_v16 }
 0x82c   : > { %v2481_v55 = vrot.slane %v2451_v39, 3  ;;  %v2482_v3 = vrot.slane %v2456_v25, 3 }
 0x82e   : > { %v2483_v51 = vsel %vm2273_vm5, %v2481_v55, %v2482_v3 }
 0x82f   : > { %v6730_v38 = vpop.permute.xlu1 %2392  ;;  %2506 = vrot.lane.b32.xlu0 %v2483_v51, %s5508_s23 }
 0x830   : > { %10020 = vst [vmem:[#allocation145_spill] sm:$0xff] %v6730_v38  ;;  %v6734_v14 = vpop.permute.xlu0 %2396  ;;  %v6761_v38 = vld [vmem:[%s5588_s5 + $0x48] sm:$0xff] }
 0x831   : > { %10021 = vst [vmem:[#allocation146_spill] sm:$0xff] %v6734_v14  ;;  %v2442_v27 = vpop.permute.xlu2 %2441 }
 0x832   : > { %v2455_v51 = vmul.f32 %v2442_v27, %v6654_v30  ;;  %v2460_v40 = vmul.f32 %v6747_v54, %v2442_v27 }
 0x834   : > { %v2493_v50 = vrot.slane %v2455_v51, 3  ;;  %v2494_v60 = vrot.slane %v2460_v40, 3 }
 0x836   : > { %v2495_v48 = vsel %vm2273_vm5, %v2493_v50, %v2494_v60 }
 0x837   : > { %v6736_v33 = vpop.permute.xlu1 %2398 }
 0x838   : > { %10022 = vst [vmem:[#allocation147_spill] sm:$0xff] %v6736_v33  ;;  %v6738_v59 = vpop.permute.xlu0 %2402 }
 0x839   : > { %10023 = vst [vmem:[#allocation148_spill] sm:$0xff] %v6738_v59 }
 0x83f   : > { %v6740_v31 = vpop.permute.xlu1 %2404 }
 0x840   : > { %10024 = vst [vmem:[#allocation149_spill] sm:$0xff] %v6740_v31  ;;  %v2438_v11 = vpop.permute.xlu0 %2437 }
 0x841   : > { %v2443_v47 = vsel %vm331_vm0, %v2436_v42, %v2438_v11 }
 0x842   : > { %v2452_v62 = vmul.f32 %v2443_v47, %v6648_v34  ;;  %v2457_v39 = vmul.f32 %v6264_v35, %v2443_v47  ;;  %v2462_v40 = vmul.f32 %v2443_v47, %v6673_v46 }
 0x844   : > { %v2484_v25 = vrot.slane %v2452_v62, 3  ;;  %v2485_v55 = vrot.slane %v2457_v39, 3  ;;  %v6756_v62 = vld [vmem:[%s5588_s5 + $0x40] sm:$0xff] }
 0x846   : > { %v2486_v31 = vsel %vm2273_vm5, %v2484_v25, %v2485_v55 }
 0x847   : > { %v2440_v59 = vpop.permute.xlu1 %2439  ;;  %2508 = vrot.lane.b32.xlu1 %v2486_v31, %s5508_s23 }
 0x848   : > { %v2444_v41 = vsel %vm331_vm0, %v2438_v11, %v2440_v59  ;;  %v2445_v14 = vsel %vm331_vm0, %v2440_v59, %v2442_v27 }
 0x849   : > { %v2453_v35 = vmul.f32 %v2444_v41, %v6641_v53  ;;  %v2458_v39 = vmul.f32 %v6756_v62, %v2444_v41  ;;  %v2454_v33 = vmul.f32 %v2445_v14, %v6661_v57  ;;  %v2459_v25 = vmul.f32 %v6761_v38, %v2445_v14 }
 0x84a   : > { %v2463_v51 = vmul.f32 %v2444_v41, %v6683_v37  ;;  %v2464_v42 = vmul.f32 %v2445_v14, %v6680_v32 }
 0x84b   : > { %v2487_v13 = vrot.slane %v2453_v35, 3  ;;  %v2488_v11 = vrot.slane %v2458_v39, 3  ;;  %v2490_v4 = vrot.slane %v2454_v33, 3  ;;  %v2491_v59 = vrot.slane %v2459_v25, 3 }
 0x84c   : > { %v2496_v33 = vrot.slane %v2461_v36, 3  ;;  %v2498_v35 = vrot.slane %v2462_v40, 3  ;;  %v2500_v39 = vrot.slane %v2463_v51, 3  ;;  %v2502_v36 = vrot.slane %v2464_v42, 3 }
 0x84d   : > { %v2489_v31 = vsel %vm2273_vm5, %v2487_v13, %v2488_v11  ;;  %v2492_v52 = vsel %vm2273_vm5, %v2490_v4, %v2491_v59  ;;  %v2465_v4 = vmul.f32 %v2442_v27, %v6691_v58 }
 0x84e   : > { %2510 = vrot.lane.b32.xlu2 %v2489_v31, %s5508_s23  ;;  %2512 = vrot.lane.b32.xlu0 %v2492_v52, %s5508_s23  ;;  %v2497_v13 = vsel %vm2273_vm5, %v2482_v3, %v2496_v33  ;;  %v2499_v50 = vsel %vm2273_vm5, %v2485_v55, %v2498_v35  ;;  %v2501_v52 = vsel %vm2273_vm5, %v2488_v11, %v2500_v39 }
 0x84f   : > { %2514 = vrot.lane.b32.xlu1 %v2495_v48, %s5508_s23  ;;  %v2550_v48 = vrot.slane %v6705_v49, 4  ;;  %v2504_v41 = vrot.slane %v2465_v4, 3  ;;  %v2503_v3 = vsel %vm2273_vm5, %v2491_v59, %v2502_v36 }
 0x851   : > { %v2551_v47 = vperm.slane %v2550_v48, 0  ;;  %v2505_v14 = vsel %vm2273_vm5, %v2494_v60, %v2504_v41  ;;  %v2552_v27 = vperm.slane %v2550_v48, 1  ;;  %v2553_v55 = vperm.slane %v2550_v48, 2  ;;  %v6818_v41 = vld [vmem:[%s5588_s5 + $0x38] sm:$0xff] }
 0x852   : > { %v2554_v25 = vperm.slane %v2550_v48, 3 }
 0x856   : > { %2516 = vrot.lane.b32.xlu2 %v2497_v13, %s5508_s23  ;;  %2518 = vrot.lane.b32.xlu0 %v2499_v50, %s5508_s23 }
 0x857   : > { %2520 = vrot.lane.b32.xlu1 %v2501_v52, %s5508_s23  ;;  %v6813_v52 = vld [vmem:[%s5588_s5 + $0x30] sm:$0xff] }
 0x85e   : > { %2522 = vrot.lane.b32.xlu2 %v2503_v3, %s5508_s23  ;;  %2524 = vrot.lane.b32.xlu0 %v2505_v14, %s5508_s23 }
 0x85f   : > { %2555 = vrot.lane.b32.xlu1 %v2551_v47, %s5509_s28 }
 0x866   : > { %2557 = vrot.lane.b32.xlu2 %v2552_v27, %s5509_s28  ;;  %2559 = vrot.lane.b32.xlu0 %v2553_v55, %s5509_s28 }
 0x867   : > { %2561 = vrot.lane.b32.xlu1 %v2554_v25, %s5509_s28 }
 0x8a1   : > { %v6792_v11 = vpop.permute.xlu0 %2506 }
 0x8a2   : > { %10026 = vst [vmem:[#allocation151_spill] sm:$0xff] %v6792_v11 }
 0x8a8   : > { %v6790_v49 = vpop.permute.xlu2 %2510 }
 0x8a9   : > { %10025 = vst [vmem:[#allocation150_spill] sm:$0xff] %v6790_v49 }
 0x8b0   : > { %v6796_v59 = vpop.permute.xlu2 %2516 }
 0x8b1   : > { %10028 = vst [vmem:[#allocation153_spill] sm:$0xff] %v6796_v59 }
 0x8b8   : > { %v6802_v51 = vpop.permute.xlu2 %2522 }
 0x8b9   : > { %v6794_v60 = vpop.permute.xlu1 %2508  ;;  %10031 = vst [vmem:[#allocation156_spill] sm:$0xff] %v6802_v51 }
 0x8ba   : > { %10027 = vst [vmem:[#allocation152_spill] sm:$0xff] %v6794_v60 }
 0x8c0   : > { %v6798_v31 = vpop.permute.xlu0 %2512  ;;  %v2558_v13 = vpop.permute.xlu2 %2557 }
 0x8c1   : > { %10029 = vst [vmem:[#allocation154_spill] sm:$0xff] %v6798_v31  ;;  %v6800_v40 = vpop.permute.xlu1 %2514 }
 0x8c2   : > { %10030 = vst [vmem:[#allocation155_spill] sm:$0xff] %v6800_v40 }
 0x8c8   : > { %v6804_v33 = vpop.permute.xlu0 %2518 }
 0x8c9   : > { %10032 = vst [vmem:[#allocation157_spill] sm:$0xff] %v6804_v33  ;;  %v6806_v35 = vpop.permute.xlu1 %2520 }
 0x8ca   : > { %10033 = vst [vmem:[#allocation158_spill] sm:$0xff] %v6806_v35 }
 0x8d0   : > { %v6808_v39 = vpop.permute.xlu0 %2524 }
 0x8d1   : > { %10034 = vst [vmem:[#allocation159_spill] sm:$0xff] %v6808_v39  ;;  %v2556_v42 = vpop.permute.xlu1 %2555 }
 0x8d2   : > { %v2563_v50 = vsel %vm293_vm2, %v2556_v42, %v2558_v13  ;;  %v2571_v4 = vmul.f32 %v2556_v42, %v6635_v8  ;;  %v2576_v48 = vmul.f32 %v6813_v52, %v2556_v42 }
 0x8d3   : > { %v2572_v36 = vmul.f32 %v2563_v50, %v6648_v34  ;;  %v2577_v47 = vmul.f32 %v6818_v41, %v2563_v50  ;;  %v2582_v31 = vmul.f32 %v2563_v50, %v6673_v46 }
 0x8d4   : > { %v2601_v3 = vrot.slane %v2571_v4, 3  ;;  %v2602_v14 = vrot.slane %v2576_v48, 3 }
 0x8d5   : > { %v2604_v27 = vrot.slane %v2572_v36, 3  ;;  %v2605_v55 = vrot.slane %v2577_v47, 3 }
 0x8d6   : > { %v2603_v25 = vsel %vm2273_vm5, %v2601_v3, %v2602_v14 }
 0x8d7   : > { %2626 = vrot.lane.b32.xlu2 %v2603_v25, %s5507_s22  ;;  %v2606_v8 = vsel %vm2273_vm5, %v2604_v27, %v2605_v55 }
 0x8d8   : > { %v2560_v11 = vpop.permute.xlu0 %2559  ;;  %2628 = vrot.lane.b32.xlu0 %v2606_v8, %s5507_s22 }
 0x8d9   : > { %v2564_v60 = vsel %vm293_vm2, %v2558_v13, %v2560_v11  ;;  %v2562_v39 = vpop.permute.xlu1 %2561 }
 0x8da   : > { %v2573_v35 = vmul.f32 %v2564_v60, %v6641_v53  ;;  %v2578_v51 = vmul.f32 %v6756_v62, %v2564_v60  ;;  %v2565_v4 = vsel %vm293_vm2, %v2560_v11, %v2562_v39  ;;  %v2575_v48 = vmul.f32 %v2562_v39, %v6654_v30 }
 0x8db   : > { %v2580_v36 = vmul.f32 %v6747_v54, %v2562_v39  ;;  %v2574_v47 = vmul.f32 %v2565_v4, %v6661_v57  ;;  %v2579_v3 = vmul.f32 %v6761_v38, %v2565_v4  ;;  %v2581_v11 = vmul.f32 %v2556_v42, %v6657_v16  ;;  %v5369_v16 = vld [vmem:[%s9681_s1 + $0x83] ss:$8 sm:$0xf0] }
 0x8dc   : > { %v2607_v27 = vrot.slane %v2573_v35, 3  ;;  %v2608_v25 = vrot.slane %v2578_v51, 3  ;;  %v2613_v8 = vrot.slane %v2575_v48, 3  ;;  %v2583_v29 = vmul.f32 %v2564_v60, %v6683_v37  ;;  %v5368_v51 = vld [vmem:[%s9681_s1 + $0x83] ss:$8 sm:$0xf] }
 0x8dd   : > { %v2614_v59 = vrot.slane %v2580_v36, 3  ;;  %v2610_v13 = vrot.slane %v2574_v47, 3  ;;  %v2611_v33 = vrot.slane %v2579_v3, 3  ;;  %v2616_v35 = vrot.slane %v2581_v11, 3 }
 0x8de   : > { %v2609_v40 = vsel %vm2273_vm5, %v2607_v27, %v2608_v25  ;;  %v2618_v42 = vrot.slane %v2582_v31, 3  ;;  %v2620_v50 = vrot.slane %v2583_v29, 3  ;;  %v6848_v60 = vor.u32 %v5369_v16, %v5368_v51 }
 0x8df   : > { %v2615_v49 = vsel %vm2273_vm5, %v2613_v8, %v2614_v59  ;;  %v2612_v45 = vsel %vm2273_vm5, %v2610_v13, %v2611_v33  ;;  %2630 = vrot.lane.b32.xlu1 %v2609_v40, %s5507_s22  ;;  %v2584_v48 = vmul.f32 %v2565_v4, %v6680_v32  ;;  %v2617_v40 = vsel %vm2273_vm5, %v2602_v14, %v2616_v35 }
 0x8e0   : > { %2632 = vrot.lane.b32.xlu2 %v2612_v45, %s5507_s22  ;;  %2634 = vrot.lane.b32.xlu0 %v2615_v49, %s5507_s22  ;;  %10035 = vst [vmem:[#allocation160_spill] sm:$0xff] %v6848_v60  ;;  %v2619_v45 = vsel %vm2273_vm5, %v2605_v55, %v2618_v42  ;;  %v2621_v49 = vsel %vm2273_vm5, %v2608_v25, %v2620_v50  ;;  %v2739_v29 = vrot.slane %v6848_v60, 4 }
 0x8e1   : > { %v2585_v36 = vmul.f32 %v2562_v39, %v6691_v58  ;;  %v2622_v31 = vrot.slane %v2584_v48, 3 }
 0x8e2   : > { %v2740_v3 = vperm.slane %v2739_v29, 0  ;;  %v2741_v39 = vperm.slane %v2739_v29, 1  ;;  %v2743_v55 = vperm.slane %v2739_v29, 3  ;;  %v2742_v27 = vperm.slane %v2739_v29, 2 }
 0x8e3   : > { %v2624_v47 = vrot.slane %v2585_v36, 3  ;;  %v2623_v4 = vsel %vm2273_vm5, %v2611_v33, %v2622_v31 }
 0x8e5   : > { %v2625_v14 = vsel %vm2273_vm5, %v2614_v59, %v2624_v47 }
 0x8e7   : > { %2636 = vrot.lane.b32.xlu1 %v2617_v40, %s5507_s22 }
 0x8e8   : > { %2638 = vrot.lane.b32.xlu2 %v2619_v45, %s5507_s22  ;;  %2640 = vrot.lane.b32.xlu0 %v2621_v49, %s5507_s22 }
 0x8ef   : > { %2642 = vrot.lane.b32.xlu1 %v2623_v4, %s5507_s22 }
 0x8f0   : > { %2644 = vrot.lane.b32.xlu2 %v2625_v14, %s5507_s22  ;;  %2744 = vrot.lane.b32.xlu0 %v2740_v3, %s5507_s22 }
 0x8f7   : > { %2746 = vrot.lane.b32.xlu1 %v2741_v39, %s5507_s22 }
 0x8f8   : > { %2750 = vrot.lane.b32.xlu0 %v2743_v55, %s5507_s22  ;;  %2748 = vrot.lane.b32.xlu2 %v2742_v27, %s5507_s22 }
 0x931   : > { %v6867_v25 = vpop.permute.xlu2 %2626 }
 0x932   : > { %10036 = vst [vmem:[#allocation161_spill] sm:$0xff] %v6867_v25 }
 0x93a   : > { %v6871_v8 = vpop.permute.xlu2 %2632 }
 0x93b   : > { %10038 = vst [vmem:[#allocation163_spill] sm:$0xff] %v6871_v8 }
 0x942   : > { %v6877_v11 = vpop.permute.xlu2 %2638 }
 0x943   : > { %10041 = vst [vmem:[#allocation166_spill] sm:$0xff] %v6877_v11 }
 0x94a   : > { %v6869_v33 = vpop.permute.xlu0 %2628  ;;  %v6883_v35 = vpop.permute.xlu2 %2644 }
 0x94b   : > { %10037 = vst [vmem:[#allocation162_spill] sm:$0xff] %v6869_v33 }
 0x94c   : > { %10044 = vst [vmem:[#allocation169_spill] sm:$0xff] %v6883_v35 }
 0x951   : > { %v6873_v59 = vpop.permute.xlu1 %2630 }
 0x952   : > { %10039 = vst [vmem:[#allocation164_spill] sm:$0xff] %v6873_v59  ;;  %v6875_v13 = vpop.permute.xlu0 %2634  ;;  %v2749_v29 = vpop.permute.xlu2 %2748 }
 0x953   : > { %10040 = vst [vmem:[#allocation165_spill] sm:$0xff] %v6875_v13 }
 0x959   : > { %v6879_v51 = vpop.permute.xlu1 %2636 }
 0x95a   : > { %10042 = vst [vmem:[#allocation167_spill] sm:$0xff] %v6879_v51  ;;  %v6881_v16 = vpop.permute.xlu0 %2640 }
 0x95b   : > { %10043 = vst [vmem:[#allocation168_spill] sm:$0xff] %v6881_v16 }
 0x961   : > { %v6885_v42 = vpop.permute.xlu1 %2642 }
 0x962   : > { %10045 = vst [vmem:[#allocation170_spill] sm:$0xff] %v6885_v42  ;;  %v2745_v50 = vpop.permute.xlu0 %2744 }
 0x963   : > { %v2760_v48 = vmul.f32 %v2745_v50, %v6648_v34  ;;  %v2765_v40 = vmul.f32 %v6818_v41, %v2745_v50  ;;  %v2770_v59 = vmul.f32 %v2745_v50, %v6673_v46 }
 0x965   : > { %v2790_v45 = vrot.slane %v2760_v48, 3  ;;  %v2791_v49 = vrot.slane %v2765_v40, 3 }
 0x967   : > { %v2792_v36 = vsel %vm2273_vm5, %v2790_v45, %v2791_v49 }
 0x968   : > { %2815 = vrot.lane.b32.xlu1 %v2792_v36, %s5509_s28  ;;  %v6901_v36 = vld [vmem:[%s5588_s5 + $0x28] sm:$0xf8] }
 0x969   : > { %v2747_v31 = vpop.permute.xlu1 %2746 }
 0x96a   : > { %v2752_v47 = vsel %vm244_vm1, %v2745_v50, %v2747_v31  ;;  %v2751_v3 = vpop.permute.xlu0 %2750  ;;  %v2753_v4 = vsel %vm244_vm1, %v2747_v31, %v2749_v29 }
 0x96b   : > { %v2761_v14 = vmul.f32 %v2752_v47, %v6641_v53  ;;  %v2766_v39 = vmul.f32 %v6756_v62, %v2752_v47  ;;  %v2754_v55 = vsel %vm244_vm1, %v2749_v29, %v2751_v3  ;;  %v2762_v27 = vmul.f32 %v2753_v4, %v6661_v57 }
 0x96c   : > { %v2763_v48 = vmul.f32 %v2754_v55, %v6654_v30  ;;  %v2767_v40 = vmul.f32 %v6761_v38, %v2753_v4  ;;  %v2768_v45 = vmul.f32 %v6747_v54, %v2754_v55  ;;  %v2764_v29 = vmul.f32 %v2751_v3, %v6901_v36 }
 0x96d   : > { %v2793_v25 = vrot.slane %v2761_v14, 3  ;;  %v2794_v33 = vrot.slane %v2766_v39, 3  ;;  %v2796_v35 = vrot.slane %v2762_v27, 3  ;;  %v2769_v13 = vmul.f32 %v6506_v0, %v2751_v3 }
 0x96e   : > { %v2797_v31 = vrot.slane %v2767_v40, 3  ;;  %v2799_v42 = vrot.slane %v2763_v48, 3  ;;  %v2800_v16 = vrot.slane %v2768_v45, 3  ;;  %v2771_v14 = vmul.f32 %v2752_v47, %v6683_v37  ;;  %v6915_v45 = vld [vmem:[%s5588_s5 + $0x88] sm:$0x7] }
 0x96f   : > { %v2795_v51 = vsel %vm2273_vm5, %v2793_v25, %v2794_v33  ;;  %v2802_v27 = vrot.slane %v2764_v29, 3  ;;  %v2803_v25 = vrot.slane %v2769_v13, 3  ;;  %v2805_v48 = vrot.slane %v2770_v59, 3 }
 0x970   : > { %2817 = vrot.lane.b32.xlu2 %v2795_v51, %s5509_s28  ;;  %v2798_v11 = vsel %vm2273_vm5, %v2796_v35, %v2797_v31  ;;  %v2801_v39 = vsel %vm2273_vm5, %v2799_v42, %v2800_v16  ;;  %v2807_v40 = vrot.slane %v2771_v14, 3  ;;  %v2772_v35 = vmul.f32 %v2753_v4, %v6680_v32 }
 0x971   : > { %2819 = vrot.lane.b32.xlu0 %v2798_v11, %s5509_s28  ;;  %2821 = vrot.lane.b32.xlu1 %v2801_v39, %s5509_s28  ;;  %v2804_v51 = vsel %vm2273_vm5, %v2802_v27, %v2803_v25  ;;  %v2773_v50 = vmul.f32 %v2754_v55, %v6691_v58  ;;  %v2806_v42 = vsel %vm2273_vm5, %v2791_v49, %v2805_v48 }
 0x972   : > { %v2808_v11 = vsel %vm2273_vm5, %v2794_v33, %v2807_v40  ;;  %v2774_v13 = vmul.f32 %v2751_v3, %v6915_v45  ;;  %v2809_v59 = vrot.slane %v2772_v35, 3  ;;  %v5370_v33 = vld [vmem:[%s9681_s1 + $0xc3] ss:$8 sm:$0xf] }
 0x973   : > { %v2811_v47 = vrot.slane %v2773_v50, 3  ;;  %v2860_v49 = vperm.slane %v5370_v33, 0  ;;  %v2861_v3 = vperm.slane %v5370_v33, 1  ;;  %v2862_v39 = vperm.slane %v5370_v33, 2 }
 0x974   : > { %v2813_v29 = vrot.slane %v2774_v13, 3  ;;  %v2810_v14 = vsel %vm2273_vm5, %v2797_v31, %v2809_v59 }
 0x975   : > { %v2812_v4 = vsel %vm2273_vm5, %v2800_v16, %v2811_v47  ;;  %v2863_v16 = vperm.slane %v5370_v33, 3 }
 0x976   : > { %v2814_v55 = vsel %vm2273_vm5, %v2803_v25, %v2813_v29 }
 0x978   : > { %2823 = vrot.lane.b32.xlu2 %v2804_v51, %s5509_s28 }
 0x979   : > { %2825 = vrot.lane.b32.xlu0 %v2806_v42, %s5509_s28  ;;  %2827 = vrot.lane.b32.xlu1 %v2808_v11, %s5509_s28 }
 0x980   : > { %2829 = vrot.lane.b32.xlu2 %v2810_v14, %s5509_s28 }
 0x981   : > { %2831 = vrot.lane.b32.xlu0 %v2812_v4, %s5509_s28  ;;  %2833 = vrot.lane.b32.xlu1 %v2814_v55, %s5509_s28 }
 0x988   : > { %2864 = vrot.lane.b32.xlu2 %v2860_v49, %s5508_s23 }
 0x989   : > { %2866 = vrot.lane.b32.xlu0 %v2861_v3, %s5508_s23  ;;  %2868 = vrot.lane.b32.xlu1 %v2862_v39, %s5508_s23 }
 0x990   : > { %2870 = vrot.lane.b32.xlu2 %v2863_v16, %s5508_s23 }
 0x9ca   : > { %v6938_v31 = vpop.permute.xlu2 %2817 }
 0x9cb   : > { %10046 = vst [vmem:[#allocation171_spill] sm:$0xff] %v6938_v31 }
 0x9d2   : > { %v6940_v27 = vpop.permute.xlu2 %2823 }
 0x9d3   : > { %10047 = vst [vmem:[#allocation172_spill] sm:$0xff] %v6940_v27 }
 0x9da   : > { %v6942_v25 = vpop.permute.xlu1 %2815  ;;  %v6944_v48 = vpop.permute.xlu2 %2829 }
 0x9db   : > { %10048 = vst [vmem:[#allocation173_spill] sm:$0xff] %v6942_v25 }
 0x9dc   : > { %10049 = vst [vmem:[#allocation174_spill] sm:$0xff] %v6944_v48 }
 0x9e2   : > { %v2865_v40 = vpop.permute.xlu2 %2864 }
 0x9e3   : > { %v6946_v51 = vpop.permute.xlu0 %2819  ;;  %v2880_v35 = vmul.f32 %v2865_v40, %v6648_v34  ;;  %v2885_v50 = vmul.f32 %v6818_v41, %v2865_v40  ;;  %v6950_v42 = vpop.permute.xlu1 %2821 }
 0x9e4   : > { %10050 = vst [vmem:[#allocation175_spill] sm:$0xff] %v6946_v51 }
 0x9e5   : > { %10051 = vst [vmem:[#allocation176_spill] sm:$0xff] %v6950_v42  ;;  %v2910_v11 = vrot.slane %v2880_v35, 3  ;;  %v2911_v13 = vrot.slane %v2885_v50, 3 }
 0x9e7   : > { %v2912_v59 = vsel %vm2273_vm5, %v2910_v11, %v2911_v13 }
 0x9e8   : > { %2935 = vrot.lane.b32.xlu0 %v2912_v59, %s5508_s23 }
 0x9ea   : > { %v2871_v34 = vpop.permute.xlu2 %2870 }
 0x9eb   : > { %v6954_v47 = vpop.permute.xlu0 %2825  ;;  %v6956_v29 = vpop.permute.xlu1 %2827  ;;  %v2884_v59 = vmul.f32 %v2871_v34, %v6901_v36  ;;  %v2890_v36 = vmul.f32 %v2865_v40, %v6673_v46 }
 0x9ec   : > { %10052 = vst [vmem:[#allocation177_spill] sm:$0xff] %v6954_v47 }
 0x9ed   : > { %10053 = vst [vmem:[#allocation178_spill] sm:$0xff] %v6956_v29 }
 0x9f3   : > { %v6958_v14 = vpop.permute.xlu0 %2831  ;;  %v6960_v4 = vpop.permute.xlu1 %2833 }
 0x9f4   : > { %10054 = vst [vmem:[#allocation179_spill] sm:$0xff] %v6958_v14  ;;  %v2889_v14 = vmul.f32 %v6506_v0, %v2871_v34 }
 0x9f5   : > { %10055 = vst [vmem:[#allocation180_spill] sm:$0xff] %v6960_v4 }
 0x9fb   : > { %v2867_v55 = vpop.permute.xlu0 %2866  ;;  %v2869_v33 = vpop.permute.xlu1 %2868 }
 0x9fc   : > { %v2872_v49 = vsel %vm331_vm0, %v2865_v40, %v2867_v55  ;;  %v2873_v3 = vsel %vm331_vm0, %v2867_v55, %v2869_v33  ;;  %v2874_v11 = vsel %vm331_vm0, %v2869_v33, %v2871_v34 }
 0x9fd   : > { %v2881_v39 = vmul.f32 %v2872_v49, %v6641_v53  ;;  %v2886_v16 = vmul.f32 %v6756_v62, %v2872_v49  ;;  %v2882_v35 = vmul.f32 %v2873_v3, %v6661_v57  ;;  %v2887_v50 = vmul.f32 %v6761_v38, %v2873_v3 }
 0x9fe   : > { %v2883_v4 = vmul.f32 %v2874_v11, %v6654_v30  ;;  %v2888_v53 = vmul.f32 %v6747_v54, %v2874_v11  ;;  %v2923_v30 = vrot.slane %v2889_v14, 3  ;;  %v2891_v0 = vmul.f32 %v2872_v49, %v6683_v37  ;;  %v5371_v37 = vld [vmem:[%s9681_s1 + $0x4] ss:$8 sm:$0xf] }
 0x9ff   : > { %v2913_v25 = vrot.slane %v2881_v39, 3  ;;  %v2914_v31 = vrot.slane %v2886_v16, 3  ;;  %v2916_v47 = vrot.slane %v2882_v35, 3  ;;  %v2917_v55 = vrot.slane %v2887_v50, 3 }
 0xa00   : > { %v2919_v48 = vrot.slane %v2883_v4, 3  ;;  %v2920_v33 = vrot.slane %v2888_v53, 3  ;;  %v2922_v39 = vrot.slane %v2884_v59, 3  ;;  %v2925_v35 = vrot.slane %v2890_v36, 3 }
 0xa01   : > { %v2915_v29 = vsel %vm2273_vm5, %v2913_v25, %v2914_v31  ;;  %v2918_v57 = vsel %vm2273_vm5, %v2916_v47, %v2917_v55  ;;  %v2927_v4 = vrot.slane %v2891_v0, 3  ;;  %v2892_v47 = vmul.f32 %v2873_v3, %v6680_v32 }
 0xa02   : > { %2937 = vrot.lane.b32.xlu1 %v2915_v29, %s5508_s23  ;;  %2939 = vrot.lane.b32.xlu2 %v2918_v57, %s5508_s23  ;;  %v2921_v16 = vsel %vm2273_vm5, %v2919_v48, %v2920_v33  ;;  %v2924_v25 = vsel %vm2273_vm5, %v2922_v39, %v2923_v30  ;;  %v2926_v29 = vsel %vm2273_vm5, %v2911_v13, %v2925_v35  ;;  %v5372_v48 = vld [vmem:[%s9681_s1 + $0x4] ss:$8 sm:$0xf0] }
 0xa03   : > { %2941 = vrot.lane.b32.xlu0 %v2921_v16, %s5508_s23  ;;  %v2893_v46 = vmul.f32 %v2874_v11, %v6691_v58  ;;  %v2928_v40 = vsel %vm2273_vm5, %v2914_v31, %v2927_v4  ;;  %v2894_v32 = vmul.f32 %v2871_v34, %v6915_v45  ;;  %v2929_v14 = vrot.slane %v2892_v47, 3 }
 0xa04   : > { %v6996_v49 = vor.u32 %v5372_v48, %v5371_v37 }
 0xa05   : > { %v2931_v13 = vrot.slane %v2893_v46, 3  ;;  %v2933_v58 = vrot.slane %v2894_v32, 3  ;;  %v2930_v3 = vsel %vm2273_vm5, %v2917_v55, %v2929_v14  ;;  %v7033_v46 = vld [vmem:[%s5588_s5 + $0x8] sm:$0xf0] }
 0xa06   : > { %10056 = vst [vmem:[#allocation181_spill] sm:$0xff] %v6996_v49  ;;  %v3075_v11 = vrot.slane %v6996_v49, 4 }
 0xa07   : > { %v2932_v50 = vsel %vm2273_vm5, %v2920_v33, %v2931_v13  ;;  %v2934_v31 = vsel %vm2273_vm5, %v2923_v30, %v2933_v58 }
 0xa08   : > { %v3076_v45 = vperm.slane %v3075_v11, 0  ;;  %v3077_v34 = vperm.slane %v3075_v11, 1  ;;  %v3078_v59 = vperm.slane %v3075_v11, 2  ;;  %v3079_v55 = vperm.slane %v3075_v11, 3 }
 0xa0a   : > { %2943 = vrot.lane.b32.xlu1 %v2924_v25, %s5508_s23  ;;  %2945 = vrot.lane.b32.xlu2 %v2926_v29, %s5508_s23  ;;  %v7030_v29 = vld [vmem:[%s5588_s5] sm:$0xf0] }
 0xa0b   : > { %2947 = vrot.lane.b32.xlu0 %v2928_v40, %s5508_s23 }
 0xa12   : > { %2949 = vrot.lane.b32.xlu1 %v2930_v3, %s5508_s23  ;;  %2951 = vrot.lane.b32.xlu2 %v2932_v50, %s5508_s23  ;;  %v7041_v50 = vld [vmem:[%s5588_s5 + $0x10] sm:$0xf0] }
 0xa13   : > { %2953 = vrot.lane.b32.xlu0 %v2934_v31, %s5508_s23 }
 0xa1a   : > { %3080 = vrot.lane.b32.xlu1 %v3076_v45, %s5507_s22  ;;  %3082 = vrot.lane.b32.xlu2 %v3077_v34, %s5507_s22 }
 0xa1b   : > { %3084 = vrot.lane.b32.xlu0 %v3078_v59, %s5507_s22 }
 0xa22   : > { %3086 = vrot.lane.b32.xlu1 %v3079_v55, %s5507_s22 }
 0xa5a   : > { %v7009_v53 = vpop.permute.xlu0 %2935 }
 0xa5b   : > { %10057 = vst [vmem:[#allocation182_spill] sm:$0xff] %v7009_v53  ;;  %v7050_v53 = vld [vmem:[%s5588_s5 + $0x20] sm:$0xf0] }
 0xa5c   : > { %v7011_v57 = vpop.permute.xlu2 %2939 }
 0xa5d   : > { %10058 = vst [vmem:[#allocation183_spill] sm:$0xff] %v7011_v57 }
 0xa64   : > { %v7017_v39 = vpop.permute.xlu2 %2945 }
 0xa65   : > { %10061 = vst [vmem:[#allocation186_spill] sm:$0xff] %v7017_v39 }
 0xa6c   : > { %v7023_v16 = vpop.permute.xlu2 %2951 }
 0xa6d   : > { %10064 = vst [vmem:[#allocation189_spill] sm:$0xff] %v7023_v16 }
 0xa74   : > { %v7013_v33 = vpop.permute.xlu1 %2937  ;;  %v3083_v4 = vpop.permute.xlu2 %3082 }
 0xa75   : > { %10059 = vst [vmem:[#allocation184_spill] sm:$0xff] %v7013_v33  ;;  %v7015_v36 = vpop.permute.xlu0 %2941 }
 0xa76   : > { %10060 = vst [vmem:[#allocation185_spill] sm:$0xff] %v7015_v36 }
 0xa7c   : > { %v7019_v30 = vpop.permute.xlu1 %2943 }
 0xa7d   : > { %10062 = vst [vmem:[#allocation187_spill] sm:$0xff] %v7019_v30  ;;  %v7021_v0 = vpop.permute.xlu0 %2947 }
 0xa7e   : > { %10063 = vst [vmem:[#allocation188_spill] sm:$0xff] %v7021_v0 }
 0xa84   : > { %v7025_v35 = vpop.permute.xlu1 %2949 }
 0xa85   : > { %10065 = vst [vmem:[#allocation190_spill] sm:$0xff] %v7025_v35  ;;  %v7027_v25 = vpop.permute.xlu0 %2953 }
 0xa86   : > { %10066 = vst [vmem:[#allocation191_spill] sm:$0xff] %v7027_v25 }
 0xa8c   : > { %v3081_v47 = vpop.permute.xlu1 %3080 }
 0xa8d   : > { %v3088_v37 = vsel %vm244_vm1, %v3081_v47, %v3083_v4  ;;  %v3096_v48 = vmul.f32 %v3081_v47, %v7030_v29  ;;  %v3101_v40 = vmul.f32 %v6813_v52, %v3081_v47  ;;  %v3085_v13 = vpop.permute.xlu0 %3084 }
 0xa8e   : > { %v3097_v32 = vmul.f32 %v3088_v37, %v7033_v46  ;;  %v3102_v14 = vmul.f32 %v6818_v41, %v3088_v37  ;;  %v3089_v11 = vsel %vm244_vm1, %v3083_v4, %v3085_v13  ;;  %v7054_v4 = vld [vmem:[%s5588_s5 + $0x60] sm:$0xf] }
 0xa8f   : > { %v3126_v58 = vrot.slane %v3096_v48, 4  ;;  %v3127_v3 = vrot.slane %v3101_v40, 4  ;;  %v3098_v34 = vmul.f32 %v3089_v11, %v7041_v50  ;;  %v3103_v59 = vmul.f32 %v6756_v62, %v3089_v11 }
 0xa90   : > { %v3129_v31 = vrot.slane %v3097_v32, 4  ;;  %v3130_v45 = vrot.slane %v3102_v14, 4  ;;  %v3106_v14 = vmul.f32 %v3081_v47, %v7054_v4 }
 0xa91   : > { %v3128_v55 = vsel %vm3038_vm6, %v3126_v58, %v3127_v3  ;;  %v3132_v40 = vrot.slane %v3098_v34, 4  ;;  %v3133_v33 = vrot.slane %v3103_v59, 4 }
 0xa92   : > { %3151 = vrot.lane.b32.xlu2 %v3128_v55, %s5509_s28  ;;  %v3131_v48 = vsel %vm3038_vm6, %v3129_v31, %v3130_v45  ;;  %v7060_v55 = vld [vmem:[%s5588_s5 + $0x18] sm:$0xf0]  ;;  %v3141_v0 = vrot.slane %v3106_v14, 4 }
 0xa93   : > { %3153 = vrot.lane.b32.xlu0 %v3131_v48, %s5509_s28  ;;  %v3134_v25 = vsel %vm3038_vm6, %v3132_v40, %v3133_v33  ;;  %v7068_v40 = vld [vmem:[%s5588_s5 + $0x68] sm:$0xf] }
 0xa94   : > { %v3087_v32 = vpop.permute.xlu1 %3086  ;;  %3155 = vrot.lane.b32.xlu1 %v3134_v25, %s5509_s28  ;;  %v3107_v57 = vmul.f32 %v3088_v37, %v7068_v40  ;;  %v5373_v37 = vld [vmem:[%s9681_s1 + $0x44] ss:$8 sm:$0xf] }
 0xa95   : > { %v3090_v58 = vsel %vm244_vm1, %v3085_v13, %v3087_v32  ;;  %v3100_v31 = vmul.f32 %v3087_v32, %v7050_v53  ;;  %v3105_v34 = vmul.f32 %v6747_v54, %v3087_v32  ;;  %v7071_v13 = vld [vmem:[%s5588_s5 + $0x70] sm:$0xf] }
 0xa96   : > { %v3099_v59 = vmul.f32 %v3090_v58, %v7060_v55  ;;  %v3104_v48 = vmul.f32 %v6761_v38, %v3090_v58  ;;  %v3108_v25 = vmul.f32 %v3089_v11, %v7071_v13 }
 0xa97   : > { %v3138_v16 = vrot.slane %v3100_v31, 4  ;;  %v3139_v35 = vrot.slane %v3105_v34, 4  ;;  %v7080_v31 = vld [vmem:[%s5588_s5 + $0x78] sm:$0xf]  ;;  %v3142_v34 = vsel %vm3038_vm6, %v3127_v3, %v3141_v0 }
 0xa98   : > { %v3135_v47 = vrot.slane %v3099_v59, 4  ;;  %v3136_v39 = vrot.slane %v3104_v48, 4  ;;  %v3109_v59 = vmul.f32 %v3090_v58, %v7080_v31  ;;  %v3143_v48 = vrot.slane %v3107_v57, 4 }
 0xa99   : > { %v3140_v30 = vsel %vm3038_vm6, %v3138_v16, %v3139_v35  ;;  %v3145_v14 = vrot.slane %v3108_v25, 4  ;;  %v7086_v16 = vld [vmem:[%s5588_s5 + $0x80] sm:$0xf] }
 0xa9a   : > { %v3137_v36 = vsel %vm3038_vm6, %v3135_v47, %v3136_v39  ;;  %v3144_v11 = vsel %vm3038_vm6, %v3130_v45, %v3143_v48  ;;  %v3110_v57 = vmul.f32 %v3087_v32, %v7086_v16 }
 0xa9b   : > { %3157 = vrot.lane.b32.xlu2 %v3137_v36, %s5509_s28  ;;  %3159 = vrot.lane.b32.xlu0 %v3140_v30, %s5509_s28  ;;  %v5374_v36 = vld [vmem:[%s9681_s1 + $0x44] ss:$8 sm:$0xf0]  ;;  %v3147_v30 = vrot.slane %v3109_v59, 4  ;;  %v3146_v0 = vsel %vm3038_vm6, %v3133_v33, %v3145_v14 }
 0xa9c   : > { %3161 = vrot.lane.b32.xlu1 %v3142_v34, %s5509_s28  ;;  %v7099_v3 = vor.u32 %v5374_v36, %v5373_v37  ;;  %v3149_v47 = vrot.slane %v3110_v57, 4 }
 0xa9d   : > { %v3148_v58 = vsel %vm3038_vm6, %v3136_v39, %v3147_v30 }
 0xa9e   : > { %v3196_v25 = vperm.slane %v7099_v3, 0  ;;  %v3197_v34 = vperm.slane %v7099_v3, 1  ;;  %v3150_v45 = vsel %vm3038_vm6, %v3139_v35, %v3149_v47  ;;  %v3199_v33 = vperm.slane %v7099_v3, 3 }
 0xa9f   : > { %v3198_v32 = vperm.slane %v7099_v3, 2 }
 0xaa3   : > { %3163 = vrot.lane.b32.xlu2 %v3144_v11, %s5509_s28  ;;  %3165 = vrot.lane.b32.xlu0 %v3146_v0, %s5509_s28 }
 0xaa4   : > { %3167 = vrot.lane.b32.xlu1 %v3148_v58, %s5509_s28 }
 0xaab   : > { %3169 = vrot.lane.b32.xlu2 %v3150_v45, %s5509_s28  ;;  %3200 = vrot.lane.b32.xlu0 %v3196_v25, %s5508_s23 }
 0xaac   : > { %3202 = vrot.lane.b32.xlu1 %v3197_v34, %s5508_s23 }
 0xab3   : > { %3206 = vrot.lane.b32.xlu0 %v3199_v33, %s5508_s23  ;;  %3204 = vrot.lane.b32.xlu2 %v3198_v32, %s5508_s23 }
 0xaec   : > { %v7113_v39 = vpop.permute.xlu2 %3151 }
 0xaed   : > { %10067 = vst [vmem:[#allocation192_spill] sm:$0xff] %v7113_v39 }
 0xaf5   : > { %v7115_v59 = vpop.permute.xlu2 %3157 }
 0xaf6   : > { %10068 = vst [vmem:[#allocation193_spill] sm:$0xff] %v7115_v59 }
 0xafd   : > { %v7121_v14 = vpop.permute.xlu2 %3163 }
 0xafe   : > { %10071 = vst [vmem:[#allocation196_spill] sm:$0xff] %v7121_v14 }
 0xb05   : > { %v7117_v48 = vpop.permute.xlu0 %3153  ;;  %v7129_v11 = vpop.permute.xlu2 %3169 }
 0xb06   : > { %10069 = vst [vmem:[#allocation194_spill] sm:$0xff] %v7117_v48  ;;  %v7119_v35 = vpop.permute.xlu1 %3155 }
 0xb07   : > { %10070 = vst [vmem:[#allocation195_spill] sm:$0xff] %v7119_v35 }
 0xb08   : > { %10075 = vst [vmem:[#allocation200_spill] sm:$0xff] %v7129_v11 }
 0xb0d   : > { %v7123_v37 = vpop.permute.xlu0 %3159  ;;  %v3205_v58 = vpop.permute.xlu2 %3204 }
 0xb0e   : > { %10072 = vst [vmem:[#allocation197_spill] sm:$0xff] %v7123_v37  ;;  %v7125_v36 = vpop.permute.xlu1 %3161 }
 0xb0f   : > { %10073 = vst [vmem:[#allocation198_spill] sm:$0xff] %v7125_v36 }
 0xb15   : > { %v7127_v30 = vpop.permute.xlu0 %3165 }
 0xb16   : > { %10074 = vst [vmem:[#allocation199_spill] sm:$0xff] %v7127_v30  ;;  %v7131_v0 = vpop.permute.xlu1 %3167 }
 0xb17   : > { %10076 = vst [vmem:[#allocation201_spill] sm:$0xff] %v7131_v0 }
 0xb1d   : > { %v3201_v57 = vpop.permute.xlu0 %3200 }
 0xb1e   : > { %v3216_v47 = vmul.f32 %v3201_v57, %v7030_v29  ;;  %v3221_v25 = vmul.f32 %v6813_v52, %v3201_v57  ;;  %v3203_v34 = vpop.permute.xlu1 %3202  ;;  %v3226_v59 = vmul.f32 %v3201_v57, %v7054_v4 }
 0xb1f   : > { %v3208_v32 = vsel %vm331_vm0, %v3201_v57, %v3203_v34  ;;  %v3209_v39 = vsel %vm331_vm0, %v3203_v34, %v3205_v58 }
 0xb20   : > { %v3246_v45 = vrot.slane %v3216_v47, 4  ;;  %v3247_v33 = vrot.slane %v3221_v25, 4  ;;  %v3218_v48 = vmul.f32 %v3209_v39, %v7041_v50  ;;  %v3223_v30 = vmul.f32 %v6756_v62, %v3209_v39 }
 0xb21   : > { %v3217_v0 = vmul.f32 %v3208_v32, %v7033_v46  ;;  %v3222_v37 = vmul.f32 %v6818_v41, %v3208_v32  ;;  %v3261_v27 = vrot.slane %v3226_v59, 4  ;;  %v3227_v49 = vmul.f32 %v3208_v32, %v7068_v40 }
 0xb22   : > { %v3248_v11 = vsel %vm3038_vm6, %v3246_v45, %v3247_v33  ;;  %v3252_v36 = vrot.slane %v3218_v48, 4  ;;  %v3253_v14 = vrot.slane %v3223_v30, 4  ;;  %v3228_v60 = vmul.f32 %v3209_v39, %v7071_v13 }
 0xb23   : > { %3271 = vrot.lane.b32.xlu1 %v3248_v11, %s5508_s23  ;;  %v3249_v47 = vrot.slane %v3217_v0, 4  ;;  %v3250_v25 = vrot.slane %v3222_v37, 4  ;;  %v3315_v39 = vrot.slane %v7099_v3, 4 }
 0xb24   : > { %v3254_v34 = vsel %vm3038_vm6, %v3252_v36, %v3253_v14 }
 0xb25   : > { %v3207_v35 = vpop.permute.xlu0 %3206  ;;  %v3251_v11 = vsel %vm3038_vm6, %v3249_v47, %v3250_v25  ;;  %3275 = vrot.lane.b32.xlu0 %v3254_v34, %s5508_s23  ;;  %v3262_v34 = vsel %vm3038_vm6, %v3247_v33, %v3261_v27 }
 0xb26   : > { %v3210_v51 = vsel %vm331_vm0, %v3205_v58, %v3207_v35  ;;  %v3220_v42 = vmul.f32 %v3207_v35, %v7050_v53  ;;  %v3225_v45 = vmul.f32 %v6747_v54, %v3207_v35  ;;  %3273 = vrot.lane.b32.xlu2 %v3251_v11, %s5508_s23  ;;  %v3230_v32 = vmul.f32 %v3207_v35, %v7086_v16 }
 0xb27   : > { %v3219_v48 = vmul.f32 %v3210_v51, %v7060_v55  ;;  %v3224_v30 = vmul.f32 %v6761_v38, %v3210_v51  ;;  %v3229_v8 = vmul.f32 %v3210_v51, %v7080_v31  ;;  %v3318_v35 = vperm.slane %v3315_v39, 2 }
 0xb28   : > { %v3258_v37 = vrot.slane %v3220_v42, 4  ;;  %v3259_v0 = vrot.slane %v3225_v45, 4  ;;  %v3263_v42 = vrot.slane %v3227_v49, 4  ;;  %v3265_v45 = vrot.slane %v3228_v60, 4 }
 0xb29   : > { %v3255_v57 = vrot.slane %v3219_v48, 4  ;;  %v3256_v36 = vrot.slane %v3224_v30, 4  ;;  %v3267_v59 = vrot.slane %v3229_v8, 4  ;;  %v3269_v51 = vrot.slane %v3230_v32, 4 }
 0xb2a   : > { %v3260_v47 = vsel %vm3038_vm6, %v3258_v37, %v3259_v0  ;;  %v3264_v11 = vsel %vm3038_vm6, %v3250_v25, %v3263_v42  ;;  %v3266_v27 = vsel %vm3038_vm6, %v3253_v14, %v3265_v45  ;;  %v3317_v60 = vperm.slane %v3315_v39, 1 }
 0xb2b   : > { %v3257_v58 = vsel %vm3038_vm6, %v3255_v57, %v3256_v36  ;;  %v3268_v48 = vsel %vm3038_vm6, %v3256_v36, %v3267_v59  ;;  %v3270_v8 = vsel %vm3038_vm6, %v3259_v0, %v3269_v51  ;;  %v3316_v49 = vperm.slane %v3315_v39, 0 }
 0xb2c   : > { %3277 = vrot.lane.b32.xlu1 %v3257_v58, %s5508_s23  ;;  %v3319_v14 = vperm.slane %v3315_v39, 3 }
 0xb2d   : > { %3281 = vrot.lane.b32.xlu0 %v3262_v34, %s5508_s23 }
 0xb2e   : > { %3279 = vrot.lane.b32.xlu2 %v3260_v47, %s5508_s23 }
 0xb34   : > { %3283 = vrot.lane.b32.xlu1 %v3264_v11, %s5508_s23 }
 0xb35   : > { %3287 = vrot.lane.b32.xlu0 %v3268_v48, %s5508_s23 }
 0xb36   : > { %3285 = vrot.lane.b32.xlu2 %v3266_v27, %s5508_s23 }
 0xb3c   : > { %3289 = vrot.lane.b32.xlu1 %v3270_v8, %s5508_s23 }
 0xb3d   : > { %3322 = vrot.lane.b32.xlu0 %v3317_v60, %s5509_s28 }
 0xb3e   : > { %3320 = vrot.lane.b32.xlu2 %v3316_v49, %s5509_s28 }
 0xb44   : > { %3324 = vrot.lane.b32.xlu1 %v3318_v35, %s5509_s28 }
 0xb46   : > { %3326 = vrot.lane.b32.xlu2 %v3319_v14, %s5509_s28 }
 0xb80   : > { %v7176_v33 = vpop.permute.xlu2 %3273 }
 0xb81   : > { %10077 = vst [vmem:[#allocation202_spill] sm:$0xff] %v7176_v33 }
 0xb88   : > { %v7178_v3 = vpop.permute.xlu2 %3279 }
 0xb89   : > { %10078 = vst [vmem:[#allocation203_spill] sm:$0xff] %v7178_v3 }
 0xb90   : > { %v7180_v25 = vpop.permute.xlu2 %3285 }
 0xb91   : > { %10079 = vst [vmem:[#allocation204_spill] sm:$0xff] %v7180_v25 }
 0xb95   : > { %v7182_v30 = vpop.permute.xlu1 %3271 }
 0xb96   : > { %10080 = vst [vmem:[#allocation205_spill] sm:$0xff] %v7182_v30 }
 0xb97   : > { %v7184_v37 = vpop.permute.xlu0 %3275 }
 0xb98   : > { %10081 = vst [vmem:[#allocation206_spill] sm:$0xff] %v7184_v37  ;;  %v3321_v0 = vpop.permute.xlu2 %3320 }
 0xb99   : > { %v3336_v57 = vmul.f32 %v3321_v0, %v7030_v29  ;;  %v3341_v36 = vmul.f32 %v6813_v52, %v3321_v0 }
 0xb9b   : > { %v3366_v58 = vrot.slane %v3336_v57, 4  ;;  %v3367_v47 = vrot.slane %v3341_v36, 4 }
 0xb9d   : > { %v3368_v42 = vsel %vm3038_vm6, %v3366_v58, %v3367_v47 }
 0xb9e   : > { %v7188_v34 = vpop.permute.xlu1 %3277  ;;  %3391 = vrot.lane.b32.xlu0 %v3368_v42, %s5507_s22 }
 0xb9f   : > { %v7192_v59 = vpop.permute.xlu0 %3281 }
 0xba0   : > { %10082 = vst [vmem:[#allocation207_spill] sm:$0xff] %v7192_v59  ;;  %v3327_v52 = vpop.permute.xlu2 %3326 }
 0xba1   : > { %v3340_v60 = vmul.f32 %v3327_v52, %v7050_v53  ;;  %v3345_v49 = vmul.f32 %v6747_v54, %v3327_v52 }
 0xba3   : > { %v3379_v30 = vrot.slane %v3345_v49, 4 }
 0xba6   : > { %v7194_v45 = vpop.permute.xlu1 %3283 }
 0xba7   : > { %10083 = vst [vmem:[#allocation208_spill] sm:$0xff] %v7194_v45  ;;  %v7196_v11 = vpop.permute.xlu0 %3287 }
 0xba8   : > { %10084 = vst [vmem:[#allocation209_spill] sm:$0xff] %v7196_v11 }
 0xbae   : > { %v7198_v32 = vpop.permute.xlu1 %3289 }
 0xbaf   : > { %10085 = vst [vmem:[#allocation210_spill] sm:$0xff] %v7198_v32  ;;  %v3323_v48 = vpop.permute.xlu0 %3322 }
 0xbb0   : > { %v3328_v29 = vsel %vm293_vm2, %v3321_v0, %v3323_v48 }
 0xbb1   : > { %v3337_v27 = vmul.f32 %v3328_v29, %v7033_v46  ;;  %v3342_v51 = vmul.f32 %v6818_v41, %v3328_v29  ;;  %v3347_v25 = vmul.f32 %v3328_v29, %v7068_v40 }
 0xbb3   : > { %v3369_v39 = vrot.slane %v3337_v27, 4  ;;  %v3370_v8 = vrot.slane %v3342_v51, 4  ;;  %v3378_v51 = vrot.slane %v3340_v60, 4 }
 0xbb5   : > { %v3371_v14 = vsel %vm3038_vm6, %v3369_v39, %v3370_v8 }
 0xbb6   : > { %v3325_v35 = vpop.permute.xlu1 %3324  ;;  %3393 = vrot.lane.b32.xlu1 %v3371_v14, %s5507_s22  ;;  %v3380_v14 = vsel %vm3038_vm6, %v3378_v51, %v3379_v30 }
 0xbb7   : > { %v3329_v57 = vsel %vm293_vm2, %v3323_v48, %v3325_v35  ;;  %v3330_v36 = vsel %vm293_vm2, %v3325_v35, %v3327_v52  ;;  %v3346_v35 = vmul.f32 %v3321_v0, %v7054_v4  ;;  %v3383_v4 = vrot.slane %v3347_v25, 4  ;;  %v5376_v0 = vld [vmem:[%s9681_s1 + $0x84] ss:$8 sm:$0xf0] }
 0xbb8   : > { %v3338_v58 = vmul.f32 %v3329_v57, %v7041_v50  ;;  %v3343_v42 = vmul.f32 %v6756_v62, %v3329_v57  ;;  %v3339_v27 = vmul.f32 %v3330_v36, %v7060_v55  ;;  %v3344_v33 = vmul.f32 %v6761_v38, %v3330_v36 }
 0xbb9   : > { %v3348_v38 = vmul.f32 %v3329_v57, %v7071_v13  ;;  %v3381_v60 = vrot.slane %v3346_v35, 4  ;;  %v3384_v57 = vsel %vm3038_vm6, %v3370_v8, %v3383_v4 }
 0xbba   : > { %v3372_v54 = vrot.slane %v3338_v58, 4  ;;  %v3373_v32 = vrot.slane %v3343_v42, 4  ;;  %v3375_v11 = vrot.slane %v3339_v27, 4  ;;  %v3376_v39 = vrot.slane %v3344_v33, 4 }
 0xbbb   : > { %v5375_v33 = vld [vmem:[%s9681_s1 + $0x84] ss:$8 sm:$0xf]  ;;  %v3385_v49 = vrot.slane %v3348_v38, 4  ;;  %v3349_v58 = vmul.f32 %v3330_v36, %v7080_v31  ;;  %v3350_v42 = vmul.f32 %v3327_v52, %v7086_v16 }
 0xbbc   : > { %v3374_v48 = vsel %vm3038_vm6, %v3372_v54, %v3373_v32  ;;  %v3377_v62 = vsel %vm3038_vm6, %v3375_v11, %v3376_v39  ;;  %v3382_v11 = vsel %vm3038_vm6, %v3367_v47, %v3381_v60  ;;  %v7229_v29 = vor.u32 %v5376_v0, %v5375_v33 }
 0xbbd   : > { %3395 = vrot.lane.b32.xlu2 %v3374_v48, %s5507_s22  ;;  %3397 = vrot.lane.b32.xlu0 %v3377_v62, %s5507_s22  ;;  %v3386_v25 = vsel %vm3038_vm6, %v3373_v32, %v3385_v49  ;;  %v3387_v51 = vrot.slane %v3349_v58, 4  ;;  %v3389_v47 = vrot.slane %v3350_v42, 4 }
 0xbbe   : > { %3399 = vrot.lane.b32.xlu1 %v3380_v14, %s5507_s22  ;;  %v3504_v27 = vrot.slane %v7229_v29, 4 }
 0xbbf   : > { %v3388_v48 = vsel %vm3038_vm6, %v3376_v39, %v3387_v51  ;;  %v3390_v36 = vsel %vm3038_vm6, %v3379_v30, %v3389_v47 }
 0xbc0   : > { %v3505_v54 = vperm.slane %v3504_v27, 0  ;;  %v3506_v52 = vperm.slane %v3504_v27, 1  ;;  %v3507_v8 = vperm.slane %v3504_v27, 2  ;;  %v3508_v32 = vperm.slane %v3504_v27, 3  ;;  %v7272_v27 = vld [vmem:[%s5588_s5 + $0x40] sm:$0xff] }
 0xbc5   : > { %3401 = vrot.lane.b32.xlu2 %v3382_v11, %s5507_s22  ;;  %3403 = vrot.lane.b32.xlu0 %v3384_v57, %s5507_s22 }
 0xbc6   : > { %3405 = vrot.lane.b32.xlu1 %v3386_v25, %s5507_s22 }
 0xbcd   : > { %3407 = vrot.lane.b32.xlu2 %v3388_v48, %s5507_s22  ;;  %3409 = vrot.lane.b32.xlu0 %v3390_v36, %s5507_s22 }
 0xbce   : > { %3509 = vrot.lane.b32.xlu1 %v3505_v54, %s5507_s22 }
 0xbd5   : > { %3511 = vrot.lane.b32.xlu2 %v3506_v52, %s5507_s22  ;;  %3513 = vrot.lane.b32.xlu0 %v3507_v8, %s5507_s22 }
 0xbd6   : > { %3515 = vrot.lane.b32.xlu1 %v3508_v32, %s5507_s22  ;;  %v7279_v32 = vld [vmem:[%s5588_s5 + $0x28] sm:$0xf0] }
 0xc10   : > { %v7249_v39 = vpop.permute.xlu0 %3391 }
 0xc11   : > { %10087 = vst [vmem:[#allocation212_spill] sm:$0xff] %v7249_v39 }
 0xc17   : > { %v7247_v35 = vpop.permute.xlu2 %3395 }
 0xc18   : > { %10086 = vst [vmem:[#allocation211_spill] sm:$0xff] %v7247_v35 }
 0xc1f   : > { %v7253_v30 = vpop.permute.xlu2 %3401 }
 0xc20   : > { %10089 = vst [vmem:[#allocation214_spill] sm:$0xff] %v7253_v30 }
 0xc27   : > { %v7259_v60 = vpop.permute.xlu2 %3407 }
 0xc28   : > { %v7251_v14 = vpop.permute.xlu1 %3393  ;;  %10092 = vst [vmem:[#allocation217_spill] sm:$0xff] %v7259_v60 }
 0xc29   : > { %10088 = vst [vmem:[#allocation213_spill] sm:$0xff] %v7251_v14 }
 0xc2f   : > { %v7255_v62 = vpop.permute.xlu0 %3397  ;;  %v3512_v49 = vpop.permute.xlu2 %3511 }
 0xc30   : > { %10090 = vst [vmem:[#allocation215_spill] sm:$0xff] %v7255_v62  ;;  %v7257_v38 = vpop.permute.xlu1 %3399 }
 0xc31   : > { %10091 = vst [vmem:[#allocation216_spill] sm:$0xff] %v7257_v38 }
 0xc37   : > { %v7261_v33 = vpop.permute.xlu0 %3403 }
 0xc38   : > { %10093 = vst [vmem:[#allocation218_spill] sm:$0xff] %v7261_v33  ;;  %v7263_v4 = vpop.permute.xlu1 %3405 }
 0xc39   : > { %10094 = vst [vmem:[#allocation219_spill] sm:$0xff] %v7263_v4 }
 0xc3f   : > { %v7265_v0 = vpop.permute.xlu0 %3409 }
 0xc40   : > { %10095 = vst [vmem:[#allocation220_spill] sm:$0xff] %v7265_v0  ;;  %v3510_v11 = vpop.permute.xlu1 %3509 }
 0xc41   : > { %v3517_v58 = vsel %vm244_vm1, %v3510_v11, %v3512_v49  ;;  %v3525_v57 = vmul.f32 %v3510_v11, %v7033_v46  ;;  %v3530_v42 = vmul.f32 %v6818_v41, %v3510_v11  ;;  %v3535_v59 = vmul.f32 %v3510_v11, %v7068_v40 }
 0xc42   : > { %v3526_v25 = vmul.f32 %v3517_v58, %v7041_v50  ;;  %v3531_v51 = vmul.f32 %v7272_v27, %v3517_v58  ;;  %v3536_v45 = vmul.f32 %v3517_v58, %v7071_v13 }
 0xc43   : > { %v3555_v47 = vrot.slane %v3525_v57, 4  ;;  %v3556_v54 = vrot.slane %v3530_v42, 4  ;;  %v7285_v42 = vld [vmem:[%s5588_s5 + $0x48] sm:$0xff] }
 0xc44   : > { %v3558_v48 = vrot.slane %v3526_v25, 4  ;;  %v3559_v36 = vrot.slane %v3531_v51, 4 }
 0xc45   : > { %v3557_v52 = vsel %vm3038_vm6, %v3555_v47, %v3556_v54 }
 0xc46   : > { %3580 = vrot.lane.b32.xlu2 %v3557_v52, %s5509_s28  ;;  %v3560_v8 = vsel %vm3038_vm6, %v3558_v48, %v3559_v36  ;;  %v7291_v52 = vld [vmem:[%s5588_s5 + $0x58] sm:$0xff] }
 0xc47   : > { %v3514_v41 = vpop.permute.xlu0 %3513  ;;  %3582 = vrot.lane.b32.xlu0 %v3560_v8, %s5509_s28  ;;  %v7296_v8 = vld [vmem:[%s5588_s5 + $0x50] sm:$0xff] }
 0xc48   : > { %v3518_v39 = vsel %vm244_vm1, %v3512_v49, %v3514_v41  ;;  %v3516_v14 = vpop.permute.xlu1 %3515 }
 0xc49   : > { %v3527_v57 = vmul.f32 %v3518_v39, %v7060_v55  ;;  %v3532_v25 = vmul.f32 %v7285_v42, %v3518_v39  ;;  %v3519_v51 = vsel %vm244_vm1, %v3514_v41, %v3516_v14  ;;  %v3529_v47 = vmul.f32 %v3516_v14, %v7279_v32 }
 0xc4a   : > { %v3534_v48 = vmul.f32 %v7291_v52, %v3516_v14  ;;  %v3528_v0 = vmul.f32 %v3519_v51, %v7050_v53  ;;  %v3533_v49 = vmul.f32 %v7296_v8, %v3519_v51  ;;  %v3537_v3 = vmul.f32 %v3518_v39, %v7080_v31 }
 0xc4b   : > { %v3561_v60 = vrot.slane %v3527_v57, 4  ;;  %v3562_v4 = vrot.slane %v3532_v25, 4  ;;  %v3567_v30 = vrot.slane %v3529_v47, 4  ;;  %v3572_v57 = vrot.slane %v3536_v45, 4 }
 0xc4c   : > { %v3568_v33 = vrot.slane %v3534_v48, 4  ;;  %v3564_v38 = vrot.slane %v3528_v0, 4  ;;  %v3565_v35 = vrot.slane %v3533_v49, 4  ;;  %v3570_v0 = vrot.slane %v3535_v59, 4 }
 0xc4d   : > { %v3563_v41 = vsel %vm3038_vm6, %v3561_v60, %v3562_v4  ;;  %v3574_v25 = vrot.slane %v3537_v3, 4  ;;  %v7309_v60 = vld [vmem:[%s5588_s5 + $0x88] sm:$0xf]  ;;  %v3573_v39 = vsel %vm3038_vm6, %v3559_v36, %v3572_v57  ;;  %v5377_v3 = vld [vmem:[%s9681_s1 + $0xc4] ss:$8 sm:$0xf] }
 0xc4e   : > { %v3569_v62 = vsel %vm3038_vm6, %v3567_v30, %v3568_v33  ;;  %v3566_v37 = vsel %vm3038_vm6, %v3564_v38, %v3565_v35  ;;  %3584 = vrot.lane.b32.xlu1 %v3563_v41, %s5509_s28  ;;  %v3538_v30 = vmul.f32 %v3519_v51, %v7086_v16  ;;  %v3571_v11 = vsel %vm3038_vm6, %v3556_v54, %v3570_v0 }
 0xc4f   : > { %3586 = vrot.lane.b32.xlu2 %v3566_v37, %s5509_s28  ;;  %3588 = vrot.lane.b32.xlu0 %v3569_v62, %s5509_s28  ;;  %v3575_v38 = vsel %vm3038_vm6, %v3562_v4, %v3574_v25  ;;  %v3539_v58 = vmul.f32 %v3516_v14, %v7309_v60  ;;  %v3625_v45 = vperm.slane %v5377_v3, 0  ;;  %v3626_v14 = vperm.slane %v5377_v3, 1 }
 0xc50   : > { %v3576_v37 = vrot.slane %v3538_v30, 4  ;;  %v3628_v4 = vperm.slane %v5377_v3, 3  ;;  %v3627_v36 = vperm.slane %v5377_v3, 2 }
 0xc51   : > { %v3578_v59 = vrot.slane %v3539_v58, 4 }
 0xc52   : > { %v3577_v62 = vsel %vm3038_vm6, %v3565_v35, %v3576_v37 }
 0xc53   : > { %v3579_v54 = vsel %vm3038_vm6, %v3568_v33, %v3578_v59 }
 0xc56   : > { %3590 = vrot.lane.b32.xlu1 %v3571_v11, %s5509_s28 }
 0xc57   : > { %3592 = vrot.lane.b32.xlu2 %v3573_v39, %s5509_s28  ;;  %3594 = vrot.lane.b32.xlu0 %v3575_v38, %s5509_s28  ;;  %v7352_v39 = vld [vmem:[%s5588_s5 + $0x38] sm:$0xff] }
 0xc5e   : > { %3596 = vrot.lane.b32.xlu1 %v3577_v62, %s5509_s28 }
 0xc5f   : > { %3598 = vrot.lane.b32.xlu2 %v3579_v54, %s5509_s28  ;;  %3629 = vrot.lane.b32.xlu0 %v3625_v45, %s5508_s23 }
 0xc66   : > { %3631 = vrot.lane.b32.xlu1 %v3626_v14, %s5508_s23 }
 0xc67   : > { %3635 = vrot.lane.b32.xlu0 %v3628_v4, %s5508_s23  ;;  %3633 = vrot.lane.b32.xlu2 %v3627_v36, %s5508_s23 }
 0xca0   : > { %v7330_v51 = vpop.permute.xlu2 %3580 }
 0xca1   : > { %10096 = vst [vmem:[#allocation221_spill] sm:$0xff] %v7330_v51 }
 0xca9   : > { %v7334_v47 = vpop.permute.xlu2 %3586 }
 0xcb1   : > { %v7340_v49 = vpop.permute.xlu2 %3592 }
 0xcb2   : > { %10098 = vst [vmem:[#allocation223_spill] sm:$0xff] %v7340_v49 }
 0xcb9   : > { %v7332_v35 = vpop.permute.xlu0 %3582  ;;  %v7346_v57 = vpop.permute.xlu2 %3598 }
 0xcba   : > { %10097 = vst [vmem:[#allocation222_spill] sm:$0xff] %v7332_v35 }
 0xcbb   : > { %10101 = vst [vmem:[#allocation226_spill] sm:$0xff] %v7346_v57 }
 0xcc0   : > { %v7336_v33 = vpop.permute.xlu1 %3584 }
 0xcc1   : > { %v7338_v48 = vpop.permute.xlu0 %3588  ;;  %v3634_v59 = vpop.permute.xlu2 %3633 }
 0xcc8   : > { %v7342_v41 = vpop.permute.xlu1 %3590 }
 0xcc9   : > { %10099 = vst [vmem:[#allocation224_spill] sm:$0xff] %v7342_v41  ;;  %v7344_v0 = vpop.permute.xlu0 %3594 }
 0xcca   : > { %10100 = vst [vmem:[#allocation225_spill] sm:$0xff] %v7344_v0 }
 0xcd0   : > { %v7348_v25 = vpop.permute.xlu1 %3596 }
 0xcd1   : > { %10102 = vst [vmem:[#allocation227_spill] sm:$0xff] %v7348_v25  ;;  %v3630_v30 = vpop.permute.xlu0 %3629 }
 0xcd2   : > { %v3645_v11 = vmul.f32 %v3630_v30, %v7033_v46  ;;  %v3650_v38 = vmul.f32 %v7352_v39, %v3630_v30 }
 0xcd4   : > { %v3675_v58 = vrot.slane %v3645_v11, 4  ;;  %v3676_v3 = vrot.slane %v3650_v38, 4 }
 0xcd6   : > { %v3677_v37 = vsel %vm3038_vm6, %v3675_v58, %v3676_v3 }
 0xcd7   : > { %3700 = vrot.lane.b32.xlu1 %v3677_v37, %s5508_s23 }
 0xcd8   : > { %v3632_v45 = vpop.permute.xlu1 %3631 }
 0xcd9   : > { %v3637_v62 = vsel %vm331_vm0, %v3630_v30, %v3632_v45  ;;  %v3636_v54 = vpop.permute.xlu0 %3635  ;;  %v3638_v14 = vsel %vm331_vm0, %v3632_v45, %v3634_v59 }
 0xcda   : > { %v3646_v4 = vmul.f32 %v3637_v62, %v7041_v50  ;;  %v3651_v46 = vmul.f32 %v7272_v27, %v3637_v62  ;;  %v3639_v36 = vsel %vm331_vm0, %v3634_v59, %v3636_v54  ;;  %v3647_v11 = vmul.f32 %v3638_v14, %v7060_v55 }
 0xcdb   : > { %v3648_v38 = vmul.f32 %v3639_v36, %v7050_v53  ;;  %v3652_v58 = vmul.f32 %v7285_v42, %v3638_v14  ;;  %v3653_v37 = vmul.f32 %v7296_v8, %v3639_v36  ;;  %v3649_v41 = vmul.f32 %v3636_v54, %v7279_v32 }
 0xcdc   : > { %v3678_v51 = vrot.slane %v3646_v4, 4  ;;  %v3679_v35 = vrot.slane %v3651_v46, 4  ;;  %v3681_v57 = vrot.slane %v3647_v11, 4  ;;  %v3654_v53 = vmul.f32 %v7291_v52, %v3636_v54 }
 0xcdd   : > { %v3682_v25 = vrot.slane %v3652_v58, 4  ;;  %v3684_v0 = vrot.slane %v3648_v38, 4  ;;  %v3685_v45 = vrot.slane %v3653_v37, 4  ;;  %v3655_v59 = vmul.f32 %v3630_v30, %v7068_v40 }
 0xcde   : > { %v3680_v50 = vsel %vm3038_vm6, %v3678_v51, %v3679_v35  ;;  %v3656_v49 = vmul.f32 %v3637_v62, %v7071_v13  ;;  %v3687_v46 = vrot.slane %v3649_v41, 4  ;;  %v3688_v51 = vrot.slane %v3654_v53, 4 }
 0xcdf   : > { %3702 = vrot.lane.b32.xlu2 %v3680_v50, %s5508_s23  ;;  %v3683_v55 = vsel %vm3038_vm6, %v3681_v57, %v3682_v25  ;;  %v3686_v4 = vsel %vm3038_vm6, %v3684_v0, %v3685_v45  ;;  %v3690_v11 = vrot.slane %v3655_v59, 4  ;;  %v3657_v57 = vmul.f32 %v3638_v14, %v7080_v31  ;;  %v5379_v31 = vld [vmem:[%s9681_s1 + $0x5] ss:$8 sm:$0xf0] }
 0xce0   : > { %3704 = vrot.lane.b32.xlu0 %v3683_v55, %s5508_s23  ;;  %3706 = vrot.lane.b32.xlu1 %v3686_v4, %s5508_s23  ;;  %v3692_v32 = vrot.slane %v3656_v49, 4  ;;  %v3689_v38 = vsel %vm3038_vm6, %v3687_v46, %v3688_v51  ;;  %v3658_v52 = vmul.f32 %v3639_v36, %v7086_v16  ;;  %v3659_v41 = vmul.f32 %v3636_v54, %v7309_v60  ;;  %v5378_v49 = vld [vmem:[%s9681_s1 + $0x5] ss:$8 sm:$0xf] }
 0xce1   : > { %v3691_v40 = vsel %vm3038_vm6, %v3676_v3, %v3690_v11  ;;  %v3694_v16 = vrot.slane %v3657_v57, 4  ;;  %v7391_v3 = vor.u32 %v5379_v31, %v5378_v49  ;;  %v210_v37 = vperm.slane %v5544_v2, 3  ;;  %v5423_v59 = vld [vmem:[%s5588_s5 + $0x18] sm:$0xff]  ;;  %v7418_v11 = vld [vmem:[%s5588_s5 + $0x30] sm:$0xff] }
 0xce2   : > { %v3693_v13 = vsel %vm3038_vm6, %v3679_v35, %v3692_v32  ;;  %v3696_v0 = vrot.slane %v3658_v52, 4  ;;  %v3698_v30 = vrot.slane %v3659_v41, 4  ;;  %v209_v50 = vperm.slane %v5544_v2, 2  ;;  %v5425_v57 = vld [vmem:[%s5588_s5 + $0x10] sm:$0xff] }
 0xce3   : > { %v3695_v35 = vsel %vm3038_vm6, %v3682_v25, %v3694_v16  ;;  %v3840_v54 = vrot.slane %v7391_v3, 4  ;;  %v9828_v55 = vperm.slane %v5544_v2, 0  ;;  %v218_v4 = vmul.f32 %v5423_v59, %v210_v37 }
 0xce4   : > { %v3697_v60 = vsel %vm3038_vm6, %v3685_v45, %v3696_v0  ;;  %v3699_v62 = vsel %vm3038_vm6, %v3688_v51, %v3698_v30  ;;  %v7408_v45 = vld [vmem:[%s9682_s2] sm:$0xf]  ;;  %v9827_v51 = vperm.slane %v5544_v2, 1  ;;  %v217_v52 = vmul.f32 %v5425_v57, %v209_v50 }
 0xce5   : > { %v3841_v14 = vperm.slane %v3840_v54, 0  ;;  %v3842_v36 = vperm.slane %v3840_v54, 1  ;;  %v3843_v58 = vperm.slane %v3840_v54, 2  ;;  %v3844_v25 = vperm.slane %v3840_v54, 3  ;;  %10103 = vst [vmem:[#allocation228_spill] sm:$0xff] %v7408_v45 }
 0xce6   : > { %v176_v53 = vperm.slane %v7408_v45, 3  ;;  %v219_v32 = vmul.f32 %v7418_v11, %v9828_v55  ;;  %v221_v41 = vmul.f32 %v7272_v27, %v209_v50  ;;  %v220_v49 = vmul.f32 %v7352_v39, %v9827_v51  ;;  %v10125_v55 = vld [vmem:[#allocation32_spill] sm:$0xff] }
 0xce7   : > { %3708 = vrot.lane.b32.xlu2 %v3689_v38, %s5508_s23  ;;  %v175_v38 = vperm.slane %v7408_v45, 2  ;;  %v297_v31 = vsel %vm293_vm2, %v5764_v20, %v5736_v5  ;;  %v222_v16 = vmul.f32 %v7285_v42, %v210_v37  ;;  %v9825_v0 = vperm.slane %v7408_v45, 1 }
 0xce8   : > { %3710 = vrot.lane.b32.xlu0 %v3691_v40, %s5508_s23  ;;  %3712 = vrot.lane.b32.xlu1 %v3693_v13, %s5508_s23  ;;  %v9826_v40 = vperm.slane %v7408_v45, 0  ;;  %v226_v13 = vadd.f32 %v218_v4, %v176_v53  ;;  %v296_v5 = vsel %vm293_vm2, %v5762_v18, %v5764_v20  ;;  %v382_v20 = vsel %vm331_vm0, %v5717_v56, %v5738_v6  ;;  %v10161_v56 = vld [vmem:[#allocation66_spill] sm:$0xff] }
 0xce9   : > { %v301_v50 = vsel %vm293_vm2, %v5768_v22, %v5746_v10  ;;  %v492_v4 = vperm.slane %v5565_v19, 2  ;;  %v9824_v10 = vperm.slane %v5565_v19, 0  ;;  %v7767_v45 = vld [vmem:[%s5588_s5 + $0x60] sm:$0x1f] }
 0xcea   : > { %v227_v30 = vadd.f32 %v219_v32, %v9826_v40  ;;  %v313_v54 = vadd.f32 %v297_v31, %v226_v13  ;;  %v384_v32 = vsel %vm331_vm0, %v5701_v44, %v5744_v9  ;;  %v467_v44 = vsel %vm244_vm1, %v5776_v26, %v5766_v21  ;;  %v10123_v40 = vld [vmem:[#allocation31_spill] sm:$0xff] }
 0xceb   : > { %v500_v31 = vmul.f32 %v5423_v59, %v492_v4 }
 0xcef   : > { %3714 = vrot.lane.b32.xlu2 %v3695_v35, %s5508_s23  ;;  %v387_v35 = vsel %vm331_vm0, %v5724_v61, %v5731_v1  ;;  %v299_v1 = vsel %vm293_vm2, %v5770_v23, %v5760_v17 }
 0xcf0   : > { %3716 = vrot.lane.b32.xlu0 %v3697_v60, %s5508_s23  ;;  %3718 = vrot.lane.b32.xlu1 %v3699_v62, %s5508_s23  ;;  %v225_v60 = vadd.f32 %v217_v52, %v175_v38  ;;  %v298_v62 = vsel %vm293_vm2, %v5750_v12, %v5770_v23  ;;  %v493_v12 = vperm.slane %v5565_v19, 3  ;;  %v386_v23 = vsel %vm331_vm0, %v5740_v7, %v5724_v61 }
 0xcf7   : > { %3845 = vrot.lane.b32.xlu2 %v3841_v14, %s5507_s22  ;;  %v229_v14 = vadd.f32 %v221_v41, %v175_v38  ;;  %v312_v38 = vadd.f32 %v296_v5, %v225_v60  ;;  %v10105_v60 = vld [vmem:[#allocation17_spill] sm:$0xff] }
 0xcf8   : > { %3847 = vrot.lane.b32.xlu0 %v3842_v36, %s5507_s22  ;;  %3849 = vrot.lane.b32.xlu1 %v3843_v58, %s5507_s22  ;;  %v228_v36 = vadd.f32 %v220_v49, %v9825_v0  ;;  %v230_v58 = vadd.f32 %v222_v16, %v176_v53  ;;  %v314_v53 = vadd.f32 %v298_v62, %v227_v30 }
 0xcf9   : > { %v502_v16 = vmul.f32 %v7352_v39, %v9824_v10  ;;  %v398_v30 = vadd.f32 %v382_v20, %v312_v38  ;;  %v471_v59 = vsel %vm244_vm1, %v5780_v28, %v10105_v60  ;;  %v505_v38 = vmul.f32 %v7296_v8, %v493_v12 }
 0xcfa   : > { %v315_v13 = vadd.f32 %v299_v1, %v228_v36  ;;  %v317_v41 = vadd.f32 %v301_v50, %v230_v58  ;;  %v400_v61 = vadd.f32 %v384_v32, %v314_v53  ;;  %v10107_v58 = vld [vmem:[#allocation10_spill] sm:$0xff] }
 0xcfc   : > { %v403_v1 = vadd.f32 %v387_v35, %v317_v41  ;;  %v10112_v41 = vld [vmem:[#allocation26_spill] sm:$0xff] }
 0xcff   : > { %3851 = vrot.lane.b32.xlu2 %v3844_v25, %s5507_s22  ;;  %v300_v25 = vsel %vm293_vm2, %v5760_v17, %v5768_v22  ;;  %v383_v17 = vsel %vm331_vm0, %v5738_v6, %v5726_v63  ;;  %v385_v22 = vsel %vm331_vm0, %v5744_v9, %v5740_v7  ;;  %v9823_v63 = vperm.slane %v5565_v19, 1  ;;  %v5426_v6 = vld [vmem:[%s5588_s5 + $0x20] sm:$0xff] }
 0xd00   : > { %v316_v57 = vadd.f32 %v300_v25, %v229_v14  ;;  %v399_v52 = vadd.f32 %v383_v17, %v313_v54  ;;  %v501_v49 = vmul.f32 %v5426_v6, %v493_v12  ;;  %v468_v7 = vsel %vm244_vm1, %v5766_v21, %v5756_v15  ;;  %v10106_v14 = vld [vmem:[#allocation9_spill] sm:$0xff] }
 0xd01   : > { %v470_v9 = vsel %vm244_vm1, %v5772_v24, %v5780_v28  ;;  %v401_v54 = vadd.f32 %v385_v22, %v315_v13  ;;  %v472_v36 = vsel %vm244_vm1, %v10105_v60, %v10106_v14  ;;  %v469_v25 = vsel %vm244_vm1, %v10107_v58, %v5772_v24  ;;  %v10109_v24 = vld [vmem:[#allocation20_spill] sm:$0xff]  ;;  %v10111_v22 = vld [vmem:[#allocation18_spill] sm:$0xff] }
 0xd02   : > { %v402_v62 = vadd.f32 %v386_v23, %v316_v57  ;;  %v484_v5 = vadd.f32 %v468_v7, %v399_v52  ;;  %v483_v15 = vadd.f32 %v467_v44, %v398_v30  ;;  %v503_v21 = vmul.f32 %v7272_v27, %v9823_v63  ;;  %v10110_v52 = vld [vmem:[#allocation19_spill] sm:$0xff]  ;;  %v10115_v30 = vld [vmem:[#allocation22_spill] sm:$0xff]  ;;  %v10118_v58 = vld [vmem:[#allocation24_spill] sm:$0xff] }
 0xd03   : > { %v485_v50 = vadd.f32 %v469_v25, %v400_v61  ;;  %v486_v53 = vadd.f32 %v470_v9, %v401_v54  ;;  %v504_v17 = vmul.f32 %v7285_v42, %v492_v4  ;;  %v488_v32 = vadd.f32 %v472_v36, %v403_v1  ;;  %v10114_v44 = vld [vmem:[#allocation23_spill] sm:$0xff] }
 0xd04   : > { %v487_v23 = vadd.f32 %v471_v59, %v402_v62  ;;  %v509_v57 = vadd.f32 %v501_v49, %v484_v5  ;;  %v577_v13 = vsel %vm293_vm2, %v10110_v52, %v10109_v24  ;;  %v578_v35 = vsel %vm293_vm2, %v10109_v24, %v10111_v22  ;;  %v10116_v59 = vld [vmem:[#allocation21_spill] sm:$0xff] }
 0xd05   : > { %v7516_v6 = vperm.slane %v10112_v41, 0  ;;  %v508_v61 = vadd.f32 %v500_v31, %v483_v15  ;;  %v579_v4 = vsel %vm293_vm2, %v10115_v30, %v10114_v44  ;;  %v714_v7 = vperm.slane %v10112_v41, 3  ;;  %v10119_v15 = vld [vmem:[#allocation25_spill] sm:$0xff] }
 0xd06   : > { %v713_v12 = vperm.slane %v10112_v41, 2  ;;  %v511_v49 = vadd.f32 %v503_v21, %v486_v53  ;;  %v512_v9 = vadd.f32 %v504_v17, %v487_v23  ;;  %v510_v60 = vadd.f32 %v502_v16, %v485_v50  ;;  %v5427_v53 = vld [vmem:[%s5588_s5 + $0x10] sm:$0xfe] }
 0xd07   : > { %10113 = vst [vmem:[#allocation9_spill] sm:$0xff] %v7516_v6  ;;  %v580_v62 = vsel %vm293_vm2, %v10114_v44, %v10116_v59  ;;  %v593_v5 = vadd.f32 %v577_v13, %v508_v61  ;;  %v594_v31 = vadd.f32 %v578_v35, %v509_v57  ;;  %v513_v54 = vadd.f32 %v505_v38, %v488_v32  ;;  %v3744_v32 = vld [vmem:[%s5588_s5] sm:$0xe0]  ;;  %v7546_v57 = vld [vmem:[%s5588_s5 + $0x18] sm:$0xfe] }
 0xd08   : > { %v7527_v14 = vperm.slane %v10112_v41, 1  ;;  %v595_v36 = vadd.f32 %v579_v4, %v510_v60  ;;  %v581_v25 = vsel %vm293_vm2, %v10116_v59, %v10118_v58  ;;  %v582_v16 = vsel %vm293_vm2, %v10118_v58, %v10119_v15  ;;  %v5429_v13 = vld [vmem:[%s5588_s5 + $0x60] sm:$0x1]  ;;  %v7571_v58 = vld [vmem:[%s5588_s5 + $0x70] sm:$0x1] }
 0xd09   : > { %v7537_v21 = vmul.f32 %v7418_v11, %v7516_v6  ;;  %v596_v1 = vadd.f32 %v580_v62, %v511_v49  ;;  %v726_v50 = vmul.f32 %v7285_v42, %v714_v7  ;;  %v721_v17 = vmul.f32 %v5427_v53, %v713_v12  ;;  %v7563_v49 = vld [vmem:[%s5588_s5 + $0x68] sm:$0x1] }
 0xd0a   : > { %10117 = vst [vmem:[#allocation10_spill] sm:$0xff] %v7527_v14  ;;  %v725_v23 = vmul.f32 %v7272_v27, %v713_v12  ;;  %v722_v24 = vmul.f32 %v7546_v57, %v714_v7  ;;  %v727_v22 = vmul.f32 %v5429_v13, %v7516_v6  ;;  %v597_v44 = vadd.f32 %v581_v25, %v512_v9  ;;  %v7580_v25 = vld [vmem:[%s5588_s5 + $0x78] sm:$0x1] }
 0xd0b   : > { %10120 = vst [vmem:[#allocation20_spill] sm:$0xff] %v7537_v21  ;;  %v598_v30 = vadd.f32 %v582_v16, %v513_v54  ;;  %v7560_v4 = vmul.f32 %v7352_v39, %v7527_v14  ;;  %v728_v60 = vmul.f32 %v7563_v49, %v7527_v14  ;;  %v729_v15 = vmul.f32 %v7571_v58, %v713_v12  ;;  %v10124_v12 = vld [vmem:[#allocation27_spill] sm:$0xff] }
 0xd0c   : > { %v730_v16 = vmul.f32 %v7580_v25, %v714_v7  ;;  %v750_v53 = vrot.slane %v721_v17, 1  ;;  %v754_v63 = vrot.slane %v726_v50, 1  ;;  %v753_v10 = vrot.slane %v722_v24, 1  ;;  %v10126_v17 = vld [vmem:[#allocation33_spill] sm:$0xff]  ;;  %v10128_v24 = vld [vmem:[#allocation34_spill] sm:$0xff] }
 0xd0d   : > { %10121 = vst [vmem:[#allocation18_spill] sm:$0xff] %v7560_v4  ;;  %v756_v0 = vrot.slane %v727_v22, 1  ;;  %v662_v51 = vsel %vm331_vm0, %v10124_v12, %v10123_v40  ;;  %v10129_v22 = vld [vmem:[#allocation30_spill] sm:$0xff]  ;;  %v10131_v14 = vrot.slane %v7537_v21, 1 }
 0xd0e   : > { %v664_v62 = vsel %vm331_vm0, %v10129_v22, %v10128_v24  ;;  %v678_v12 = vadd.f32 %v662_v51, %v593_v5  ;;  %v755_v22 = vsel %vm743_vm3, %v753_v10, %v754_v63  ;;  %v10134_v5 = vld [vmem:[#allocation39_spill] sm:$0xff] }
 0xd39   : > { %v7414_v46 = vpop.permute.xlu2 %3702 }
 0xd3a   : > { %10104 = vst [vmem:[#allocation229_spill] sm:$0xff] %v7414_v46  ;;  %v760_v46 = vrot.slane %v729_v15, 1 }
 0xd41   : > { %v7455_v37 = vpop.permute.xlu2 %3708 }
 0xd49   : > { %v7503_v20 = vpop.permute.xlu1 %3700  ;;  %v7505_v28 = vpop.permute.xlu2 %3714 }
 0xd4a   : > { %10108 = vst [vmem:[#allocation17_spill] sm:$0xff] %v7503_v20 }
 0xd51   : > { %v7543_v38 = vpop.permute.xlu2 %3845 }
 0xd52   : > { %v7551_v35 = vpop.permute.xlu0 %3704  ;;  %v3861_v41 = vmul.f32 %v7543_v38, %v3744_v32  ;;  %v7556_v61 = vmul.f32 %v7418_v11, %v7543_v38  ;;  %v7567_v59 = vpop.permute.xlu1 %3706  ;;  %v751_v32 = vrot.slane %v725_v23, 1  ;;  %v10127_v23 = vld [vmem:[#allocation35_spill] sm:$0xff] }
 0xd53   : > { %v7577_v9 = vsel %vm331_vm0, %v7567_v59, %v7455_v37  ;;  %v663_v37 = vsel %vm331_vm0, %v10123_v40, %v10125_v55  ;;  %v666_v50 = vsel %vm331_vm0, %v10127_v23, %v10126_v17  ;;  %v665_v20 = vsel %vm331_vm0, %v10128_v24, %v10127_v23  ;;  %v10130_v40 = vld [vmem:[#allocation36_spill] sm:$0xff] }
 0xd54   : > { %10122 = vst [vmem:[#allocation26_spill] sm:$0xff] %v7577_v9  ;;  %v3891_v54 = vrot.slane %v3861_v41, 5  ;;  %v9830_v13 = vrot.slane %v7556_v61, 5  ;;  %v758_v41 = vrot.slane %v728_v60, 1  ;;  %v762_v55 = vrot.slane %v730_v16, 1 }
 0xd55   : > { %v667_v60 = vsel %vm331_vm0, %v10126_v17, %v10130_v40  ;;  %v679_v52 = vadd.f32 %v663_v37, %v594_v31  ;;  %v757_v23 = vsel %vm743_vm3, %v10131_v14, %v756_v0  ;;  %v682_v24 = vadd.f32 %v666_v50, %v597_v44  ;;  %v10135_v31 = vld [vmem:[#allocation40_spill] sm:$0xff]  ;;  %v10136_v14 = vld [vmem:[#allocation41_spill] sm:$0xff]  ;;  %v7783_v9 = vld [vmem:[%s5588_s5 + $0x68] sm:$0x1f] }
 0xd56   : > { %v3893_v7 = vsel %vm3803_vm7, %v3891_v54, %v9830_v13  ;;  %v9833_v54 = vrot.slane %v7560_v4, 1  ;;  %v752_v13 = vsel %vm743_vm3, %v750_v53, %v751_v32  ;;  %v681_v16 = vadd.f32 %v665_v20, %v596_v1  ;;  %v10137_v1 = vld [vmem:[#allocation57_spill] sm:$0xff] }
 0xd57   : > { %3916 = vrot.lane.b32.xlu0 %v3893_v7, %s5509_s28  ;;  %v680_v7 = vadd.f32 %v664_v62, %v595_v36  ;;  %v683_v6 = vadd.f32 %v667_v60, %v598_v30  ;;  %v761_v53 = vsel %vm743_vm3, %v751_v32, %v760_v46  ;;  %v763_v0 = vsel %vm743_vm3, %v754_v63, %v762_v55  ;;  %v10138_v62 = vld [vmem:[#allocation42_spill] sm:$0xff]  ;;  %v10139_v32 = vld [vmem:[#allocation43_spill] sm:$0xff]  ;;  %v10140_v60 = vld [vmem:[#allocation44_spill] sm:$0xff] }
 0xd58   : > { %v759_v17 = vsel %vm743_vm3, %v9833_v54, %v758_v41  ;;  %v878_v20 = vsel %vm293_vm2, %v10135_v31, %v10134_v5  ;;  %v879_v36 = vsel %vm293_vm2, %v10134_v5, %v10136_v14  ;;  %v1143_v44 = vperm.slane %v10137_v1, 2  ;;  %v10141_v31 = vld [vmem:[#allocation46_spill] sm:$0xff]  ;;  %v10147_v14 = vld [vmem:[#allocation51_spill] sm:$0xff] }
 0xd59   : > { %v774_v46 = vadd.f32 %v752_v13, %v678_v12  ;;  %v775_v30 = vadd.f32 %v755_v22, %v679_v52  ;;  %v880_v37 = vsel %vm293_vm2, %v10139_v32, %v10138_v62  ;;  %v776_v41 = vadd.f32 %v757_v23, %v680_v7  ;;  %v10144_v7 = vld [vmem:[#allocation45_spill] sm:$0xff] }
 0xd5a   : > { %v3711_v15 = vpop.permute.xlu0 %3710  ;;  %v3713_v40 = vpop.permute.xlu1 %3712  ;;  %v777_v50 = vadd.f32 %v759_v17, %v681_v16  ;;  %v881_v63 = vsel %vm293_vm2, %v10138_v62, %v10140_v60  ;;  %v778_v55 = vadd.f32 %v761_v53, %v682_v24  ;;  %v882_v5 = vsel %vm293_vm2, %v10140_v60, %v10141_v31  ;;  %v10151_v32 = vld [vmem:[#allocation53_spill] sm:$0xff] }
 0xd5b   : > { %v7618_v51 = vsel %vm331_vm0, %v3713_v40, %v7505_v28  ;;  %v7621_v10 = vsel %vm331_vm0, %v3711_v15, %v3713_v40  ;;  %v779_v15 = vadd.f32 %v763_v0, %v683_v6  ;;  %v894_v40 = vadd.f32 %v878_v20, %v774_v46  ;;  %v10145_v0 = vld [vmem:[#allocation48_spill] sm:$0xff] }
 0xd5c   : > { %10132 = vst [vmem:[#allocation23_spill] sm:$0xff] %v7618_v51  ;;  %v895_v54 = vadd.f32 %v879_v36, %v775_v30  ;;  %v896_v13 = vadd.f32 %v880_v37, %v776_v41  ;;  %v1151_v52 = vmul.f32 %v7546_v57, %v1143_v44  ;;  %v7642_v12 = vperm.slane %v10137_v1, 0  ;;  %v10146_v57 = vld [vmem:[#allocation52_spill] sm:$0xff]  ;;  %v10150_v30 = vld [vmem:[#allocation54_spill] sm:$0xff]  ;;  %v10152_v41 = vld [vmem:[#allocation55_spill] sm:$0xff] }
 0xd5d   : > { %10133 = vst [vmem:[#allocation22_spill] sm:$0xff] %v7621_v10  ;;  %v7645_v22 = vperm.slane %v10137_v1, 1  ;;  %v897_v23 = vadd.f32 %v881_v63, %v777_v50  ;;  %v883_v6 = vsel %vm293_vm2, %v10141_v31, %v10144_v7  ;;  %v1144_v24 = vperm.slane %v10137_v1, 3  ;;  %v10149_v1 = vld [vmem:[#allocation50_spill] sm:$0xff]  ;;  %v10154_v63 = vld [vmem:[#allocation56_spill] sm:$0xff] }
 0xd5e   : > { %10142 = vst [vmem:[#allocation21_spill] sm:$0xff] %v7642_v12  ;;  %v7652_v16 = vmul.f32 %v7285_v42, %v1143_v44  ;;  %v898_v53 = vadd.f32 %v882_v5, %v778_v55  ;;  %v999_v20 = vsel %vm331_vm0, %v10146_v57, %v10145_v0  ;;  %v998_v36 = vsel %vm331_vm0, %v10147_v14, %v10146_v57 }
 0xd5f   : > { %10143 = vst [vmem:[#allocation24_spill] sm:$0xff] %v7645_v22  ;;  %v1001_v62 = vsel %vm331_vm0, %v10150_v30, %v10149_v1  ;;  %v1000_v37 = vsel %vm331_vm0, %v10151_v32, %v10150_v30  ;;  %v1002_v50 = vsel %vm331_vm0, %v10149_v1, %v10152_v41  ;;  %v1179_v55 = vrot.slane %v1151_v52, 1  ;;  %v5434_v30 = vld [vmem:[%s5588_s5 + $0x80] sm:$0x1] }
 0xd60   : > { %v7681_v5 = vmul.f32 %v7352_v39, %v7642_v12  ;;  %v7685_v7 = vmul.f32 %v7272_v27, %v7645_v22  ;;  %v7688_v0 = vmul.f32 %v7296_v8, %v1144_v24  ;;  %v899_v52 = vadd.f32 %v883_v6, %v779_v15 }
 0xd61   : > { %v7699_v32 = vmul.f32 %v5434_v30, %v1144_v24  ;;  %v1015_v57 = vadd.f32 %v999_v20, %v895_v54  ;;  %v1014_v14 = vadd.f32 %v998_v36, %v894_v40  ;;  %v1017_v4 = vadd.f32 %v1001_v62, %v897_v23  ;;  %v7719_v23 = vpop.permute.xlu2 %3851 }
 0xd62   : > { %v3717_v17 = vpop.permute.xlu0 %3716  ;;  %v3719_v46 = vpop.permute.xlu1 %3718 }
 0xd63   : > { %v7662_v31 = vsel %vm331_vm0, %v7505_v28, %v3717_v17  ;;  %v7674_v60 = vsel %vm331_vm0, %v3717_v17, %v3719_v46  ;;  %v1003_v28 = vsel %vm331_vm0, %v10152_v41, %v10154_v63  ;;  %v7693_v17 = vmul.f32 %v7563_v49, %v7642_v12  ;;  %v5433_v46 = vld [vmem:[%s5588_s5 + $0x20] sm:$0xfe] }
 0xd64   : > { %10148 = vst [vmem:[#allocation25_spill] sm:$0xff] %v7662_v31  ;;  %v7696_v1 = vmul.f32 %v5433_v46, %v1144_v24  ;;  %v7703_v41 = vmul.f32 %v7571_v58, %v7645_v22  ;;  %v7706_v63 = vmul.f32 %v7580_v25, %v1143_v44  ;;  %v1016_v49 = vadd.f32 %v1000_v37, %v896_v13  ;;  %v3748_v13 = vld [vmem:[%s5588_s5 + $0x20] sm:$0xe0]  ;;  %v3745_v37 = vld [vmem:[%s5588_s5 + $0x8] sm:$0xe0] }
 0xd65   : > { %10153 = vst [vmem:[#allocation31_spill] sm:$0xff] %v7674_v60  ;;  %v1018_v12 = vadd.f32 %v1002_v50, %v898_v53  ;;  %v7708_v46 = vadd.f32 %v1003_v28, %v899_v52  ;;  %v1183_v24 = vrot.slane %v7688_v0, 1  ;;  %v10155_v58 = vrot.slane %v7652_v16, 1  ;;  %v10156_v28 = vld [vmem:[#allocation61_spill] sm:$0xff]  ;;  %v10158_v22 = vld [vmem:[#allocation63_spill] sm:$0xff] }
 0xd66   : > { %v1185_v54 = vrot.slane %v7693_v17, 1  ;;  %v1182_v44 = vrot.slane %v7696_v1, 1  ;;  %v1191_v53 = vrot.slane %v7699_v32, 1  ;;  %v1187_v20 = vrot.slane %v7703_v41, 1  ;;  %v7731_v17 = vld [vmem:[%s5588_s5 + $0x10] sm:$0xe0] }
 0xd67   : > { %v1181_v25 = vsel %vm743_vm3, %v1179_v55, %v10155_v58  ;;  %v1189_v36 = vrot.slane %v7706_v63, 1  ;;  %v10157_v55 = vld [vmem:[#allocation59_spill] sm:$0xff]  ;;  %v7742_v63 = vld [vmem:[%s5588_s5 + $0x18] sm:$0xe0]  ;;  %v3865_v6 = vmul.f32 %v7719_v23, %v3748_v13  ;;  %v1119_v21 = vsel %vm244_vm1, %v10156_v28, %v10158_v22  ;;  %v10159_v13 = vld [vmem:[#allocation64_spill] sm:$0xff] }
 0xd68   : > { %v1118_v0 = vsel %vm244_vm1, %v10157_v55, %v10156_v28  ;;  %v7751_v55 = vmul.f32 %v7296_v8, %v7719_v23  ;;  %v1121_v18 = vsel %vm244_vm1, %v10159_v13, %v10161_v56  ;;  %v3871_v60 = vmul.f32 %v7543_v38, %v7767_v45 }
 0xd69   : > { %v1134_v51 = vadd.f32 %v1118_v0, %v1014_v14  ;;  %v1135_v10 = vadd.f32 %v1119_v21, %v1015_v57  ;;  %v1137_v21 = vadd.f32 %v1121_v18, %v1017_v4 }
 0xd6a   : > { %v3848_v40 = vpop.permute.xlu0 %3847  ;;  %v3850_v62 = vpop.permute.xlu1 %3849  ;;  %v3906_v18 = vrot.slane %v3871_v60, 5 }
 0xd6b   : > { %v3853_v50 = vsel %vm244_vm1, %v7543_v38, %v3848_v40  ;;  %v3854_v1 = vsel %vm244_vm1, %v3848_v40, %v3850_v62  ;;  %v3855_v58 = vsel %vm244_vm1, %v3850_v62, %v7719_v23 }
 0xd6c   : > { %v3862_v52 = vmul.f32 %v3853_v50, %v3745_v37  ;;  %v7735_v30 = vmul.f32 %v7352_v39, %v3853_v50  ;;  %v3863_v32 = vmul.f32 %v3854_v1, %v7731_v17  ;;  %v7739_v41 = vmul.f32 %v7272_v27, %v3854_v1 }
 0xd6d   : > { %v3864_v37 = vmul.f32 %v3855_v58, %v7742_v63  ;;  %v7758_v62 = vmul.f32 %v7285_v42, %v3855_v58 }
 0xd6e   : > { %v3894_v15 = vrot.slane %v3862_v52, 5  ;;  %v3897_v26 = vrot.slane %v3863_v32, 5  ;;  %v10160_v52 = vld [vmem:[#allocation62_spill] sm:$0xff]  ;;  %v10162_v2 = vrot.slane %v7735_v30, 5  ;;  %v10163_v32 = vld [vmem:[#allocation65_spill] sm:$0xff] }
 0xd6f   : > { %v1120_v40 = vsel %vm244_vm1, %v10160_v52, %v10159_v13  ;;  %v3900_v28 = vrot.slane %v3864_v37, 5  ;;  %v1122_v19 = vsel %vm244_vm1, %v10161_v56, %v10163_v32  ;;  %v10164_v52 = vrot.slane %v7739_v41, 5  ;;  %v10165_v37 = vld [vmem:[#allocation67_spill] sm:$0xff] }
 0xd70   : > { %v3896_v22 = vsel %vm3803_vm7, %v3894_v15, %v10162_v2  ;;  %v3901_v13 = vrot.slane %v7758_v62, 5  ;;  %v3903_v2 = vrot.slane %v3865_v6, 5  ;;  %v3904_v15 = vrot.slane %v7751_v55, 5 }
 0xd71   : > { %v3899_v31 = vsel %vm3803_vm7, %v3897_v26, %v10164_v52  ;;  %3918 = vrot.lane.b32.xlu1 %v3896_v22, %s5509_s28  ;;  %v1136_v56 = vadd.f32 %v1120_v40, %v1016_v49  ;;  %v1123_v38 = vsel %vm244_vm1, %v10163_v32, %v10165_v37  ;;  %v3872_v26 = vmul.f32 %v3853_v50, %v7783_v9  ;;  %v7811_v32 = vld [vmem:[%s5588_s5 + $0x70] sm:$0x1f]  ;;  %v10169_v52 = vld [vmem:[#allocation69_spill] sm:$0xff] }
 0xd72   : > { %3920 = vrot.lane.b32.xlu2 %v3899_v31, %s5509_s28  ;;  %v3902_v14 = vsel %vm3803_vm7, %v3900_v28, %v3901_v13  ;;  %v1138_v57 = vadd.f32 %v1122_v19, %v1018_v12  ;;  %v10166_v6 = vrot.slane %v7681_v5, 1  ;;  %v1184_v31 = vsel %vm743_vm3, %v1182_v44, %v1183_v24 }
 0xd73   : > { %3922 = vrot.lane.b32.xlu0 %v3902_v14, %s5509_s28  ;;  %v10167_v49 = vrot.slane %v7685_v7, 1  ;;  %v10168_v40 = vrot.slane %v7652_v16, 1  ;;  %v1192_v19 = vsel %vm743_vm3, %v1183_v24, %v1191_v53  ;;  %v1139_v4 = vadd.f32 %v1123_v38, %v7708_v46  ;;  %v10170_v16 = vld [vmem:[#allocation71_spill] sm:$0xff]  ;;  %v7818_v53 = vld [vmem:[%s5588_s5 + $0x78] sm:$0x1f] }
 0xd74   : > { %v1186_v0 = vsel %vm743_vm3, %v10166_v6, %v1185_v54  ;;  %v3905_v12 = vsel %vm3803_vm7, %v3903_v2, %v3904_v15  ;;  %v1203_v54 = vadd.f32 %v1181_v25, %v1134_v51  ;;  %v1204_v28 = vadd.f32 %v1184_v31, %v1135_v10  ;;  %v3754_v46 = vld [vmem:[%s5588_s5 + $0x80] sm:$0x1f]  ;;  %v10171_v38 = vld [vmem:[#allocation73_spill] sm:$0xff] }
 0xd75   : > { %v1188_v50 = vsel %vm743_vm3, %v10167_v49, %v1187_v20  ;;  %v1190_v22 = vsel %vm743_vm3, %v10168_v40, %v1189_v36  ;;  %v1205_v44 = vadd.f32 %v1186_v0, %v1136_v56  ;;  %v3908_v20 = vrot.slane %v3872_v26, 5  ;;  %v10172_v25 = vld [vmem:[#allocation78_spill] sm:$0xff] }
 0xd76   : > { %v1307_v37 = vsel %vm293_vm2, %v10170_v16, %v10169_v52  ;;  %v1206_v36 = vadd.f32 %v1188_v50, %v1137_v21  ;;  %v1207_v60 = vadd.f32 %v1190_v22, %v1138_v57  ;;  %v3873_v24 = vmul.f32 %v3854_v1, %v7811_v32  ;;  %v10174_v1 = vld [vmem:[#allocation72_spill] sm:$0xff]  ;;  %v10175_v21 = vld [vmem:[#allocation74_spill] sm:$0xff] }
 0xd77   : > { %v1308_v51 = vsel %vm293_vm2, %v10169_v52, %v10171_v38  ;;  %v7825_v10 = vperm.slane %v10172_v25, 0  ;;  %v3874_v2 = vmul.f32 %v3855_v58, %v7818_v53  ;;  %v10173_v56 = vrot.slane %v7556_v61, 5  ;;  %v10176_v58 = vld [vmem:[#allocation76_spill] sm:$0xff]  ;;  %v7861_v38 = vld [vmem:[%s5588_s5 + $0x18] sm:$0xfc] }
 0xd78   : > { %v1208_v14 = vadd.f32 %v1192_v19, %v1139_v4  ;;  %v1309_v57 = vsel %vm293_vm2, %v10175_v21, %v10174_v1  ;;  %v1478_v6 = vperm.slane %v10172_v25, 2  ;;  %v1479_v0 = vperm.slane %v10172_v25, 3  ;;  %v10179_v19 = vld [vmem:[#allocation77_spill] sm:$0xff] }
 0xd79   : > { %v3907_v26 = vsel %vm3803_vm7, %v10173_v56, %v3906_v18  ;;  %3924 = vrot.lane.b32.xlu1 %v3905_v12, %s5509_s28  ;;  %v1323_v31 = vadd.f32 %v1307_v37, %v1203_v54  ;;  %v1310_v61 = vsel %vm293_vm2, %v10174_v1, %v10176_v58  ;;  %v3875_v49 = vmul.f32 %v7719_v23, %v3754_v46  ;;  %v10178_v18 = vld [vmem:[#allocation75_spill] sm:$0xff]  ;;  %v5435_v37 = vld [vmem:[%s5588_s5 + $0x10] sm:$0xfc]  ;;  %v7873_v1 = vld [vmem:[%s5588_s5 + $0x70] sm:$0x3] }
 0xd7a   : > { %3926 = vrot.lane.b32.xlu2 %v3907_v26, %s5509_s28  ;;  %v10177_v50 = vrot.slane %v7735_v30, 5  ;;  %v1324_v22 = vadd.f32 %v1308_v51, %v1204_v28  ;;  %v1312_v4 = vsel %vm293_vm2, %v10179_v19, %v10178_v18  ;;  %v1311_v12 = vsel %vm293_vm2, %v10176_v58, %v10179_v19  ;;  %v5380_v51 = vld [vmem:[%s9681_s1 + $0x45] ss:$8 sm:$0xf]  ;;  %v7879_v58 = vld [vmem:[%s5588_s5 + $0x68] sm:$0x3] }
 0xd7b   : > { %v3910_v54 = vrot.slane %v3873_v24, 5  ;;  %v1325_v52 = vadd.f32 %v1309_v57, %v1205_v44  ;;  %v7854_v23 = vmul.f32 %v7418_v11, %v7825_v10  ;;  %v7857_v30 = vperm.slane %v10172_v25, 1  ;;  %v5381_v25 = vld [vmem:[%s9681_s1 + $0x45] ss:$8 sm:$0xf0] }
 0xd7c   : > { %v3909_v40 = vsel %vm3803_vm7, %v10177_v50, %v3908_v20  ;;  %v3912_v28 = vrot.slane %v3874_v2, 5  ;;  %v1326_v20 = vadd.f32 %v1310_v61, %v1206_v36  ;;  %v1486_v46 = vmul.f32 %v5435_v37, %v1478_v6  ;;  %v5438_v57 = vld [vmem:[%s5588_s5 + $0x60] sm:$0x3]  ;;  %v10184_v37 = vld [vmem:[#allocation83_spill] sm:$0xff] }
 0xd7d   : > { %3928 = vrot.lane.b32.xlu0 %v3909_v40, %s5509_s28  ;;  %10180 = vst [vmem:[#allocation32_spill] sm:$0xff] %v7854_v23  ;;  %v1487_v24 = vmul.f32 %v7861_v38, %v1479_v0  ;;  %v1490_v44 = vmul.f32 %v7272_v27, %v1478_v6  ;;  %v1328_v2 = vadd.f32 %v1312_v4, %v1208_v14  ;;  %v3914_v26 = vrot.slane %v3875_v49, 5  ;;  %v7888_v40 = vld [vmem:[%s5588_s5 + $0x78] sm:$0x3] }
 0xd7e   : > { %v1327_v36 = vadd.f32 %v1311_v12, %v1207_v60  ;;  %v1491_v56 = vmul.f32 %v7285_v42, %v1479_v0  ;;  %v1494_v21 = vmul.f32 %v7873_v1, %v1478_v6  ;;  %v1492_v27 = vmul.f32 %v5438_v57, %v7825_v10  ;;  %v10185_v57 = vld [vmem:[#allocation80_spill] sm:$0xff]  ;;  %v10189_v60 = vld [vmem:[#allocation87_spill] sm:$0xff] }
 0xd7f   : > { %v1493_v61 = vmul.f32 %v7879_v58, %v7857_v30  ;;  %v10181_v50 = vrot.slane %v7739_v41, 5  ;;  %v1495_v49 = vmul.f32 %v7888_v40, %v1479_v0  ;;  %v3913_v6 = vsel %vm3803_vm7, %v3901_v13, %v3912_v28 }
 0xd80   : > { %v7895_v18 = vor.u32 %v5381_v25, %v5380_v51  ;;  %v7899_v19 = vmul.f32 %v7352_v39, %v7857_v30  ;;  %v1515_v41 = vrot.slane %v1486_v46, 2  ;;  %v1516_v4 = vrot.slane %v1490_v44, 2  ;;  %v10186_v51 = vld [vmem:[#allocation86_spill] sm:$0xff]  ;;  %v10187_v25 = vld [vmem:[#allocation85_spill] sm:$0xff] }
 0xd81   : > { %v3911_v14 = vsel %vm3803_vm7, %v10181_v50, %v3910_v54  ;;  %v1518_v12 = vrot.slane %v1487_v24, 2  ;;  %v10183_v54 = vld [vmem:[#allocation84_spill] sm:$0xff]  ;;  %v1519_v13 = vrot.slane %v1491_v56, 2  ;;  %v3915_v28 = vsel %vm3803_vm7, %v3904_v15, %v3914_v26 }
 0xd82   : > { %3930 = vrot.lane.b32.xlu1 %v3911_v14, %s5509_s28  ;;  %10182 = vst [vmem:[#allocation33_spill] sm:$0xff] %v7899_v19  ;;  %3932 = vrot.lane.b32.xlu2 %v3913_v6, %s5509_s28  ;;  %v1427_v0 = vsel %vm331_vm0, %v10184_v37, %v10183_v54  ;;  %v1428_v62 = vsel %vm331_vm0, %v10183_v54, %v10185_v57  ;;  %v1525_v24 = vrot.slane %v1494_v21, 2  ;;  %v1521_v44 = vrot.slane %v1492_v27, 2  ;;  %v10188_v14 = vld [vmem:[#allocation81_spill] sm:$0xff]  ;;  %v10190_v57 = vld [vmem:[#allocation88_spill] sm:$0xff] }
 0xd83   : > { %v1429_v46 = vsel %vm331_vm0, %v10187_v25, %v10186_v51  ;;  %v1523_v50 = vrot.slane %v1493_v61, 2  ;;  %v1430_v6 = vsel %vm331_vm0, %v10186_v51, %v10188_v14  ;;  %v1431_v56 = vsel %vm331_vm0, %v10188_v14, %v10189_v60 }
 0xd84   : > { %v1527_v55 = vrot.slane %v1495_v49, 2  ;;  %v3961_v15 = vperm.slane %v7895_v18, 0  ;;  %v1443_v26 = vadd.f32 %v1427_v0, %v1323_v31  ;;  %v1444_v54 = vadd.f32 %v1428_v62, %v1324_v22 }
 0xd85   : > { %3934 = vrot.lane.b32.xlu0 %v3915_v28, %s5509_s28  ;;  %v1432_v21 = vsel %vm331_vm0, %v10189_v60, %v10190_v57  ;;  %v3962_v27 = vperm.slane %v7895_v18, 1  ;;  %v1445_v61 = vadd.f32 %v1429_v46, %v1325_v52  ;;  %v9847_v28 = vrot.slane %v7899_v19, 2  ;;  %v10239_v19 = vld [vmem:[#allocation139_spill] sm:$0xff] }
 0xd86   : > { %v1517_v51 = vsel %vm1508_vm4, %v1515_v41, %v1516_v4  ;;  %v1520_v25 = vsel %vm1508_vm4, %v1518_v12, %v1519_v13  ;;  %v1446_v37 = vadd.f32 %v1430_v6, %v1326_v20  ;;  %v1447_v14 = vadd.f32 %v1431_v56, %v1327_v36  ;;  %v10192_v12 = vld [vmem:[#allocation94_spill] sm:$0xff]  ;;  %v10193_v20 = vld [vmem:[#allocation89_spill] sm:$0xff] }
 0xd87   : > { %v10191_v49 = vrot.slane %v7854_v23, 2  ;;  %v3963_v22 = vperm.slane %v7895_v18, 2  ;;  %v1448_v0 = vadd.f32 %v1432_v21, %v1328_v2  ;;  %v1526_v60 = vsel %vm1508_vm4, %v1516_v4, %v1525_v24  ;;  %v10195_v4 = vld [vmem:[#allocation95_spill] sm:$0xff]  ;;  %v10196_v24 = vld [vmem:[#allocation96_spill] sm:$0xff]  ;;  %v10197_v56 = vld [vmem:[#allocation97_spill] sm:$0xff] }
 0xd88   : > { %v1524_v52 = vsel %vm1508_vm4, %v9847_v28, %v1523_v50  ;;  %v1539_v41 = vadd.f32 %v1517_v51, %v1443_v26  ;;  %v1540_v62 = vadd.f32 %v1520_v25, %v1444_v54  ;;  %v1643_v36 = vsel %vm293_vm2, %v10193_v20, %v10192_v12  ;;  %v10238_v20 = vld [vmem:[#allocation137_spill] sm:$0xff] }
 0xd89   : > { %v1522_v31 = vsel %vm1508_vm4, %v10191_v49, %v1521_v44  ;;  %v1528_v46 = vsel %vm1508_vm4, %v1519_v13, %v1527_v55  ;;  %v10194_v44 = vld [vmem:[#allocation93_spill] sm:$0xff]  ;;  %v1647_v50 = vsel %vm293_vm2, %v10196_v24, %v10195_v4  ;;  %v1543_v54 = vadd.f32 %v1526_v60, %v1447_v14  ;;  %v10199_v55 = vld [vmem:[#allocation98_spill] sm:$0xff] }
 0xd8a   : > { %3965 = vrot.lane.b32.xlu1 %v3961_v15, %s5508_s23  ;;  %3967 = vrot.lane.b32.xlu2 %v3962_v27, %s5508_s23  ;;  %v1644_v2 = vsel %vm293_vm2, %v10192_v12, %v10194_v44  ;;  %v1541_v6 = vadd.f32 %v1522_v31, %v1445_v61  ;;  %v10198_v15 = vld [vmem:[#allocation92_spill] sm:$0xff]  ;;  %v1542_v57 = vadd.f32 %v1524_v52, %v1446_v37  ;;  %v1908_v61 = vperm.slane %v6456_v43, 2  ;;  %v10200_v12 = vld [vmem:[#allocation101_spill] sm:$0xff]  ;;  %v10201_v44 = vld [vmem:[#allocation102_spill] sm:$0xff] }
 0xd8b   : > { %v1645_v26 = vsel %vm293_vm2, %v10198_v15, %v10197_v56  ;;  %v1646_v13 = vsel %vm293_vm2, %v10197_v56, %v10196_v24  ;;  %v1648_v21 = vsel %vm293_vm2, %v10195_v4, %v10199_v55  ;;  %v1659_v27 = vadd.f32 %v1643_v36, %v1539_v41  ;;  %v10202_v24 = vld [vmem:[#allocation103_spill] sm:$0xff]  ;;  %v10204_v41 = vld [vmem:[#allocation105_spill] sm:$0xff] }
 0xd8c   : > { %v1544_v51 = vadd.f32 %v1528_v46, %v1448_v0  ;;  %v3964_v25 = vperm.slane %v7895_v18, 3  ;;  %v1660_v49 = vadd.f32 %v1644_v2, %v1540_v62  ;;  %v1663_v31 = vadd.f32 %v1647_v50, %v1543_v54  ;;  %v10203_v0 = vld [vmem:[#allocation104_spill] sm:$0xff]  ;;  %v10205_v62 = vld [vmem:[#allocation106_spill] sm:$0xff] }
 0xd8d   : > { %3969 = vrot.lane.b32.xlu0 %v3963_v22, %s5508_s23  ;;  %v1661_v14 = vadd.f32 %v1645_v26, %v1541_v6  ;;  %v1909_v37 = vperm.slane %v6456_v43, 3  ;;  %v1662_v60 = vadd.f32 %v1646_v13, %v1542_v57  ;;  %v1763_v4 = vsel %vm331_vm0, %v10201_v44, %v10200_v12  ;;  %v10206_v2 = vld [vmem:[#allocation108_spill] sm:$0xff]  ;;  %v10207_v6 = vld [vmem:[#allocation107_spill] sm:$0xff] }
 0xd8e   : > { %v1664_v52 = vadd.f32 %v1648_v21, %v1544_v51  ;;  %v1764_v22 = vsel %vm331_vm0, %v10200_v12, %v10202_v24  ;;  %v1765_v36 = vsel %vm331_vm0, %v10204_v41, %v10203_v0  ;;  %v1766_v46 = vsel %vm331_vm0, %v10203_v0, %v10205_v62  ;;  %v5441_v21 = vld [vmem:[%s5588_s5 + $0x20] sm:$0xfc] }
 0xd8f   : > { %v1767_v50 = vsel %vm331_vm0, %v10205_v62, %v10206_v2  ;;  %v1768_v56 = vsel %vm331_vm0, %v10206_v2, %v10207_v6  ;;  %v7981_v15 = vperm.slane %v6456_v43, 0  ;;  %v7984_v26 = vperm.slane %v6456_v43, 1 }
 0xd90   : > { %v1916_v54 = vmul.f32 %v7861_v38, %v1908_v61  ;;  %v1920_v57 = vmul.f32 %v7285_v42, %v1908_v61  ;;  %v1779_v13 = vadd.f32 %v1763_v4, %v1659_v27  ;;  %v1780_v55 = vadd.f32 %v1764_v22, %v1660_v49  ;;  %v8002_v49 = vld [vmem:[%s5588_s5 + $0x40] sm:$0xff]  ;;  %v10216_v4 = vld [vmem:[#allocation116_spill] sm:$0xff] }
 0xd91   : > { %10208 = vst [vmem:[#allocation35_spill] sm:$0xff] %v7981_v15  ;;  %v1917_v51 = vmul.f32 %v5441_v21, %v1909_v37  ;;  %v1921_v12 = vmul.f32 %v7296_v8, %v1909_v37  ;;  %v1781_v24 = vadd.f32 %v1765_v36, %v1661_v14  ;;  %v1782_v0 = vadd.f32 %v1766_v46, %v1662_v60  ;;  %v10212_v60 = vld [vmem:[#allocation110_spill] sm:$0xff]  ;;  %v10217_v46 = vld [vmem:[#allocation115_spill] sm:$0xff] }
 0xd92   : > { %10209 = vst [vmem:[#allocation34_spill] sm:$0xff] %v7984_v26  ;;  %3971 = vrot.lane.b32.xlu1 %v3964_v25, %s5508_s23  ;;  %v1922_v43 = vmul.f32 %v7879_v58, %v7981_v15  ;;  %v1923_v41 = vmul.f32 %v7873_v1, %v7984_v26  ;;  %v1783_v38 = vadd.f32 %v1767_v50, %v1663_v31  ;;  %v5442_v25 = vld [vmem:[%s5588_s5 + $0x80] sm:$0x3]  ;;  %v1944_v58 = vrot.slane %v1916_v54, 2 }
 0xd93   : > { %v1784_v62 = vadd.f32 %v1768_v56, %v1664_v52  ;;  %v1924_v42 = vmul.f32 %v7888_v40, %v1908_v61  ;;  %v1925_v2 = vmul.f32 %v5442_v25, %v1909_v37  ;;  %v7999_v27 = vmul.f32 %v7352_v39, %v7981_v15  ;;  %v10213_v1 = vld [vmem:[#allocation114_spill] sm:$0xff]  ;;  %v10214_v40 = vld [vmem:[#allocation113_spill] sm:$0xff]  ;;  %v10215_v39 = vld [vmem:[#allocation112_spill] sm:$0xff] }
 0xd94   : > { %v8006_v8 = vmul.f32 %v8002_v49, %v7984_v26  ;;  %v1945_v14 = vrot.slane %v1920_v57, 2  ;;  %v1884_v31 = vsel %vm244_vm1, %v10213_v1, %v10212_v60  ;;  %v1883_v61 = vsel %vm244_vm1, %v10214_v40, %v10213_v1  ;;  %v10218_v56 = vld [vmem:[#allocation117_spill] sm:$0xff]  ;;  %v10219_v57 = vld [vmem:[#allocation118_spill] sm:$0xff] }
 0xd95   : > { %10210 = vst [vmem:[#allocation30_spill] sm:$0xff] %v7999_v27  ;;  %v1947_v37 = vrot.slane %v1917_v51, 2  ;;  %v1948_v52 = vrot.slane %v1921_v12, 2  ;;  %v1886_v22 = vsel %vm244_vm1, %v10216_v4, %v10215_v39  ;;  %v1950_v36 = vrot.slane %v1922_v43, 2 }
 0xd96   : > { %10211 = vst [vmem:[#allocation36_spill] sm:$0xff] %v8006_v8  ;;  %v1885_v50 = vsel %vm244_vm1, %v10217_v46, %v10216_v4  ;;  %v1952_v6 = vrot.slane %v1923_v41, 2  ;;  %v1887_v54 = vsel %vm244_vm1, %v10215_v39, %v10218_v56  ;;  %v1888_v21 = vsel %vm244_vm1, %v10218_v56, %v10219_v57 }
 0xd97   : > { %v1954_v51 = vrot.slane %v1924_v42, 2  ;;  %v1956_v12 = vrot.slane %v1925_v2, 2  ;;  %v9849_v25 = vrot.slane %v7999_v27, 2  ;;  %v1900_v60 = vadd.f32 %v1884_v31, %v1780_v55 }
 0xd98   : > { %v1899_v1 = vadd.f32 %v1883_v61, %v1779_v13  ;;  %v9848_v43 = vrot.slane %v8006_v8, 2  ;;  %v1902_v28 = vadd.f32 %v1886_v22, %v1782_v0  ;;  %v1901_v40 = vadd.f32 %v1885_v50, %v1781_v24  ;;  %v10220_v24 = vld [vmem:[#allocation129_spill] sm:$0xff]  ;;  %v10223_v22 = vld [vmem:[#allocation124_spill] sm:$0xff]  ;;  %v10235_v8 = vld [vmem:[#allocation135_spill] sm:$0xff] }
 0xd99   : > { %v1946_v41 = vsel %vm1508_vm4, %v1944_v58, %v1945_v14  ;;  %v1949_v4 = vsel %vm1508_vm4, %v1947_v37, %v1948_v52  ;;  %v1951_v39 = vsel %vm1508_vm4, %v9849_v25, %v1950_v36  ;;  %v1903_v46 = vadd.f32 %v1887_v54, %v1783_v38  ;;  %v10221_v37 = vld [vmem:[#allocation122_spill] sm:$0xff]  ;;  %v10222_v38 = vld [vmem:[#allocation120_spill] sm:$0xff]  ;;  %v10224_v50 = vld [vmem:[#allocation125_spill] sm:$0xff] }
 0xd9a   : > { %v1904_v56 = vadd.f32 %v1888_v21, %v1784_v62  ;;  %v1953_v42 = vsel %vm1508_vm4, %v9848_v43, %v1952_v6  ;;  %v1955_v13 = vsel %vm1508_vm4, %v1945_v14, %v1954_v51  ;;  %v1957_v55 = vsel %vm1508_vm4, %v1948_v52, %v1956_v12  ;;  %v10225_v52 = vld [vmem:[#allocation123_spill] sm:$0xff]  ;;  %v10234_v43 = vld [vmem:[#allocation133_spill] sm:$0xff] }
 0xd9b   : > { %v2243_v0 = vperm.slane %v10220_v24, 2  ;;  %v1968_v2 = vadd.f32 %v1946_v41, %v1899_v1  ;;  %v1969_v58 = vadd.f32 %v1949_v4, %v1900_v60  ;;  %v2244_v31 = vperm.slane %v10220_v24, 3  ;;  %v5444_v60 = vld [vmem:[%s5588_s5 + $0x10] sm:$0xf8] }
 0xd9c   : > { %v1970_v61 = vadd.f32 %v1951_v39, %v1901_v40  ;;  %v2072_v62 = vsel %vm293_vm2, %v10222_v38, %v10221_v37  ;;  %v2073_v14 = vsel %vm293_vm2, %v10221_v37, %v10223_v22  ;;  %v1971_v36 = vadd.f32 %v1953_v42, %v1902_v28  ;;  %v10227_v40 = vld [vmem:[#allocation127_spill] sm:$0xff]  ;;  %v8061_v39 = vld [vmem:[%s5588_s5 + $0x18] sm:$0xf8]  ;;  %v5447_v37 = vld [vmem:[%s5588_s5 + $0x60] sm:$0x7] }
 0xd9d   : > { %v2074_v6 = vsel %vm293_vm2, %v10225_v52, %v10224_v50  ;;  %v1972_v54 = vadd.f32 %v1955_v13, %v1903_v46  ;;  %v1973_v57 = vadd.f32 %v1957_v55, %v1904_v56  ;;  %v8050_v21 = vperm.slane %v10220_v24, 0  ;;  %v8065_v56 = vld [vmem:[%s5588_s5 + $0x48] sm:$0xff]  ;;  %v10229_v55 = vld [vmem:[#allocation126_spill] sm:$0xff]  ;;  %v8086_v52 = vld [vmem:[%s5588_s5 + $0x70] sm:$0x7] }
 0xd9e   : > { %v2075_v51 = vsel %vm293_vm2, %v10224_v50, %v10227_v40  ;;  %v8056_v12 = vperm.slane %v10220_v24, 1  ;;  %v2251_v28 = vmul.f32 %v5444_v60, %v2243_v0  ;;  %v2255_v1 = vmul.f32 %v8002_v49, %v2243_v0 }
 0xd9f   : > { %10226 = vst [vmem:[#allocation39_spill] sm:$0xff] %v8050_v21  ;;  %v2088_v41 = vadd.f32 %v2072_v62, %v1968_v2  ;;  %v2089_v4 = vadd.f32 %v2073_v14, %v1969_v58  ;;  %v2252_v46 = vmul.f32 %v8061_v39, %v2244_v31  ;;  %v2256_v42 = vmul.f32 %v8065_v56, %v2244_v31  ;;  %v8074_v2 = vld [vmem:[%s5588_s5 + $0x68] sm:$0x7]  ;;  %v10230_v14 = vld [vmem:[#allocation128_spill] sm:$0xff] }
 0xda0   : > { %10228 = vst [vmem:[#allocation41_spill] sm:$0xff] %v8056_v12  ;;  %v2090_v13 = vadd.f32 %v2074_v6, %v1970_v61  ;;  %v2076_v24 = vsel %vm293_vm2, %v10227_v40, %v10229_v55  ;;  %v2257_v22 = vmul.f32 %v5447_v37, %v8050_v21  ;;  %v2258_v58 = vmul.f32 %v8074_v2, %v8056_v12  ;;  %v8090_v40 = vld [vmem:[%s5588_s5 + $0x38] sm:$0xff] }
 0xda1   : > { %v2091_v62 = vadd.f32 %v2075_v51, %v1971_v36  ;;  %v2077_v50 = vsel %vm293_vm2, %v10229_v55, %v10230_v14  ;;  %v8083_v61 = vmul.f32 %v7418_v11, %v8050_v21  ;;  %v2259_v6 = vmul.f32 %v8086_v52, %v2243_v0  ;;  %v8097_v51 = vld [vmem:[%s5588_s5 + $0x78] sm:$0x7]  ;;  %v10233_v14 = vld [vmem:[#allocation131_spill] sm:$0xff] }
 0xda2   : > { %v8094_v60 = vmul.f32 %v8090_v40, %v8056_v12  ;;  %v2280_v37 = vrot.slane %v2251_v28, 3  ;;  %v2281_v36 = vrot.slane %v2255_v1, 3  ;;  %v2260_v55 = vmul.f32 %v8097_v51, %v2244_v31  ;;  %v10236_v28 = vld [vmem:[#allocation134_spill] sm:$0xff]  ;;  %v10237_v1 = vld [vmem:[#allocation136_spill] sm:$0xff] }
 0xda3   : > { %10231 = vst [vmem:[#allocation57_spill] sm:$0xff] %v8083_v61  ;;  %v2192_v11 = vsel %vm331_vm0, %v10234_v43, %v10233_v14  ;;  %v2283_v25 = vrot.slane %v2252_v46, 3  ;;  %v2284_v38 = vrot.slane %v2256_v42, 3  ;;  %v2193_v0 = vsel %vm331_vm0, %v10233_v14, %v10235_v8  ;;  %v10240_v8 = vld [vmem:[#allocation138_spill] sm:$0xff] }
 0xda4   : > { %10232 = vst [vmem:[#allocation42_spill] sm:$0xff] %v8094_v60  ;;  %v2092_v21 = vadd.f32 %v2076_v24, %v1972_v54  ;;  %v2093_v27 = vadd.f32 %v2077_v50, %v1973_v57  ;;  %v2286_v12 = vrot.slane %v2257_v22, 3  ;;  %v2288_v44 = vrot.slane %v2258_v58, 3 }
 0xda5   : > { %v2194_v26 = vsel %vm331_vm0, %v10237_v1, %v10236_v28  ;;  %v2195_v31 = vsel %vm331_vm0, %v10236_v28, %v10238_v20  ;;  %v2196_v46 = vsel %vm331_vm0, %v10238_v20, %v10239_v19  ;;  %v2290_v42 = vrot.slane %v2259_v6, 3 }
 0xda6   : > { %v2208_v43 = vadd.f32 %v2192_v11, %v2088_v41  ;;  %v2209_v15 = vadd.f32 %v2193_v0, %v2089_v4  ;;  %v2197_v54 = vsel %vm331_vm0, %v10239_v19, %v10240_v8  ;;  %v2292_v57 = vrot.slane %v2260_v55, 3  ;;  %v10241_v55 = vld [vmem:[#allocation145_spill] sm:$0xff]  ;;  %v10242_v11 = vld [vmem:[#allocation144_spill] sm:$0xff]  ;;  %v10246_v0 = vld [vmem:[#allocation142_spill] sm:$0xff] }
 0xda7   : > { %v9858_v24 = vrot.slane %v8083_v61, 3  ;;  %v2285_v22 = vsel %vm2273_vm5, %v2283_v25, %v2284_v38  ;;  %v9857_v58 = vrot.slane %v8094_v60, 3  ;;  %v2282_v50 = vsel %vm2273_vm5, %v2280_v37, %v2281_v36 }
 0xda8   : > { %v2210_v14 = vadd.f32 %v2194_v26, %v2090_v13  ;;  %v2211_v28 = vadd.f32 %v2195_v31, %v2091_v62  ;;  %v2212_v1 = vadd.f32 %v2196_v46, %v2092_v21  ;;  %v2213_v41 = vadd.f32 %v2197_v54, %v2093_v27  ;;  %v10243_v21 = vld [vmem:[#allocation141_spill] sm:$0xff]  ;;  %v10245_v27 = vld [vmem:[#allocation146_spill] sm:$0xff] }
 0xda9   : > { %v2287_v20 = vsel %vm2273_vm5, %v9858_v24, %v2286_v12  ;;  %v2289_v19 = vsel %vm2273_vm5, %v9857_v58, %v2288_v44  ;;  %v2291_v4 = vsel %vm2273_vm5, %v2281_v36, %v2290_v42  ;;  %v2305_v6 = vadd.f32 %v2285_v22, %v2209_v15  ;;  %v10244_v12 = vld [vmem:[#allocation147_spill] sm:$0xff]  ;;  %v10247_v15 = vld [vmem:[#allocation148_spill] sm:$0xff] }
 0xdaa   : > { %v2304_v25 = vadd.f32 %v2282_v50, %v2208_v43  ;;  %v2408_v37 = vsel %vm293_vm2, %v10242_v11, %v10241_v55  ;;  %v2293_v26 = vsel %vm2273_vm5, %v2284_v38, %v2292_v57  ;;  %v2409_v13 = vsel %vm293_vm2, %v10241_v55, %v10243_v21  ;;  %v10248_v38 = vld [vmem:[#allocation149_spill] sm:$0xff]  ;;  %v10249_v57 = vld [vmem:[#allocation160_spill] sm:$0xff] }
 0xdab   : > { %v2410_v62 = vsel %vm293_vm2, %v10245_v27, %v10244_v12  ;;  %v2411_v44 = vsel %vm293_vm2, %v10244_v12, %v10246_v0  ;;  %v2412_v43 = vsel %vm293_vm2, %v10246_v0, %v10247_v15  ;;  %v2306_v36 = vadd.f32 %v2287_v20, %v2210_v14  ;;  %v10250_v14 = vld [vmem:[#allocation154_spill] sm:$0xff]  ;;  %v10252_v20 = vld [vmem:[#allocation155_spill] sm:$0xff] }
 0xdac   : > { %v2307_v31 = vadd.f32 %v2289_v19, %v2211_v28  ;;  %v2308_v46 = vadd.f32 %v2291_v4, %v2212_v1  ;;  %v2413_v42 = vsel %vm293_vm2, %v10247_v15, %v10248_v38  ;;  %v2424_v8 = vadd.f32 %v2408_v37, %v2304_v25  ;;  %v10251_v28 = vld [vmem:[#allocation150_spill] sm:$0xff]  ;;  %v10253_v4 = vld [vmem:[#allocation157_spill] sm:$0xff]  ;;  %v10255_v37 = vld [vmem:[#allocation156_spill] sm:$0xff] }
 0xdad   : > { %v2309_v54 = vadd.f32 %v2293_v26, %v2213_v41  ;;  %v2674_v22 = vperm.slane %v10249_v57, 3  ;;  %v2673_v50 = vperm.slane %v10249_v57, 2  ;;  %v2425_v55 = vadd.f32 %v2409_v13, %v2305_v6  ;;  %v10254_v41 = vld [vmem:[#allocation153_spill] sm:$0xff]  ;;  %v10256_v26 = vld [vmem:[#allocation158_spill] sm:$0xff] }
 0xdae   : > { %v2426_v21 = vadd.f32 %v2410_v62, %v2306_v36  ;;  %v2427_v12 = vadd.f32 %v2411_v44, %v2307_v31  ;;  %v2428_v27 = vadd.f32 %v2412_v43, %v2308_v46  ;;  %v2528_v1 = vsel %vm331_vm0, %v10251_v28, %v10250_v14  ;;  %v5452_v15 = vld [vmem:[%s5588_s5 + $0x20] sm:$0xf8]  ;;  %v8173_v36 = vld [vmem:[%s5588_s5 + $0x50] sm:$0xff] }
 0xdaf   : > { %v2429_v0 = vadd.f32 %v2413_v42, %v2309_v54  ;;  %v2529_v19 = vsel %vm331_vm0, %v10250_v14, %v10252_v20  ;;  %v2530_v25 = vsel %vm331_vm0, %v10254_v41, %v10253_v4  ;;  %v2532_v6 = vsel %vm331_vm0, %v10256_v26, %v10255_v37  ;;  %v10267_v28 = vld [vmem:[#allocation168_spill] sm:$0xff] }
 0xdb0   : > { %v2531_v13 = vsel %vm331_vm0, %v10253_v4, %v10256_v26  ;;  %v8166_v62 = vperm.slane %v10249_v57, 0  ;;  %v8169_v44 = vperm.slane %v10249_v57, 1  ;;  %v2682_v43 = vmul.f32 %v5452_v15, %v2674_v22  ;;  %v10259_v15 = vld [vmem:[#allocation159_spill] sm:$0xff] }
 0xdb1   : > { %v2686_v31 = vmul.f32 %v8173_v36, %v2674_v22  ;;  %v2681_v46 = vmul.f32 %v8061_v39, %v2673_v50  ;;  %v2685_v38 = vmul.f32 %v8065_v56, %v2673_v50  ;;  %v2544_v42 = vadd.f32 %v2528_v1, %v2424_v8  ;;  %v10262_v1 = vld [vmem:[#allocation163_spill] sm:$0xff] }
 0xdb2   : > { %10257 = vst [vmem:[#allocation43_spill] sm:$0xff] %v8166_v62  ;;  %v2545_v54 = vadd.f32 %v2529_v19, %v2425_v55  ;;  %v2688_v14 = vmul.f32 %v8086_v52, %v8169_v44  ;;  %v2687_v57 = vmul.f32 %v8074_v2, %v8166_v62  ;;  %v2548_v20 = vadd.f32 %v2532_v6, %v2428_v27  ;;  %v5454_v52 = vld [vmem:[%s5588_s5 + $0x80] sm:$0x7]  ;;  %v10264_v19 = vld [vmem:[#allocation165_spill] sm:$0xff] }
 0xdb3   : > { %10258 = vst [vmem:[#allocation44_spill] sm:$0xff] %v8169_v44  ;;  %v2546_v4 = vadd.f32 %v2530_v25, %v2426_v21  ;;  %v2547_v41 = vadd.f32 %v2531_v13, %v2427_v12  ;;  %v2689_v26 = vmul.f32 %v8097_v51, %v2673_v50  ;;  %v2533_v58 = vsel %vm331_vm0, %v10255_v37, %v10259_v15  ;;  %v10263_v51 = vld [vmem:[#allocation164_spill] sm:$0xff]  ;;  %v10265_v13 = vld [vmem:[#allocation166_spill] sm:$0xff]  ;;  %v10266_v15 = vld [vmem:[#allocation167_spill] sm:$0xff] }
 0xdb4   : > { %v8188_v39 = vmul.f32 %v8090_v40, %v8166_v62  ;;  %v8192_v8 = vmul.f32 %v8002_v49, %v8169_v44  ;;  %v2690_v55 = vmul.f32 %v5454_v52, %v2674_v22  ;;  %v2712_v2 = vrot.slane %v2682_v43, 3  ;;  %v10268_v43 = vld [vmem:[#allocation170_spill] sm:$0xff] }
 0xdb5   : > { %v2713_v27 = vrot.slane %v2686_v31, 3  ;;  %v2709_v21 = vrot.slane %v2681_v46, 3  ;;  %v2710_v12 = vrot.slane %v2685_v38, 3  ;;  %v2648_v50 = vsel %vm244_vm1, %v10263_v51, %v10262_v1 }
 0xdb6   : > { %10260 = vst [vmem:[#allocation46_spill] sm:$0xff] %v8188_v39  ;;  %v2649_v25 = vsel %vm244_vm1, %v10262_v1, %v10264_v19  ;;  %v2717_v37 = vrot.slane %v2688_v14, 3  ;;  %v2715_v6 = vrot.slane %v2687_v57, 3  ;;  %v2650_v24 = vsel %vm244_vm1, %v10266_v15, %v10265_v13  ;;  %v10269_v15 = vld [vmem:[#allocation169_spill] sm:$0xff] }
 0xdb7   : > { %10261 = vst [vmem:[#allocation45_spill] sm:$0xff] %v8192_v8  ;;  %v2651_v22 = vsel %vm244_vm1, %v10265_v13, %v10267_v28  ;;  %v2652_v31 = vsel %vm244_vm1, %v10267_v28, %v10268_v43  ;;  %v2719_v46 = vrot.slane %v2689_v26, 3  ;;  %v2549_v38 = vadd.f32 %v2533_v58, %v2429_v0 }
 0xdb8   : > { %v9862_v52 = vrot.slane %v8188_v39, 3  ;;  %v9861_v1 = vrot.slane %v8192_v8, 3  ;;  %v2721_v14 = vrot.slane %v2690_v55, 3  ;;  %v2664_v57 = vadd.f32 %v2648_v50, %v2544_v42  ;;  %v10270_v55 = vld [vmem:[#allocation181_spill] sm:$0xff]  ;;  %v10284_v8 = vld [vmem:[#allocation187_spill] sm:$0xff]  ;;  %v10286_v39 = vld [vmem:[#allocation186_spill] sm:$0xff] }
 0xdb9   : > { %v2714_v19 = vsel %vm2273_vm5, %v2712_v2, %v2713_v27  ;;  %v2665_v51 = vadd.f32 %v2649_v25, %v2545_v54  ;;  %v2653_v44 = vsel %vm244_vm1, %v10268_v43, %v10269_v15  ;;  %v2666_v13 = vadd.f32 %v2650_v24, %v2546_v4  ;;  %v10273_v25 = vld [vmem:[#allocation175_spill] sm:$0xff]  ;;  %v10276_v43 = vld [vmem:[#allocation177_spill] sm:$0xff] }
 0xdba   : > { %v2667_v11 = vadd.f32 %v2651_v22, %v2547_v41  ;;  %v2668_v60 = vadd.f32 %v2652_v31, %v2548_v20  ;;  %v2711_v28 = vsel %vm2273_vm5, %v2709_v21, %v2710_v12  ;;  %v2718_v58 = vsel %vm2273_vm5, %v9861_v1, %v2717_v37  ;;  %v10271_v20 = vld [vmem:[#allocation172_spill] sm:$0xff]  ;;  %v10275_v22 = vld [vmem:[#allocation178_spill] sm:$0xff]  ;;  %v10280_v15 = vld [vmem:[#allocation179_spill] sm:$0xff] }
 0xdbb   : > { %v2716_v0 = vsel %vm2273_vm5, %v9862_v52, %v2715_v6  ;;  %v2720_v42 = vsel %vm2273_vm5, %v2710_v12, %v2719_v46  ;;  %v2669_v54 = vadd.f32 %v2653_v44, %v2549_v38  ;;  %v2722_v26 = vsel %vm2273_vm5, %v2713_v27, %v2721_v14  ;;  %v10272_v41 = vld [vmem:[#allocation176_spill] sm:$0xff]  ;;  %v10274_v6 = vld [vmem:[#allocation174_spill] sm:$0xff]  ;;  %v10283_v1 = vld [vmem:[#allocation183_spill] sm:$0xff] }
 0xdbc   : > { %v3008_v24 = vperm.slane %v10270_v55, 2  ;;  %v2734_v4 = vadd.f32 %v2714_v19, %v2665_v51  ;;  %v2838_v2 = vsel %vm293_vm2, %v10272_v41, %v10271_v20  ;;  %v2733_v21 = vadd.f32 %v2711_v28, %v2664_v57  ;;  %v8246_v57 = vld [vmem:[%s5588_s5 + $0x10] sm:$0xf0]  ;;  %v8258_v20 = vld [vmem:[%s5588_s5 + $0x68] sm:$0xf] }
 0xdbd   : > { %v3009_v50 = vperm.slane %v10270_v55, 3  ;;  %v2837_v37 = vsel %vm293_vm2, %v10273_v25, %v10272_v41  ;;  %v2736_v12 = vadd.f32 %v2718_v58, %v2667_v11  ;;  %v2735_v44 = vadd.f32 %v2716_v0, %v2666_v13  ;;  %10279 = vst [vmem:[#allocation50_spill] sm:$0xff] %v8246_v57  ;;  %v5456_v58 = vld [vmem:[%s5588_s5 + $0x60] sm:$0xf] }
 0xdbe   : > { %v2737_v27 = vadd.f32 %v2720_v42, %v2668_v60  ;;  %v2840_v51 = vsel %vm293_vm2, %v10275_v22, %v10274_v6  ;;  %v2839_v31 = vsel %vm293_vm2, %v10276_v43, %v10275_v22  ;;  %v8240_v46 = vperm.slane %v10270_v55, 0  ;;  %v5457_v42 = vld [vmem:[%s5588_s5 + $0x18] sm:$0xf0]  ;;  %v8266_v22 = vld [vmem:[%s5588_s5 + $0x78] sm:$0xf] }
 0xdbf   : > { %v8243_v38 = vperm.slane %v10270_v55, 1  ;;  %v2854_v14 = vadd.f32 %v2838_v2, %v2734_v4  ;;  %v2738_v11 = vadd.f32 %v2722_v26, %v2669_v54  ;;  %v3016_v60 = vmul.f32 %v8246_v57, %v3008_v24  ;;  %v10281_v2 = vld [vmem:[#allocation180_spill] sm:$0xff] }
 0xdc0   : > { %10277 = vst [vmem:[#allocation48_spill] sm:$0xff] %v8240_v46  ;;  %v3020_v19 = vmul.f32 %v8002_v49, %v3008_v24  ;;  %v2841_v13 = vsel %vm293_vm2, %v10274_v6, %v10280_v15  ;;  %v3021_v28 = vmul.f32 %v8065_v56, %v3009_v50  ;;  %v3022_v0 = vmul.f32 %v5456_v58, %v8240_v46  ;;  %v8270_v58 = vld [vmem:[%s5588_s5 + $0x30] sm:$0xff] }
 0xdc1   : > { %10278 = vst [vmem:[#allocation52_spill] sm:$0xff] %v8243_v38  ;;  %v3017_v54 = vmul.f32 %v5457_v42, %v3009_v50  ;;  %v2853_v26 = vadd.f32 %v2837_v37, %v2733_v21  ;;  %v2856_v55 = vadd.f32 %v2840_v51, %v2736_v12  ;;  %v2855_v4 = vadd.f32 %v2839_v31, %v2735_v44  ;;  %v8281_v31 = vld [vmem:[%s5588_s5 + $0x70] sm:$0xf] }
 0xdc2   : > { %v3023_v41 = vmul.f32 %v8258_v20, %v8243_v38  ;;  %v2842_v6 = vsel %vm293_vm2, %v10280_v15, %v10281_v2  ;;  %v3025_v43 = vmul.f32 %v8266_v22, %v3009_v50  ;;  %v8274_v21 = vmul.f32 %v8270_v58, %v8240_v46  ;;  %v10282_v2 = vld [vmem:[#allocation185_spill] sm:$0xff] }
 0xdc3   : > { %v8278_v37 = vmul.f32 %v8090_v40, %v8243_v38  ;;  %v2857_v12 = vadd.f32 %v2841_v13, %v2737_v27  ;;  %v3045_v44 = vrot.slane %v3016_v60, 4  ;;  %v3046_v51 = vrot.slane %v3020_v19, 4  ;;  %v10285_v38 = vld [vmem:[#allocation188_spill] sm:$0xff]  ;;  %v10287_v60 = vld [vmem:[#allocation190_spill] sm:$0xff] }
 0xdc4   : > { %v3024_v15 = vmul.f32 %v8281_v31, %v3008_v24  ;;  %v2957_v50 = vsel %vm331_vm0, %v10283_v1, %v10282_v2  ;;  %v3049_v52 = vrot.slane %v3021_v28, 4  ;;  %v3051_v57 = vrot.slane %v3022_v0, 4 }
 0xdc5   : > { %v3048_v25 = vrot.slane %v3017_v54, 4  ;;  %v2958_v46 = vsel %vm331_vm0, %v10282_v2, %v10284_v8  ;;  %v2959_v27 = vsel %vm331_vm0, %v10286_v39, %v10285_v38  ;;  %v2960_v19 = vsel %vm331_vm0, %v10285_v38, %v10287_v60  ;;  %v10288_v54 = vld [vmem:[#allocation189_spill] sm:$0xff]  ;;  %v10289_v2 = vld [vmem:[#allocation191_spill] sm:$0xff] }
 0xdc6   : > { %v3053_v24 = vrot.slane %v3023_v41, 4  ;;  %v2858_v13 = vadd.f32 %v2842_v6, %v2738_v11  ;;  %v3057_v62 = vrot.slane %v3025_v43, 4  ;;  %v9872_v1 = vrot.slane %v8274_v21, 4 }
 0xdc7   : > { %v9871_v28 = vrot.slane %v8278_v37, 4  ;;  %v2973_v0 = vadd.f32 %v2957_v50, %v2853_v26  ;;  %v2961_v8 = vsel %vm331_vm0, %v10287_v60, %v10288_v54  ;;  %v2962_v39 = vsel %vm331_vm0, %v10288_v54, %v10289_v2  ;;  %v10293_v54 = vld [vmem:[#allocation198_spill] sm:$0xff] }
 0xdc8   : > { %v3055_v61 = vrot.slane %v3024_v15, 4  ;;  %v2974_v23 = vadd.f32 %v2958_v46, %v2854_v14  ;;  %v2975_v16 = vadd.f32 %v2959_v27, %v2855_v4  ;;  %v2976_v38 = vadd.f32 %v2960_v19, %v2856_v55  ;;  %v10290_v55 = vld [vmem:[#allocation193_spill] sm:$0xff]  ;;  %v10291_v4 = vld [vmem:[#allocation195_spill] sm:$0xff]  ;;  %v10292_v19 = vld [vmem:[#allocation196_spill] sm:$0xff] }
 0xdc9   : > { %v3047_v11 = vsel %vm3038_vm6, %v3045_v44, %v3046_v51  ;;  %v3052_v41 = vsel %vm3038_vm6, %v9872_v1, %v3051_v57  ;;  %v3050_v26 = vsel %vm3038_vm6, %v3048_v25, %v3049_v52  ;;  %v3054_v6 = vsel %vm3038_vm6, %v9871_v28, %v3053_v24  ;;  %v10298_v2 = vld [vmem:[#allocation206_spill] sm:$0xff] }
 0xdca   : > { %v2977_v43 = vadd.f32 %v2961_v8, %v2857_v12  ;;  %v2978_v50 = vadd.f32 %v2962_v39, %v2858_v13  ;;  %v3058_v60 = vsel %vm3038_vm6, %v3049_v52, %v3057_v62  ;;  %v3069_v15 = vadd.f32 %v3047_v11, %v2973_v0  ;;  %v10294_v12 = vld [vmem:[#allocation197_spill] sm:$0xff]  ;;  %v10295_v52 = vld [vmem:[#allocation200_spill] sm:$0xff]  ;;  %v10308_v28 = vld [vmem:[#allocation218_spill] sm:$0xff] }
 0xdcb   : > { %v3056_v46 = vsel %vm3038_vm6, %v3046_v51, %v3055_v61  ;;  %v3438_v14 = vperm.slane %v7229_v29, 2  ;;  %v3173_v44 = vsel %vm293_vm2, %v10291_v4, %v10290_v55  ;;  %v3071_v57 = vadd.f32 %v3052_v41, %v2975_v16  ;;  %v10296_v13 = vld [vmem:[#allocation201_spill] sm:$0xff]  ;;  %v10297_v51 = vld [vmem:[#allocation199_spill] sm:$0xff] }
 0xdcc   : > { %v3070_v27 = vadd.f32 %v3050_v26, %v2974_v23  ;;  %v3072_v25 = vadd.f32 %v3054_v6, %v2976_v38  ;;  %v3175_v24 = vsel %vm293_vm2, %v10293_v54, %v10292_v19  ;;  %v3174_v62 = vsel %vm293_vm2, %v10290_v55, %v10294_v12 }
 0xdcd   : > { %v3178_v61 = vsel %vm293_vm2, %v10296_v13, %v10295_v52  ;;  %v3176_v0 = vsel %vm293_vm2, %v10292_v19, %v10297_v51  ;;  %v3074_v8 = vadd.f32 %v3058_v60, %v2978_v50  ;;  %v3073_v16 = vadd.f32 %v3056_v46, %v2977_v43  ;;  %v10299_v46 = vld [vmem:[#allocation203_spill] sm:$0xff]  ;;  %v10302_v52 = vld [vmem:[#allocation204_spill] sm:$0xff] }
 0xdce   : > { %v3177_v23 = vsel %vm293_vm2, %v10297_v51, %v10296_v13  ;;  %v3293_v39 = vsel %vm331_vm0, %v10298_v2, %v7188_v34  ;;  %v3189_v38 = vadd.f32 %v3173_v44, %v3069_v15  ;;  %v3439_v11 = vperm.slane %v7229_v29, 3  ;;  %v10300_v15 = vld [vmem:[#allocation208_spill] sm:$0xff]  ;;  %v10301_v44 = vld [vmem:[#allocation207_spill] sm:$0xff] }
 0xdcf   : > { %v3446_v41 = vmul.f32 %v5457_v42, %v3438_v14  ;;  %v8338_v26 = vmul.f32 %v8065_v56, %v3438_v14  ;;  %v3191_v6 = vadd.f32 %v3175_v24, %v3071_v57  ;;  %v3190_v55 = vadd.f32 %v3174_v62, %v3070_v27  ;;  %v10303_v27 = vld [vmem:[#allocation209_spill] sm:$0xff] }
 0xdd0   : > { %v3194_v50 = vadd.f32 %v3178_v61, %v3074_v8  ;;  %v3192_v43 = vadd.f32 %v3176_v0, %v3072_v25  ;;  %v3193_v60 = vadd.f32 %v3177_v23, %v3073_v16  ;;  %v3294_v19 = vsel %vm331_vm0, %v7188_v34, %v10299_v46  ;;  %v5462_v61 = vld [vmem:[%s5588_s5 + $0x20] sm:$0xf0]  ;;  %v10304_v8 = vld [vmem:[#allocation215_spill] sm:$0xff] }
 0xdd1   : > { %v3309_v54 = vadd.f32 %v3293_v39, %v3189_v38  ;;  %v8344_v12 = vperm.slane %v7229_v29, 0  ;;  %v3295_v42 = vsel %vm331_vm0, %v10301_v44, %v10300_v15  ;;  %v3296_v57 = vsel %vm331_vm0, %v10300_v15, %v10302_v52  ;;  %v10305_v16 = vld [vmem:[#allocation211_spill] sm:$0xff] }
 0xdd2   : > { %v3297_v25 = vsel %vm331_vm0, %v10302_v52, %v10303_v27  ;;  %v8356_v24 = vperm.slane %v7229_v29, 1  ;;  %v8359_v34 = vmul.f32 %v8173_v36, %v3439_v11  ;;  %v3474_v62 = vrot.slane %v3446_v41, 4 }
 0xdd3   : > { %v3475_v13 = vrot.slane %v8338_v26, 4  ;;  %v3447_v51 = vmul.f32 %v5462_v61, %v3439_v11  ;;  %v3310_v0 = vadd.f32 %v3294_v19, %v3190_v55  ;;  %v3413_v23 = vsel %vm244_vm1, %v10305_v16, %v10304_v8  ;;  %v10306_v19 = vld [vmem:[#allocation210_spill] sm:$0xff] }
 0xdd4   : > { %v3452_v39 = vmul.f32 %v8258_v20, %v8344_v12  ;;  %v8369_v38 = vperm.slane %v7391_v3, 2  ;;  %v3311_v29 = vadd.f32 %v3295_v42, %v3191_v6  ;;  %v3312_v46 = vadd.f32 %v3296_v57, %v3192_v43  ;;  %v10307_v57 = vld [vmem:[#allocation216_spill] sm:$0xff] }
 0xdd5   : > { %v8373_v41 = vmul.f32 %v8090_v40, %v8344_v12  ;;  %v3453_v26 = vmul.f32 %v8281_v31, %v8356_v24  ;;  %v3313_v55 = vadd.f32 %v3297_v25, %v3193_v60  ;;  %v3298_v15 = vsel %vm331_vm0, %v10303_v27, %v10306_v19  ;;  %v3921_v19 = vpop.permute.xlu2 %3920 }
 0xdd6   : > { %v8382_v20 = vmul.f32 %v8002_v49, %v8356_v24  ;;  %v3454_v6 = vmul.f32 %v8266_v22, %v3438_v14  ;;  %v3429_v43 = vadd.f32 %v3413_v23, %v3309_v54  ;;  %v9875_v44 = vrot.slane %v8359_v34, 4  ;;  %v3917_v54 = vpop.permute.xlu0 %3916 }
 0xdd7   : > { %v3476_v42 = vsel %vm3038_vm6, %v3474_v62, %v3475_v13  ;;  %v3477_v52 = vrot.slane %v3447_v51, 4  ;;  %v3414_v31 = vsel %vm244_vm1, %v10304_v8, %v10307_v57  ;;  %v3480_v60 = vrot.slane %v3452_v39, 4  ;;  %v5463_v51 = vld [vmem:[%s5588_s5 + $0x80] sm:$0xf] }
 0xdd8   : > { %v3781_v27 = vmul.f32 %v8369_v38, %v7731_v17  ;;  %v8394_v25 = vmul.f32 %v8002_v49, %v8369_v38  ;;  %v3314_v61 = vadd.f32 %v3298_v15, %v3194_v50  ;;  %v9873_v22 = vrot.slane %v8373_v41, 4  ;;  %v10309_v50 = vld [vmem:[#allocation214_spill] sm:$0xff] }
 0xdd9   : > { %v3482_v14 = vrot.slane %v3453_v26, 4  ;;  %v8398_v62 = vperm.slane %v7391_v3, 3  ;;  %v3455_v23 = vmul.f32 %v5463_v51, %v3439_v11  ;;  %v9874_v8 = vrot.slane %v8382_v20, 4 }
 0xdda   : > { %v3602_v17 = vsel %vm293_vm2, %v7336_v33, %v7334_v47  ;;  %v3484_v39 = vrot.slane %v3454_v6, 4  ;;  %v3430_v57 = vadd.f32 %v3414_v31, %v3310_v0  ;;  %v3415_v15 = vsel %vm244_vm1, %v10309_v50, %v10308_v28 }
 0xddb   : > { %v3498_v26 = vadd.f32 %v3476_v42, %v3429_v43  ;;  %v3479_v1 = vsel %vm3038_vm6, %v3477_v52, %v9875_v44  ;;  %v3481_v11 = vsel %vm3038_vm6, %v9873_v22, %v3480_v60  ;;  %v3722_v51 = vsel %vm331_vm0, %v7551_v35, %v7567_v59 }
 0xddc   : > { %v3810_v6 = vrot.slane %v3781_v27, 5  ;;  %v9876_v0 = vrot.slane %v8394_v25, 5  ;;  %v3483_v43 = vsel %vm3038_vm6, %v9874_v8, %v3482_v14  ;;  %v3782_v42 = vmul.f32 %v8398_v62, %v7742_v63  ;;  %v10310_v27 = vld [vmem:[#allocation219_spill] sm:$0xff]  ;;  %v10311_v8 = vld [vmem:[#allocation217_spill] sm:$0xff] }
 0xddd   : > { %v3618_v31 = vadd.f32 %v3602_v17, %v3498_v26  ;;  %v8425_v52 = vmul.f32 %v8065_v56, %v8398_v62  ;;  %v3431_v60 = vadd.f32 %v3415_v15, %v3311_v29  ;;  %v3486_v50 = vrot.slane %v3455_v23, 4  ;;  %v10312_v23 = vld [vmem:[#allocation223_spill] sm:$0xff]  ;;  %v10313_v15 = vld [vmem:[#allocation224_spill] sm:$0xff] }
 0xdde   : > { %v3485_v22 = vsel %vm3038_vm6, %v3475_v13, %v3484_v39  ;;  %v8429_v59 = vperm.slane %v7391_v3, 0  ;;  %v3416_v17 = vsel %vm244_vm1, %v10308_v28, %v10310_v27  ;;  %v3499_v26 = vadd.f32 %v3479_v1, %v3430_v57 }
 0xddf   : > { %v3603_v63 = vsel %vm293_vm2, %v7334_v47, %v7338_v48  ;;  %v3738_v14 = vadd.f32 %v3722_v51, %v3618_v31  ;;  %v3417_v29 = vsel %vm244_vm1, %v10310_v27, %v10311_v8  ;;  %v3604_v13 = vsel %vm293_vm2, %v10313_v15, %v10312_v23 }
 0xde0   : > { %v3812_v44 = vsel %vm3803_vm7, %v3810_v6, %v9876_v0  ;;  %v3787_v1 = vmul.f32 %v8429_v59, %v7767_v45  ;;  %v3813_v48 = vrot.slane %v3782_v42, 5  ;;  %v3814_v57 = vrot.slane %v8425_v52, 5  ;;  %v10316_v0 = vld [vmem:[#allocation220_spill] sm:$0xff] }
 0xde1   : > { %v3432_v51 = vadd.f32 %v3416_v17, %v3312_v46  ;;  %v3619_v31 = vadd.f32 %v3603_v63, %v3499_v26  ;;  %v3500_v27 = vadd.f32 %v3481_v11, %v3431_v60  ;;  %v8457_v15 = vmul.f32 %v8270_v58, %v8429_v59  ;;  %v3927_v46 = vpop.permute.xlu2 %3926 }
 0xde2   : > { %v3433_v6 = vadd.f32 %v3417_v29, %v3313_v55  ;;  %v3418_v45 = vsel %vm244_vm1, %v10311_v8, %v10316_v0  ;;  %v3816_v60 = vrot.slane %v3787_v1, 5  ;;  %v3815_v55 = vsel %vm3803_vm7, %v3813_v48, %v3814_v57 }
 0xde3   : > { %v3919_v39 = vpop.permute.xlu1 %3918  ;;  %v3620_v42 = vadd.f32 %v3604_v13, %v3500_v27  ;;  %v3434_v0 = vadd.f32 %v3418_v45, %v3314_v61  ;;  %v3501_v63 = vadd.f32 %v3483_v43, %v3432_v51  ;;  %v10320_v13 = vld [vmem:[#allocation227_spill] sm:$0xff]  ;;  %v10322_v27 = vld [vmem:[#allocation226_spill] sm:$0xff] }
 0xde4   : > { %v8449_v28 = vsel %vm293_vm2, %v3917_v54, %v3919_v39  ;;  %v8452_v47 = vsel %vm293_vm2, %v3919_v39, %v3921_v19  ;;  %v8463_v54 = vperm.slane %v7391_v3, 1  ;;  %v3834_v39 = vadd.f32 %v3812_v44, %v3738_v14 }
 0xde5   : > { %10314 = vst [vmem:[#allocation54_spill] sm:$0xff] %v8449_v28  ;;  %v10317_v28 = vld [vmem:[#allocation26_spill] sm:$0xff]  ;;  %v3789_v3 = vmul.f32 %v8369_v38, %v7811_v32  ;;  %v10318_v44 = vrot.slane %v8359_v34, 4  ;;  %v3805_v14 = vrot.slane %v8457_v15, 5  ;;  %v3502_v34 = vadd.f32 %v3485_v22, %v3433_v6 }
 0xde6   : > { %10315 = vst [vmem:[#allocation53_spill] sm:$0xff] %v8452_v47  ;;  %v3923_v47 = vpop.permute.xlu0 %3922  ;;  %v3739_v52 = vadd.f32 %v10317_v28, %v3619_v31  ;;  %v3788_v26 = vmul.f32 %v8463_v54, %v7783_v9  ;;  %v10321_v9 = vld [vmem:[#allocation22_spill] sm:$0xff]  ;;  %v8487_v32 = vmul.f32 %v8090_v40, %v8463_v54  ;;  %v3607_v45 = vsel %vm293_vm2, %v10320_v13, %v10322_v27 }
 0xde7   : > { %v3938_v11 = vsel %vm293_vm2, %v3921_v19, %v3923_v47  ;;  %v3487_v8 = vsel %vm3038_vm6, %v10318_v44, %v3486_v50  ;;  %v10319_v19 = vld [vmem:[#allocation225_spill] sm:$0xff]  ;;  %v3740_v28 = vadd.f32 %v10321_v9, %v3620_v42  ;;  %v3817_v43 = vsel %vm3803_vm7, %v3805_v14, %v3816_v60  ;;  %v10323_v60 = vld [vmem:[#allocation23_spill] sm:$0xff]  ;;  %v8524_v27 = vld [vmem:[%s5588_s5] sm:$0xe0] }
 0xde8   : > { %v8467_v17 = vadd.f32 %v3938_v11, %v3834_v39  ;;  %v3605_v29 = vsel %vm293_vm2, %v10312_v23, %v10319_v19  ;;  %v3606_v1 = vsel %vm293_vm2, %v10319_v19, %v10320_v13  ;;  %v3835_v38 = vadd.f32 %v3815_v55, %v3739_v52 }
 0xde9   : > { %v3790_v50 = vmul.f32 %v8398_v62, %v7818_v53  ;;  %v3818_v48 = vrot.slane %v3788_v26, 5  ;;  %v3820_v51 = vrot.slane %v3789_v3, 5  ;;  %v3621_v31 = vadd.f32 %v3605_v29, %v3501_v63  ;;  %v10324_v53 = vld [vmem:[#allocation25_spill] sm:$0xff]  ;;  %v3933_v19 = vpop.permute.xlu2 %3932  ;;  %v10326_v29 = vld [vmem:[#allocation31_spill] sm:$0xff] }
 0xdea   : > { %v3622_v39 = vadd.f32 %v3606_v1, %v3502_v34  ;;  %v3503_v6 = vadd.f32 %v3487_v8, %v3434_v0  ;;  %v3808_v42 = vrot.slane %v8487_v32, 5  ;;  %v3836_v52 = vadd.f32 %v3817_v43, %v3740_v28 }
 0xdeb   : > { %v3925_v61 = vpop.permute.xlu1 %3924  ;;  %v3741_v55 = vadd.f32 %v10323_v60, %v3621_v31  ;;  %v3822_v26 = vrot.slane %v3790_v50, 5  ;;  %v10325_v8 = vrot.slane %v8394_v25, 5 }
 0xdec   : > { %v3939_v23 = vsel %vm293_vm2, %v3923_v47, %v3925_v61  ;;  %v3742_v62 = vadd.f32 %v10324_v53, %v3622_v39  ;;  %v3623_v3 = vadd.f32 %v3607_v45, %v3503_v6  ;;  %v3819_v63 = vsel %vm3803_vm7, %v3808_v42, %v3818_v48  ;;  %v8530_v6 = vld [vmem:[%s5588_s5 + $0x8] sm:$0xe0] }
 0xded   : > { %v8498_v22 = vadd.f32 %v3939_v23, %v3835_v38  ;;  %v3821_v0 = vsel %vm3803_vm7, %v10325_v8, %v3820_v51  ;;  %v3837_v1 = vadd.f32 %v3819_v63, %v3741_v55 }
 0xdee   : > { %v3743_v13 = vadd.f32 %v10326_v29, %v3623_v3  ;;  %v3838_v9 = vadd.f32 %v3821_v0, %v3742_v62  ;;  %v8536_v3 = vld [vmem:[%s5588_s5 + $0x10] sm:$0xe0] }
 0xdef   : > { %v3929_v11 = vpop.permute.xlu0 %3928 }
 0xdf0   : > { %v3940_v47 = vsel %vm293_vm2, %v3927_v46, %v3929_v11  ;;  %v3823_v46 = vsel %vm3803_vm7, %v3814_v57, %v3822_v26 }
 0xdf1   : > { %v8504_v44 = vadd.f32 %v3940_v47, %v3836_v52  ;;  %v3839_v25 = vadd.f32 %v3823_v46, %v3743_v13  ;;  %v3968_v51 = vpop.permute.xlu2 %3967  ;;  %v8545_v13 = vld [vmem:[%s5588_s5 + $0x60] sm:$0x1f]  ;;  %v8551_v46 = vld [vmem:[%s5588_s5 + $0x20] sm:$0xe0] }
 0xdf4   : > { %v3931_v28 = vpop.permute.xlu1 %3930 }
 0xdf5   : > { %v3941_v34 = vsel %vm293_vm2, %v3929_v11, %v3931_v28  ;;  %v3942_v38 = vsel %vm293_vm2, %v3931_v28, %v3933_v19 }
 0xdf6   : > { %v8516_v61 = vadd.f32 %v3941_v34, %v3837_v1  ;;  %v8518_v43 = vadd.f32 %v3942_v38, %v3838_v9 }
 0xdf7   : > { %v3935_v50 = vpop.permute.xlu0 %3934 }
 0xdf8   : > { %v3943_v23 = vsel %vm293_vm2, %v3933_v19, %v3935_v50 }
 0xdf9   : > { %v8521_v48 = vadd.f32 %v3943_v23, %v3839_v25  ;;  %v8557_v25 = vld [vmem:[%s5588_s5 + $0x18] sm:$0xe0] }
 0xdfc   : > { %v3966_v31 = vpop.permute.xlu1 %3965 }
 0xdfd   : > { %v3981_v57 = vmul.f32 %v8524_v27, %v3966_v31  ;;  %v3986_v45 = vmul.f32 %v8270_v58, %v3966_v31  ;;  %v3973_v39 = vsel %vm331_vm0, %v3966_v31, %v3968_v51  ;;  %v3991_v1 = vmul.f32 %v8545_v13, %v3966_v31 }
 0xdfe   : > { %v3982_v52 = vmul.f32 %v8530_v6, %v3973_v39  ;;  %v3987_v11 = vmul.f32 %v8090_v40, %v3973_v39 }
 0xdff   : > { %v4011_v60 = vrot.slane %v3981_v57, 5  ;;  %v4012_v55 = vrot.slane %v3986_v45, 5  ;;  %v3970_v53 = vpop.permute.xlu0 %3969 }
 0xe00   : > { %v3974_v62 = vsel %vm331_vm0, %v3968_v51, %v3970_v53  ;;  %v4014_v47 = vrot.slane %v3982_v52, 5  ;;  %v4015_v26 = vrot.slane %v3987_v11, 5  ;;  %v4026_v52 = vrot.slane %v3991_v1, 5  ;;  %v10327_v1 = vld [vmem:[#allocation2_spill] sm:$0xff] }
 0xe01   : > { %v3983_v63 = vmul.f32 %v8536_v3, %v3974_v62  ;;  %v3988_v8 = vmul.f32 %v8002_v49, %v3974_v62  ;;  %v4013_v0 = vsel %vm3803_vm7, %v4011_v60, %v4012_v55  ;;  %v8563_v60 = vld [vmem:[%s5588_s5 + $0x68] sm:$0x1f] }
 0xe02   : > { %4036 = vrot.lane.b32.xlu2 %v4013_v0, %s5508_s23  ;;  %v4016_v40 = vsel %vm3803_vm7, %v4014_v47, %v4015_v26  ;;  %v4027_v0 = vsel %vm3803_vm7, %v4012_v55, %v4026_v52  ;;  %v4080_v55 = vrot.slane %v7895_v18, 4 }
 0xe03   : > { %v4017_v19 = vrot.slane %v3983_v63, 5  ;;  %v4018_v29 = vrot.slane %v3988_v8, 5  ;;  %4038 = vrot.lane.b32.xlu0 %v4016_v40, %s5508_s23 }
 0xe04   : > { %v3972_v9 = vpop.permute.xlu1 %3971 }
 0xe05   : > { %v4019_v28 = vsel %vm3803_vm7, %v4017_v19, %v4018_v29  ;;  %v3975_v49 = vsel %vm331_vm0, %v3970_v53, %v3972_v9  ;;  %v3985_v34 = vmul.f32 %v8551_v46, %v3972_v9  ;;  %v3990_v38 = vmul.f32 %v8173_v36, %v3972_v9  ;;  %v8567_v53 = vld [vmem:[%s5588_s5 + $0x70] sm:$0x1f] }
 0xe06   : > { %4040 = vrot.lane.b32.xlu1 %v4019_v28, %s5508_s23  ;;  %v3984_v50 = vmul.f32 %v8557_v25, %v3975_v49  ;;  %v3989_v23 = vmul.f32 %v8065_v56, %v3975_v49  ;;  %v3992_v36 = vmul.f32 %v8563_v60, %v3973_v39  ;;  %v3993_v47 = vmul.f32 %v8567_v53, %v3974_v62  ;;  %v8574_v56 = vld [vmem:[%s5588_s5 + $0x78] sm:$0x1f]  ;;  %v5473_v39 = vld [vmem:[%s5588_s5] sm:$0xff] }
 0xe07   : > { %v4023_v51 = vrot.slane %v3985_v34, 5  ;;  %v4024_v31 = vrot.slane %v3990_v38, 5  ;;  %v3994_v8 = vmul.f32 %v8574_v56, %v3975_v49  ;;  %v10328_v62 = vperm.slane %v10327_v1, 0  ;;  %v8583_v38 = vld [vmem:[%s5588_s5 + $0x80] sm:$0x1f]  ;;  %v5475_v49 = vld [vmem:[%s5588_s5 + $0x8] sm:$0xff] }
 0xe08   : > { %v4020_v57 = vrot.slane %v3984_v50, 5  ;;  %v4021_v45 = vrot.slane %v3989_v23, 5  ;;  %v4028_v40 = vrot.slane %v3992_v36, 5  ;;  %v4030_v19 = vrot.slane %v3993_v47, 5 }
 0xe09   : > { %v4025_v11 = vsel %vm3803_vm7, %v4023_v51, %v4024_v31  ;;  %v215_v28 = vmul.f32 %v5473_v39, %v10328_v62  ;;  %v4032_v34 = vrot.slane %v3994_v8, 5  ;;  %v3995_v50 = vmul.f32 %v8583_v38, %v3972_v9  ;;  %v10332_v9 = vld [vmem:[#allocation11_spill] sm:$0xff]  ;;  %v10333_v8 = vld [vmem:[#allocation6_spill] sm:$0xff]  ;;  %v10335_v39 = vld [vmem:[#allocation13_spill] sm:$0xff] }
 0xe0a   : > { %v4022_v63 = vsel %vm3803_vm7, %v4020_v57, %v4021_v45  ;;  %v4029_v23 = vsel %vm3803_vm7, %v4015_v26, %v4028_v40  ;;  %v4031_v51 = vsel %vm3803_vm7, %v4018_v29, %v4030_v19  ;;  %v10329_v57 = vperm.slane %v10327_v1, 1 }
 0xe0b   : > { %4042 = vrot.lane.b32.xlu2 %v4022_v63, %s5508_s23  ;;  %4044 = vrot.lane.b32.xlu0 %v4025_v11, %s5508_s23  ;;  %v10330_v11 = vld [vmem:[#allocation228_spill] sm:$0xff]  ;;  %v4033_v63 = vsel %vm3803_vm7, %v4021_v45, %v4032_v34  ;;  %v294_v26 = vsel %vm293_vm2, %v10333_v8, %v10332_v9  ;;  %v4034_v29 = vrot.slane %v3995_v50, 5  ;;  %v295_v1 = vsel %vm293_vm2, %v10332_v9, %v10335_v39  ;;  %v10337_v34 = vld [vmem:[#allocation5_spill] sm:$0xff]  ;;  %v5476_v39 = vld [vmem:[%s5588_s5] sm:$0xfe] }
 0xe0c   : > { %v216_v52 = vmul.f32 %v5475_v49, %v10329_v57  ;;  %v10331_v36 = vperm.slane %v10330_v11, 0  ;;  %v10334_v40 = vperm.slane %v10330_v11, 1  ;;  %v4082_v62 = vperm.slane %v4080_v55, 1  ;;  %v10339_v57 = vld [vmem:[#allocation8_spill] sm:$0xff] }
 0xe0d   : > { %v4035_v45 = vsel %vm3803_vm7, %v4024_v31, %v4034_v29 }
 0xe0e   : > { %4046 = vrot.lane.b32.xlu1 %v4027_v0, %s5508_s23  ;;  %v223_v47 = vadd.f32 %v215_v28, %v10331_v36  ;;  %v4081_v0 = vperm.slane %v4080_v55, 0  ;;  %v224_v18 = vadd.f32 %v216_v52, %v10334_v40  ;;  %v10336_v28 = vld [vmem:[#allocation7_spill] sm:$0xff]  ;;  %v10340_v36 = vld [vmem:[#allocation4_spill] sm:$0xff]  ;;  %v4083_v40 = vperm.slane %v4080_v55, 2 }
 0xe0f   : > { %v380_v50 = vsel %vm331_vm0, %v10337_v34, %v10336_v28  ;;  %v381_v31 = vsel %vm331_vm0, %v10336_v28, %v10340_v36  ;;  %v10348_v36 = vld [vmem:[#allocation10_spill] sm:$0xff] }
 0xe10   : > { %v310_v19 = vadd.f32 %v294_v26, %v223_v47  ;;  %v10341_v47 = vld [vmem:[#allocation3_spill] sm:$0xff] }
 0xe11   : > { %v10343_v26 = vld [vmem:[#allocation15_spill] sm:$0xff]  ;;  %v10345_v34 = vperm.slane %v10341_v47, 1 }
 0xe12   : > { %v396_v11 = vadd.f32 %v380_v50, %v310_v19  ;;  %v10344_v19 = vld [vmem:[#allocation9_spill] sm:$0xff] }
 0xe13   : > { %4048 = vrot.lane.b32.xlu2 %v4029_v23, %s5508_s23  ;;  %4050 = vrot.lane.b32.xlu0 %v4031_v51, %s5508_s23  ;;  %v311_v23 = vadd.f32 %v295_v1, %v224_v18  ;;  %v10338_v51 = vld [vmem:[#allocation14_spill] sm:$0xff]  ;;  %v719_v1 = vmul.f32 %v5476_v39, %v10344_v19 }
 0xe14   : > { %v465_v52 = vsel %vm244_vm1, %v10339_v57, %v10338_v51  ;;  %v466_v29 = vsel %vm244_vm1, %v10338_v51, %v10343_v26  ;;  %v10346_v57 = vld [vmem:[#allocation16_spill] sm:$0xff]  ;;  %v10351_v26 = vld [vmem:[#allocation19_spill] sm:$0xff] }
 0xe15   : > { %v481_v8 = vadd.f32 %v465_v52, %v396_v11  ;;  %v397_v18 = vadd.f32 %v381_v31, %v311_v23  ;;  %v5478_v11 = vld [vmem:[%s5588_s5 + $0x8] sm:$0xfe]  ;;  %v10350_v23 = vld [vmem:[#allocation28_spill] sm:$0xff]  ;;  %v744_v31 = vrot.slane %v719_v1, 1  ;;  %v10355_v1 = vld [vmem:[#allocation38_spill] sm:$0xff] }
 0xe16   : > { %4052 = vrot.lane.b32.xlu1 %v4033_v63, %s5508_s23  ;;  %v10342_v63 = vperm.slane %v10341_v47, 0 }
 0xe17   : > { %v482_v50 = vadd.f32 %v466_v29, %v397_v18  ;;  %v576_v29 = vsel %vm293_vm2, %v10346_v57, %v10351_v26 }
 0xe18   : > { %v498_v9 = vmul.f32 %v5475_v49, %v10342_v63  ;;  %v10347_v49 = vld [vmem:[#allocation12_spill] sm:$0xff]  ;;  %v720_v63 = vmul.f32 %v5478_v11, %v10348_v36  ;;  %v10357_v36 = vld [vmem:[#allocation21_spill] sm:$0xff] }
 0xe1a   : > { %v506_v52 = vadd.f32 %v498_v9, %v481_v8  ;;  %v10352_v9 = vld [vmem:[#allocation27_spill] sm:$0xff] }
 0xe1b   : > { %4054 = vrot.lane.b32.xlu2 %v4035_v45, %s5508_s23  ;;  %4085 = vrot.lane.b32.xlu0 %v4081_v0, %s5509_s28  ;;  %v4084_v0 = vperm.slane %v4080_v55, 3  ;;  %v5477_v45 = vld [vmem:[%s5588_s5 + $0x10] sm:$0xff]  ;;  %v10349_v55 = vld [vmem:[#allocation29_spill] sm:$0xff] }
 0xe1c   : > { %v499_v28 = vmul.f32 %v5477_v45, %v10345_v34  ;;  %v660_v51 = vsel %vm331_vm0, %v10350_v23, %v10349_v55  ;;  %v661_v8 = vsel %vm331_vm0, %v10349_v55, %v10352_v9  ;;  %v1149_v23 = vmul.f32 %v5478_v11, %v10357_v36  ;;  %v10360_v55 = vld [vmem:[#allocation47_spill] sm:$0xff]  ;;  %v10363_v9 = vld [vmem:[#allocation24_spill] sm:$0xff] }
 0xe1d   : > { %v10364_v11 = vld [vmem:[#allocation60_spill] sm:$0xff]  ;;  %v10367_v36 = vld [vmem:[#allocation59_spill] sm:$0xff] }
 0xe1e   : > { %4087 = vrot.lane.b32.xlu1 %v4082_v62, %s5509_s28  ;;  %v575_v62 = vsel %vm293_vm2, %v10347_v49, %v10346_v57  ;;  %v507_v18 = vadd.f32 %v499_v28, %v482_v50  ;;  %v10358_v28 = vld [vmem:[#allocation18_spill] sm:$0xff] }
 0xe1f   : > { %v591_v47 = vadd.f32 %v575_v62, %v506_v52  ;;  %v10356_v62 = vld [vmem:[#allocation37_spill] sm:$0xff]  ;;  %v10359_v50 = vrot.slane %v10358_v28, 1 }
 0xe20   : > { %v592_v19 = vadd.f32 %v576_v29, %v507_v18  ;;  %v876_v52 = vsel %vm293_vm2, %v10356_v62, %v10355_v1  ;;  %v10362_v29 = vld [vmem:[#allocation40_spill] sm:$0xff] }
 0xe21   : > { %v676_v39 = vadd.f32 %v660_v51, %v591_v47  ;;  %v10361_v51 = vld [vmem:[#allocation49_spill] sm:$0xff]  ;;  %v5479_v18 = vld [vmem:[%s5588_s5 + $0x10] sm:$0xfe] }
 0xe22   : > { %v677_v49 = vadd.f32 %v661_v8, %v592_v19  ;;  %v1150_v8 = vmul.f32 %v5479_v18, %v10363_v9 }
 0xe23   : > { %4091 = vrot.lane.b32.xlu0 %v4084_v0, %s5509_s28  ;;  %4089 = vrot.lane.b32.xlu2 %v4083_v40, %s5509_s28  ;;  %v747_v0 = vrot.slane %v720_v63, 1  ;;  %v10353_v40 = vld [vmem:[#allocation20_spill] sm:$0xff]  ;;  %v996_v63 = vsel %vm331_vm0, %v10361_v51, %v10360_v55  ;;  %v5480_v51 = vld [vmem:[%s5588_s5] sm:$0xfc] }
 0xe24   : > { %v10354_v45 = vrot.slane %v10353_v40, 1  ;;  %v1176_v28 = vrot.slane %v1150_v8, 1 }
 0xe25   : > { %v749_v26 = vsel %vm743_vm3, %v747_v0, %v10359_v50  ;;  %v1173_v0 = vrot.slane %v1149_v23, 1  ;;  %v1484_v23 = vmul.f32 %v5480_v51, %v7825_v10 }
 0xe26   : > { %v746_v34 = vsel %vm743_vm3, %v744_v31, %v10354_v45  ;;  %v877_v31 = vsel %vm293_vm2, %v10355_v1, %v10362_v29  ;;  %v773_v19 = vadd.f32 %v749_v26, %v677_v49  ;;  %v1117_v1 = vsel %vm244_vm1, %v10364_v11, %v10367_v36  ;;  %v10370_v29 = vld [vmem:[#allocation68_spill] sm:$0xff] }
 0xe27   : > { %v772_v57 = vadd.f32 %v746_v34, %v676_v39  ;;  %v10365_v39 = vld [vmem:[#allocation58_spill] sm:$0xff]  ;;  %v10366_v34 = vld [vmem:[#allocation51_spill] sm:$0xff]  ;;  %v10368_v49 = vrot.slane %v7681_v5, 1 }
 0xe28   : > { %v1116_v40 = vsel %vm244_vm1, %v10365_v39, %v10364_v11  ;;  %v997_v62 = vsel %vm331_vm0, %v10360_v55, %v10366_v34  ;;  %v1509_v11 = vrot.slane %v1484_v23, 2  ;;  %v10372_v5 = vld [vmem:[#allocation79_spill] sm:$0xff]  ;;  %v10373_v39 = vld [vmem:[#allocation82_spill] sm:$0xff] }
 0xe29   : > { %v892_v47 = vadd.f32 %v876_v52, %v772_v57  ;;  %v893_v52 = vadd.f32 %v877_v31, %v773_v19  ;;  %v1175_v26 = vsel %vm743_vm3, %v1173_v0, %v10368_v49  ;;  %v10371_v31 = vrot.slane %v7685_v7, 1  ;;  %v5481_v19 = vld [vmem:[%s5588_s5 + $0x8] sm:$0xfc] }
 0xe2a   : > { %v1485_v8 = vmul.f32 %v5481_v19, %v7857_v30  ;;  %v10374_v0 = vld [vmem:[#allocation71_spill] sm:$0xff]  ;;  %v10376_v30 = vld [vmem:[#allocation32_spill] sm:$0xff] }
 0xe2b   : > { %v1012_v45 = vadd.f32 %v996_v63, %v892_v47  ;;  %v1013_v50 = vadd.f32 %v997_v62, %v893_v52  ;;  %v10369_v47 = vld [vmem:[#allocation70_spill] sm:$0xff]  ;;  %v1178_v18 = vsel %vm743_vm3, %v1176_v28, %v10371_v31  ;;  %v10375_v7 = vld [vmem:[#allocation83_spill] sm:$0xff] }
 0xe2c   : > { %v1305_v55 = vsel %vm293_vm2, %v10370_v29, %v10369_v47  ;;  %v1306_v10 = vsel %vm293_vm2, %v10369_v47, %v10374_v0  ;;  %v1426_v52 = vsel %vm331_vm0, %v10372_v5, %v10375_v7  ;;  %v1512_v36 = vrot.slane %v1485_v8, 2  ;;  %v10378_v49 = vld [vmem:[#allocation91_spill] sm:$0xff]  ;;  %v10386_v0 = vld [vmem:[#allocation34_spill] sm:$0xff] }
 0xe2d   : > { %v1132_v57 = vadd.f32 %v1116_v40, %v1012_v45  ;;  %v1133_v63 = vadd.f32 %v1117_v1, %v1013_v50  ;;  %v1425_v40 = vsel %vm331_vm0, %v10373_v39, %v10372_v5  ;;  %v10380_v23 = vld [vmem:[#allocation35_spill] sm:$0xff]  ;;  %v10385_v5 = vld [vmem:[#allocation89_spill] sm:$0xff] }
 0xe2e   : > { %v1914_v47 = vmul.f32 %v5481_v19, %v10380_v23 }
 0xe2f   : > { %v1201_v9 = vadd.f32 %v1175_v26, %v1132_v57  ;;  %v1202_v34 = vadd.f32 %v1178_v18, %v1133_v63  ;;  %v10377_v57 = vrot.slane %v10376_v30, 2  ;;  %v10379_v26 = vld [vmem:[#allocation90_spill] sm:$0xff]  ;;  %v10381_v63 = vld [vmem:[#allocation33_spill] sm:$0xff]  ;;  %v10383_v18 = vld [vmem:[#allocation100_spill] sm:$0xff] }
 0xe30   : > { %v1641_v51 = vsel %vm293_vm2, %v10379_v26, %v10378_v49  ;;  %v1938_v19 = vrot.slane %v1914_v47, 2 }
 0xe31   : > { %v1321_v45 = vadd.f32 %v1305_v55, %v1201_v9  ;;  %v1322_v1 = vadd.f32 %v1306_v10, %v1202_v34  ;;  %v1511_v28 = vsel %vm1508_vm4, %v1509_v11, %v10377_v57  ;;  %v10382_v55 = vrot.slane %v10381_v63, 2  ;;  %v10384_v9 = vld [vmem:[#allocation99_spill] sm:$0xff]  ;;  %v10387_v34 = vld [vmem:[#allocation109_spill] sm:$0xff] }
 0xe32   : > { %v1761_v8 = vsel %vm331_vm0, %v10384_v9, %v10383_v18  ;;  %v1642_v11 = vsel %vm293_vm2, %v10378_v49, %v10385_v5  ;;  %v10393_v63 = vld [vmem:[#allocation39_spill] sm:$0xff]  ;;  %v10394_v9 = vld [vmem:[#allocation121_spill] sm:$0xff] }
 0xe33   : > { %v1441_v62 = vadd.f32 %v1425_v40, %v1321_v45  ;;  %v1442_v50 = vadd.f32 %v1426_v52, %v1322_v1  ;;  %v1514_v31 = vsel %vm1508_vm4, %v1512_v36, %v10382_v55  ;;  %v5482_v40 = vld [vmem:[%s5588_s5 + $0x10] sm:$0xfc]  ;;  %v10389_v36 = vld [vmem:[#allocation102_spill] sm:$0xff] }
 0xe34   : > { %v1915_v10 = vmul.f32 %v5482_v40, %v10386_v0  ;;  %v1762_v1 = vsel %vm331_vm0, %v10383_v18, %v10389_v36  ;;  %v5484_v0 = vld [vmem:[%s5588_s5 + $0x8] sm:$0xf8] }
 0xe35   : > { %v1537_v29 = vadd.f32 %v1511_v28, %v1441_v62  ;;  %v1538_v45 = vadd.f32 %v1514_v31, %v1442_v50  ;;  %v10388_v62 = vld [vmem:[#allocation111_spill] sm:$0xff]  ;;  %v10390_v28 = vld [vmem:[#allocation113_spill] sm:$0xff]  ;;  %v10391_v50 = vld [vmem:[#allocation30_spill] sm:$0xff] }
 0xe36   : > { %v1881_v7 = vsel %vm244_vm1, %v10388_v62, %v10387_v34  ;;  %v1882_v49 = vsel %vm244_vm1, %v10387_v34, %v10390_v28  ;;  %v1941_v26 = vrot.slane %v1915_v10, 2  ;;  %v10392_v23 = vrot.slane %v10391_v50, 2  ;;  %v10398_v10 = vld [vmem:[#allocation41_spill] sm:$0xff]  ;;  %v10399_v34 = vld [vmem:[#allocation132_spill] sm:$0xff]  ;;  %v10400_v62 = vld [vmem:[#allocation130_spill] sm:$0xff] }
 0xe37   : > { %v1657_v39 = vadd.f32 %v1641_v51, %v1537_v29  ;;  %v1658_v30 = vadd.f32 %v1642_v11, %v1538_v45  ;;  %v5483_v29 = vld [vmem:[%s5588_s5] sm:$0xf8]  ;;  %v10396_v11 = vld [vmem:[#allocation36_spill] sm:$0xff]  ;;  %v2250_v45 = vmul.f32 %v5484_v0, %v10398_v10  ;;  %v10403_v50 = vld [vmem:[#allocation57_spill] sm:$0xff] }
 0xe38   : > { %v1940_v47 = vsel %vm1508_vm4, %v1938_v19, %v10392_v23  ;;  %v2249_v55 = vmul.f32 %v5483_v29, %v10393_v63  ;;  %v2190_v19 = vsel %vm331_vm0, %v10400_v62, %v10399_v34  ;;  %v10404_v23 = vrot.slane %v10403_v50, 3  ;;  %v10405_v63 = vld [vmem:[#allocation140_spill] sm:$0xff]  ;;  %v10411_v10 = vld [vmem:[#allocation151_spill] sm:$0xff] }
 0xe39   : > { %v1777_v52 = vadd.f32 %v1761_v8, %v1657_v39  ;;  %v1778_v51 = vadd.f32 %v1762_v1, %v1658_v30  ;;  %v10395_v8 = vld [vmem:[#allocation119_spill] sm:$0xff]  ;;  %v10397_v39 = vrot.slane %v10396_v11, 2  ;;  %v10412_v62 = vld [vmem:[#allocation144_spill] sm:$0xff] }
 0xe3a   : > { %v2070_v18 = vsel %vm293_vm2, %v10395_v8, %v10394_v9 }
 0xe3b   : > { %v1897_v57 = vadd.f32 %v1881_v7, %v1777_v52  ;;  %v1898_v31 = vadd.f32 %v1882_v49, %v1778_v51  ;;  %v1943_v40 = vsel %vm1508_vm4, %v1941_v26, %v10397_v39  ;;  %v2274_v7 = vrot.slane %v2249_v55, 3  ;;  %v10401_v52 = vld [vmem:[#allocation120_spill] sm:$0xff]  ;;  %v10406_v55 = vld [vmem:[#allocation143_spill] sm:$0xff] }
 0xe3c   : > { %v2071_v36 = vsel %vm293_vm2, %v10394_v9, %v10401_v52  ;;  %v2277_v26 = vrot.slane %v2250_v45, 3  ;;  %v2406_v8 = vsel %vm293_vm2, %v10406_v55, %v10405_v63  ;;  %v10407_v9 = vld [vmem:[#allocation43_spill] sm:$0xff]  ;;  %v10413_v52 = vld [vmem:[#allocation44_spill] sm:$0xff] }
 0xe3d   : > { %v1966_v5 = vadd.f32 %v1940_v47, %v1897_v57  ;;  %v1967_v30 = vadd.f32 %v1943_v40, %v1898_v31  ;;  %v10402_v57 = vld [vmem:[#allocation133_spill] sm:$0xff]  ;;  %v2276_v47 = vsel %vm2273_vm5, %v2274_v7, %v10404_v23  ;;  %v2679_v11 = vmul.f32 %v5484_v0, %v10407_v9  ;;  %v10408_v31 = vld [vmem:[#allocation42_spill] sm:$0xff]  ;;  %v10410_v40 = vld [vmem:[#allocation152_spill] sm:$0xff] }
 0xe3e   : > { %v2191_v28 = vsel %vm331_vm0, %v10399_v34, %v10402_v57  ;;  %v2526_v45 = vsel %vm331_vm0, %v10411_v10, %v10410_v40  ;;  %v5485_v7 = vld [vmem:[%s5588_s5 + $0x10] sm:$0xf8]  ;;  %v10414_v0 = vld [vmem:[#allocation162_spill] sm:$0xff]  ;;  %v10421_v10 = vld [vmem:[#allocation171_spill] sm:$0xff] }
 0xe3f   : > { %v2086_v1 = vadd.f32 %v2070_v18, %v1966_v5  ;;  %v2087_v51 = vadd.f32 %v2071_v36, %v1967_v30  ;;  %v10409_v5 = vrot.slane %v10408_v31, 3  ;;  %v2680_v36 = vmul.f32 %v5485_v7, %v10413_v52  ;;  %v10415_v30 = vld [vmem:[#allocation161_spill] sm:$0xff]  ;;  %v5486_v31 = vld [vmem:[%s5588_s5] sm:$0xf0]  ;;  %v5487_v52 = vld [vmem:[%s5588_s5 + $0x8] sm:$0xf0] }
 0xe40   : > { %v2646_v57 = vsel %vm244_vm1, %v10415_v30, %v10414_v0  ;;  %v10427_v30 = vld [vmem:[#allocation182_spill] sm:$0xff] }
 0xe41   : > { %v2206_v49 = vadd.f32 %v2190_v19, %v2086_v1  ;;  %v2207_v29 = vadd.f32 %v2191_v28, %v2087_v51  ;;  %v2279_v39 = vsel %vm2273_vm5, %v2277_v26, %v10409_v5  ;;  %v2407_v19 = vsel %vm293_vm2, %v10405_v63, %v10412_v62  ;;  %v10420_v5 = vld [vmem:[#allocation48_spill] sm:$0xff]  ;;  %v10422_v62 = vld [vmem:[#allocation173_spill] sm:$0xff] }
 0xe42   : > { %v2703_v28 = vrot.slane %v2679_v11, 3  ;;  %v2706_v55 = vrot.slane %v2680_v36, 3  ;;  %v3014_v11 = vmul.f32 %v5486_v31, %v10420_v5  ;;  %v10425_v36 = vld [vmem:[#allocation52_spill] sm:$0xff]  ;;  %v10431_v31 = vld [vmem:[#allocation194_spill] sm:$0xff] }
 0xe43   : > { %v2302_v18 = vadd.f32 %v2276_v47, %v2206_v49  ;;  %v2303_v1 = vadd.f32 %v2279_v39, %v2207_v29  ;;  %v10416_v49 = vld [vmem:[#allocation150_spill] sm:$0xff]  ;;  %v10417_v47 = vld [vmem:[#allocation164_spill] sm:$0xff] }
 0xe44   : > { %v2527_v26 = vsel %vm331_vm0, %v10410_v40, %v10416_v49  ;;  %v2647_v63 = vsel %vm244_vm1, %v10414_v0, %v10417_v47  ;;  %v10418_v29 = vld [vmem:[#allocation46_spill] sm:$0xff]  ;;  %v2835_v40 = vsel %vm293_vm2, %v10422_v62, %v10421_v10  ;;  %v10426_v0 = vld [vmem:[#allocation184_spill] sm:$0xff]  ;;  %v10429_v47 = vld [vmem:[#allocation183_spill] sm:$0xff]  ;;  %v3444_v62 = vmul.f32 %v5487_v52, %v8344_v12 }
 0xe45   : > { %v2422_v34 = vadd.f32 %v2406_v8, %v2302_v18  ;;  %v2423_v50 = vadd.f32 %v2407_v19, %v2303_v1  ;;  %v10419_v9 = vrot.slane %v10418_v29, 3  ;;  %v3015_v1 = vmul.f32 %v5487_v52, %v10425_v36  ;;  %v10432_v5 = vld [vmem:[#allocation192_spill] sm:$0xff]  ;;  %v10436_v36 = vld [vmem:[#allocation50_spill] sm:$0xff] }
 0xe46   : > { %v10430_v29 = vrot.slane %v8274_v21, 4  ;;  %v3172_v21 = vsel %vm293_vm2, %v10431_v31, %v10291_v4  ;;  %v10438_v12 = vld [vmem:[#allocation212_spill] sm:$0xff]  ;;  %v3468_v52 = vrot.slane %v3444_v62, 4 }
 0xe47   : > { %v2542_v51 = vadd.f32 %v2526_v45, %v2422_v34  ;;  %v2543_v8 = vadd.f32 %v2527_v26, %v2423_v50  ;;  %v2705_v18 = vsel %vm2273_vm5, %v2703_v28, %v10419_v9  ;;  %v10423_v34 = vld [vmem:[#allocation45_spill] sm:$0xff]  ;;  %v3039_v28 = vrot.slane %v3014_v11, 4  ;;  %v10428_v26 = vld [vmem:[#allocation175_spill] sm:$0xff] }
 0xe48   : > { %v10424_v19 = vrot.slane %v10423_v34, 3  ;;  %v3171_v11 = vsel %vm293_vm2, %v10432_v5, %v10431_v31  ;;  %v10435_v34 = vld [vmem:[#allocation205_spill] sm:$0xff]  ;;  %v3780_v31 = vmul.f32 %v8530_v6, %v8463_v54 }
 0xe49   : > { %v2662_v23 = vadd.f32 %v2646_v57, %v2542_v51  ;;  %v2663_v39 = vadd.f32 %v2647_v63, %v2543_v8  ;;  %v2955_v57 = vsel %vm331_vm0, %v10427_v30, %v10426_v0  ;;  %v2836_v51 = vsel %vm293_vm2, %v10421_v10, %v10428_v26  ;;  %v10437_v30 = vld [vmem:[#allocation213_spill] sm:$0xff] }
 0xe4a   : > { %v2708_v7 = vsel %vm2273_vm5, %v2706_v55, %v10424_v19  ;;  %v3042_v55 = vrot.slane %v3015_v1, 4  ;;  %v3041_v9 = vsel %vm3038_vm6, %v3039_v28, %v10430_v29  ;;  %v3445_v1 = vmul.f32 %v10436_v36, %v8356_v24  ;;  %v10441_v29 = vld [vmem:[#allocation221_spill] sm:$0xff] }
 0xe4b   : > { %v2731_v45 = vadd.f32 %v2705_v18, %v2662_v23  ;;  %v2732_v50 = vadd.f32 %v2708_v7, %v2663_v39  ;;  %v2956_v23 = vsel %vm331_vm0, %v10426_v0, %v10429_v47  ;;  %v10433_v39 = vrot.slane %v8278_v37, 4  ;;  %v10444_v5 = vld [vmem:[#allocation17_spill] sm:$0xff] }
 0xe4c   : > { %v3411_v37 = vsel %vm244_vm1, %v10438_v12, %v10437_v30  ;;  %v3412_v4 = vsel %vm244_vm1, %v10437_v30, %v10305_v16  ;;  %v10439_v24 = vrot.slane %v8373_v41, 4  ;;  %v10443_v41 = vld [vmem:[#allocation229_spill] sm:$0xff] }
 0xe4d   : > { %v2851_v49 = vadd.f32 %v2835_v40, %v2731_v45  ;;  %v2852_v8 = vadd.f32 %v2836_v51, %v2732_v50  ;;  %v3044_v10 = vsel %vm3038_vm6, %v3042_v55, %v10433_v39  ;;  %v10434_v45 = vld [vmem:[#allocation202_spill] sm:$0xff]  ;;  %v3471_v51 = vrot.slane %v3445_v1, 4 }
 0xe4e   : > { %v3291_v19 = vsel %vm331_vm0, %v10435_v34, %v10434_v45  ;;  %v3292_v28 = vsel %vm331_vm0, %v10434_v45, %v10298_v2  ;;  %v3470_v47 = vsel %vm3038_vm6, %v3468_v52, %v10439_v24  ;;  %v3807_v45 = vrot.slane %v3780_v31, 5 }
 0xe4f   : > { %v2971_v63 = vadd.f32 %v2955_v57, %v2851_v49  ;;  %v2972_v18 = vadd.f32 %v2956_v23, %v2852_v8  ;;  %v3779_v23 = vmul.f32 %v8524_v27, %v8429_v59  ;;  %v10440_v8 = vld [vmem:[#allocation222_spill] sm:$0xff] }
 0xe50   : > { %v3600_v2 = vsel %vm293_vm2, %v10441_v29, %v10440_v8  ;;  %v3601_v39 = vsel %vm293_vm2, %v10440_v8, %v7336_v33  ;;  %v10445_v33 = vld [vmem:[#allocation54_spill] sm:$0xff] }
 0xe51   : > { %v3067_v40 = vadd.f32 %v3041_v9, %v2971_v63  ;;  %v3068_v0 = vadd.f32 %v3044_v10, %v2972_v18  ;;  %v10442_v18 = vrot.slane %v8382_v20, 4  ;;  %v3804_v62 = vrot.slane %v3779_v23, 5 }
 0xe52   : > { %v3721_v20 = vsel %vm331_vm0, %v10443_v41, %v7551_v35 }
 0xe53   : > { %v3187_v7 = vadd.f32 %v3171_v11, %v3067_v40  ;;  %v3188_v49 = vadd.f32 %v3172_v21, %v3068_v0  ;;  %v3473_v16 = vsel %vm3038_vm6, %v3471_v51, %v10442_v18  ;;  %v3720_v11 = vsel %vm331_vm0, %v10444_v5, %v10443_v41 }
 0xe54   : > { %v3806_v54 = vsel %vm3803_vm7, %v3804_v62, %v3805_v14 }
 0xe55   : > { %v3307_v57 = vadd.f32 %v3291_v19, %v3187_v7  ;;  %v3308_v50 = vadd.f32 %v3292_v28, %v3188_v49  ;;  %v3809_v7 = vsel %vm3803_vm7, %v3807_v45, %v3808_v42 }
 0xe57   : > { %v3427_v26 = vadd.f32 %v3411_v37, %v3307_v57  ;;  %v3428_v55 = vadd.f32 %v3412_v4, %v3308_v50  ;;  %v10446_v37 = vld [vmem:[#allocation53_spill] sm:$0xff] }
 0xe59   : > { %v3496_v9 = vadd.f32 %v3470_v47, %v3427_v26  ;;  %v3497_v10 = vadd.f32 %v3473_v16, %v3428_v55 }
 0xe5b   : > { %v3616_v59 = vadd.f32 %v3600_v2, %v3496_v9  ;;  %v3617_v34 = vadd.f32 %v3601_v39, %v3497_v10 }
 0xe5c   : > { %v4037_v63 = vpop.permute.xlu2 %4036 }
 0xe5d   : > { %v3736_v40 = vadd.f32 %v3720_v11, %v3616_v59  ;;  %v3737_v19 = vadd.f32 %v3721_v20, %v3617_v34 }
 0xe5f   : > { %v3832_v36 = vadd.f32 %v3806_v54, %v3736_v40  ;;  %v3833_v30 = vadd.f32 %v3809_v7, %v3737_v19  ;;  %v8899_v7 = vld [vmem:[%s5588_s5 + $0x50] sm:$0xff] }
 0xe61   : > { %v3952_v1 = vadd.f32 %v10445_v33, %v3832_v36  ;;  %v3953_v52 = vadd.f32 %v10446_v37, %v3833_v30  ;;  %v8907_v30 = vld [vmem:[%s5588_s5 + $0x48] sm:$0xff] }
 0xe65   : > { %v4043_v21 = vpop.permute.xlu2 %4042 }
 0xe6d   : > { %v4049_v28 = vpop.permute.xlu2 %4048 }
 0xe75   : > { %v4039_v0 = vpop.permute.xlu0 %4038  ;;  %v4055_v23 = vpop.permute.xlu2 %4054 }
 0xe76   : > { %v4056_v12 = vsel %vm331_vm0, %v4037_v63, %v4039_v0 }
 0xe77   : > { %v8849_v35 = vadd.f32 %v4056_v12, %v3952_v1 }
 0xe78   : > { %v4041_v15 = vpop.permute.xlu1 %4040 }
 0xe79   : > { %v4058_v14 = vsel %vm331_vm0, %v4041_v15, %v4043_v21  ;;  %v4057_v57 = vsel %vm331_vm0, %v4039_v0, %v4041_v15 }
 0xe7a   : > { %v8855_v32 = vadd.f32 %v4058_v14, %v8467_v17  ;;  %v8857_v42 = vadd.f32 %v4057_v57, %v3953_v52 }
 0xe7d   : > { %v4045_v49 = vpop.permute.xlu0 %4044 }
 0xe7e   : > { %v4059_v4 = vsel %vm331_vm0, %v4043_v21, %v4045_v49 }
 0xe7f   : > { %v8861_v26 = vadd.f32 %v4059_v4, %v8498_v22 }
 0xe80   : > { %v4047_v51 = vpop.permute.xlu1 %4046 }
 0xe81   : > { %v4060_v50 = vsel %vm331_vm0, %v4047_v51, %v4049_v28 }
 0xe82   : > { %v8865_v24 = vadd.f32 %v4060_v50, %v8504_v44 }
 0xe85   : > { %v4051_v47 = vpop.permute.xlu0 %4050 }
 0xe86   : > { %v4061_v17 = vsel %vm331_vm0, %v4049_v28, %v4051_v47 }
 0xe87   : > { %v8869_v63 = vadd.f32 %v4061_v17, %v8516_v61  ;;  %v4090_v61 = vpop.permute.xlu2 %4089  ;;  %v5383_v17 = vld [vmem:[%s9681_s1 + $0x85] ss:$8 sm:$0xf0] }
 0xe88   : > { %v4053_v55 = vpop.permute.xlu1 %4052 }
 0xe89   : > { %v4063_v8 = vsel %vm331_vm0, %v4053_v55, %v4055_v23  ;;  %v4062_v22 = vsel %vm331_vm0, %v4051_v47, %v4053_v55  ;;  %v5382_v23 = vld [vmem:[%s9681_s1 + $0x85] ss:$8 sm:$0xf] }
 0xe8a   : > { %v8874_v29 = vadd.f32 %v4063_v8, %v8521_v48  ;;  %v8877_v44 = vadd.f32 %v4062_v22, %v8518_v43  ;;  %v8885_v48 = vld [vmem:[%s5588_s5 + $0x38] sm:$0xff] }
 0xe8d   : > { %v4086_v2 = vpop.permute.xlu0 %4085 }
 0xe8e   : > { %v4101_v9 = vmul.f32 %v8524_v27, %v4086_v2  ;;  %v4106_v18 = vmul.f32 %v8270_v58, %v4086_v2  ;;  %v8890_v27 = vld [vmem:[%s5588_s5 + $0x40] sm:$0xff]  ;;  %v4111_v33 = vmul.f32 %v8545_v13, %v4086_v2 }
 0xe90   : > { %v4088_v16 = vpop.permute.xlu1 %4087  ;;  %v4131_v31 = vrot.slane %v4101_v9, 5  ;;  %v4132_v41 = vrot.slane %v4106_v18, 5  ;;  %v4146_v28 = vrot.slane %v4111_v33, 5  ;;  %v8929_v9 = vor.u32 %v5383_v17, %v5382_v23  ;;  %v8983_v17 = vld [vmem:[%s5588_s5 + $0x28] sm:$0xe0] }
 0xe91   : > { %v4093_v5 = vsel %vm293_vm2, %v4086_v2, %v4088_v16  ;;  %v4094_v11 = vsel %vm293_vm2, %v4088_v16, %v4090_v61 }
 0xe92   : > { %v4102_v62 = vmul.f32 %v8530_v6, %v4093_v5  ;;  %v4107_v43 = vmul.f32 %v8885_v48, %v4093_v5  ;;  %v4103_v59 = vmul.f32 %v8536_v3, %v4094_v11  ;;  %v4108_v58 = vmul.f32 %v8890_v27, %v4094_v11 }
 0xe93   : > { %v4133_v39 = vsel %vm3803_vm7, %v4131_v31, %v4132_v41  ;;  %v4112_v57 = vmul.f32 %v8563_v60, %v4093_v5  ;;  %v4113_v4 = vmul.f32 %v8567_v53, %v4094_v11  ;;  %v4147_v50 = vsel %vm3803_vm7, %v4132_v41, %v4146_v28 }
 0xe94   : > { %v4137_v10 = vrot.slane %v4103_v59, 5  ;;  %4156 = vrot.lane.b32.xlu1 %v4133_v39, %s5507_s22  ;;  %v4134_v40 = vrot.slane %v4102_v62, 5  ;;  %v4135_v20 = vrot.slane %v4107_v43, 5  ;;  %v4138_v45 = vrot.slane %v4108_v58, 5 }
 0xe95   : > { %v4092_v34 = vpop.permute.xlu0 %4091  ;;  %v4148_v47 = vrot.slane %v4112_v57, 5  ;;  %v4150_v55 = vrot.slane %v4113_v4, 5  ;;  %v4269_v31 = vrot.slane %v8929_v9, 4 }
 0xe96   : > { %v4136_v54 = vsel %vm3803_vm7, %v4134_v40, %v4135_v20  ;;  %v4095_v19 = vsel %vm293_vm2, %v4090_v61, %v4092_v34  ;;  %v4105_v21 = vmul.f32 %v8551_v46, %v4092_v34  ;;  %v4110_v36 = vmul.f32 %v8899_v7, %v4092_v34 }
 0xe97   : > { %4158 = vrot.lane.b32.xlu2 %v4136_v54, %s5507_s22  ;;  %v4139_v1 = vsel %vm3803_vm7, %v4137_v10, %v4138_v45  ;;  %v4104_v0 = vmul.f32 %v8557_v25, %v4095_v19  ;;  %v4109_v12 = vmul.f32 %v8907_v30, %v4095_v19  ;;  %v4114_v51 = vmul.f32 %v8574_v56, %v4095_v19 }
 0xe98   : > { %4160 = vrot.lane.b32.xlu0 %v4139_v1, %s5507_s22  ;;  %v4143_v37 = vrot.slane %v4105_v21, 5  ;;  %v4144_v52 = vrot.slane %v4110_v36, 5  ;;  %v4115_v8 = vmul.f32 %v8583_v38, %v4092_v34  ;;  %v4149_v22 = vsel %vm3803_vm7, %v4135_v20, %v4148_v47 }
 0xe99   : > { %v4140_v15 = vrot.slane %v4104_v0, 5  ;;  %v4141_v14 = vrot.slane %v4109_v12, 5  ;;  %v4152_v2 = vrot.slane %v4114_v51, 5  ;;  %v4151_v18 = vsel %vm3803_vm7, %v4138_v45, %v4150_v55 }
 0xe9a   : > { %v4145_v49 = vsel %vm3803_vm7, %v4143_v37, %v4144_v52  ;;  %v4154_v61 = vrot.slane %v4115_v8, 5  ;;  %v4270_v5 = vperm.slane %v4269_v31, 0  ;;  %v4271_v11 = vperm.slane %v4269_v31, 1 }
 0xe9b   : > { %v4142_v13 = vsel %vm3803_vm7, %v4140_v15, %v4141_v14  ;;  %v4153_v16 = vsel %vm3803_vm7, %v4141_v14, %v4152_v2  ;;  %v4272_v62 = vperm.slane %v4269_v31, 2  ;;  %v4273_v43 = vperm.slane %v4269_v31, 3 }
 0xe9c   : > { %4162 = vrot.lane.b32.xlu1 %v4142_v13, %s5507_s22  ;;  %v4155_v41 = vsel %vm3803_vm7, %v4144_v52, %v4154_v61  ;;  %v8989_v61 = vld [vmem:[%s5588_s5 + $0x58] sm:$0xff] }
 0xe9f   : > { %4164 = vrot.lane.b32.xlu2 %v4145_v49, %s5507_s22 }
 0xea0   : > { %4166 = vrot.lane.b32.xlu0 %v4147_v50, %s5507_s22 }
 0xea4   : > { %4168 = vrot.lane.b32.xlu1 %v4149_v22, %s5507_s22 }
 0xea7   : > { %4170 = vrot.lane.b32.xlu2 %v4151_v18, %s5507_s22 }
 0xea8   : > { %4172 = vrot.lane.b32.xlu0 %v4153_v16, %s5507_s22 }
 0xeac   : > { %4174 = vrot.lane.b32.xlu1 %v4155_v41, %s5507_s22 }
 0xeaf   : > { %4274 = vrot.lane.b32.xlu2 %v4270_v5, %s5507_s22 }
 0xeb0   : > { %4276 = vrot.lane.b32.xlu0 %v4271_v11, %s5507_s22 }
 0xeb4   : > { %4278 = vrot.lane.b32.xlu1 %v4272_v62, %s5507_s22 }
 0xeb7   : > { %4280 = vrot.lane.b32.xlu2 %v4273_v43, %s5507_s22 }
 0xef1   : > { %v4159_v59 = vpop.permute.xlu2 %4158 }
 0xef9   : > { %v4165_v58 = vpop.permute.xlu2 %4164 }
 0xf01   : > { %v4171_v39 = vpop.permute.xlu2 %4170 }
 0xf06   : > { %v4157_v10 = vpop.permute.xlu1 %4156 }
 0xf07   : > { %v4176_v40 = vsel %vm244_vm1, %v4157_v10, %v4159_v59 }
 0xf08   : > { %v8944_v20 = vadd.f32 %v4176_v40, %v8849_v35 }
 0xf09   : > { %v4275_v45 = vpop.permute.xlu2 %4274 }
 0xf0a   : > { %v4161_v34 = vpop.permute.xlu0 %4160  ;;  %v4290_v54 = vmul.f32 %v8530_v6, %v4275_v45  ;;  %v8948_v19 = vmul.f32 %v8885_v48, %v4275_v45 }
 0xf0b   : > { %v4177_v21 = vsel %vm244_vm1, %v4159_v59, %v4161_v34 }
 0xf0c   : > { %v8952_v36 = vadd.f32 %v4177_v21, %v8857_v42  ;;  %v4320_v33 = vrot.slane %v4290_v54, 5  ;;  %v4321_v1 = vrot.slane %v8948_v19, 5  ;;  %v4300_v54 = vmul.f32 %v8563_v60, %v4275_v45 }
 0xf0e   : > { %v4163_v0 = vpop.permute.xlu1 %4162  ;;  %v4322_v12 = vsel %vm3803_vm7, %v4320_v33, %v4321_v1 }
 0xf0f   : > { %v4178_v35 = vsel %vm244_vm1, %v4161_v34, %v4163_v0  ;;  %v4179_v37 = vsel %vm244_vm1, %v4163_v0, %v4165_v58  ;;  %4345 = vrot.lane.b32.xlu0 %v4322_v12, %s5509_s28  ;;  %v4335_v12 = vrot.slane %v4300_v54, 5 }
 0xf10   : > { %v8960_v52 = vadd.f32 %v4178_v35, %v8855_v32  ;;  %v8963_v15 = vadd.f32 %v4179_v37, %v8861_v26 }
 0xf12   : > { %v4167_v42 = vpop.permute.xlu0 %4166 }
 0xf16   : > { %v4169_v14 = vpop.permute.xlu1 %4168 }
 0xf17   : > { %v4180_v57 = vsel %vm244_vm1, %v4167_v42, %v4169_v14  ;;  %v4181_v28 = vsel %vm244_vm1, %v4169_v14, %v4171_v39  ;;  %v9010_v42 = vld [vmem:[%s5588_s5 + $0x88] sm:$0x1f] }
 0xf18   : > { %v8968_v13 = vadd.f32 %v4180_v57, %v8865_v24  ;;  %v8971_v49 = vadd.f32 %v4181_v28, %v8869_v63  ;;  %v4281_v63 = vpop.permute.xlu2 %4280  ;;  %v4336_v57 = vsel %vm3803_vm7, %v4321_v1, %v4335_v12 }
 0xf19   : > { %v4294_v18 = vmul.f32 %v4281_v63, %v8983_v17  ;;  %v4304_v28 = vmul.f32 %v4281_v63, %v9010_v42 }
 0xf1a   : > { %v4173_v4 = vpop.permute.xlu0 %4172 }
 0xf1b   : > { %v4182_v32 = vsel %vm244_vm1, %v4171_v39, %v4173_v4  ;;  %v4332_v39 = vrot.slane %v4294_v18, 5 }
 0xf1c   : > { %v8975_v51 = vadd.f32 %v4182_v32, %v8877_v44 }
 0xf1e   : > { %v4175_v26 = vpop.permute.xlu1 %4174 }
 0xf1f   : > { %v4183_v50 = vsel %vm244_vm1, %v4173_v4, %v4175_v26 }
 0xf20   : > { %v8979_v47 = vadd.f32 %v4183_v50, %v8874_v29  ;;  %v4299_v29 = vmul.f32 %v8989_v61, %v4281_v63  ;;  %v4343_v50 = vrot.slane %v4304_v28, 5 }
 0xf22   : > { %v4277_v23 = vpop.permute.xlu0 %4276  ;;  %v4333_v10 = vrot.slane %v4299_v29, 5 }
 0xf23   : > { %v4282_v24 = vsel %vm244_vm1, %v4275_v45, %v4277_v23 }
 0xf24   : > { %v4291_v55 = vmul.f32 %v8536_v3, %v4282_v24  ;;  %v4296_v8 = vmul.f32 %v8890_v27, %v4282_v24  ;;  %v4301_v21 = vmul.f32 %v8567_v53, %v4282_v24  ;;  %v4334_v0 = vsel %vm3803_vm7, %v4332_v39, %v4333_v10 }
 0xf26   : > { %v4323_v22 = vrot.slane %v4291_v55, 5  ;;  %v4324_v2 = vrot.slane %v4296_v8, 5  ;;  %v4279_v44 = vpop.permute.xlu1 %4278  ;;  %v4337_v37 = vrot.slane %v4301_v21, 5 }
 0xf27   : > { %v4283_v16 = vsel %vm244_vm1, %v4277_v23, %v4279_v44  ;;  %v4284_v31 = vsel %vm244_vm1, %v4279_v44, %v4281_v63  ;;  %v5384_v23 = vld [vmem:[%s9681_s1 + $0xc5] ss:$8 sm:$0xf]  ;;  %v4344_v63 = vsel %vm3803_vm7, %v4333_v10, %v4343_v50  ;;  %v4202_v44 = vperm.slane %v8929_v9, 1 }
 0xf28   : > { %v4325_v41 = vsel %vm3803_vm7, %v4323_v22, %v4324_v2  ;;  %v4292_v5 = vmul.f32 %v8557_v25, %v4283_v16  ;;  %v4297_v11 = vmul.f32 %v8907_v30, %v4283_v16  ;;  %v4293_v62 = vmul.f32 %v8551_v46, %v4284_v31 }
 0xf29   : > { %4347 = vrot.lane.b32.xlu1 %v4325_v41, %s5509_s28  ;;  %v4298_v43 = vmul.f32 %v8899_v7, %v4284_v31  ;;  %v4302_v35 = vmul.f32 %v8574_v56, %v4283_v16  ;;  %v4303_v14 = vmul.f32 %v8583_v38, %v4284_v31  ;;  %v4338_v4 = vsel %vm3803_vm7, %v4324_v2, %v4337_v37 }
 0xf2a   : > { %v4326_v59 = vrot.slane %v4292_v5, 5  ;;  %v4327_v58 = vrot.slane %v4297_v11, 5  ;;  %v4329_v40 = vrot.slane %v4293_v62, 5  ;;  %v4390_v24 = vperm.slane %v5384_v23, 0 }
 0xf2b   : > { %v4330_v34 = vrot.slane %v4298_v43, 5  ;;  %v4339_v45 = vrot.slane %v4302_v35, 5  ;;  %v4341_v26 = vrot.slane %v4303_v14, 5  ;;  %v4391_v55 = vperm.slane %v5384_v23, 1 }
 0xf2c   : > { %v4328_v19 = vsel %vm3803_vm7, %v4326_v59, %v4327_v58  ;;  %v4392_v8 = vperm.slane %v5384_v23, 2  ;;  %v4393_v22 = vperm.slane %v5384_v23, 3  ;;  %v4201_v2 = vperm.slane %v8929_v9, 0 }
 0xf2d   : > { %4349 = vrot.lane.b32.xlu2 %v4328_v19, %s5509_s28  ;;  %v4331_v33 = vsel %vm3803_vm7, %v4329_v40, %v4330_v34  ;;  %v4340_v32 = vsel %vm3803_vm7, %v4327_v58, %v4339_v45  ;;  %v4342_v1 = vsel %vm3803_vm7, %v4330_v34, %v4341_v26  ;;  %v4210_v29 = vmul.f32 %v8536_v3, %v4202_v44 }
 0xf2e   : > { %4351 = vrot.lane.b32.xlu0 %v4331_v33, %s5509_s28  ;;  %v4209_v18 = vmul.f32 %v8530_v6, %v4201_v2  ;;  %v4213_v16 = vmul.f32 %v8885_v48, %v4201_v2  ;;  %v4214_v31 = vmul.f32 %v8890_v27, %v4202_v44  ;;  %v4203_v41 = vperm.slane %v8929_v9, 2 }
 0xf2f   : > { %v4236_v62 = vrot.slane %v4210_v29, 5  ;;  %v4204_v59 = vperm.slane %v8929_v9, 3  ;;  %v4217_v26 = vmul.f32 %v8563_v60, %v4201_v2 }
 0xf30   : > { %v4233_v5 = vrot.slane %v4209_v18, 5  ;;  %v4234_v11 = vrot.slane %v4213_v16, 5  ;;  %v4237_v43 = vrot.slane %v4214_v31, 5  ;;  %v4211_v39 = vmul.f32 %v8557_v25, %v4203_v41 }
 0xf31   : > { %4353 = vrot.lane.b32.xlu1 %v4334_v0, %s5509_s28  ;;  %v4215_v10 = vmul.f32 %v8907_v30, %v4203_v41  ;;  %v4212_v19 = vmul.f32 %v8551_v46, %v4204_v59  ;;  %v4216_v21 = vmul.f32 %v8899_v7, %v4204_v59 }
 0xf32   : > { %v4235_v34 = vsel %vm3803_vm7, %v4233_v5, %v4234_v11  ;;  %v4238_v54 = vsel %vm3803_vm7, %v4236_v62, %v4237_v43  ;;  %v4239_v33 = vrot.slane %v4211_v39, 5 }
 0xf33   : > { %v4240_v0 = vrot.slane %v4215_v10, 5  ;;  %v4262_v12 = vadd.f32 %v4238_v54, %v8952_v36  ;;  %v4261_v9 = vadd.f32 %v4235_v34, %v8944_v20  ;;  %v4242_v14 = vrot.slane %v4212_v19, 5 }
 0xf35   : > { %4355 = vrot.lane.b32.xlu2 %v4336_v57, %s5509_s28  ;;  %v4243_v57 = vrot.slane %v4216_v21, 5 }
 0xf36   : > { %4357 = vrot.lane.b32.xlu0 %v4338_v4, %s5509_s28 }
 0xf37   : > { %v4244_v36 = vsel %vm3803_vm7, %v4242_v14, %v4243_v57 }
 0xf38   : > { %v4264_v18 = vadd.f32 %v4244_v36, %v8963_v15 }
 0xf39   : > { %4359 = vrot.lane.b32.xlu1 %v4340_v32, %s5509_s28  ;;  %v4241_v32 = vsel %vm3803_vm7, %v4239_v33, %v4240_v0 }
 0xf3a   : > { %v4263_v23 = vadd.f32 %v4241_v32, %v8960_v52 }
 0xf3d   : > { %4361 = vrot.lane.b32.xlu2 %v4342_v1, %s5509_s28  ;;  %v4219_v1 = vmul.f32 %v8574_v56, %v4203_v41  ;;  %v4220_v41 = vmul.f32 %v8583_v38, %v4204_v59 }
 0xf3e   : > { %4363 = vrot.lane.b32.xlu0 %v4344_v63, %s5509_s28 }
 0xf3f   : > { %v4249_v29 = vrot.slane %v4219_v1, 5  ;;  %v4251_v10 = vrot.slane %v4220_v41, 5 }
 0xf41   : > { %4394 = vrot.lane.b32.xlu1 %v4390_v24, %s5508_s23  ;;  %v4218_v24 = vmul.f32 %v8567_v53, %v4202_v44  ;;  %v4250_v44 = vsel %vm3803_vm7, %v4240_v0, %v4249_v29 }
 0xf42   : > { %v4267_v34 = vadd.f32 %v4250_v44, %v8975_v51 }
 0xf43   : > { %v4247_v16 = vrot.slane %v4218_v24, 5 }
 0xf45   : > { %4396 = vrot.lane.b32.xlu2 %v4391_v55, %s5508_s23  ;;  %v4245_v55 = vrot.slane %v4217_v26, 5  ;;  %v4248_v5 = vsel %vm3803_vm7, %v4237_v43, %v4247_v16 }
 0xf46   : > { %4398 = vrot.lane.b32.xlu0 %v4392_v8, %s5508_s23 }
 0xf47   : > { %v4246_v52 = vsel %vm3803_vm7, %v4234_v11, %v4245_v55  ;;  %v4266_v11 = vadd.f32 %v4248_v5, %v8971_v49 }
 0xf48   : > { %v4265_v62 = vadd.f32 %v4246_v52, %v8968_v13  ;;  %v4252_v13 = vsel %vm3803_vm7, %v4243_v57, %v4251_v10 }
 0xf49   : > { %4400 = vrot.lane.b32.xlu1 %v4393_v22, %s5508_s23  ;;  %v4268_v33 = vadd.f32 %v4252_v13, %v8979_v47 }
 0xf81   : > { %v4346_v40 = vpop.permute.xlu0 %4345 }
 0xf87   : > { %v4350_v58 = vpop.permute.xlu2 %4349 }
 0xf8f   : > { %v4356_v50 = vpop.permute.xlu2 %4355 }
 0xf97   : > { %v4362_v39 = vpop.permute.xlu2 %4361 }
 0xf9b   : > { %v4348_v35 = vpop.permute.xlu1 %4347 }
 0xf9c   : > { %v4365_v37 = vsel %vm293_vm2, %v4346_v40, %v4348_v35  ;;  %v4366_v45 = vsel %vm293_vm2, %v4348_v35, %v4350_v58 }
 0xf9d   : > { %v9049_v28 = vadd.f32 %v4365_v37, %v4261_v9  ;;  %v9051_v4 = vadd.f32 %v4366_v45, %v4262_v12 }
 0xf9f   : > { %v4397_v35 = vpop.permute.xlu2 %4396 }
 0xfa0   : > { %v4352_v20 = vpop.permute.xlu0 %4351 }
 0xfa1   : > { %v4367_v63 = vsel %vm293_vm2, %v4350_v58, %v4352_v20 }
 0xfa2   : > { %v9060_v8 = vadd.f32 %v4367_v63, %v4263_v23 }
 0xfa3   : > { %v4354_v22 = vpop.permute.xlu1 %4353 }
 0xfa4   : > { %v4368_v2 = vsel %vm293_vm2, %v4352_v20, %v4354_v22 }
 0xfa5   : > { %v9064_v31 = vadd.f32 %v4368_v2, %v4264_v18 }
 0xfa8   : > { %v4358_v58 = vpop.permute.xlu0 %4357 }
 0xfa9   : > { %v4369_v15 = vsel %vm293_vm2, %v4356_v50, %v4358_v58 }
 0xfaa   : > { %v9072_v40 = vadd.f32 %v4369_v15, %v4265_v62 }
 0xfab   : > { %v4360_v54 = vpop.permute.xlu1 %4359 }
 0xfac   : > { %v4371_v59 = vsel %vm293_vm2, %v4360_v54, %v4362_v39  ;;  %v4370_v19 = vsel %vm293_vm2, %v4358_v58, %v4360_v54 }
 0xfad   : > { %v9078_v21 = vadd.f32 %v4371_v59, %v4267_v34  ;;  %v9080_v43 = vadd.f32 %v4370_v19, %v4266_v11 }
 0xfb0   : > { %v4364_v0 = vpop.permute.xlu0 %4363 }
 0xfb1   : > { %v4372_v12 = vsel %vm293_vm2, %v4362_v39, %v4364_v0  ;;  %v5386_v39 = vld [vmem:[%s9681_s1 + $0x6] ss:$8 sm:$0xf0] }
 0xfb2   : > { %v9085_v51 = vadd.f32 %v4372_v12, %v4268_v33 }
 0xfb3   : > { %v4395_v9 = vpop.permute.xlu1 %4394 }
 0xfb4   : > { %v4410_v49 = vmul.f32 %v8530_v6, %v4395_v9  ;;  %v4415_v37 = vmul.f32 %v8885_v48, %v4395_v9  ;;  %v4402_v45 = vsel %vm331_vm0, %v4395_v9, %v4397_v35 }
 0xfb5   : > { %v4411_v14 = vmul.f32 %v8536_v3, %v4402_v45  ;;  %v4416_v32 = vmul.f32 %v8890_v27, %v4402_v45 }
 0xfb6   : > { %v4440_v57 = vrot.slane %v4410_v49, 5  ;;  %v4441_v26 = vrot.slane %v4415_v37, 5 }
 0xfb7   : > { %v4443_v47 = vrot.slane %v4411_v14, 5  ;;  %v4444_v50 = vrot.slane %v4416_v32, 5 }
 0xfb8   : > { %v4442_v36 = vsel %vm3803_vm7, %v4440_v57, %v4441_v26  ;;  %v4399_v23 = vpop.permute.xlu0 %4398 }
 0xfb9   : > { %4465 = vrot.lane.b32.xlu2 %v4442_v36, %s5508_s23  ;;  %v4445_v20 = vsel %vm3803_vm7, %v4443_v47, %v4444_v50  ;;  %v4403_v6 = vsel %vm331_vm0, %v4397_v35, %v4399_v23 }
 0xfba   : > { %4467 = vrot.lane.b32.xlu0 %v4445_v20, %s5508_s23  ;;  %v4412_v1 = vmul.f32 %v8557_v25, %v4403_v6  ;;  %v4417_v3 = vmul.f32 %v8907_v30, %v4403_v6  ;;  %v4420_v25 = vmul.f32 %v8563_v60, %v4395_v9  ;;  %v4422_v58 = vmul.f32 %v8574_v56, %v4403_v6  ;;  %v5385_v60 = vld [vmem:[%s9681_s1 + $0x6] ss:$8 sm:$0xf] }
 0xfbb   : > { %v4401_v24 = vpop.permute.xlu1 %4400  ;;  %v9119_v56 = vor.u32 %v5386_v39, %v5385_v60 }
 0xfbc   : > { %v4414_v63 = vmul.f32 %v4401_v24, %v8983_v17  ;;  %v4419_v55 = vmul.f32 %v8989_v61, %v4401_v24  ;;  %v4404_v22 = vsel %vm331_vm0, %v4399_v23, %v4401_v24  ;;  %v4446_v29 = vrot.slane %v4412_v1, 5 }
 0xfbd   : > { %v4413_v18 = vmul.f32 %v8551_v46, %v4404_v22  ;;  %v4418_v2 = vmul.f32 %v8899_v7, %v4404_v22  ;;  %v4447_v41 = vrot.slane %v4417_v3, 5  ;;  %v4421_v61 = vmul.f32 %v8567_v53, %v4402_v45 }
 0xfbe   : > { %v4452_v16 = vrot.slane %v4414_v63, 5  ;;  %v4453_v52 = vrot.slane %v4419_v55, 5  ;;  %v4455_v15 = vrot.slane %v4420_v25, 5  ;;  %v4459_v10 = vrot.slane %v4422_v58, 5 }
 0xfbf   : > { %v4449_v44 = vrot.slane %v4413_v18, 5  ;;  %v4450_v5 = vrot.slane %v4418_v2, 5  ;;  %v4448_v62 = vsel %vm3803_vm7, %v4446_v29, %v4447_v41  ;;  %v4457_v53 = vrot.slane %v4421_v61, 5  ;;  %v9165_v29 = vld [vmem:[%s5588_s5] sm:$0xc0] }
 0xfc0   : > { %v4454_v17 = vsel %vm3803_vm7, %v4452_v16, %v4453_v52  ;;  %4469 = vrot.lane.b32.xlu1 %v4448_v62, %s5508_s23  ;;  %v4423_v34 = vmul.f32 %v8583_v38, %v4404_v22  ;;  %v4456_v54 = vsel %vm3803_vm7, %v4441_v26, %v4455_v15  ;;  %v4424_v11 = vmul.f32 %v4401_v24, %v9010_v42  ;;  %v9188_v15 = vld [vmem:[%s5588_s5 + $0x20] sm:$0xc0] }
 0xfc1   : > { %v4451_v46 = vsel %vm3803_vm7, %v4449_v44, %v4450_v5  ;;  %v4458_v59 = vsel %vm3803_vm7, %v4444_v50, %v4457_v53  ;;  %v4460_v19 = vsel %vm3803_vm7, %v4447_v41, %v4459_v10  ;;  %v4605_v13 = vrot.slane %v9119_v56, 4  ;;  %v9191_v53 = vld [vmem:[%s5588_s5 + $0x10] sm:$0xc0] }
 0xfc2   : > { %4471 = vrot.lane.b32.xlu2 %v4451_v46, %s5508_s23  ;;  %4473 = vrot.lane.b32.xlu0 %v4454_v17, %s5508_s23  ;;  %v4461_v33 = vrot.slane %v4423_v34, 5  ;;  %v4463_v0 = vrot.slane %v4424_v11, 5 }
 0xfc3   : > { %v4606_v12 = vperm.slane %v4605_v13, 0  ;;  %v4607_v35 = vperm.slane %v4605_v13, 1  ;;  %v4609_v9 = vperm.slane %v4605_v13, 3  ;;  %v4608_v49 = vperm.slane %v4605_v13, 2 }
 0xfc4   : > { %v4462_v38 = vsel %vm3803_vm7, %v4450_v5, %v4461_v33  ;;  %v4464_v42 = vsel %vm3803_vm7, %v4453_v52, %v4463_v0 }
 0xfc8   : > { %4475 = vrot.lane.b32.xlu1 %v4456_v54, %s5508_s23 }
 0xfca   : > { %4477 = vrot.lane.b32.xlu2 %v4458_v59, %s5508_s23  ;;  %4479 = vrot.lane.b32.xlu0 %v4460_v19, %s5508_s23  ;;  %v9196_v59 = vld [vmem:[%s5588_s5 + $0x18] sm:$0xc0] }
 0xfd0   : > { %4481 = vrot.lane.b32.xlu1 %v4462_v38, %s5508_s23 }
 0xfd2   : > { %4483 = vrot.lane.b32.xlu2 %v4464_v42, %s5508_s23  ;;  %4610 = vrot.lane.b32.xlu0 %v4606_v12, %s5507_s22 }
 0xfd8   : > { %4612 = vrot.lane.b32.xlu1 %v4607_v35, %s5507_s22 }
 0xfda   : > { %4616 = vrot.lane.b32.xlu0 %v4609_v9, %s5507_s22  ;;  %4614 = vrot.lane.b32.xlu2 %v4608_v49, %s5507_s22  ;;  %v9205_v49 = vld [vmem:[%s5588_s5 + $0x60] sm:$0x3f] }
0x1013   : > { %v4466_v37 = vpop.permute.xlu2 %4465 }
0x101c   : > { %v4472_v14 = vpop.permute.xlu2 %4471 }
0x102c   : > { %v4468_v45 = vpop.permute.xlu0 %4467 }
0x102d   : > { %v4485_v32 = vsel %vm331_vm0, %v4466_v37, %v4468_v45 }
0x102e   : > { %v9140_v57 = vadd.f32 %v4485_v32, %v9049_v28  ;;  %v4478_v28 = vpop.permute.xlu2 %4477 }
0x1032   : > { %v4470_v26 = vpop.permute.xlu1 %4469 }
0x1033   : > { %v4486_v47 = vsel %vm331_vm0, %v4468_v45, %v4470_v26  ;;  %v4487_v50 = vsel %vm331_vm0, %v4470_v26, %v4472_v14 }
0x1034   : > { %v4474_v36 = vpop.permute.xlu0 %4473  ;;  %v9145_v23 = vadd.f32 %v4486_v47, %v9051_v4  ;;  %v9148_v20 = vadd.f32 %v4487_v50, %v9060_v8 }
0x1035   : > { %v4488_v6 = vsel %vm331_vm0, %v4472_v14, %v4474_v36  ;;  %v9210_v14 = vld [vmem:[%s5588_s5 + $0x68] sm:$0x3f] }
0x1036   : > { %v9152_v1 = vadd.f32 %v4488_v6, %v9064_v31  ;;  %v4484_v8 = vpop.permute.xlu2 %4483 }
0x103a   : > { %v4476_v3 = vpop.permute.xlu1 %4475 }
0x103b   : > { %v4489_v24 = vsel %vm331_vm0, %v4476_v3, %v4478_v28 }
0x103c   : > { %v4480_v63 = vpop.permute.xlu0 %4479  ;;  %v9156_v55 = vadd.f32 %v4489_v24, %v9072_v40  ;;  %v9219_v24 = vld [vmem:[%s5588_s5 + $0x70] sm:$0x3f] }
0x103d   : > { %v4490_v4 = vsel %vm331_vm0, %v4478_v28, %v4480_v63 }
0x103e   : > { %v9160_v22 = vadd.f32 %v4490_v4, %v9080_v43  ;;  %v9175_v43 = vld [vmem:[%s5588_s5 + $0x30] sm:$0xff]  ;;  %v4615_v17 = vpop.permute.xlu2 %4614 }
0x1042   : > { %v4482_v18 = vpop.permute.xlu1 %4481 }
0x1043   : > { %v4491_v2 = vsel %vm331_vm0, %v4480_v63, %v4482_v18  ;;  %v4492_v31 = vsel %vm331_vm0, %v4482_v18, %v4484_v8  ;;  %v9222_v63 = vld [vmem:[%s5588_s5 + $0x80] sm:$0x3f]  ;;  %v9226_v8 = vld [vmem:[%s5588_s5 + $0x78] sm:$0x3f] }
0x1044   : > { %v4611_v16 = vpop.permute.xlu0 %4610  ;;  %v9168_v52 = vadd.f32 %v4491_v2, %v9078_v21  ;;  %v9171_v40 = vadd.f32 %v4492_v31, %v9085_v51  ;;  %v9181_v51 = vld [vmem:[%s5588_s5 + $0x8] sm:$0xc0] }
0x1045   : > { %v4626_v41 = vmul.f32 %v4611_v16, %v9165_v29  ;;  %v4631_v44 = vmul.f32 %v9175_v43, %v4611_v16  ;;  %v4636_v45 = vmul.f32 %v4611_v16, %v9205_v49 }
0x1047   : > { %v4656_v5 = vrot.slane %v4626_v41, 6  ;;  %v4657_v25 = vrot.slane %v4631_v44, 6  ;;  %v4671_v6 = vrot.slane %v4636_v45, 6 }
0x1049   : > { %v4658_v62 = vsel %vm4568_vm8, %v4656_v5, %v4657_v25  ;;  %v4672_v2 = vsel %vm4568_vm8, %v4657_v25, %v4671_v6  ;;  %v5388_v25 = vld [vmem:[%s9681_s1 + $0x46] ss:$8 sm:$0xf0] }
0x104a   : > { %4681 = vrot.lane.b32.xlu1 %v4658_v62, %s5509_s28  ;;  %v4613_v21 = vpop.permute.xlu1 %4612 }
0x104b   : > { %v4618_v61 = vsel %vm244_vm1, %v4611_v16, %v4613_v21  ;;  %v4619_v46 = vsel %vm244_vm1, %v4613_v21, %v4615_v17 }
0x104c   : > { %v4617_v58 = vpop.permute.xlu0 %4616  ;;  %v4627_v60 = vmul.f32 %v4618_v61, %v9181_v51  ;;  %v4632_v39 = vmul.f32 %v8885_v48, %v4618_v61  ;;  %v4628_v34 = vmul.f32 %v4619_v46, %v9191_v53  ;;  %v4633_v0 = vmul.f32 %v8890_v27, %v4619_v46 }
0x104d   : > { %v4620_v10 = vsel %vm244_vm1, %v4615_v17, %v4617_v58  ;;  %v4630_v19 = vmul.f32 %v4617_v58, %v9188_v15  ;;  %v4635_v13 = vmul.f32 %v8899_v7, %v4617_v58  ;;  %v4637_v50 = vmul.f32 %v4618_v61, %v9210_v14  ;;  %v5387_v17 = vld [vmem:[%s9681_s1 + $0x46] ss:$8 sm:$0xf] }
0x104e   : > { %v4659_v54 = vrot.slane %v4627_v60, 6  ;;  %v4660_v11 = vrot.slane %v4632_v39, 6  ;;  %v4629_v33 = vmul.f32 %v4620_v10, %v9196_v59  ;;  %v4634_v12 = vmul.f32 %v8907_v30, %v4620_v10 }
0x104f   : > { %v4662_v38 = vrot.slane %v4628_v34, 6  ;;  %v4663_v42 = vrot.slane %v4633_v0, 6  ;;  %v4668_v32 = vrot.slane %v4630_v19, 6  ;;  %v4669_v26 = vrot.slane %v4635_v13, 6 }
0x1050   : > { %v4665_v35 = vrot.slane %v4629_v33, 6  ;;  %v4661_v9 = vsel %vm4568_vm8, %v4659_v54, %v4660_v11  ;;  %v4666_v37 = vrot.slane %v4634_v12, 6  ;;  %v4673_v3 = vrot.slane %v4637_v50, 6 }
0x1051   : > { %4683 = vrot.lane.b32.xlu2 %v4661_v9, %s5509_s28  ;;  %v4664_v47 = vsel %vm4568_vm8, %v4662_v38, %v4663_v42  ;;  %v4670_v28 = vsel %vm4568_vm8, %v4668_v32, %v4669_v26  ;;  %v4638_v4 = vmul.f32 %v4619_v46, %v9219_v24  ;;  %v4639_v18 = vmul.f32 %v4620_v10, %v9226_v8 }
0x1052   : > { %v4667_v36 = vsel %vm4568_vm8, %v4665_v35, %v4666_v37  ;;  %4685 = vrot.lane.b32.xlu0 %v4664_v47, %s5509_s28  ;;  %v4640_v31 = vmul.f32 %v4617_v58, %v9222_v63  ;;  %v4674_v16 = vsel %vm4568_vm8, %v4660_v11, %v4673_v3  ;;  %v9246_v58 = vor.u32 %v5388_v25, %v5387_v17 }
0x1053   : > { %4687 = vrot.lane.b32.xlu1 %v4667_v36, %s5509_s28  ;;  %v4675_v41 = vrot.slane %v4638_v4, 6  ;;  %v4677_v44 = vrot.slane %v4639_v18, 6  ;;  %v4536_v54 = vperm.slane %v9119_v56, 0  ;;  %v4537_v12 = vperm.slane %v9119_v56, 1 }
0x1054   : > { %v4679_v5 = vrot.slane %v4640_v31, 6  ;;  %v4726_v46 = vperm.slane %v9246_v58, 0  ;;  %v4727_v60 = vperm.slane %v9246_v58, 1  ;;  %v4728_v39 = vperm.slane %v9246_v58, 2 }
0x1055   : > { %v4676_v62 = vsel %vm4568_vm8, %v4663_v42, %v4675_v41  ;;  %v4678_v21 = vsel %vm4568_vm8, %v4666_v37, %v4677_v44  ;;  %v4729_v10 = vperm.slane %v9246_v58, 3  ;;  %v4544_v11 = vmul.f32 %v4536_v54, %v9165_v29 }
0x1056   : > { %v4680_v61 = vsel %vm4568_vm8, %v4669_v26, %v4679_v5  ;;  %v4548_v19 = vmul.f32 %v9175_v43, %v4536_v54  ;;  %v4538_v38 = vperm.slane %v9119_v56, 2  ;;  %v4539_v35 = vperm.slane %v9119_v56, 3 }
0x1057   : > { %v4569_v33 = vrot.slane %v4544_v11, 6  ;;  %v4545_v9 = vmul.f32 %v4537_v12, %v9181_v51  ;;  %v4549_v26 = vmul.f32 %v8885_v48, %v4537_v12 }
0x1058   : > { %v4570_v0 = vrot.slane %v4548_v19, 6  ;;  %v4546_v32 = vmul.f32 %v4538_v38, %v9191_v53  ;;  %v4550_v47 = vmul.f32 %v8890_v27, %v4538_v38  ;;  %v4547_v6 = vmul.f32 %v4539_v35, %v9196_v59 }
0x1059   : > { %4689 = vrot.lane.b32.xlu2 %v4670_v28, %s5509_s28  ;;  %v4551_v28 = vmul.f32 %v8907_v30, %v4539_v35  ;;  %v4572_v56 = vrot.slane %v4545_v9, 6  ;;  %v4573_v4 = vrot.slane %v4549_v26, 6 }
0x105a   : > { %4691 = vrot.lane.b32.xlu0 %v4672_v2, %s5509_s28  ;;  %v4571_v42 = vsel %vm4568_vm8, %v4569_v33, %v4570_v0  ;;  %v4575_v18 = vrot.slane %v4546_v32, 6  ;;  %v4576_v2 = vrot.slane %v4550_v47, 6  ;;  %v4555_v32 = vmul.f32 %v4539_v35, %v9226_v8 }
0x105b   : > { %4693 = vrot.lane.b32.xlu1 %v4674_v16, %s5509_s28  ;;  %v4597_v45 = vadd.f32 %v4571_v42, %v9140_v57  ;;  %v4578_v57 = vrot.slane %v4547_v6, 6  ;;  %v4579_v31 = vrot.slane %v4551_v28, 6  ;;  %v4553_v16 = vmul.f32 %v4537_v12, %v9210_v14 }
0x105c   : > { %v4574_v41 = vsel %vm4568_vm8, %v4572_v56, %v4573_v4  ;;  %v4577_v44 = vsel %vm4568_vm8, %v4575_v18, %v4576_v2 }
0x105d   : > { %v4580_v5 = vsel %vm4568_vm8, %v4578_v57, %v4579_v31  ;;  %v4587_v57 = vrot.slane %v4555_v32, 6 }
0x105f   : > { %v4588_v35 = vsel %vm4568_vm8, %v4579_v31, %v4587_v57 }
0x1061   : > { %4695 = vrot.lane.b32.xlu2 %v4676_v62, %s5509_s28  ;;  %v4552_v62 = vmul.f32 %v4536_v54, %v9205_v49 }
0x1062   : > { %4697 = vrot.lane.b32.xlu0 %v4678_v21, %s5509_s28 }
0x1063   : > { %4699 = vrot.lane.b32.xlu1 %v4680_v61, %s5509_s28  ;;  %v4598_v61 = vadd.f32 %v4574_v41, %v9145_v23 }
0x1069   : > { %4730 = vrot.lane.b32.xlu2 %v4726_v46, %s5508_s23  ;;  %v4599_v46 = vadd.f32 %v4577_v44, %v9148_v20 }
0x106a   : > { %4732 = vrot.lane.b32.xlu0 %v4727_v60, %s5508_s23 }
0x106b   : > { %4734 = vrot.lane.b32.xlu1 %v4728_v39, %s5508_s23  ;;  %v4583_v39 = vrot.slane %v4553_v16, 6 }
0x1071   : > { %4736 = vrot.lane.b32.xlu2 %v4729_v10, %s5508_s23  ;;  %v4600_v10 = vadd.f32 %v4580_v5, %v9152_v1 }
0x10ab   : > { %v4684_v34 = vpop.permute.xlu2 %4683 }
0x10b3   : > { %v4690_v13 = vpop.permute.xlu2 %4689 }
0x10bb   : > { %v4696_v36 = vpop.permute.xlu2 %4695 }
0x10bc   : > { %v4682_v37 = vpop.permute.xlu1 %4681 }
0x10bd   : > { %v4701_v50 = vsel %vm293_vm2, %v4682_v37, %v4684_v34  ;;  %v4581_v37 = vrot.slane %v4552_v62, 6 }
0x10be   : > { %v9272_v3 = vadd.f32 %v4701_v50, %v4597_v45  ;;  %v4584_v45 = vsel %vm4568_vm8, %v4573_v4, %v4583_v39 }
0x10bf   : > { %v4602_v47 = vadd.f32 %v4584_v45, %v9160_v22 }
0x10c3   : > { %v9279_v17 = vpop.permute.xlu2 %4730 }
0x10c4   : > { %v4746_v25 = vmul.f32 %v9279_v17, %v9165_v29  ;;  %v9285_v21 = vmul.f32 %v9175_v43, %v9279_v17  ;;  %v4686_v60 = vpop.permute.xlu0 %4685 }
0x10c5   : > { %v4688_v11 = vpop.permute.xlu1 %4687  ;;  %v4702_v54 = vsel %vm293_vm2, %v4684_v34, %v4686_v60  ;;  %v4554_v34 = vmul.f32 %v4538_v38, %v9219_v24 }
0x10c6   : > { %v4776_v19 = vrot.slane %v4746_v25, 6  ;;  %v4777_v33 = vrot.slane %v9285_v21, 6  ;;  %v4704_v12 = vsel %vm293_vm2, %v4688_v11, %v4690_v13  ;;  %v4703_v42 = vsel %vm293_vm2, %v4686_v60, %v4688_v11 }
0x10c7   : > { %v9294_v9 = vadd.f32 %v4702_v54, %v4598_v61  ;;  %v9296_v23 = vadd.f32 %v4704_v12, %v4600_v10  ;;  %v9298_v20 = vadd.f32 %v4703_v42, %v4599_v46  ;;  %v4582_v13 = vsel %vm4568_vm8, %v4570_v0, %v4581_v37 }
0x10c8   : > { %v4778_v1 = vsel %vm4568_vm8, %v4776_v19, %v4777_v33  ;;  %v4601_v6 = vadd.f32 %v4582_v13, %v9156_v55  ;;  %v4585_v28 = vrot.slane %v4554_v34, 6  ;;  %v4604_v55 = vadd.f32 %v4588_v35, %v9171_v40 }
0x10c9   : > { %4801 = vrot.lane.b32.xlu0 %v4778_v1, %s5508_s23 }
0x10ca   : > { %v4586_v0 = vsel %vm4568_vm8, %v4576_v2, %v4585_v28 }
0x10cb   : > { %v4603_v4 = vadd.f32 %v4586_v0, %v9168_v52  ;;  %v4737_v46 = vpop.permute.xlu2 %4736 }
0x10cc   : > { %v4692_v26 = vpop.permute.xlu0 %4691  ;;  %v4750_v11 = vmul.f32 %v4737_v46, %v9188_v15  ;;  %v4755_v42 = vmul.f32 %v8899_v7, %v4737_v46  ;;  %v4760_v57 = vmul.f32 %v4737_v46, %v9222_v63 }
0x10cd   : > { %v4694_v50 = vpop.permute.xlu1 %4693 }
0x10ce   : > { %v4706_v56 = vsel %vm293_vm2, %v4694_v50, %v4696_v36  ;;  %v4705_v18 = vsel %vm293_vm2, %v4692_v26, %v4694_v50  ;;  %v4788_v26 = vrot.slane %v4750_v11, 6 }
0x10cf   : > { %v9312_v16 = vadd.f32 %v4706_v56, %v4602_v47  ;;  %v9314_v38 = vadd.f32 %v4705_v18, %v4601_v6  ;;  %v4789_v47 = vrot.slane %v4755_v42, 6 }
0x10d1   : > { %v4790_v6 = vsel %vm4568_vm8, %v4788_v26, %v4789_v47 }
0x10d4   : > { %v4698_v22 = vpop.permute.xlu0 %4697 }
0x10d5   : > { %v4700_v41 = vpop.permute.xlu1 %4699  ;;  %v4707_v44 = vsel %vm293_vm2, %v4696_v36, %v4698_v22 }
0x10d6   : > { %v4708_v5 = vsel %vm293_vm2, %v4698_v22, %v4700_v41  ;;  %v9322_v62 = vadd.f32 %v4707_v44, %v4603_v4  ;;  %v4799_v22 = vrot.slane %v4760_v57, 6  ;;  %v9412_v57 = vld [vmem:[%s5588_s5 + $0x40] sm:$0xff] }
0x10d7   : > { %v9324_v25 = vadd.f32 %v4708_v5, %v4604_v55 }
0x10d8   : > { %v4800_v55 = vsel %vm4568_vm8, %v4789_v47, %v4799_v22 }
0x10dc   : > { %v4733_v61 = vpop.permute.xlu0 %4732 }
0x10dd   : > { %v4735_v60 = vpop.permute.xlu1 %4734  ;;  %v4738_v2 = vsel %vm331_vm0, %v9279_v17, %v4733_v61 }
0x10de   : > { %v4739_v52 = vsel %vm331_vm0, %v4733_v61, %v4735_v60  ;;  %v4747_v31 = vmul.f32 %v4738_v2, %v9181_v51  ;;  %v4752_v40 = vmul.f32 %v8885_v48, %v4738_v2  ;;  %v4740_v10 = vsel %vm331_vm0, %v4735_v60, %v4737_v46 }
0x10df   : > { %v4748_v36 = vmul.f32 %v4739_v52, %v9191_v53  ;;  %v4753_v39 = vmul.f32 %v8890_v27, %v4739_v52  ;;  %v4749_v12 = vmul.f32 %v4740_v10, %v9196_v59  ;;  %v4754_v34 = vmul.f32 %v8907_v30, %v4740_v10 }
0x10e0   : > { %v4779_v54 = vrot.slane %v4747_v31, 6  ;;  %v4780_v19 = vrot.slane %v4752_v40, 6  ;;  %v4756_v27 = vmul.f32 %v9279_v17, %v9205_v49  ;;  %v4757_v7 = vmul.f32 %v4738_v2, %v9210_v14 }
0x10e1   : > { %v4782_v37 = vrot.slane %v4748_v36, 6  ;;  %v4783_v1 = vrot.slane %v4753_v39, 6  ;;  %v4785_v45 = vrot.slane %v4749_v12, 6  ;;  %v4786_v32 = vrot.slane %v4754_v34, 6 }
0x10e2   : > { %v4781_v48 = vsel %vm4568_vm8, %v4779_v54, %v4780_v19  ;;  %v4791_v30 = vrot.slane %v4756_v27, 6  ;;  %v4793_v28 = vrot.slane %v4757_v7, 6  ;;  %v4758_v17 = vmul.f32 %v4739_v52, %v9219_v24 }
0x10e3   : > { %v4784_v13 = vsel %vm4568_vm8, %v4782_v37, %v4783_v1  ;;  %4803 = vrot.lane.b32.xlu1 %v4781_v48, %s5508_s23  ;;  %v4787_v50 = vsel %vm4568_vm8, %v4785_v45, %v4786_v32  ;;  %v4759_v56 = vmul.f32 %v4740_v10, %v9226_v8 }
0x10e4   : > { %4805 = vrot.lane.b32.xlu2 %v4784_v13, %s5508_s23  ;;  %4807 = vrot.lane.b32.xlu0 %v4787_v50, %s5508_s23  ;;  %v4792_v18 = vsel %vm4568_vm8, %v4777_v33, %v4791_v30  ;;  %v4794_v0 = vsel %vm4568_vm8, %v4780_v19, %v4793_v28  ;;  %v4795_v35 = vrot.slane %v4758_v17, 6  ;;  %v4845_v33 = vrot.slane %v9246_v58, 4  ;;  %v9406_v30 = vld [vmem:[%s5588_s5 + $0x38] sm:$0xff] }
0x10e5   : > { %v4797_v4 = vrot.slane %v4759_v56, 6 }
0x10e6   : > { %v4796_v41 = vsel %vm4568_vm8, %v4783_v1, %v4795_v35  ;;  %v4846_v44 = vperm.slane %v4845_v33, 0  ;;  %v4847_v5 = vperm.slane %v4845_v33, 1  ;;  %v4848_v61 = vperm.slane %v4845_v33, 2 }
0x10e7   : > { %v4798_v21 = vsel %vm4568_vm8, %v4786_v32, %v4797_v4  ;;  %v4849_v46 = vperm.slane %v4845_v33, 3 }
0x10eb   : > { %4809 = vrot.lane.b32.xlu1 %v4790_v6, %s5508_s23 }
0x10ec   : > { %4811 = vrot.lane.b32.xlu2 %v4792_v18, %s5508_s23  ;;  %4813 = vrot.lane.b32.xlu0 %v4794_v0, %s5508_s23 }
0x10f3   : > { %4815 = vrot.lane.b32.xlu1 %v4796_v41, %s5508_s23 }
0x10f4   : > { %4817 = vrot.lane.b32.xlu2 %v4798_v21, %s5508_s23  ;;  %4819 = vrot.lane.b32.xlu0 %v4800_v55, %s5508_s23 }
0x10fb   : > { %4850 = vrot.lane.b32.xlu1 %v4846_v44, %s5509_s28 }
0x10fc   : > { %4852 = vrot.lane.b32.xlu2 %v4847_v5, %s5509_s28  ;;  %4854 = vrot.lane.b32.xlu0 %v4848_v61, %s5509_s28  ;;  %v9424_v5 = vld [vmem:[%s5588_s5 + $0x50] sm:$0xff] }
0x1103   : > { %4856 = vrot.lane.b32.xlu1 %v4849_v46, %s5509_s28 }
0x113b   : > { %v4802_v60 = vpop.permute.xlu0 %4801 }
0x113e   : > { %v4806_v58 = vpop.permute.xlu2 %4805 }
0x1146   : > { %v4812_v10 = vpop.permute.xlu2 %4811 }
0x1155   : > { %v4804_v2 = vpop.permute.xlu1 %4803 }
0x1156   : > { %v4821_v52 = vsel %vm331_vm0, %v4802_v60, %v4804_v2  ;;  %v4822_v31 = vsel %vm331_vm0, %v4804_v2, %v4806_v58  ;;  %v4808_v39 = vpop.permute.xlu0 %4807  ;;  %v9430_v60 = vld [vmem:[%s5588_s5 + $0x48] sm:$0xff] }
0x1157   : > { %v9372_v40 = vadd.f32 %v4821_v52, %v9272_v3  ;;  %v9375_v36 = vadd.f32 %v4822_v31, %v9294_v9  ;;  %v4823_v11 = vsel %vm331_vm0, %v4806_v58, %v4808_v39  ;;  %v4818_v9 = vpop.permute.xlu2 %4817 }
0x1158   : > { %v9379_v54 = vadd.f32 %v4823_v11, %v9298_v20 }
0x115d   : > { %v4810_v19 = vpop.permute.xlu1 %4809 }
0x115e   : > { %v4824_v12 = vsel %vm331_vm0, %v4808_v39, %v4810_v19  ;;  %v4814_v37 = vpop.permute.xlu0 %4813 }
0x115f   : > { %v9383_v42 = vadd.f32 %v4824_v12, %v9296_v23  ;;  %v4825_v3 = vsel %vm331_vm0, %v4812_v10, %v4814_v37 }
0x1160   : > { %v9387_v1 = vadd.f32 %v4825_v3, %v9314_v38  ;;  %v4853_v38 = vpop.permute.xlu2 %4852  ;;  %v5390_v3 = vld [vmem:[%s9681_s1 + $0x86] ss:$8 sm:$0xf0] }
0x1165   : > { %v4816_v34 = vpop.permute.xlu1 %4815 }
0x1166   : > { %v4826_v48 = vsel %vm331_vm0, %v4814_v37, %v4816_v34  ;;  %v4827_v20 = vsel %vm331_vm0, %v4816_v34, %v4818_v9  ;;  %v4820_v23 = vpop.permute.xlu0 %4819  ;;  %v5389_v37 = vld [vmem:[%s9681_s1 + $0x86] ss:$8 sm:$0xf] }
0x1167   : > { %v9392_v45 = vadd.f32 %v4826_v48, %v9312_v16  ;;  %v9395_v27 = vadd.f32 %v4827_v20, %v9322_v62  ;;  %v4828_v13 = vsel %vm331_vm0, %v4818_v9, %v4820_v23  ;;  %v9448_v23 = vor.u32 %v5390_v3, %v5389_v37 }
0x1168   : > { %v9399_v32 = vadd.f32 %v4828_v13, %v9324_v25 }
0x116d   : > { %v4851_v26 = vpop.permute.xlu1 %4850 }
0x116e   : > { %v4866_v47 = vmul.f32 %v4851_v26, %v9165_v29  ;;  %v4871_v7 = vmul.f32 %v9175_v43, %v4851_v26  ;;  %v4858_v50 = vsel %vm293_vm2, %v4851_v26, %v4853_v38  ;;  %v4855_v17 = vpop.permute.xlu0 %4854  ;;  %v4876_v41 = vmul.f32 %v4851_v26, %v9205_v49 }
0x116f   : > { %v4867_v16 = vmul.f32 %v4858_v50, %v9181_v51  ;;  %v4872_v62 = vmul.f32 %v9406_v30, %v4858_v50  ;;  %v4859_v25 = vsel %vm293_vm2, %v4853_v38, %v4855_v17  ;;  %v4877_v11 = vmul.f32 %v4858_v50, %v9210_v14 }
0x1170   : > { %v4896_v6 = vrot.slane %v4866_v47, 6  ;;  %v4897_v28 = vrot.slane %v4871_v7, 6  ;;  %v4868_v29 = vmul.f32 %v4859_v25, %v9191_v53  ;;  %v4873_v43 = vmul.f32 %v9412_v57, %v4859_v25 }
0x1171   : > { %v4899_v56 = vrot.slane %v4867_v16, 6  ;;  %v4900_v18 = vrot.slane %v4872_v62, 6  ;;  %v4911_v39 = vrot.slane %v4876_v41, 6  ;;  %v4878_v19 = vmul.f32 %v4859_v25, %v9219_v24 }
0x1172   : > { %v4898_v0 = vsel %vm4568_vm8, %v4896_v6, %v4897_v28  ;;  %v4902_v4 = vrot.slane %v4868_v29, 6  ;;  %v4903_v22 = vrot.slane %v4873_v43, 6  ;;  %v4913_v48 = vrot.slane %v4877_v11, 6  ;;  %v5391_v6 = vld [vmem:[%s9681_s1 + $0xc6] ss:$8 sm:$0xf] }
0x1173   : > { %4921 = vrot.lane.b32.xlu2 %v4898_v0, %s5507_s22  ;;  %v4901_v35 = vsel %vm4568_vm8, %v4899_v56, %v4900_v18  ;;  %v4912_v34 = vsel %vm4568_vm8, %v4897_v28, %v4911_v39  ;;  %v4915_v20 = vrot.slane %v4878_v19, 6  ;;  %v5034_v47 = vrot.slane %v9448_v23, 4 }
0x1174   : > { %4923 = vrot.lane.b32.xlu0 %v4901_v35, %s5507_s22  ;;  %v4904_v33 = vsel %vm4568_vm8, %v4902_v4, %v4903_v22  ;;  %v4914_v38 = vsel %vm4568_vm8, %v4900_v18, %v4913_v48  ;;  %v5156_v25 = vperm.slane %v5391_v6, 1  ;;  %v5158_v18 = vperm.slane %v5391_v6, 3 }
0x1175   : > { %v4857_v21 = vpop.permute.xlu1 %4856  ;;  %4925 = vrot.lane.b32.xlu1 %v4904_v33, %s5507_s22  ;;  %v4916_v26 = vsel %vm4568_vm8, %v4903_v22, %v4915_v20  ;;  %v5036_v50 = vperm.slane %v5034_v47, 1  ;;  %v5035_v16 = vperm.slane %v5034_v47, 0  ;;  %v5037_v62 = vperm.slane %v5034_v47, 2 }
0x1176   : > { %v4860_v55 = vsel %vm293_vm2, %v4855_v17, %v4857_v21  ;;  %v4870_v44 = vmul.f32 %v4857_v21, %v9188_v15  ;;  %v4875_v61 = vmul.f32 %v9424_v5, %v4857_v21  ;;  %v5038_v28 = vperm.slane %v5034_v47, 3 }
0x1177   : > { %v4869_v46 = vmul.f32 %v4860_v55, %v9196_v59  ;;  %v4874_v58 = vmul.f32 %v9430_v60, %v4860_v55  ;;  %v4879_v9 = vmul.f32 %v4860_v55, %v9226_v8  ;;  %v5155_v17 = vperm.slane %v5391_v6, 0 }
0x1178   : > { %v4908_v49 = vrot.slane %v4870_v44, 6  ;;  %v4909_v2 = vrot.slane %v4875_v61, 6  ;;  %v4880_v56 = vmul.f32 %v4857_v21, %v9222_v63  ;;  %v5157_v29 = vperm.slane %v5391_v6, 2  ;;  %v9515_v6 = vld [vmem:[%s5588_s5 + $0x58] sm:$0xff] }
0x1179   : > { %v4905_v52 = vrot.slane %v4869_v46, 6  ;;  %v4906_v31 = vrot.slane %v4874_v58, 6  ;;  %v4917_v13 = vrot.slane %v4879_v9, 6 }
0x117a   : > { %v4910_v10 = vsel %vm4568_vm8, %v4908_v49, %v4909_v2  ;;  %v4919_v43 = vrot.slane %v4880_v56, 6 }
0x117b   : > { %v4907_v12 = vsel %vm4568_vm8, %v4905_v52, %v4906_v31  ;;  %v4918_v7 = vsel %vm4568_vm8, %v4906_v31, %v4917_v13  ;;  %v9507_v13 = vld [vmem:[%s5588_s5 + $0x28] sm:$0xc0] }
0x117c   : > { %4927 = vrot.lane.b32.xlu2 %v4907_v12, %s5507_s22  ;;  %4929 = vrot.lane.b32.xlu0 %v4910_v10, %s5507_s22  ;;  %v4920_v0 = vsel %vm4568_vm8, %v4909_v2, %v4919_v43 }
0x117d   : > { %4931 = vrot.lane.b32.xlu1 %v4912_v34, %s5507_s22 }
0x1184   : > { %4933 = vrot.lane.b32.xlu2 %v4914_v38, %s5507_s22  ;;  %4935 = vrot.lane.b32.xlu0 %v4916_v26, %s5507_s22 }
0x1185   : > { %4937 = vrot.lane.b32.xlu1 %v4918_v7, %s5507_s22 }
0x118c   : > { %5041 = vrot.lane.b32.xlu0 %v5036_v50, %s5507_s22  ;;  %5039 = vrot.lane.b32.xlu2 %v5035_v16, %s5507_s22 }
0x118d   : > { %5043 = vrot.lane.b32.xlu1 %v5037_v62, %s5507_s22 }
0x1194   : > { %5045 = vrot.lane.b32.xlu2 %v5038_v28, %s5507_s22  ;;  %5159 = vrot.lane.b32.xlu0 %v5155_v17, %s5508_s23 }
0x1195   : > { %5161 = vrot.lane.b32.xlu1 %v5156_v25, %s5508_s23 }
0x119c   : > { %5165 = vrot.lane.b32.xlu0 %v5158_v18, %s5508_s23  ;;  %5163 = vrot.lane.b32.xlu2 %v5157_v29, %s5508_s23 }
0x119d   : > { %4939 = vrot.lane.b32.xlu1 %v4920_v0, %s5507_s22  ;;  %s5394_s22 = sshll.u32 %s10448_s13, 6 }
0x11cd   : > { %v4922_v35 = vpop.permute.xlu2 %4921 }
0x11d6   : > { %v4928_v4 = vpop.permute.xlu2 %4927 }
0x11de   : > { %v4934_v22 = vpop.permute.xlu2 %4933 }
0x11e6   : > { %v4924_v41 = vpop.permute.xlu0 %4923  ;;  %v5040_v33 = vpop.permute.xlu2 %5039 }
0x11e7   : > { %v4941_v21 = vsel %vm244_vm1, %v4922_v35, %v4924_v41  ;;  %v5055_v55 = vmul.f32 %v5040_v33, %v9181_v51  ;;  %v9474_v44 = vmul.f32 %v9406_v30, %v5040_v33  ;;  %v4926_v46 = vpop.permute.xlu1 %4925 }
0x11e8   : > { %v9477_v61 = vadd.f32 %v4941_v21, %v9372_v40  ;;  %v4943_v2 = vsel %vm244_vm1, %v4926_v46, %v4928_v4  ;;  %v4942_v52 = vsel %vm244_vm1, %v4924_v41, %v4926_v46  ;;  %v5065_v21 = vmul.f32 %v5040_v33, %v9210_v14 }
0x11e9   : > { %v5085_v58 = vrot.slane %v5055_v55, 6  ;;  %v5086_v49 = vrot.slane %v9474_v44, 6  ;;  %v9483_v31 = vadd.f32 %v4943_v2, %v9379_v54  ;;  %v9486_v39 = vadd.f32 %v4942_v52, %v9375_v36 }
0x11eb   : > { %v5087_v10 = vsel %vm4568_vm8, %v5085_v58, %v5086_v49 }
0x11ec   : > { %5110 = vrot.lane.b32.xlu2 %v5087_v10, %s5509_s28  ;;  %v5100_v10 = vrot.slane %v5065_v21, 6 }
0x11ee   : > { %v4930_v40 = vpop.permute.xlu0 %4929  ;;  %v5046_v47 = vpop.permute.xlu2 %5045 }
0x11ef   : > { %v4944_v11 = vsel %vm244_vm1, %v4928_v4, %v4930_v40  ;;  %v4932_v12 = vpop.permute.xlu1 %4931 }
0x11f0   : > { %v9492_v19 = vadd.f32 %v4944_v11, %v9383_v42  ;;  %v4945_v37 = vsel %vm244_vm1, %v4932_v12, %v4934_v22  ;;  %v9534_v12 = vld [vmem:[%s5588_s5 + $0x88] sm:$0x3f]  ;;  %s9631_s5 = scalar_lea.vmem %s9683_s3, %s5394_s22 }
0x11f1   : > { %v9496_v54 = vadd.f32 %v4945_v37, %v9387_v1  ;;  %v5101_v37 = vsel %vm4568_vm8, %v5086_v49, %v5100_v10 }
0x11f6   : > { %v4936_v3 = vpop.permute.xlu0 %4935 }
0x11f7   : > { %v4946_v36 = vsel %vm244_vm1, %v4934_v22, %v4936_v3  ;;  %v4938_v34 = vpop.permute.xlu1 %4937 }
0x11f8   : > { %v9500_v9 = vadd.f32 %v4946_v36, %v9392_v45  ;;  %v4947_v48 = vsel %vm244_vm1, %v4936_v3, %v4938_v34  ;;  %v5059_v45 = vmul.f32 %v5046_v47, %v9507_v13  ;;  %v5069_v36 = vmul.f32 %v5046_v47, %v9534_v12 }
0x11f9   : > { %v9504_v20 = vadd.f32 %v4947_v48, %v9395_v27  ;;  %v5064_v27 = vmul.f32 %v9515_v6, %v5046_v47 }
0x11fa   : > { %v5097_v35 = vrot.slane %v5059_v45, 6 }
0x11fb   : > { %v5098_v4 = vrot.slane %v5064_v27, 6 }
0x11fd   : > { %v5099_v2 = vsel %vm4568_vm8, %v5097_v35, %v5098_v4 }
0x11fe   : > { %v5042_v42 = vpop.permute.xlu0 %5041 }
0x11ff   : > { %v5047_v38 = vsel %vm244_vm1, %v5040_v33, %v5042_v42  ;;  %v5044_v7 = vpop.permute.xlu1 %5043 }
0x1200   : > { %v5056_v1 = vmul.f32 %v5047_v38, %v9191_v53  ;;  %v5061_v26 = vmul.f32 %v9412_v57, %v5047_v38  ;;  %v5048_v50 = vsel %vm244_vm1, %v5042_v42, %v5044_v7  ;;  %v5049_v25 = vsel %vm244_vm1, %v5044_v7, %v5046_v47  ;;  %v5164_v42 = vpop.permute.xlu2 %5163 }
0x1201   : > { %v5057_v28 = vmul.f32 %v5048_v50, %v9196_v59  ;;  %v5062_v17 = vmul.f32 %v9430_v60, %v5048_v50  ;;  %v5058_v56 = vmul.f32 %v5049_v25, %v9188_v15  ;;  %v5063_v18 = vmul.f32 %v9424_v5, %v5049_v25 }
0x1202   : > { %v5088_v16 = vrot.slane %v5056_v1, 6  ;;  %v5089_v62 = vrot.slane %v5061_v26, 6  ;;  %v5066_v44 = vmul.f32 %v5047_v38, %v9219_v24  ;;  %v5067_v40 = vmul.f32 %v5048_v50, %v9226_v8 }
0x1203   : > { %v5091_v43 = vrot.slane %v5057_v28, 6  ;;  %v5092_v0 = vrot.slane %v5062_v17, 6  ;;  %v5094_v22 = vrot.slane %v5058_v56, 6  ;;  %v5095_v41 = vrot.slane %v5063_v18, 6 }
0x1204   : > { %v5090_v29 = vsel %vm4568_vm8, %v5088_v16, %v5089_v62  ;;  %v5102_v11 = vrot.slane %v5066_v44, 6  ;;  %v5068_v33 = vmul.f32 %v5049_v25, %v9222_v63  ;;  %v5104_v3 = vrot.slane %v5067_v40, 6 }
0x1205   : > { %5112 = vrot.lane.b32.xlu0 %v5090_v29, %s5509_s28  ;;  %v5093_v55 = vsel %vm4568_vm8, %v5091_v43, %v5092_v0  ;;  %v5096_v46 = vsel %vm4568_vm8, %v5094_v22, %v5095_v41  ;;  %v5108_v16 = vrot.slane %v5069_v36, 6 }
0x1206   : > { %5114 = vrot.lane.b32.xlu1 %v5093_v55, %s5509_s28  ;;  %5116 = vrot.lane.b32.xlu2 %v5096_v46, %s5509_s28  ;;  %v5160_v52 = vpop.permute.xlu0 %5159  ;;  %v5103_v48 = vsel %vm4568_vm8, %v5089_v62, %v5102_v11  ;;  %v5106_v47 = vrot.slane %v5068_v33, 6  ;;  %v5105_v62 = vsel %vm4568_vm8, %v5092_v0, %v5104_v3 }
0x1207   : > { %v5162_v58 = vpop.permute.xlu1 %5161  ;;  %v5175_v1 = vmul.f32 %v5160_v52, %v9181_v51  ;;  %v5180_v26 = vmul.f32 %v9406_v30, %v5160_v52  ;;  %v5109_v43 = vsel %vm4568_vm8, %v5098_v4, %v5108_v16  ;;  %v5185_v11 = vmul.f32 %v5160_v52, %v9210_v14 }
0x1208   : > { %v5167_v45 = vsel %vm331_vm0, %v5160_v52, %v5162_v58  ;;  %v5168_v50 = vsel %vm331_vm0, %v5162_v58, %v5164_v42  ;;  %v5107_v18 = vsel %vm4568_vm8, %v5095_v41, %v5106_v47 }
0x1209   : > { %v5176_v28 = vmul.f32 %v5167_v45, %v9191_v53  ;;  %v5181_v17 = vmul.f32 %v9412_v57, %v5167_v45  ;;  %v5205_v25 = vrot.slane %v5175_v1, 6  ;;  %v5177_v56 = vmul.f32 %v5168_v50, %v9196_v59 }
0x120a   : > { %v5186_v36 = vmul.f32 %v5167_v45, %v9219_v24 }
0x120b   : > { %v5208_v35 = vrot.slane %v5176_v28, 6  ;;  %v5209_v22 = vrot.slane %v5181_v17, 6  ;;  %v5211_v21 = vrot.slane %v5177_v56, 6  ;;  %v4966_v56 = vperm.slane %v9448_v23, 0 }
0x120d   : > { %5118 = vrot.lane.b32.xlu0 %v5099_v2, %s5509_s28  ;;  %v5210_v41 = vsel %vm4568_vm8, %v5208_v35, %v5209_v22  ;;  %v4978_v35 = vmul.f32 %v9406_v30, %v4966_v56 }
0x120e   : > { %5120 = vrot.lane.b32.xlu1 %v5101_v37, %s5509_s28  ;;  %5122 = vrot.lane.b32.xlu2 %v5103_v48, %s5509_s28  ;;  %v5166_v27 = vpop.permute.xlu0 %5165  ;;  %v5220_v48 = vrot.slane %v5185_v11, 6 }
0x120f   : > { %v4940_v38 = vpop.permute.xlu1 %4939  ;;  %v5169_v29 = vsel %vm331_vm0, %v5164_v42, %v5166_v27  ;;  %v5179_v58 = vmul.f32 %v5166_v27, %v9507_v13  ;;  %v5184_v4 = vmul.f32 %v9515_v6, %v5166_v27  ;;  %v5187_v6 = vmul.f32 %v5168_v50, %v9226_v8 }
0x1210   : > { %v4948_v7 = vsel %vm244_vm1, %v4938_v34, %v4940_v38  ;;  %v5206_v34 = vrot.slane %v5180_v26, 6  ;;  %v5178_v44 = vmul.f32 %v5169_v29, %v9188_v15  ;;  %v5183_v46 = vmul.f32 %v9424_v5, %v5169_v29 }
0x1211   : > { %v9548_v49 = vadd.f32 %v4948_v7, %v9399_v32  ;;  %v5182_v32 = vmul.f32 %v9430_v60, %v5168_v50  ;;  %v5217_v33 = vrot.slane %v5179_v58, 6  ;;  %v5218_v37 = vrot.slane %v5184_v4, 6 }
0x1212   : > { %v5207_v0 = vsel %vm4568_vm8, %v5205_v25, %v5206_v34  ;;  %v5214_v10 = vrot.slane %v5178_v44, 6  ;;  %v5215_v40 = vrot.slane %v5183_v46, 6  ;;  %v5188_v42 = vmul.f32 %v5169_v29, %v9222_v63 }
0x1213   : > { %v5212_v55 = vrot.slane %v5182_v32, 6  ;;  %v5219_v13 = vsel %vm4568_vm8, %v5217_v33, %v5218_v37  ;;  %v5221_v52 = vsel %vm4568_vm8, %v5206_v34, %v5220_v48  ;;  %v5222_v38 = vrot.slane %v5186_v36, 6 }
0x1214   : > { %v5216_v3 = vsel %vm4568_vm8, %v5214_v10, %v5215_v40  ;;  %v5224_v1 = vrot.slane %v5187_v6, 6  ;;  %v5189_v26 = vmul.f32 %v5166_v27, %v9534_v12  ;;  %v5226_v45 = vrot.slane %v5188_v42, 6 }
0x1215   : > { %5124 = vrot.lane.b32.xlu0 %v5105_v62, %s5509_s28  ;;  %v5213_v2 = vsel %vm4568_vm8, %v5211_v21, %v5212_v55  ;;  %v5223_v7 = vsel %vm4568_vm8, %v5209_v22, %v5222_v38  ;;  %v4967_v32 = vperm.slane %v9448_v23, 1  ;;  %v4968_v21 = vperm.slane %v9448_v23, 2 }
0x1216   : > { %5126 = vrot.lane.b32.xlu1 %v5107_v18, %s5509_s28  ;;  %5128 = vrot.lane.b32.xlu2 %v5109_v43, %s5509_s28  ;;  %v5225_v47 = vsel %vm4568_vm8, %v5212_v55, %v5224_v1  ;;  %v5228_v50 = vrot.slane %v5189_v26, 6  ;;  %v5227_v16 = vsel %vm4568_vm8, %v5215_v40, %v5226_v45  ;;  %v4974_v43 = vmul.f32 %v4966_v56, %v9181_v51 }
0x1217   : > { %v9603_v22 = vmul.f32 %v9412_v57, %v4967_v32  ;;  %v4999_v46 = vrot.slane %v4978_v35, 6  ;;  %v4969_v4 = vperm.slane %v9448_v23, 3  ;;  %v4976_v51 = vmul.f32 %v4968_v21, %v9196_v59 }
0x1218   : > { %v5229_v62 = vsel %vm4568_vm8, %v5218_v37, %v5228_v50  ;;  %v4998_v44 = vrot.slane %v4974_v43, 6  ;;  %v4982_v42 = vmul.f32 %v4966_v56, %v9210_v14  ;;  %v4983_v45 = vmul.f32 %v4967_v32, %v9219_v24 }
0x1219   : > { %v5002_v58 = vrot.slane %v9603_v22, 6  ;;  %v4977_v10 = vmul.f32 %v4969_v4, %v9188_v15  ;;  %v9618_v40 = vmul.f32 %v9424_v5, %v4969_v4  ;;  %v5004_v11 = vrot.slane %v4976_v51, 6 }
0x121a   : > { %v5000_v57 = vsel %vm4568_vm8, %v4998_v44, %v4999_v46  ;;  %v5010_v50 = vrot.slane %v4982_v42, 6 }
0x121b   : > { %v5026_v36 = vadd.f32 %v5000_v57, %v9477_v61  ;;  %v5007_v48 = vrot.slane %v4977_v10, 6 }
0x121c   : > { %v5011_v24 = vsel %vm4568_vm8, %v4999_v46, %v5010_v50 }
0x121d   : > { %5230 = vrot.lane.b32.xlu0 %v5207_v0, %s5508_s23  ;;  %v4975_v0 = vmul.f32 %v4967_v32, %v9191_v53  ;;  %v4980_v53 = vmul.f32 %v9430_v60, %v4968_v21  ;;  %v4985_v32 = vmul.f32 %v4969_v4, %v9222_v63 }
0x121e   : > { %5232 = vrot.lane.b32.xlu1 %v5210_v41, %s5508_s23  ;;  %5234 = vrot.lane.b32.xlu2 %v5213_v2, %s5508_s23 }
0x121f   : > { %v5001_v41 = vrot.slane %v4975_v0, 6  ;;  %v5005_v33 = vrot.slane %v4980_v53, 6  ;;  %v5016_v46 = vrot.slane %v4985_v32, 6 }
0x1221   : > { %v5003_v2 = vsel %vm4568_vm8, %v5001_v41, %v5002_v58  ;;  %v5006_v15 = vsel %vm4568_vm8, %v5004_v11, %v5005_v33 }
0x1222   : > { %v5027_v60 = vadd.f32 %v5003_v2, %v9486_v39 }
0x1225   : > { %5236 = vrot.lane.b32.xlu0 %v5216_v3, %s5508_s23 }
0x1226   : > { %5238 = vrot.lane.b32.xlu1 %v5219_v13, %s5508_s23  ;;  %5240 = vrot.lane.b32.xlu2 %v5221_v52, %s5508_s23  ;;  %v5008_v13 = vrot.slane %v9618_v40, 6 }
0x1228   : > { %v5009_v14 = vsel %vm4568_vm8, %v5007_v48, %v5008_v13  ;;  %v5017_v2 = vsel %vm4568_vm8, %v5008_v13, %v5016_v46 }
0x122d   : > { %5242 = vrot.lane.b32.xlu0 %v5223_v7, %s5508_s23  ;;  %v5028_v7 = vadd.f32 %v5006_v15, %v9483_v31  ;;  %v5012_v31 = vrot.slane %v4983_v45, 6 }
0x122e   : > { %5244 = vrot.lane.b32.xlu1 %v5225_v47, %s5508_s23  ;;  %5246 = vrot.lane.b32.xlu2 %v5227_v16, %s5508_s23  ;;  %v4984_v47 = vmul.f32 %v4968_v21, %v9226_v8 }
0x122f   : > { %v5013_v21 = vsel %vm4568_vm8, %v5002_v58, %v5012_v31 }
0x1230   : > { %v5014_v43 = vrot.slane %v4984_v47, 6  ;;  %v5031_v51 = vadd.f32 %v5013_v21, %v9500_v9 }
0x1232   : > { %v5015_v44 = vsel %vm4568_vm8, %v5005_v33, %v5014_v43 }
0x1235   : > { %5248 = vrot.lane.b32.xlu0 %v5229_v62, %s5508_s23 }
0x1246   : > { %v5111_v28 = vpop.permute.xlu2 %5110 }
0x1260   : > { %v5117_v12 = vpop.permute.xlu2 %5116 }
0x1268   : > { %v9591_v17 = vpop.permute.xlu2 %5122 }
0x1270   : > { %v9597_v29 = vpop.permute.xlu2 %5128 }
0x1277   : > { %v5113_v27 = vpop.permute.xlu0 %5112 }
0x1278   : > { %v5115_v25 = vpop.permute.xlu1 %5114  ;;  %v5235_v37 = vpop.permute.xlu2 %5234  ;;  %v5130_v23 = vsel %vm293_vm2, %v5111_v28, %v5113_v27 }
0x1279   : > { %v5131_v59 = vsel %vm293_vm2, %v5113_v27, %v5115_v25  ;;  %v5146_v5 = vadd.f32 %v5130_v23, %v5026_v36  ;;  %v5132_v38 = vsel %vm293_vm2, %v5115_v25, %v5117_v12  ;;  %v5029_v27 = vadd.f32 %v5009_v14, %v9492_v19 }
0x127a   : > { %v5147_v6 = vadd.f32 %v5131_v59, %v5027_v60  ;;  %v5148_v16 = vadd.f32 %v5132_v38, %v5028_v7 }
0x127f   : > { %v5119_v34 = vpop.permute.xlu0 %5118 }
0x1280   : > { %v9595_v18 = vpop.permute.xlu1 %5120  ;;  %v5133_v62 = vsel %vm293_vm2, %v5117_v12, %v5119_v34  ;;  %v5241_v25 = vpop.permute.xlu2 %5240  ;;  %v5030_v34 = vadd.f32 %v5011_v24, %v9496_v54  ;;  %v5032_v54 = vadd.f32 %v5015_v44, %v9504_v20 }
0x1281   : > { %v5149_v8 = vadd.f32 %v5133_v62, %v5029_v27  ;;  %v5134_v19 = vsel %vm293_vm2, %v9595_v18, %v9591_v17 }
0x1282   : > { %v5150_v41 = vadd.f32 %v5134_v19, %v5030_v34 }
0x1287   : > { %v9606_v55 = vpop.permute.xlu0 %5124 }
0x1288   : > { %v9612_v30 = vpop.permute.xlu1 %5126  ;;  %v5135_v63 = vsel %vm293_vm2, %v9591_v17, %v9606_v55  ;;  %v5247_v17 = vpop.permute.xlu2 %5246 }
0x1289   : > { %v5136_v4 = vsel %vm293_vm2, %v9606_v55, %v9612_v30  ;;  %v5151_v57 = vadd.f32 %v5135_v63, %v5031_v51  ;;  %v5137_v9 = vsel %vm293_vm2, %v9612_v30, %v9597_v29 }
0x128a   : > { %v5152_v10 = vadd.f32 %v5136_v4, %v5032_v54 }
0x128f   : > { %v5231_v3 = vpop.permute.xlu0 %5230 }
0x1290   : > { %v5233_v52 = vpop.permute.xlu1 %5232 }
0x1291   : > { %v5250_v61 = vsel %vm331_vm0, %v5231_v3, %v5233_v52  ;;  %v5251_v39 = vsel %vm331_vm0, %v5233_v52, %v5235_v37 }
0x1292   : > { %v5266_v1 = vadd.f32 %v5250_v61, %v5146_v5  ;;  %v5267_v26 = vadd.f32 %v5251_v39, %v5147_v6 }
0x1294   : > { %5274 = vst [vmem:[%s9631_s5] sm:$0xff] %v5266_v1 }
0x1295   : > { %5275 = vst [vmem:[%s9631_s5 + $0x8] sm:$0xff] %v5267_v26 }
0x1297   : > { %v5237_v28 = vpop.permute.xlu0 %5236 }
0x1298   : > { %v5252_v56 = vsel %vm331_vm0, %v5235_v37, %v5237_v28  ;;  %v5239_v35 = vpop.permute.xlu1 %5238  ;;  %v5033_v37 = vadd.f32 %v5017_v2, %v9548_v49 }
0x1299   : > { %v5268_v0 = vadd.f32 %v5252_v56, %v5148_v16  ;;  %v5253_v22 = vsel %vm331_vm0, %v5237_v28, %v5239_v35 }
0x129a   : > { %v5269_v12 = vadd.f32 %v5253_v22, %v5149_v8  ;;  %v5153_v23 = vadd.f32 %v5137_v9, %v5033_v37 }
0x129b   : > { %5276 = vst [vmem:[%s9631_s5 + $0x10] sm:$0xff] %v5268_v0 }
0x129c   : > { %5277 = vst [vmem:[%s9631_s5 + $0x18] sm:$0xff] %v5269_v12 }
0x129f   : > { %v5243_v18 = vpop.permute.xlu0 %5242 }
0x12a0   : > { %v5254_v58 = vsel %vm331_vm0, %v5241_v25, %v5243_v18  ;;  %v5245_v40 = vpop.permute.xlu1 %5244 }
0x12a1   : > { %v5270_v53 = vadd.f32 %v5254_v58, %v5150_v41  ;;  %v5255_v55 = vsel %vm331_vm0, %v5243_v18, %v5245_v40  ;;  %v5256_v11 = vsel %vm331_vm0, %v5245_v40, %v5247_v17 }
0x12a2   : > { %v5271_v20 = vadd.f32 %v5255_v55, %v5151_v57  ;;  %v5272_v33 = vadd.f32 %v5256_v11, %v5152_v10 }
0x12a3   : > { %5278 = vst [vmem:[%s9631_s5 + $0x20] sm:$0xff] %v5270_v53 }
0x12a4   : > { %5279 = vst [vmem:[%s9631_s5 + $0x28] sm:$0xff] %v5271_v20 }
0x12a5   : > { %5280 = vst [vmem:[%s9631_s5 + $0x30] sm:$0xff] %v5272_v33 }
0x12a7   : > { %v5249_v59 = vpop.permute.xlu0 %5248 }
0x12a8   : > { %v5257_v3 = vsel %vm331_vm0, %v5247_v17, %v5249_v59 }
0x12a9   : > { %v5273_v60 = vadd.f32 %v5257_v3, %v5153_v23 }
0x12ab   : > { %5281 = vst [vmem:[%s9631_s5 + $0x38] sm:$0xff] %v5273_v60 }
0x12ac PF: > { %s13_s12 = sadd.s32 1, %s5505_s12  }
0x12ad   : > { %p10_p4 = scmp.ge.s32.totalorder %s13_s12, 4  }
0x12af   :  { %12 = sbr.rel (!%p10_p4) target bundleno = 1 (0x1), region = 89 }

</bundles_post_ra>
